<compile_context>
chip_gen: v7x
topology: tpu7x:2x2x1
jax: 0.10.0
libtpu: 0.0.40
codegen_flags: <defaults>
</compile_context>

<pallas_src>
import functools

import jax
import jax.numpy as jnp
from jax.experimental import pallas as pl
from jax.experimental.pallas import tpu as pltpu

HIDDEN = 128                 # nn.LSTM(hidden_size=128)
NUM_LSTM_LAYERS = 4          # nn.LSTM(num_layers=4)
NEG_SLOPE = 0.01             # F.leaky_relu default
BN_EPS = 1e-5
CONV_PAD = 128               # conv OUTPUT channels padded to one lane width
CONV_REAL = (32, 64, 32)     # real output channels of conv1..conv3
VMEM_LIMIT = 32 * 1024 * 1024   # safe on v5e/v6e (128 MiB) and v7x (64 MiB)


# ----------------------------------------------------------------------------
# Kernel 1: fused (im2col) linear  ->  y = [leaky_relu](x @ W + b)
# Grid-less: one full-array VMEM block per operand; bf16 MXU operands with
# f32 accumulation; output channels padded to 128 so the store is lane-dense.
# ----------------------------------------------------------------------------
def fused_linear_kernel(x_ref, w_ref, b_ref, o_ref, *, activate):
    y = jnp.dot(x_ref[...], w_ref[...],
                preferred_element_type=jnp.float32) + b_ref[...]
    if activate:
        y = jnp.where(y >= 0, y, NEG_SLOPE * y)
    o_ref[...] = y.astype(o_ref.dtype)


def fused_linear(x, w, b, *, activate, out_dtype=jnp.float32):
    M = x.shape[0]
    N = w.shape[1]
    return pl.pallas_call(
        functools.partial(fused_linear_kernel, activate=activate),
        out_shape=jax.ShapeDtypeStruct((M, N), out_dtype),
        compiler_params=pltpu.CompilerParams(vmem_limit_bytes=VMEM_LIMIT),
    )(x.astype(jnp.bfloat16), w, b.reshape(1, N).astype(jnp.float32))


# ----------------------------------------------------------------------------
# Kernel 2: fused LSTM stack + FC head (single grid-less kernel).
#   * layer-0 input projection over all timesteps in one matmul
#   * for each layer > 0, the input projection over all timesteps is hoisted
#     out of the recurrence (one (T*B, H) x (H, 4H) matmul per layer)
#   * h / c / inter-layer sequence are carried as values (vregs), not VMEM
#   * recurrent dots in bf16 on the MXU, gate math in f32 (v5e: no bf16 VPU)
#   * fc1 + fc2 applied to the last layer's last hidden state in the same body
# ----------------------------------------------------------------------------
def lstm_fc_kernel(seq_ref, cur_ref, wih0_ref, b0_ref, wih_ref, whh_ref,
                   b_ref, w1h_ref, w1c_ref, b1_ref, w2_ref, b2_ref, o_ref,
                   *, n_layers, n_steps, batch):
    Hh = HIDDEN
    # Hoisted layer-0 input projection: (T*B, D) @ (D, 4H) + b0.
    gin = jnp.dot(seq_ref[...], wih0_ref[...],
                  preferred_element_type=jnp.float32) + b0_ref[...]

    prev_seq = None
    h = None
    for l in range(n_layers):
        if l > 0:
            # Hoisted layer-l input projection over all timesteps at once.
            gin = jnp.dot(prev_seq, wih_ref[l - 1],
                          preferred_element_type=jnp.float32) + b_ref[l - 1]
        whh_l = whh_ref[l]                                   # (H, 4H) bf16
        h = jnp.zeros((batch, Hh), jnp.float32)
        c = jnp.zeros((batch, Hh), jnp.float32)
        outs = []
        for t in range(n_steps):
            g = gin[t * batch:(t + 1) * batch, :] + jnp.dot(
                h.astype(jnp.bfloat16), whh_l,
                preferred_element_type=jnp.float32)          # (B, 4H) i,f,g,o
            i_g = jax.nn.sigmoid(g[:, 0 * Hh:1 * Hh])
            f_g = jax.nn.sigmoid(g[:, 1 * Hh:2 * Hh])
            g_g = jnp.tanh(g[:, 2 * Hh:3 * Hh])
            o_g = jax.nn.sigmoid(g[:, 3 * Hh:4 * Hh])
            c = f_g * c + i_g * g_g
            h = o_g * jnp.tanh(c)
            outs.append(h)
        # Inter-layer sequence (row = t*B + b) stays in registers/VMEM values.
        prev_seq = jnp.concatenate(outs, axis=0).astype(jnp.bfloat16)
        # TODO(synk): inter-layer LSTM dropout (p=0.1) is identity at inference.

    # FC head: q = leaky_relu([h_last, current] @ W1 + b1) @ W2 + b2
    hfc = (jnp.dot(h.astype(jnp.bfloat16), w1h_ref[...],
                   preferred_element_type=jnp.float32)
           + jnp.dot(cur_ref[...], w1c_ref[...],
                     preferred_element_type=jnp.float32)
           + b1_ref[...])
    hfc = jnp.where(hfc >= 0, hfc, NEG_SLOPE * hfc)
    q = jnp.dot(hfc.astype(jnp.bfloat16), w2_ref[...],
                preferred_element_type=jnp.float32) + b2_ref[...]
    o_ref[...] = q.astype(o_ref.dtype)


def lstm_fc_head(seq, cur, params):
    TB, _ = seq.shape
    B = cur.shape[0]
    T = TB // B
    n_actions = params["fc2_w"].shape[1]
    kernel = functools.partial(lstm_fc_kernel, n_layers=NUM_LSTM_LAYERS,
                               n_steps=T, batch=B)
    return pl.pallas_call(
        kernel,
        out_shape=jax.ShapeDtypeStruct((B, n_actions), jnp.float32),
        compiler_params=pltpu.CompilerParams(vmem_limit_bytes=VMEM_LIMIT),
    )(seq, cur,
      params["wih0"], params["b0"],
      params["wih_rest"], params["whh_stack"], params["b_rest"],
      params["fc1_wh"], params["fc1_wc"], params["fc1_b"],
      params["fc2_w"], params["fc2_b"])


# ----------------------------------------------------------------------------
# JAX glue (im2col over real channels only, layout, parameter folding)
# ----------------------------------------------------------------------------
def im2col_nhwc(x, k=4, pad=1):
    """x: (N, H, W, C) -> (N*OH*OW, k*k*C); patch flatten order (kH, kW, C)."""
    xp = jnp.pad(x, ((0, 0), (pad, pad), (pad, pad), (0, 0)))
    N, Hp, Wp, C = xp.shape
    OH, OW = Hp - k + 1, Wp - k + 1
    taps = [xp[:, i:i + OH, j:j + OW, :] for i in range(k) for j in range(k)]
    p = jnp.stack(taps, axis=3)                      # (N, OH, OW, k*k, C)
    return p.reshape(N * OH * OW, k * k * C), OH, OW


def fold_conv_bn(w, b, gamma, beta, mean, var, c_out_pad):
    """PyTorch conv (O,C,kH,kW)+BN -> matmul weight (kk*C, Opad), bias (Opad,).

    Only the OUTPUT channel dim is padded (lane-dense stores); the contraction
    dim K uses the real input channel count."""
    O, C, kh, kw = w.shape
    scale = gamma / jnp.sqrt(var + BN_EPS)
    w = w * scale[:, None, None, None]
    b = (b - mean) * scale + beta
    w = w.transpose(2, 3, 1, 0)                      # (kH, kW, C, O)
    w = jnp.pad(w, ((0, 0), (0, 0), (0, 0), (0, c_out_pad - O)))
    b = jnp.pad(b, (0, c_out_pad - O))
    return (w.reshape(kh * kw * C, c_out_pad).astype(jnp.bfloat16),
            b.astype(jnp.float32))


# ----------------------------------------------------------------------------
# Forward pass
# ----------------------------------------------------------------------------
def cnn_lstm_forward(params, boards, temporal_features, current_features):
    boards = boards.astype(jnp.float32)
    B, T, Hb, Wb = boards.shape

    # ---- CNN over every (batch, timestep) board, channels-last (NHWC) ----
    # K = real input channels only; output padded to 128 lanes in-kernel and
    # sliced back to real channels before the next im2col.
    x = boards.reshape(B * T, Hb, Wb, 1)
    for (w_mat, b_vec), c_real in zip(params["conv"], CONV_REAL):
        patches, OH, OW = im2col_nhwc(x)
        y = fused_linear(patches, w_mat, b_vec, activate=True,
                         out_dtype=jnp.bfloat16)
        x = y.reshape(B * T, OH, OW, CONV_PAD)[..., :c_real]
    # TODO(synk): the 3 conv layers could be fused into one pallas_call with
    # in-kernel im2col; kept as 3 calls for robust lowering of the reshapes.

    # Flatten real channels in PyTorch's NCHW order (C, H, W); single reorder.
    feat = x.transpose(0, 3, 1, 2).reshape(B, T, -1)

    # ---- LSTM input = [cnn features, temporal features], time-major ----
    lstm_in = jnp.concatenate(
        [feat, temporal_features.astype(jnp.bfloat16)], axis=2)
    seq = lstm_in.transpose(1, 0, 2).reshape(T * B, -1)      # (T*B, D) bf16

    # ---- single fused kernel: layer-0 projection + 4-layer LSTM + FC head ----
    return lstm_fc_head(seq, current_features.astype(jnp.bfloat16), params)


# ----------------------------------------------------------------------------
# Deterministic synthetic parameters (shapes from CNNLSTM.__init__)
# ----------------------------------------------------------------------------
def init_params(key, board_shape, n_temporal, n_current, n_actions):
    H, W = board_shape
    conv_out_size = CONV_REAL[-1] * (H - 3) * (W - 3)
    lstm_input_size = conv_out_size + n_temporal

    keys = iter(jax.random.split(key, 64))

    def rnd(shape, s=0.05):
        return (s * jax.random.normal(next(keys), shape)).astype(jnp.float32)

    # conv layers (real channels only for K; output padded to 128 lanes)
    conv_cfg = [(1, 32), (32, 64), (64, 32)]
    conv = []
    for c_in, c_out in conv_cfg:
        w = rnd((c_out, c_in, 4, 4))
        b = rnd((c_out,))
        gamma = 1.0 + rnd((c_out,))
        beta = rnd((c_out,))
        mean = rnd((c_out,))
        var = 1.0 + jnp.abs(rnd((c_out,)))
        conv.append(fold_conv_bn(w, b, gamma, beta, mean, var, CONV_PAD))

    # LSTM: PyTorch layout (4H, D) weights, gate order i,f,g,o, b = b_ih + b_hh
    wih_list, whh_list, b_list = [], [], []
    d_in = lstm_input_size
    for _ in range(NUM_LSTM_LAYERS):
        wih_list.append(rnd((4 * HIDDEN, d_in)))
        whh_list.append(rnd((4 * HIDDEN, HIDDEN)))
        b_list.append(rnd((4 * HIDDEN,)) + rnd((4 * HIDDEN,)))
        d_in = HIDDEN

    wih0 = wih_list[0].T.astype(jnp.bfloat16)                      # (D, 4H)
    b0 = b_list[0].reshape(1, 4 * HIDDEN).astype(jnp.float32)
    wih_rest = jnp.stack([w.T for w in wih_list[1:]]).astype(jnp.bfloat16)
    whh_stack = jnp.stack([w.T for w in whh_list]).astype(jnp.bfloat16)
    b_rest = jnp.stack(b_list[1:]).reshape(
        NUM_LSTM_LAYERS - 1, 1, 4 * HIDDEN).astype(jnp.float32)

    fc_input_size = HIDDEN + n_current
    fc1_w = rnd((64, fc_input_size)).T                             # (fc_in, 64)
    fc2_w = rnd((n_actions, 64)).T                                 # (64, n_act)

    return dict(
        conv=conv,
        wih0=wih0, b0=b0,
        wih_rest=wih_rest, whh_stack=whh_stack, b_rest=b_rest,
        fc1_wh=fc1_w[:HIDDEN].astype(jnp.bfloat16),                # (128, 64)
        fc1_wc=fc1_w[HIDDEN:].astype(jnp.bfloat16),                # (n_cur, 64)
        fc1_b=rnd((64,)).reshape(1, 64).astype(jnp.float32),
        fc2_w=fc2_w.astype(jnp.bfloat16),
        fc2_b=rnd((n_actions,)).reshape(1, n_actions).astype(jnp.float32),
    )


if __name__ == "__main__":
    key = jax.random.PRNGKey(0)
    B, T = 2, 4
    board_shape = (8, 8)
    n_temporal, n_current, n_actions = 2, 3, 5

    k_p, k_b, k_t, k_c = jax.random.split(key, 4)
    params = init_params(k_p, board_shape, n_temporal, n_current, n_actions)

    boards = jax.random.normal(k_b, (B, T, *board_shape), jnp.float32)
    temporal = jax.random.normal(k_t, (B, T, n_temporal), jnp.float32)
    current = jax.random.normal(k_c, (B, n_current), jnp.float32)

    q_values = jax.jit(cnn_lstm_forward)(params, boards, temporal, current)
    q_values = jax.block_until_ready(q_values)
    assert q_values.shape == (B, n_actions)
    assert bool(jnp.all(jnp.isfinite(q_values)))
    print("KERNEL_OK")
</pallas_src>

<mosaic_0001>
module attributes {stable_mosaic.version = 11 : i64} {
  func.func @fused_linear_kernel(%arg0: memref<392x16xbf16, #tpu.memory_space<vmem>>, %arg1: memref<16x128xbf16, #tpu.memory_space<vmem>>, %arg2: memref<1x128xf32, #tpu.memory_space<vmem>>, %arg3: memref<392x128xbf16, #tpu.memory_space<vmem>>) attributes {dimension_semantics = [], scalar_prefetch = 0 : i64, scratch_operands = 0 : i64, tpu.core_type = #tpu.core_type<tc>} {
    %c0 = arith.constant 0 : index
    %c0_0 = arith.constant 0 : index
    %0 = vector.load %arg0[%c0, %c0_0] : memref<392x16xbf16, #tpu.memory_space<vmem>>, vector<392x16xbf16>
    %c0_1 = arith.constant 0 : index
    %c0_2 = arith.constant 0 : index
    %1 = vector.load %arg1[%c0_1, %c0_2] : memref<16x128xbf16, #tpu.memory_space<vmem>>, vector<16x128xbf16>
    %cst = arith.constant dense<0.000000e+00> : vector<392x128xf32>
    %2 = tpu.matmul %0, %1, %cst {dimension_numbers = #tpu.dot_dimension_numbers<[1], [0], [0], [1], [0, 0, 1, 1], [], []>} : vector<392x16xbf16>, vector<16x128xbf16>, vector<392x128xf32> -> vector<392x128xf32>
    %c0_3 = arith.constant 0 : index
    %c0_4 = arith.constant 0 : index
    %3 = vector.load %arg2[%c0_3, %c0_4] : memref<1x128xf32, #tpu.memory_space<vmem>>, vector<1x128xf32>
    %4 = vector.broadcast %3 : vector<1x128xf32> to vector<392x128xf32>
    %5 = arith.addf %2, %4 : vector<392x128xf32>
    %cst_5 = arith.constant 0.000000e+00 : f32
    %6 = vector.broadcast %cst_5 : f32 to vector<392x128xf32>
    %7 = arith.cmpf oge, %5, %6 : vector<392x128xf32>
    %cst_6 = arith.constant 0.00999999977 : f32
    %8 = vector.broadcast %cst_6 : f32 to vector<392x128xf32>
    %9 = arith.mulf %8, %5 : vector<392x128xf32>
    %10 = arith.select %7, %5, %9 : vector<392x128xi1>, vector<392x128xf32>
    %11 = arith.truncf %10 : vector<392x128xf32> to vector<392x128xbf16>
    %c0_7 = arith.constant 0 : index
    %c0_8 = arith.constant 0 : index
    %12 = vector.load %arg3[%c0_7, %c0_8] : memref<392x128xbf16, #tpu.memory_space<vmem>>, vector<392x128xbf16>
    tpu.vector_store %arg3[%c0_7, %c0_8], %11 {strides = array<i32>} : memref<392x128xbf16, #tpu.memory_space<vmem>>, vector<392x128xbf16>,
    return
  }
}

module attributes {stable_mosaic.version = 11 : i64} {
  func.func @fused_linear_kernel(%arg0: memref<288x512xbf16, #tpu.memory_space<vmem>>, %arg1: memref<512x128xbf16, #tpu.memory_space<vmem>>, %arg2: memref<1x128xf32, #tpu.memory_space<vmem>>, %arg3: memref<288x128xbf16, #tpu.memory_space<vmem>>) attributes {dimension_semantics = [], scalar_prefetch = 0 : i64, scratch_operands = 0 : i64, tpu.core_type = #tpu.core_type<tc>} {
    %c0 = arith.constant 0 : index
    %c0_0 = arith.constant 0 : index
    %0 = vector.load %arg0[%c0, %c0_0] : memref<288x512xbf16, #tpu.memory_space<vmem>>, vector<288x512xbf16>
    %c0_1 = arith.constant 0 : index
    %c0_2 = arith.constant 0 : index
    %1 = vector.load %arg1[%c0_1, %c0_2] : memref<512x128xbf16, #tpu.memory_space<vmem>>, vector<512x128xbf16>
    %cst = arith.constant dense<0.000000e+00> : vector<288x128xf32>
    %2 = tpu.matmul %0, %1, %cst {dimension_numbers = #tpu.dot_dimension_numbers<[1], [0], [0], [1], [0, 0, 1, 1], [], []>} : vector<288x512xbf16>, vector<512x128xbf16>, vector<288x128xf32> -> vector<288x128xf32>
    %c0_3 = arith.constant 0 : index
    %c0_4 = arith.constant 0 : index
    %3 = vector.load %arg2[%c0_3, %c0_4] : memref<1x128xf32, #tpu.memory_space<vmem>>, vector<1x128xf32>
    %4 = vector.broadcast %3 : vector<1x128xf32> to vector<288x128xf32>
    %5 = arith.addf %2, %4 : vector<288x128xf32>
    %cst_5 = arith.constant 0.000000e+00 : f32
    %6 = vector.broadcast %cst_5 : f32 to vector<288x128xf32>
    %7 = arith.cmpf oge, %5, %6 : vector<288x128xf32>
    %cst_6 = arith.constant 0.00999999977 : f32
    %8 = vector.broadcast %cst_6 : f32 to vector<288x128xf32>
    %9 = arith.mulf %8, %5 : vector<288x128xf32>
    %10 = arith.select %7, %5, %9 : vector<288x128xi1>, vector<288x128xf32>
    %11 = arith.truncf %10 : vector<288x128xf32> to vector<288x128xbf16>
    %c0_7 = arith.constant 0 : index
    %c0_8 = arith.constant 0 : index
    %12 = vector.load %arg3[%c0_7, %c0_8] : memref<288x128xbf16, #tpu.memory_space<vmem>>, vector<288x128xbf16>
    tpu.vector_store %arg3[%c0_7, %c0_8], %11 {strides = array<i32>} : memref<288x128xbf16, #tpu.memory_space<vmem>>, vector<288x128xbf16>,
    return
  }
}

module attributes {stable_mosaic.version = 11 : i64} {
  func.func @fused_linear_kernel(%arg0: memref<200x1024xbf16, #tpu.memory_space<vmem>>, %arg1: memref<1024x128xbf16, #tpu.memory_space<vmem>>, %arg2: memref<1x128xf32, #tpu.memory_space<vmem>>, %arg3: memref<200x128xbf16, #tpu.memory_space<vmem>>) attributes {dimension_semantics = [], scalar_prefetch = 0 : i64, scratch_operands = 0 : i64, tpu.core_type = #tpu.core_type<tc>} {
    %c0 = arith.constant 0 : index
    %c0_0 = arith.constant 0 : index
    %0 = vector.load %arg0[%c0, %c0_0] : memref<200x1024xbf16, #tpu.memory_space<vmem>>, vector<200x1024xbf16>
    %c0_1 = arith.constant 0 : index
    %c0_2 = arith.constant 0 : index
    %1 = vector.load %arg1[%c0_1, %c0_2] : memref<1024x128xbf16, #tpu.memory_space<vmem>>, vector<1024x128xbf16>
    %cst = arith.constant dense<0.000000e+00> : vector<200x128xf32>
    %2 = tpu.matmul %0, %1, %cst {dimension_numbers = #tpu.dot_dimension_numbers<[1], [0], [0], [1], [0, 0, 1, 1], [], []>} : vector<200x1024xbf16>, vector<1024x128xbf16>, vector<200x128xf32> -> vector<200x128xf32>
    %c0_3 = arith.constant 0 : index
    %c0_4 = arith.constant 0 : index
    %3 = vector.load %arg2[%c0_3, %c0_4] : memref<1x128xf32, #tpu.memory_space<vmem>>, vector<1x128xf32>
    %4 = vector.broadcast %3 : vector<1x128xf32> to vector<200x128xf32>
    %5 = arith.addf %2, %4 : vector<200x128xf32>
    %cst_5 = arith.constant 0.000000e+00 : f32
    %6 = vector.broadcast %cst_5 : f32 to vector<200x128xf32>
    %7 = arith.cmpf oge, %5, %6 : vector<200x128xf32>
    %cst_6 = arith.constant 0.00999999977 : f32
    %8 = vector.broadcast %cst_6 : f32 to vector<200x128xf32>
    %9 = arith.mulf %8, %5 : vector<200x128xf32>
    %10 = arith.select %7, %5, %9 : vector<200x128xi1>, vector<200x128xf32>
    %11 = arith.truncf %10 : vector<200x128xf32> to vector<200x128xbf16>
    %c0_7 = arith.constant 0 : index
    %c0_8 = arith.constant 0 : index
    %12 = vector.load %arg3[%c0_7, %c0_8] : memref<200x128xbf16, #tpu.memory_space<vmem>>, vector<200x128xbf16>
    tpu.vector_store %arg3[%c0_7, %c0_8], %11 {strides = array<i32>} : memref<200x128xbf16, #tpu.memory_space<vmem>>, vector<200x128xbf16>,
    return
  }
}

module attributes {stable_mosaic.version = 11 : i64} {
  func.func @lstm_fc_kernel(%arg0: memref<8x802xbf16, #tpu.memory_space<vmem>>, %arg1: memref<2x3xbf16, #tpu.memory_space<vmem>>, %arg2: memref<802x512xbf16, #tpu.memory_space<vmem>>, %arg3: memref<1x512xf32, #tpu.memory_space<vmem>>, %arg4: memref<3x128x512xbf16, #tpu.memory_space<vmem>>, %arg5: memref<4x128x512xbf16, #tpu.memory_space<vmem>>, %arg6: memref<3x1x512xf32, #tpu.memory_space<vmem>>, %arg7: memref<128x64xbf16, #tpu.memory_space<vmem>>, %arg8: memref<3x64xbf16, #tpu.memory_space<vmem>>, %arg9: memref<1x64xf32, #tpu.memory_space<vmem>>, %arg10: memref<64x5xbf16, #tpu.memory_space<vmem>>, %arg11: memref<1x5xf32, #tpu.memory_space<vmem>>, %arg12: memref<2x5xf32, #tpu.memory_space<vmem>>) attributes {dimension_semantics = [], scalar_prefetch = 0 : i64, scratch_operands = 0 : i64, tpu.core_type = #tpu.core_type<tc>} {
    %c0 = arith.constant 0 : index
    %c0_0 = arith.constant 0 : index
    %0 = vector.load %arg0[%c0, %c0_0] : memref<8x802xbf16, #tpu.memory_space<vmem>>, vector<8x802xbf16>
    %c0_1 = arith.constant 0 : index
    %c0_2 = arith.constant 0 : index
    %1 = vector.load %arg2[%c0_1, %c0_2] : memref<802x512xbf16, #tpu.memory_space<vmem>>, vector<802x512xbf16>
    %cst = arith.constant dense<0.000000e+00> : vector<8x512xf32>
    %2 = tpu.matmul %0, %1, %cst {dimension_numbers = #tpu.dot_dimension_numbers<[1], [0], [0], [1], [0, 0, 1, 1], [], []>} : vector<8x802xbf16>, vector<802x512xbf16>, vector<8x512xf32> -> vector<8x512xf32>
    %c0_3 = arith.constant 0 : index
    %c0_4 = arith.constant 0 : index
    %3 = vector.load %arg3[%c0_3, %c0_4] : memref<1x512xf32, #tpu.memory_space<vmem>>, vector<1x512xf32>
    %4 = vector.broadcast %3 : vector<1x512xf32> to vector<8x512xf32>
    %5 = arith.addf %2, %4 : vector<8x512xf32>
    %c0_5 = arith.constant 0 : index
    %c0_6 = arith.constant 0 : index
    %c0_7 = arith.constant 0 : index
    %6 = vector.load %arg5[%c0_5, %c0_6, %c0_7] : memref<4x128x512xbf16, #tpu.memory_space<vmem>>, vector<1x128x512xbf16>
    %7 = vector.shape_cast %6 : vector<1x128x512xbf16> to vector<128x512xbf16>
    %cst_8 = arith.constant 0.000000e+00 : f32
    %8 = vector.broadcast %cst_8 : f32 to vector<2x128xf32>
    %cst_9 = arith.constant 0.000000e+00 : f32
    %9 = vector.broadcast %cst_9 : f32 to vector<2x128xf32>
    %10 = vector.extract_strided_slice %5 {offsets = [0, 0], sizes = [2, 512], strides = [1, 1]} : vector<8x512xf32> to vector<2x512xf32>
    %11 = arith.truncf %8 : vector<2x128xf32> to vector<2x128xbf16>
    %cst_10 = arith.constant dense<0.000000e+00> : vector<2x512xf32>
    %12 = tpu.matmul %11, %7, %cst_10 {dimension_numbers = #tpu.dot_dimension_numbers<[1], [0], [0], [1], [0, 0, 1, 1], [], []>} : vector<2x128xbf16>, vector<128x512xbf16>, vector<2x512xf32> -> vector<2x512xf32>
    %13 = arith.addf %10, %12 : vector<2x512xf32>
    %14 = vector.extract_strided_slice %13 {offsets = [0, 0], sizes = [2, 128], strides = [1, 1]} : vector<2x512xf32> to vector<2x128xf32>
    %15 = arith.negf %14 : vector<2x128xf32>
    %16 = math.exp %15 : vector<2x128xf32>
    %cst_11 = arith.constant 1.000000e+00 : f32
    %17 = vector.broadcast %cst_11 : f32 to vector<2x128xf32>
    %18 = arith.addf %17, %16 : vector<2x128xf32>
    %19 = arith.divf %17, %18 : vector<2x128xf32>
    %20 = vector.extract_strided_slice %13 {offsets = [0, 128], sizes = [2, 128], strides = [1, 1]} : vector<2x512xf32> to vector<2x128xf32>
    %21 = arith.negf %20 : vector<2x128xf32>
    %22 = math.exp %21 : vector<2x128xf32>
    %cst_12 = arith.constant 1.000000e+00 : f32
    %23 = vector.broadcast %cst_12 : f32 to vector<2x128xf32>
    %24 = arith.addf %23, %22 : vector<2x128xf32>
    %25 = arith.divf %23, %24 : vector<2x128xf32>
    %26 = vector.extract_strided_slice %13 {offsets = [0, 256], sizes = [2, 128], strides = [1, 1]} : vector<2x512xf32> to vector<2x128xf32>
    %27 = math.tanh %26 : vector<2x128xf32>
    %28 = vector.extract_strided_slice %13 {offsets = [0, 384], sizes = [2, 128], strides = [1, 1]} : vector<2x512xf32> to vector<2x128xf32>
    %29 = arith.negf %28 : vector<2x128xf32>
    %30 = math.exp %29 : vector<2x128xf32>
    %cst_13 = arith.constant 1.000000e+00 : f32
    %31 = vector.broadcast %cst_13 : f32 to vector<2x128xf32>
    %32 = arith.addf %31, %30 : vector<2x128xf32>
    %33 = arith.divf %31, %32 : vector<2x128xf32>
    %34 = arith.mulf %25, %9 : vector<2x128xf32>
    %35 = arith.mulf %19, %27 : vector<2x128xf32>
    %36 = arith.addf %34, %35 : vector<2x128xf32>
    %37 = math.tanh %36 : vector<2x128xf32>
    %38 = arith.mulf %33, %37 : vector<2x128xf32>
    %39 = vector.extract_strided_slice %5 {offsets = [2, 0], sizes = [2, 512], strides = [1, 1]} : vector<8x512xf32> to vector<2x512xf32>
    %40 = arith.truncf %38 : vector<2x128xf32> to vector<2x128xbf16>
    %cst_14 = arith.constant dense<0.000000e+00> : vector<2x512xf32>
    %41 = tpu.matmul %40, %7, %cst_14 {dimension_numbers = #tpu.dot_dimension_numbers<[1], [0], [0], [1], [0, 0, 1, 1], [], []>} : vector<2x128xbf16>, vector<128x512xbf16>, vector<2x512xf32> -> vector<2x512xf32>
    %42 = arith.addf %39, %41 : vector<2x512xf32>
    %43 = vector.extract_strided_slice %42 {offsets = [0, 0], sizes = [2, 128], strides = [1, 1]} : vector<2x512xf32> to vector<2x128xf32>
    %44 = arith.negf %43 : vector<2x128xf32>
    %45 = math.exp %44 : vector<2x128xf32>
    %cst_15 = arith.constant 1.000000e+00 : f32
    %46 = vector.broadcast %cst_15 : f32 to vector<2x128xf32>
    %47 = arith.addf %46, %45 : vector<2x128xf32>
    %48 = arith.divf %46, %47 : vector<2x128xf32>
    %49 = vector.extract_strided_slice %42 {offsets = [0, 128], sizes = [2, 128], strides = [1, 1]} : vector<2x512xf32> to vector<2x128xf32>
    %50 = arith.negf %49 : vector<2x128xf32>
    %51 = math.exp %50 : vector<2x128xf32>
    %cst_16 = arith.constant 1.000000e+00 : f32
    %52 = vector.broadcast %cst_16 : f32 to vector<2x128xf32>
    %53 = arith.addf %52, %51 : vector<2x128xf32>
    %54 = arith.divf %52, %53 : vector<2x128xf32>
    %55 = vector.extract_strided_slice %42 {offsets = [0, 256], sizes = [2, 128], strides = [1, 1]} : vector<2x512xf32> to vector<2x128xf32>
    %56 = math.tanh %55 : vector<2x128xf32>
    %57 = vector.extract_strided_slice %42 {offsets = [0, 384], sizes = [2, 128], strides = [1, 1]} : vector<2x512xf32> to vector<2x128xf32>
    %58 = arith.negf %57 : vector<2x128xf32>
    %59 = math.exp %58 : vector<2x128xf32>
    %cst_17 = arith.constant 1.000000e+00 : f32
    %60 = vector.broadcast %cst_17 : f32 to vector<2x128xf32>
    %61 = arith.addf %60, %59 : vector<2x128xf32>
    %62 = arith.divf %60, %61 : vector<2x128xf32>
    %63 = arith.mulf %54, %36 : vector<2x128xf32>
    %64 = arith.mulf %48, %56 : vector<2x128xf32>
    %65 = arith.addf %63, %64 : vector<2x128xf32>
    %66 = math.tanh %65 : vector<2x128xf32>
    %67 = arith.mulf %62, %66 : vector<2x128xf32>
    %68 = vector.extract_strided_slice %5 {offsets = [4, 0], sizes = [2, 512], strides = [1, 1]} : vector<8x512xf32> to vector<2x512xf32>
    %69 = arith.truncf %67 : vector<2x128xf32> to vector<2x128xbf16>
    %cst_18 = arith.constant dense<0.000000e+00> : vector<2x512xf32>
    %70 = tpu.matmul %69, %7, %cst_18 {dimension_numbers = #tpu.dot_dimension_numbers<[1], [0], [0], [1], [0, 0, 1, 1], [], []>} : vector<2x128xbf16>, vector<128x512xbf16>, vector<2x512xf32> -> vector<2x512xf32>
    %71 = arith.addf %68, %70 : vector<2x512xf32>
    %72 = vector.extract_strided_slice %71 {offsets = [0, 0], sizes = [2, 128], strides = [1, 1]} : vector<2x512xf32> to vector<2x128xf32>
    %73 = arith.negf %72 : vector<2x128xf32>
    %74 = math.exp %73 : vector<2x128xf32>
    %cst_19 = arith.constant 1.000000e+00 : f32
    %75 = vector.broadcast %cst_19 : f32 to vector<2x128xf32>
    %76 = arith.addf %75, %74 : vector<2x128xf32>
    %77 = arith.divf %75, %76 : vector<2x128xf32>
    %78 = vector.extract_strided_slice %71 {offsets = [0, 128], sizes = [2, 128], strides = [1, 1]} : vector<2x512xf32> to vector<2x128xf32>
    %79 = arith.negf %78 : vector<2x128xf32>
    %80 = math.exp %79 : vector<2x128xf32>
    %cst_20 = arith.constant 1.000000e+00 : f32
    %81 = vector.broadcast %cst_20 : f32 to vector<2x128xf32>
    %82 = arith.addf %81, %80 : vector<2x128xf32>
    %83 = arith.divf %81, %82 : vector<2x128xf32>
    %84 = vector.extract_strided_slice %71 {offsets = [0, 256], sizes = [2, 128], strides = [1, 1]} : vector<2x512xf32> to vector<2x128xf32>
    %85 = math.tanh %84 : vector<2x128xf32>
    %86 = vector.extract_strided_slice %71 {offsets = [0, 384], sizes = [2, 128], strides = [1, 1]} : vector<2x512xf32> to vector<2x128xf32>
    %87 = arith.negf %86 : vector<2x128xf32>
    %88 = math.exp %87 : vector<2x128xf32>
    %cst_21 = arith.constant 1.000000e+00 : f32
    %89 = vector.broadcast %cst_21 : f32 to vector<2x128xf32>
    %90 = arith.addf %89, %88 : vector<2x128xf32>
    %91 = arith.divf %89, %90 : vector<2x128xf32>
    %92 = arith.mulf %83, %65 : vector<2x128xf32>
    %93 = arith.mulf %77, %85 : vector<2x128xf32>
    %94 = arith.addf %92, %93 : vector<2x128xf32>
    %95 = math.tanh %94 : vector<2x128xf32>
    %96 = arith.mulf %91, %95 : vector<2x128xf32>
    %97 = vector.extract_strided_slice %5 {offsets = [6, 0], sizes = [2, 512], strides = [1, 1]} : vector<8x512xf32> to vector<2x512xf32>
    %98 = arith.truncf %96 : vector<2x128xf32> to vector<2x128xbf16>
    %cst_22 = arith.constant dense<0.000000e+00> : vector<2x512xf32>
    %99 = tpu.matmul %98, %7, %cst_22 {dimension_numbers = #tpu.dot_dimension_numbers<[1], [0], [0], [1], [0, 0, 1, 1], [], []>} : vector<2x128xbf16>, vector<128x512xbf16>, vector<2x512xf32> -> vector<2x512xf32>
    %100 = arith.addf %97, %99 : vector<2x512xf32>
    %101 = vector.extract_strided_slice %100 {offsets = [0, 0], sizes = [2, 128], strides = [1, 1]} : vector<2x512xf32> to vector<2x128xf32>
    %102 = arith.negf %101 : vector<2x128xf32>
    %103 = math.exp %102 : vector<2x128xf32>
    %cst_23 = arith.constant 1.000000e+00 : f32
    %104 = vector.broadcast %cst_23 : f32 to vector<2x128xf32>
    %105 = arith.addf %104, %103 : vector<2x128xf32>
    %106 = arith.divf %104, %105 : vector<2x128xf32>
    %107 = vector.extract_strided_slice %100 {offsets = [0, 128], sizes = [2, 128], strides = [1, 1]} : vector<2x512xf32> to vector<2x128xf32>
    %108 = arith.negf %107 : vector<2x128xf32>
    %109 = math.exp %108 : vector<2x128xf32>
    %cst_24 = arith.constant 1.000000e+00 : f32
    %110 = vector.broadcast %cst_24 : f32 to vector<2x128xf32>
    %111 = arith.addf %110, %109 : vector<2x128xf32>
    %112 = arith.divf %110, %111 : vector<2x128xf32>
    %113 = vector.extract_strided_slice %100 {offsets = [0, 256], sizes = [2, 128], strides = [1, 1]} : vector<2x512xf32> to vector<2x128xf32>
    %114 = math.tanh %113 : vector<2x128xf32>
    %115 = vector.extract_strided_slice %100 {offsets = [0, 384], sizes = [2, 128], strides = [1, 1]} : vector<2x512xf32> to vector<2x128xf32>
    %116 = arith.negf %115 : vector<2x128xf32>
    %117 = math.exp %116 : vector<2x128xf32>
    %cst_25 = arith.constant 1.000000e+00 : f32
    %118 = vector.broadcast %cst_25 : f32 to vector<2x128xf32>
    %119 = arith.addf %118, %117 : vector<2x128xf32>
    %120 = arith.divf %118, %119 : vector<2x128xf32>
    %121 = arith.mulf %112, %94 : vector<2x128xf32>
    %122 = arith.mulf %106, %114 : vector<2x128xf32>
    %123 = arith.addf %121, %122 : vector<2x128xf32>
    %124 = math.tanh %123 : vector<2x128xf32>
    %125 = arith.mulf %120, %124 : vector<2x128xf32>
    %126 = tpu.concatenate %38, %67, %96, %125 in 0 : vector<2x128xf32>, vector<2x128xf32>, vector<2x128xf32>, vector<2x128xf32> -> vector<8x128xf32>
    %127 = arith.truncf %126 : vector<8x128xf32> to vector<8x128xbf16>
    %c0_26 = arith.constant 0 : index
    %c0_27 = arith.constant 0 : index
    %c0_28 = arith.constant 0 : index
    %128 = vector.load %arg4[%c0_26, %c0_27, %c0_28] : memref<3x128x512xbf16, #tpu.memory_space<vmem>>, vector<1x128x512xbf16>
    %129 = vector.shape_cast %128 : vector<1x128x512xbf16> to vector<128x512xbf16>
    %cst_29 = arith.constant dense<0.000000e+00> : vector<8x512xf32>
    %130 = tpu.matmul %127, %129, %cst_29 {dimension_numbers = #tpu.dot_dimension_numbers<[1], [0], [0], [1], [0, 0, 1, 1], [], []>} : vector<8x128xbf16>, vector<128x512xbf16>, vector<8x512xf32> -> vector<8x512xf32>
    %c0_30 = arith.constant 0 : index
    %c0_31 = arith.constant 0 : index
    %c0_32 = arith.constant 0 : index
    %131 = vector.load %arg6[%c0_30, %c0_31, %c0_32] : memref<3x1x512xf32, #tpu.memory_space<vmem>>, vector<1x1x512xf32>
    %132 = vector.shape_cast %131 : vector<1x1x512xf32> to vector<1x512xf32>
    %133 = vector.broadcast %132 : vector<1x512xf32> to vector<8x512xf32>
    %134 = arith.addf %130, %133 : vector<8x512xf32>
    %c1 = arith.constant 1 : index
    %c0_33 = arith.constant 0 : index
    %c0_34 = arith.constant 0 : index
    %135 = vector.load %arg5[%c1, %c0_33, %c0_34] : memref<4x128x512xbf16, #tpu.memory_space<vmem>>, vector<1x128x512xbf16>
    %136 = vector.shape_cast %135 : vector<1x128x512xbf16> to vector<128x512xbf16>
    %cst_35 = arith.constant 0.000000e+00 : f32
    %137 = vector.broadcast %cst_35 : f32 to vector<2x128xf32>
    %cst_36 = arith.constant 0.000000e+00 : f32
    %138 = vector.broadcast %cst_36 : f32 to vector<2x128xf32>
    %139 = vector.extract_strided_slice %134 {offsets = [0, 0], sizes = [2, 512], strides = [1, 1]} : vector<8x512xf32> to vector<2x512xf32>
    %140 = arith.truncf %137 : vector<2x128xf32> to vector<2x128xbf16>
    %cst_37 = arith.constant dense<0.000000e+00> : vector<2x512xf32>
    %141 = tpu.matmul %140, %136, %cst_37 {dimension_numbers = #tpu.dot_dimension_numbers<[1], [0], [0], [1], [0, 0, 1, 1], [], []>} : vector<2x128xbf16>, vector<128x512xbf16>, vector<2x512xf32> -> vector<2x512xf32>
    %142 = arith.addf %139, %141 : vector<2x512xf32>
    %143 = vector.extract_strided_slice %142 {offsets = [0, 0], sizes = [2, 128], strides = [1, 1]} : vector<2x512xf32> to vector<2x128xf32>
    %144 = arith.negf %143 : vector<2x128xf32>
    %145 = math.exp %144 : vector<2x128xf32>
    %cst_38 = arith.constant 1.000000e+00 : f32
    %146 = vector.broadcast %cst_38 : f32 to vector<2x128xf32>
    %147 = arith.addf %146, %145 : vector<2x128xf32>
    %148 = arith.divf %146, %147 : vector<2x128xf32>
    %149 = vector.extract_strided_slice %142 {offsets = [0, 128], sizes = [2, 128], strides = [1, 1]} : vector<2x512xf32> to vector<2x128xf32>
    %150 = arith.negf %149 : vector<2x128xf32>
    %151 = math.exp %150 : vector<2x128xf32>
    %cst_39 = arith.constant 1.000000e+00 : f32
    %152 = vector.broadcast %cst_39 : f32 to vector<2x128xf32>
    %153 = arith.addf %152, %151 : vector<2x128xf32>
    %154 = arith.divf %152, %153 : vector<2x128xf32>
    %155 = vector.extract_strided_slice %142 {offsets = [0, 256], sizes = [2, 128], strides = [1, 1]} : vector<2x512xf32> to vector<2x128xf32>
    %156 = math.tanh %155 : vector<2x128xf32>
    %157 = vector.extract_strided_slice %142 {offsets = [0, 384], sizes = [2, 128], strides = [1, 1]} : vector<2x512xf32> to vector<2x128xf32>
    %158 = arith.negf %157 : vector<2x128xf32>
    %159 = math.exp %158 : vector<2x128xf32>
    %cst_40 = arith.constant 1.000000e+00 : f32
    %160 = vector.broadcast %cst_40 : f32 to vector<2x128xf32>
    %161 = arith.addf %160, %159 : vector<2x128xf32>
    %162 = arith.divf %160, %161 : vector<2x128xf32>
    %163 = arith.mulf %154, %138 : vector<2x128xf32>
    %164 = arith.mulf %148, %156 : vector<2x128xf32>
    %165 = arith.addf %163, %164 : vector<2x128xf32>
    %166 = math.tanh %165 : vector<2x128xf32>
    %167 = arith.mulf %162, %166 : vector<2x128xf32>
    %168 = vector.extract_strided_slice %134 {offsets = [2, 0], sizes = [2, 512], strides = [1, 1]} : vector<8x512xf32> to vector<2x512xf32>
    %169 = arith.truncf %167 : vector<2x128xf32> to vector<2x128xbf16>
    %cst_41 = arith.constant dense<0.000000e+00> : vector<2x512xf32>
    %170 = tpu.matmul %169, %136, %cst_41 {dimension_numbers = #tpu.dot_dimension_numbers<[1], [0], [0], [1], [0, 0, 1, 1], [], []>} : vector<2x128xbf16>, vector<128x512xbf16>, vector<2x512xf32> -> vector<2x512xf32>
    %171 = arith.addf %168, %170 : vector<2x512xf32>
    %172 = vector.extract_strided_slice %171 {offsets = [0, 0], sizes = [2, 128], strides = [1, 1]} : vector<2x512xf32> to vector<2x128xf32>
    %173 = arith.negf %172 : vector<2x128xf32>
    %174 = math.exp %173 : vector<2x128xf32>
    %cst_42 = arith.constant 1.000000e+00 : f32
    %175 = vector.broadcast %cst_42 : f32 to vector<2x128xf32>
    %176 = arith.addf %175, %174 : vector<2x128xf32>
    %177 = arith.divf %175, %176 : vector<2x128xf32>
    %178 = vector.extract_strided_slice %171 {offsets = [0, 128], sizes = [2, 128], strides = [1, 1]} : vector<2x512xf32> to vector<2x128xf32>
    %179 = arith.negf %178 : vector<2x128xf32>
    %180 = math.exp %179 : vector<2x128xf32>
    %cst_43 = arith.constant 1.000000e+00 : f32
    %181 = vector.broadcast %cst_43 : f32 to vector<2x128xf32>
    %182 = arith.addf %181, %180 : vector<2x128xf32>
    %183 = arith.divf %181, %182 : vector<2x128xf32>
    %184 = vector.extract_strided_slice %171 {offsets = [0, 256], sizes = [2, 128], strides = [1, 1]} : vector<2x512xf32> to vector<2x128xf32>
    %185 = math.tanh %184 : vector<2x128xf32>
    %186 = vector.extract_strided_slice %171 {offsets = [0, 384], sizes = [2, 128], strides = [1, 1]} : vector<2x512xf32> to vector<2x128xf32>
    %187 = arith.negf %186 : vector<2x128xf32>
    %188 = math.exp %187 : vector<2x128xf32>
    %cst_44 = arith.constant 1.000000e+00 : f32
    %189 = vector.broadcast %cst_44 : f32 to vector<2x128xf32>
    %190 = arith.addf %189, %188 : vector<2x128xf32>
    %191 = arith.divf %189, %190 : vector<2x128xf32>
    %192 = arith.mulf %183, %165 : vector<2x128xf32>
    %193 = arith.mulf %177, %185 : vector<2x128xf32>
    %194 = arith.addf %192, %193 : vector<2x128xf32>
    %195 = math.tanh %194 : vector<2x128xf32>
    %196 = arith.mulf %191, %195 : vector<2x128xf32>
    %197 = vector.extract_strided_slice %134 {offsets = [4, 0], sizes = [2, 512], strides = [1, 1]} : vector<8x512xf32> to vector<2x512xf32>
    %198 = arith.truncf %196 : vector<2x128xf32> to vector<2x128xbf16>
    %cst_45 = arith.constant dense<0.000000e+00> : vector<2x512xf32>
    %199 = tpu.matmul %198, %136, %cst_45 {dimension_numbers = #tpu.dot_dimension_numbers<[1], [0], [0], [1], [0, 0, 1, 1], [], []>} : vector<2x128xbf16>, vector<128x512xbf16>, vector<2x512xf32> -> vector<2x512xf32>
    %200 = arith.addf %197, %199 : vector<2x512xf32>
    %201 = vector.extract_strided_slice %200 {offsets = [0, 0], sizes = [2, 128], strides = [1, 1]} : vector<2x512xf32> to vector<2x128xf32>
    %202 = arith.negf %201 : vector<2x128xf32>
    %203 = math.exp %202 : vector<2x128xf32>
    %cst_46 = arith.constant 1.000000e+00 : f32
    %204 = vector.broadcast %cst_46 : f32 to vector<2x128xf32>
    %205 = arith.addf %204, %203 : vector<2x128xf32>
    %206 = arith.divf %204, %205 : vector<2x128xf32>
    %207 = vector.extract_strided_slice %200 {offsets = [0, 128], sizes = [2, 128], strides = [1, 1]} : vector<2x512xf32> to vector<2x128xf32>
    %208 = arith.negf %207 : vector<2x128xf32>
    %209 = math.exp %208 : vector<2x128xf32>
    %cst_47 = arith.constant 1.000000e+00 : f32
    %210 = vector.broadcast %cst_47 : f32 to vector<2x128xf32>
    %211 = arith.addf %210, %209 : vector<2x128xf32>
    %212 = arith.divf %210, %211 : vector<2x128xf32>
    %213 = vector.extract_strided_slice %200 {offsets = [0, 256], sizes = [2, 128], strides = [1, 1]} : vector<2x512xf32> to vector<2x128xf32>
    %214 = math.tanh %213 : vector<2x128xf32>
    %215 = vector.extract_strided_slice %200 {offsets = [0, 384], sizes = [2, 128], strides = [1, 1]} : vector<2x512xf32> to vector<2x128xf32>
    %216 = arith.negf %215 : vector<2x128xf32>
    %217 = math.exp %216 : vector<2x128xf32>
    %cst_48 = arith.constant 1.000000e+00 : f32
    %218 = vector.broadcast %cst_48 : f32 to vector<2x128xf32>
    %219 = arith.addf %218, %217 : vector<2x128xf32>
    %220 = arith.divf %218, %219 : vector<2x128xf32>
    %221 = arith.mulf %212, %194 : vector<2x128xf32>
    %222 = arith.mulf %206, %214 : vector<2x128xf32>
    %223 = arith.addf %221, %222 : vector<2x128xf32>
    %224 = math.tanh %223 : vector<2x128xf32>
    %225 = arith.mulf %220, %224 : vector<2x128xf32>
    %226 = vector.extract_strided_slice %134 {offsets = [6, 0], sizes = [2, 512], strides = [1, 1]} : vector<8x512xf32> to vector<2x512xf32>
    %227 = arith.truncf %225 : vector<2x128xf32> to vector<2x128xbf16>
    %cst_49 = arith.constant dense<0.000000e+00> : vector<2x512xf32>
    %228 = tpu.matmul %227, %136, %cst_49 {dimension_numbers = #tpu.dot_dimension_numbers<[1], [0], [0], [1], [0, 0, 1, 1], [], []>} : vector<2x128xbf16>, vector<128x512xbf16>, vector<2x512xf32> -> vector<2x512xf32>
    %229 = arith.addf %226, %228 : vector<2x512xf32>
    %230 = vector.extract_strided_slice %229 {offsets = [0, 0], sizes = [2, 128], strides = [1, 1]} : vector<2x512xf32> to vector<2x128xf32>
    %231 = arith.negf %230 : vector<2x128xf32>
    %232 = math.exp %231 : vector<2x128xf32>
    %cst_50 = arith.constant 1.000000e+00 : f32
    %233 = vector.broadcast %cst_50 : f32 to vector<2x128xf32>
    %234 = arith.addf %233, %232 : vector<2x128xf32>
    %235 = arith.divf %233, %234 : vector<2x128xf32>
    %236 = vector.extract_strided_slice %229 {offsets = [0, 128], sizes = [2, 128], strides = [1, 1]} : vector<2x512xf32> to vector<2x128xf32>
    %237 = arith.negf %236 : vector<2x128xf32>
    %238 = math.exp %237 : vector<2x128xf32>
    %cst_51 = arith.constant 1.000000e+00 : f32
    %239 = vector.broadcast %cst_51 : f32 to vector<2x128xf32>
    %240 = arith.addf %239, %238 : vector<2x128xf32>
    %241 = arith.divf %239, %240 : vector<2x128xf32>
    %242 = vector.extract_strided_slice %229 {offsets = [0, 256], sizes = [2, 128], strides = [1, 1]} : vector<2x512xf32> to vector<2x128xf32>
    %243 = math.tanh %242 : vector<2x128xf32>
    %244 = vector.extract_strided_slice %229 {offsets = [0, 384], sizes = [2, 128], strides = [1, 1]} : vector<2x512xf32> to vector<2x128xf32>
    %245 = arith.negf %244 : vector<2x128xf32>
    %246 = math.exp %245 : vector<2x128xf32>
    %cst_52 = arith.constant 1.000000e+00 : f32
    %247 = vector.broadcast %cst_52 : f32 to vector<2x128xf32>
    %248 = arith.addf %247, %246 : vector<2x128xf32>
    %249 = arith.divf %247, %248 : vector<2x128xf32>
    %250 = arith.mulf %241, %223 : vector<2x128xf32>
    %251 = arith.mulf %235, %243 : vector<2x128xf32>
    %252 = arith.addf %250, %251 : vector<2x128xf32>
    %253 = math.tanh %252 : vector<2x128xf32>
    %254 = arith.mulf %249, %253 : vector<2x128xf32>
    %255 = tpu.concatenate %167, %196, %225, %254 in 0 : vector<2x128xf32>, vector<2x128xf32>, vector<2x128xf32>, vector<2x128xf32> -> vector<8x128xf32>
    %256 = arith.truncf %255 : vector<8x128xf32> to vector<8x128xbf16>
    %c1_53 = arith.constant 1 : index
    %c0_54 = arith.constant 0 : index
    %c0_55 = arith.constant 0 : index
    %257 = vector.load %arg4[%c1_53, %c0_54, %c0_55] : memref<3x128x512xbf16, #tpu.memory_space<vmem>>, vector<1x128x512xbf16>
    %258 = vector.shape_cast %257 : vector<1x128x512xbf16> to vector<128x512xbf16>
    %cst_56 = arith.constant dense<0.000000e+00> : vector<8x512xf32>
    %259 = tpu.matmul %256, %258, %cst_56 {dimension_numbers = #tpu.dot_dimension_numbers<[1], [0], [0], [1], [0, 0, 1, 1], [], []>} : vector<8x128xbf16>, vector<128x512xbf16>, vector<8x512xf32> -> vector<8x512xf32>
    %c1_57 = arith.constant 1 : index
    %c0_58 = arith.constant 0 : index
    %c0_59 = arith.constant 0 : index
    %260 = vector.load %arg6[%c1_57, %c0_58, %c0_59] : memref<3x1x512xf32, #tpu.memory_space<vmem>>, vector<1x1x512xf32>
    %261 = vector.shape_cast %260 : vector<1x1x512xf32> to vector<1x512xf32>
    %262 = vector.broadcast %261 : vector<1x512xf32> to vector<8x512xf32>
    %263 = arith.addf %259, %262 : vector<8x512xf32>
    %c2 = arith.constant 2 : index
    %c0_60 = arith.constant 0 : index
    %c0_61 = arith.constant 0 : index
    %264 = vector.load %arg5[%c2, %c0_60, %c0_61] : memref<4x128x512xbf16, #tpu.memory_space<vmem>>, vector<1x128x512xbf16>
    %265 = vector.shape_cast %264 : vector<1x128x512xbf16> to vector<128x512xbf16>
    %cst_62 = arith.constant 0.000000e+00 : f32
    %266 = vector.broadcast %cst_62 : f32 to vector<2x128xf32>
    %cst_63 = arith.constant 0.000000e+00 : f32
    %267 = vector.broadcast %cst_63 : f32 to vector<2x128xf32>
    %268 = vector.extract_strided_slice %263 {offsets = [0, 0], sizes = [2, 512], strides = [1, 1]} : vector<8x512xf32> to vector<2x512xf32>
    %269 = arith.truncf %266 : vector<2x128xf32> to vector<2x128xbf16>
    %cst_64 = arith.constant dense<0.000000e+00> : vector<2x512xf32>
    %270 = tpu.matmul %269, %265, %cst_64 {dimension_numbers = #tpu.dot_dimension_numbers<[1], [0], [0], [1], [0, 0, 1, 1], [], []>} : vector<2x128xbf16>, vector<128x512xbf16>, vector<2x512xf32> -> vector<2x512xf32>
    %271 = arith.addf %268, %270 : vector<2x512xf32>
    %272 = vector.extract_strided_slice %271 {offsets = [0, 0], sizes = [2, 128], strides = [1, 1]} : vector<2x512xf32> to vector<2x128xf32>
    %273 = arith.negf %272 : vector<2x128xf32>
    %274 = math.exp %273 : vector<2x128xf32>
    %cst_65 = arith.constant 1.000000e+00 : f32
    %275 = vector.broadcast %cst_65 : f32 to vector<2x128xf32>
    %276 = arith.addf %275, %274 : vector<2x128xf32>
    %277 = arith.divf %275, %276 : vector<2x128xf32>
    %278 = vector.extract_strided_slice %271 {offsets = [0, 128], sizes = [2, 128], strides = [1, 1]} : vector<2x512xf32> to vector<2x128xf32>
    %279 = arith.negf %278 : vector<2x128xf32>
    %280 = math.exp %279 : vector<2x128xf32>
    %cst_66 = arith.constant 1.000000e+00 : f32
    %281 = vector.broadcast %cst_66 : f32 to vector<2x128xf32>
    %282 = arith.addf %281, %280 : vector<2x128xf32>
    %283 = arith.divf %281, %282 : vector<2x128xf32>
    %284 = vector.extract_strided_slice %271 {offsets = [0, 256], sizes = [2, 128], strides = [1, 1]} : vector<2x512xf32> to vector<2x128xf32>
    %285 = math.tanh %284 : vector<2x128xf32>
    %286 = vector.extract_strided_slice %271 {offsets = [0, 384], sizes = [2, 128], strides = [1, 1]} : vector<2x512xf32> to vector<2x128xf32>
    %287 = arith.negf %286 : vector<2x128xf32>
    %288 = math.exp %287 : vector<2x128xf32>
    %cst_67 = arith.constant 1.000000e+00 : f32
    %289 = vector.broadcast %cst_67 : f32 to vector<2x128xf32>
    %290 = arith.addf %289, %288 : vector<2x128xf32>
    %291 = arith.divf %289, %290 : vector<2x128xf32>
    %292 = arith.mulf %283, %267 : vector<2x128xf32>
    %293 = arith.mulf %277, %285 : vector<2x128xf32>
    %294 = arith.addf %292, %293 : vector<2x128xf32>
    %295 = math.tanh %294 : vector<2x128xf32>
    %296 = arith.mulf %291, %295 : vector<2x128xf32>
    %297 = vector.extract_strided_slice %263 {offsets = [2, 0], sizes = [2, 512], strides = [1, 1]} : vector<8x512xf32> to vector<2x512xf32>
    %298 = arith.truncf %296 : vector<2x128xf32> to vector<2x128xbf16>
    %cst_68 = arith.constant dense<0.000000e+00> : vector<2x512xf32>
    %299 = tpu.matmul %298, %265, %cst_68 {dimension_numbers = #tpu.dot_dimension_numbers<[1], [0], [0], [1], [0, 0, 1, 1], [], []>} : vector<2x128xbf16>, vector<128x512xbf16>, vector<2x512xf32> -> vector<2x512xf32>
    %300 = arith.addf %297, %299 : vector<2x512xf32>
    %301 = vector.extract_strided_slice %300 {offsets = [0, 0], sizes = [2, 128], strides = [1, 1]} : vector<2x512xf32> to vector<2x128xf32>
    %302 = arith.negf %301 : vector<2x128xf32>
    %303 = math.exp %302 : vector<2x128xf32>
    %cst_69 = arith.constant 1.000000e+00 : f32
    %304 = vector.broadcast %cst_69 : f32 to vector<2x128xf32>
    %305 = arith.addf %304, %303 : vector<2x128xf32>
    %306 = arith.divf %304, %305 : vector<2x128xf32>
    %307 = vector.extract_strided_slice %300 {offsets = [0, 128], sizes = [2, 128], strides = [1, 1]} : vector<2x512xf32> to vector<2x128xf32>
    %308 = arith.negf %307 : vector<2x128xf32>
    %309 = math.exp %308 : vector<2x128xf32>
    %cst_70 = arith.constant 1.000000e+00 : f32
    %310 = vector.broadcast %cst_70 : f32 to vector<2x128xf32>
    %311 = arith.addf %310, %309 : vector<2x128xf32>
    %312 = arith.divf %310, %311 : vector<2x128xf32>
    %313 = vector.extract_strided_slice %300 {offsets = [0, 256], sizes = [2, 128], strides = [1, 1]} : vector<2x512xf32> to vector<2x128xf32>
    %314 = math.tanh %313 : vector<2x128xf32>
    %315 = vector.extract_strided_slice %300 {offsets = [0, 384], sizes = [2, 128], strides = [1, 1]} : vector<2x512xf32> to vector<2x128xf32>
    %316 = arith.negf %315 : vector<2x128xf32>
    %317 = math.exp %316 : vector<2x128xf32>
    %cst_71 = arith.constant 1.000000e+00 : f32
    %318 = vector.broadcast %cst_71 : f32 to vector<2x128xf32>
    %319 = arith.addf %318, %317 : vector<2x128xf32>
    %320 = arith.divf %318, %319 : vector<2x128xf32>
    %321 = arith.mulf %312, %294 : vector<2x128xf32>
    %322 = arith.mulf %306, %314 : vector<2x128xf32>
    %323 = arith.addf %321, %322 : vector<2x128xf32>
    %324 = math.tanh %323 : vector<2x128xf32>
    %325 = arith.mulf %320, %324 : vector<2x128xf32>
    %326 = vector.extract_strided_slice %263 {offsets = [4, 0], sizes = [2, 512], strides = [1, 1]} : vector<8x512xf32> to vector<2x512xf32>
    %327 = arith.truncf %325 : vector<2x128xf32> to vector<2x128xbf16>
    %cst_72 = arith.constant dense<0.000000e+00> : vector<2x512xf32>
    %328 = tpu.matmul %327, %265, %cst_72 {dimension_numbers = #tpu.dot_dimension_numbers<[1], [0], [0], [1], [0, 0, 1, 1], [], []>} : vector<2x128xbf16>, vector<128x512xbf16>, vector<2x512xf32> -> vector<2x512xf32>
    %329 = arith.addf %326, %328 : vector<2x512xf32>
    %330 = vector.extract_strided_slice %329 {offsets = [0, 0], sizes = [2, 128], strides = [1, 1]} : vector<2x512xf32> to vector<2x128xf32>
    %331 = arith.negf %330 : vector<2x128xf32>
    %332 = math.exp %331 : vector<2x128xf32>
    %cst_73 = arith.constant 1.000000e+00 : f32
    %333 = vector.broadcast %cst_73 : f32 to vector<2x128xf32>
    %334 = arith.addf %333, %332 : vector<2x128xf32>
    %335 = arith.divf %333, %334 : vector<2x128xf32>
    %336 = vector.extract_strided_slice %329 {offsets = [0, 128], sizes = [2, 128], strides = [1, 1]} : vector<2x512xf32> to vector<2x128xf32>
    %337 = arith.negf %336 : vector<2x128xf32>
    %338 = math.exp %337 : vector<2x128xf32>
    %cst_74 = arith.constant 1.000000e+00 : f32
    %339 = vector.broadcast %cst_74 : f32 to vector<2x128xf32>
    %340 = arith.addf %339, %338 : vector<2x128xf32>
    %341 = arith.divf %339, %340 : vector<2x128xf32>
    %342 = vector.extract_strided_slice %329 {offsets = [0, 256], sizes = [2, 128], strides = [1, 1]} : vector<2x512xf32> to vector<2x128xf32>
    %343 = math.tanh %342 : vector<2x128xf32>
    %344 = vector.extract_strided_slice %329 {offsets = [0, 384], sizes = [2, 128], strides = [1, 1]} : vector<2x512xf32> to vector<2x128xf32>
    %345 = arith.negf %344 : vector<2x128xf32>
    %346 = math.exp %345 : vector<2x128xf32>
    %cst_75 = arith.constant 1.000000e+00 : f32
    %347 = vector.broadcast %cst_75 : f32 to vector<2x128xf32>
    %348 = arith.addf %347, %346 : vector<2x128xf32>
    %349 = arith.divf %347, %348 : vector<2x128xf32>
    %350 = arith.mulf %341, %323 : vector<2x128xf32>
    %351 = arith.mulf %335, %343 : vector<2x128xf32>
    %352 = arith.addf %350, %351 : vector<2x128xf32>
    %353 = math.tanh %352 : vector<2x128xf32>
    %354 = arith.mulf %349, %353 : vector<2x128xf32>
    %355 = vector.extract_strided_slice %263 {offsets = [6, 0], sizes = [2, 512], strides = [1, 1]} : vector<8x512xf32> to vector<2x512xf32>
    %356 = arith.truncf %354 : vector<2x128xf32> to vector<2x128xbf16>
    %cst_76 = arith.constant dense<0.000000e+00> : vector<2x512xf32>
    %357 = tpu.matmul %356, %265, %cst_76 {dimension_numbers = #tpu.dot_dimension_numbers<[1], [0], [0], [1], [0, 0, 1, 1], [], []>} : vector<2x128xbf16>, vector<128x512xbf16>, vector<2x512xf32> -> vector<2x512xf32>
    %358 = arith.addf %355, %357 : vector<2x512xf32>
    %359 = vector.extract_strided_slice %358 {offsets = [0, 0], sizes = [2, 128], strides = [1, 1]} : vector<2x512xf32> to vector<2x128xf32>
    %360 = arith.negf %359 : vector<2x128xf32>
    %361 = math.exp %360 : vector<2x128xf32>
    %cst_77 = arith.constant 1.000000e+00 : f32
    %362 = vector.broadcast %cst_77 : f32 to vector<2x128xf32>
    %363 = arith.addf %362, %361 : vector<2x128xf32>
    %364 = arith.divf %362, %363 : vector<2x128xf32>
    %365 = vector.extract_strided_slice %358 {offsets = [0, 128], sizes = [2, 128], strides = [1, 1]} : vector<2x512xf32> to vector<2x128xf32>
    %366 = arith.negf %365 : vector<2x128xf32>
    %367 = math.exp %366 : vector<2x128xf32>
    %cst_78 = arith.constant 1.000000e+00 : f32
    %368 = vector.broadcast %cst_78 : f32 to vector<2x128xf32>
    %369 = arith.addf %368, %367 : vector<2x128xf32>
    %370 = arith.divf %368, %369 : vector<2x128xf32>
    %371 = vector.extract_strided_slice %358 {offsets = [0, 256], sizes = [2, 128], strides = [1, 1]} : vector<2x512xf32> to vector<2x128xf32>
    %372 = math.tanh %371 : vector<2x128xf32>
    %373 = vector.extract_strided_slice %358 {offsets = [0, 384], sizes = [2, 128], strides = [1, 1]} : vector<2x512xf32> to vector<2x128xf32>
    %374 = arith.negf %373 : vector<2x128xf32>
    %375 = math.exp %374 : vector<2x128xf32>
    %cst_79 = arith.constant 1.000000e+00 : f32
    %376 = vector.broadcast %cst_79 : f32 to vector<2x128xf32>
    %377 = arith.addf %376, %375 : vector<2x128xf32>
    %378 = arith.divf %376, %377 : vector<2x128xf32>
    %379 = arith.mulf %370, %352 : vector<2x128xf32>
    %380 = arith.mulf %364, %372 : vector<2x128xf32>
    %381 = arith.addf %379, %380 : vector<2x128xf32>
    %382 = math.tanh %381 : vector<2x128xf32>
    %383 = arith.mulf %378, %382 : vector<2x128xf32>
    %384 = tpu.concatenate %296, %325, %354, %383 in 0 : vector<2x128xf32>, vector<2x128xf32>, vector<2x128xf32>, vector<2x128xf32> -> vector<8x128xf32>
    %385 = arith.truncf %384 : vector<8x128xf32> to vector<8x128xbf16>
    %c2_80 = arith.constant 2 : index
    %c0_81 = arith.constant 0 : index
    %c0_82 = arith.constant 0 : index
    %386 = vector.load %arg4[%c2_80, %c0_81, %c0_82] : memref<3x128x512xbf16, #tpu.memory_space<vmem>>, vector<1x128x512xbf16>
    %387 = vector.shape_cast %386 : vector<1x128x512xbf16> to vector<128x512xbf16>
    %cst_83 = arith.constant dense<0.000000e+00> : vector<8x512xf32>
    %388 = tpu.matmul %385, %387, %cst_83 {dimension_numbers = #tpu.dot_dimension_numbers<[1], [0], [0], [1], [0, 0, 1, 1], [], []>} : vector<8x128xbf16>, vector<128x512xbf16>, vector<8x512xf32> -> vector<8x512xf32>
    %c2_84 = arith.constant 2 : index
    %c0_85 = arith.constant 0 : index
    %c0_86 = arith.constant 0 : index
    %389 = vector.load %arg6[%c2_84, %c0_85, %c0_86] : memref<3x1x512xf32, #tpu.memory_space<vmem>>, vector<1x1x512xf32>
    %390 = vector.shape_cast %389 : vector<1x1x512xf32> to vector<1x512xf32>
    %391 = vector.broadcast %390 : vector<1x512xf32> to vector<8x512xf32>
    %392 = arith.addf %388, %391 : vector<8x512xf32>
    %c3 = arith.constant 3 : index
    %c0_87 = arith.constant 0 : index
    %c0_88 = arith.constant 0 : index
    %393 = vector.load %arg5[%c3, %c0_87, %c0_88] : memref<4x128x512xbf16, #tpu.memory_space<vmem>>, vector<1x128x512xbf16>
    %394 = vector.shape_cast %393 : vector<1x128x512xbf16> to vector<128x512xbf16>
    %cst_89 = arith.constant 0.000000e+00 : f32
    %395 = vector.broadcast %cst_89 : f32 to vector<2x128xf32>
    %cst_90 = arith.constant 0.000000e+00 : f32
    %396 = vector.broadcast %cst_90 : f32 to vector<2x128xf32>
    %397 = vector.extract_strided_slice %392 {offsets = [0, 0], sizes = [2, 512], strides = [1, 1]} : vector<8x512xf32> to vector<2x512xf32>
    %398 = arith.truncf %395 : vector<2x128xf32> to vector<2x128xbf16>
    %cst_91 = arith.constant dense<0.000000e+00> : vector<2x512xf32>
    %399 = tpu.matmul %398, %394, %cst_91 {dimension_numbers = #tpu.dot_dimension_numbers<[1], [0], [0], [1], [0, 0, 1, 1], [], []>} : vector<2x128xbf16>, vector<128x512xbf16>, vector<2x512xf32> -> vector<2x512xf32>
    %400 = arith.addf %397, %399 : vector<2x512xf32>
    %401 = vector.extract_strided_slice %400 {offsets = [0, 0], sizes = [2, 128], strides = [1, 1]} : vector<2x512xf32> to vector<2x128xf32>
    %402 = arith.negf %401 : vector<2x128xf32>
    %403 = math.exp %402 : vector<2x128xf32>
    %cst_92 = arith.constant 1.000000e+00 : f32
    %404 = vector.broadcast %cst_92 : f32 to vector<2x128xf32>
    %405 = arith.addf %404, %403 : vector<2x128xf32>
    %406 = arith.divf %404, %405 : vector<2x128xf32>
    %407 = vector.extract_strided_slice %400 {offsets = [0, 128], sizes = [2, 128], strides = [1, 1]} : vector<2x512xf32> to vector<2x128xf32>
    %408 = arith.negf %407 : vector<2x128xf32>
    %409 = math.exp %408 : vector<2x128xf32>
    %cst_93 = arith.constant 1.000000e+00 : f32
    %410 = vector.broadcast %cst_93 : f32 to vector<2x128xf32>
    %411 = arith.addf %410, %409 : vector<2x128xf32>
    %412 = arith.divf %410, %411 : vector<2x128xf32>
    %413 = vector.extract_strided_slice %400 {offsets = [0, 256], sizes = [2, 128], strides = [1, 1]} : vector<2x512xf32> to vector<2x128xf32>
    %414 = math.tanh %413 : vector<2x128xf32>
    %415 = vector.extract_strided_slice %400 {offsets = [0, 384], sizes = [2, 128], strides = [1, 1]} : vector<2x512xf32> to vector<2x128xf32>
    %416 = arith.negf %415 : vector<2x128xf32>
    %417 = math.exp %416 : vector<2x128xf32>
    %cst_94 = arith.constant 1.000000e+00 : f32
    %418 = vector.broadcast %cst_94 : f32 to vector<2x128xf32>
    %419 = arith.addf %418, %417 : vector<2x128xf32>
    %420 = arith.divf %418, %419 : vector<2x128xf32>
    %421 = arith.mulf %412, %396 : vector<2x128xf32>
    %422 = arith.mulf %406, %414 : vector<2x128xf32>
    %423 = arith.addf %421, %422 : vector<2x128xf32>
    %424 = math.tanh %423 : vector<2x128xf32>
    %425 = arith.mulf %420, %424 : vector<2x128xf32>
    %426 = vector.extract_strided_slice %392 {offsets = [2, 0], sizes = [2, 512], strides = [1, 1]} : vector<8x512xf32> to vector<2x512xf32>
    %427 = arith.truncf %425 : vector<2x128xf32> to vector<2x128xbf16>
    %cst_95 = arith.constant dense<0.000000e+00> : vector<2x512xf32>
    %428 = tpu.matmul %427, %394, %cst_95 {dimension_numbers = #tpu.dot_dimension_numbers<[1], [0], [0], [1], [0, 0, 1, 1], [], []>} : vector<2x128xbf16>, vector<128x512xbf16>, vector<2x512xf32> -> vector<2x512xf32>
    %429 = arith.addf %426, %428 : vector<2x512xf32>
    %430 = vector.extract_strided_slice %429 {offsets = [0, 0], sizes = [2, 128], strides = [1, 1]} : vector<2x512xf32> to vector<2x128xf32>
    %431 = arith.negf %430 : vector<2x128xf32>
    %432 = math.exp %431 : vector<2x128xf32>
    %cst_96 = arith.constant 1.000000e+00 : f32
    %433 = vector.broadcast %cst_96 : f32 to vector<2x128xf32>
    %434 = arith.addf %433, %432 : vector<2x128xf32>
    %435 = arith.divf %433, %434 : vector<2x128xf32>
    %436 = vector.extract_strided_slice %429 {offsets = [0, 128], sizes = [2, 128], strides = [1, 1]} : vector<2x512xf32> to vector<2x128xf32>
    %437 = arith.negf %436 : vector<2x128xf32>
    %438 = math.exp %437 : vector<2x128xf32>
    %cst_97 = arith.constant 1.000000e+00 : f32
    %439 = vector.broadcast %cst_97 : f32 to vector<2x128xf32>
    %440 = arith.addf %439, %438 : vector<2x128xf32>
    %441 = arith.divf %439, %440 : vector<2x128xf32>
    %442 = vector.extract_strided_slice %429 {offsets = [0, 256], sizes = [2, 128], strides = [1, 1]} : vector<2x512xf32> to vector<2x128xf32>
    %443 = math.tanh %442 : vector<2x128xf32>
    %444 = vector.extract_strided_slice %429 {offsets = [0, 384], sizes = [2, 128], strides = [1, 1]} : vector<2x512xf32> to vector<2x128xf32>
    %445 = arith.negf %444 : vector<2x128xf32>
    %446 = math.exp %445 : vector<2x128xf32>
    %cst_98 = arith.constant 1.000000e+00 : f32
    %447 = vector.broadcast %cst_98 : f32 to vector<2x128xf32>
    %448 = arith.addf %447, %446 : vector<2x128xf32>
    %449 = arith.divf %447, %448 : vector<2x128xf32>
    %450 = arith.mulf %441, %423 : vector<2x128xf32>
    %451 = arith.mulf %435, %443 : vector<2x128xf32>
    %452 = arith.addf %450, %451 : vector<2x128xf32>
    %453 = math.tanh %452 : vector<2x128xf32>
    %454 = arith.mulf %449, %453 : vector<2x128xf32>
    %455 = vector.extract_strided_slice %392 {offsets = [4, 0], sizes = [2, 512], strides = [1, 1]} : vector<8x512xf32> to vector<2x512xf32>
    %456 = arith.truncf %454 : vector<2x128xf32> to vector<2x128xbf16>
    %cst_99 = arith.constant dense<0.000000e+00> : vector<2x512xf32>
    %457 = tpu.matmul %456, %394, %cst_99 {dimension_numbers = #tpu.dot_dimension_numbers<[1], [0], [0], [1], [0, 0, 1, 1], [], []>} : vector<2x128xbf16>, vector<128x512xbf16>, vector<2x512xf32> -> vector<2x512xf32>
    %458 = arith.addf %455, %457 : vector<2x512xf32>
    %459 = vector.extract_strided_slice %458 {offsets = [0, 0], sizes = [2, 128], strides = [1, 1]} : vector<2x512xf32> to vector<2x128xf32>
    %460 = arith.negf %459 : vector<2x128xf32>
    %461 = math.exp %460 : vector<2x128xf32>
    %cst_100 = arith.constant 1.000000e+00 : f32
    %462 = vector.broadcast %cst_100 : f32 to vector<2x128xf32>
    %463 = arith.addf %462, %461 : vector<2x128xf32>
    %464 = arith.divf %462, %463 : vector<2x128xf32>
    %465 = vector.extract_strided_slice %458 {offsets = [0, 128], sizes = [2, 128], strides = [1, 1]} : vector<2x512xf32> to vector<2x128xf32>
    %466 = arith.negf %465 : vector<2x128xf32>
    %467 = math.exp %466 : vector<2x128xf32>
    %cst_101 = arith.constant 1.000000e+00 : f32
    %468 = vector.broadcast %cst_101 : f32 to vector<2x128xf32>
    %469 = arith.addf %468, %467 : vector<2x128xf32>
    %470 = arith.divf %468, %469 : vector<2x128xf32>
    %471 = vector.extract_strided_slice %458 {offsets = [0, 256], sizes = [2, 128], strides = [1, 1]} : vector<2x512xf32> to vector<2x128xf32>
    %472 = math.tanh %471 : vector<2x128xf32>
    %473 = vector.extract_strided_slice %458 {offsets = [0, 384], sizes = [2, 128], strides = [1, 1]} : vector<2x512xf32> to vector<2x128xf32>
    %474 = arith.negf %473 : vector<2x128xf32>
    %475 = math.exp %474 : vector<2x128xf32>
    %cst_102 = arith.constant 1.000000e+00 : f32
    %476 = vector.broadcast %cst_102 : f32 to vector<2x128xf32>
    %477 = arith.addf %476, %475 : vector<2x128xf32>
    %478 = arith.divf %476, %477 : vector<2x128xf32>
    %479 = arith.mulf %470, %452 : vector<2x128xf32>
    %480 = arith.mulf %464, %472 : vector<2x128xf32>
    %481 = arith.addf %479, %480 : vector<2x128xf32>
    %482 = math.tanh %481 : vector<2x128xf32>
    %483 = arith.mulf %478, %482 : vector<2x128xf32>
    %484 = vector.extract_strided_slice %392 {offsets = [6, 0], sizes = [2, 512], strides = [1, 1]} : vector<8x512xf32> to vector<2x512xf32>
    %485 = arith.truncf %483 : vector<2x128xf32> to vector<2x128xbf16>
    %cst_103 = arith.constant dense<0.000000e+00> : vector<2x512xf32>
    %486 = tpu.matmul %485, %394, %cst_103 {dimension_numbers = #tpu.dot_dimension_numbers<[1], [0], [0], [1], [0, 0, 1, 1], [], []>} : vector<2x128xbf16>, vector<128x512xbf16>, vector<2x512xf32> -> vector<2x512xf32>
    %487 = arith.addf %484, %486 : vector<2x512xf32>
    %488 = vector.extract_strided_slice %487 {offsets = [0, 0], sizes = [2, 128], strides = [1, 1]} : vector<2x512xf32> to vector<2x128xf32>
    %489 = arith.negf %488 : vector<2x128xf32>
    %490 = math.exp %489 : vector<2x128xf32>
    %cst_104 = arith.constant 1.000000e+00 : f32
    %491 = vector.broadcast %cst_104 : f32 to vector<2x128xf32>
    %492 = arith.addf %491, %490 : vector<2x128xf32>
    %493 = arith.divf %491, %492 : vector<2x128xf32>
    %494 = vector.extract_strided_slice %487 {offsets = [0, 128], sizes = [2, 128], strides = [1, 1]} : vector<2x512xf32> to vector<2x128xf32>
    %495 = arith.negf %494 : vector<2x128xf32>
    %496 = math.exp %495 : vector<2x128xf32>
    %cst_105 = arith.constant 1.000000e+00 : f32
    %497 = vector.broadcast %cst_105 : f32 to vector<2x128xf32>
    %498 = arith.addf %497, %496 : vector<2x128xf32>
    %499 = arith.divf %497, %498 : vector<2x128xf32>
    %500 = vector.extract_strided_slice %487 {offsets = [0, 256], sizes = [2, 128], strides = [1, 1]} : vector<2x512xf32> to vector<2x128xf32>
    %501 = math.tanh %500 : vector<2x128xf32>
    %502 = vector.extract_strided_slice %487 {offsets = [0, 384], sizes = [2, 128], strides = [1, 1]} : vector<2x512xf32> to vector<2x128xf32>
    %503 = arith.negf %502 : vector<2x128xf32>
    %504 = math.exp %503 : vector<2x128xf32>
    %cst_106 = arith.constant 1.000000e+00 : f32
    %505 = vector.broadcast %cst_106 : f32 to vector<2x128xf32>
    %506 = arith.addf %505, %504 : vector<2x128xf32>
    %507 = arith.divf %505, %506 : vector<2x128xf32>
    %508 = arith.mulf %499, %481 : vector<2x128xf32>
    %509 = arith.mulf %493, %501 : vector<2x128xf32>
    %510 = arith.addf %508, %509 : vector<2x128xf32>
    %511 = math.tanh %510 : vector<2x128xf32>
    %512 = arith.mulf %507, %511 : vector<2x128xf32>
    %513 = arith.truncf %512 : vector<2x128xf32> to vector<2x128xbf16>
    %c0_107 = arith.constant 0 : index
    %c0_108 = arith.constant 0 : index
    %514 = vector.load %arg7[%c0_107, %c0_108] : memref<128x64xbf16, #tpu.memory_space<vmem>>, vector<128x64xbf16>
    %cst_109 = arith.constant dense<0.000000e+00> : vector<2x64xf32>
    %515 = tpu.matmul %513, %514, %cst_109 {dimension_numbers = #tpu.dot_dimension_numbers<[1], [0], [0], [1], [0, 0, 1, 1], [], []>} : vector<2x128xbf16>, vector<128x64xbf16>, vector<2x64xf32> -> vector<2x64xf32>
    %c0_110 = arith.constant 0 : index
    %c0_111 = arith.constant 0 : index
    %516 = vector.load %arg1[%c0_110, %c0_111] : memref<2x3xbf16, #tpu.memory_space<vmem>>, vector<2x3xbf16>
    %c0_112 = arith.constant 0 : index
    %c0_113 = arith.constant 0 : index
    %517 = vector.load %arg8[%c0_112, %c0_113] : memref<3x64xbf16, #tpu.memory_space<vmem>>, vector<3x64xbf16>
    %cst_114 = arith.constant dense<0.000000e+00> : vector<2x64xf32>
    %518 = tpu.matmul %516, %517, %cst_114 {dimension_numbers = #tpu.dot_dimension_numbers<[1], [0], [0], [1], [0, 0, 1, 1], [], []>} : vector<2x3xbf16>, vector<3x64xbf16>, vector<2x64xf32> -> vector<2x64xf32>
    %519 = arith.addf %515, %518 : vector<2x64xf32>
    %c0_115 = arith.constant 0 : index
    %c0_116 = arith.constant 0 : index
    %520 = vector.load %arg9[%c0_115, %c0_116] : memref<1x64xf32, #tpu.memory_space<vmem>>, vector<1x64xf32>
    %521 = vector.broadcast %520 : vector<1x64xf32> to vector<2x64xf32>
    %522 = arith.addf %519, %521 : vector<2x64xf32>
    %cst_117 = arith.constant 0.000000e+00 : f32
    %523 = vector.broadcast %cst_117 : f32 to vector<2x64xf32>
    %524 = arith.cmpf oge, %522, %523 : vector<2x64xf32>
    %cst_118 = arith.constant 0.00999999977 : f32
    %525 = vector.broadcast %cst_118 : f32 to vector<2x64xf32>
    %526 = arith.mulf %525, %522 : vector<2x64xf32>
    %527 = arith.select %524, %522, %526 : vector<2x64xi1>, vector<2x64xf32>
    %528 = arith.truncf %527 : vector<2x64xf32> to vector<2x64xbf16>
    %c0_119 = arith.constant 0 : index
    %c0_120 = arith.constant 0 : index
    %529 = vector.load %arg10[%c0_119, %c0_120] : memref<64x5xbf16, #tpu.memory_space<vmem>>, vector<64x5xbf16>
    %cst_121 = arith.constant dense<0.000000e+00> : vector<2x5xf32>
    %530 = tpu.matmul %528, %529, %cst_121 {dimension_numbers = #tpu.dot_dimension_numbers<[1], [0], [0], [1], [0, 0, 1, 1], [], []>} : vector<2x64xbf16>, vector<64x5xbf16>, vector<2x5xf32> -> vector<2x5xf32>
    %c0_122 = arith.constant 0 : index
    %c0_123 = arith.constant 0 : index
    %531 = vector.load %arg11[%c0_122, %c0_123] : memref<1x5xf32, #tpu.memory_space<vmem>>, vector<1x5xf32>
    %532 = vector.broadcast %531 : vector<1x5xf32> to vector<2x5xf32>
    %533 = arith.addf %530, %532 : vector<2x5xf32>
    %c0_124 = arith.constant 0 : index
    %c0_125 = arith.constant 0 : index
    %534 = vector.load %arg12[%c0_124, %c0_125] : memref<2x5xf32, #tpu.memory_space<vmem>>, vector<2x5xf32>
    tpu.vector_store %arg12[%c0_124, %c0_125], %533 {strides = array<i32>} : memref<2x5xf32, #tpu.memory_space<vmem>>, vector<2x5xf32>,
    return
  }
}

</mosaic_0001>

<bundles_post_ra>
// kernel: cnn_lstm_forward.4
= control target key start
LH: loop header
LB: loop body
LE: loop exit
PB: predicated region body
PF: predicated region fallthrough
CT: control target
= control target key end

     0   :  { %8 = vsyncpa [#allocation3], 0  ;;  %s1766_s0 = inlined_call_operand.vmem [shape: bf16[392,16], index: 0, kind: input, shape index: {}]   ;;  %s1767_s1 = inlined_call_operand.hbm [shape: bf16[16,128], index: 1, kind: input, shape index: {}]   ;;  %s1768_s2 = inlined_call_operand.hbm [shape: f32[1,128], index: 2, kind: input, shape index: {}]   ;;  %s1769_s3 = inlined_call_operand.vmem [shape: bf16[392,128], index: 3, kind: output, shape index: {}]  }
   0x1   :  { %9 = vsyncpa [#allocation5], 0  ;;  %s1438_s12 = smov [#allocation2]   ;;  %s1390_s16 = scalar_lea.hbm %s1767_s1, 128 }
   0x2   :  { %s17_s13 = sshll.u32 %s1438_s12, 4  ;;  %p1391_p0 = scmp.ne.s32.totalorder %s1767_s1, %s1390_s16  ;;  %s18_s13 = int_to_ptr.vmem [resolvable:$true] %s17_s13 }
   0x3   :  { %p1394_p1 = scmp.lt.u32.totalorder %s1390_s16, %s1767_s1 }
   0x5   :  { %p1396_p2 = pnand %p1394_p1, %p1391_p0 }
   0x7   :  { %1399 = shalt.err (!%p1396_p2)
}
   0x8   :  { %s1400_s21 = scalar_lea.vmem %s18_s13, 128  ;;  %p1405_p4 = scmp.lt.s32.totalorder %s18_s13, %s18_s13 }
   0x9   :  { %p1401_p3 = scmp.ne.s32.totalorder %s18_s13, %s1400_s21  ;;  %p1406_p5 = scmp.lt.s32.totalorder %s1400_s21, %s1400_s21 }
   0xb   :  { %p1407_p6 = por %p1406_p5, %p1405_p4 }
   0xd   :  { %p1408_p7 = pnand %p1407_p6, %p1401_p3 }
   0xf   :  { %1411 = shalt.err (!%p1408_p7)
}
  0x10   :  { %s1439_s22 = smov 64   ;;  %s1440_s23 = smov 4  }
  0x11   :  { %23 = dma.hbm_to_vmem [thread:$0]  %s1767_s1, 128, %s18_s13, [#allocation3], %s1439_s22, %s1439_s22, %s1440_s23  }
  0x12   :  { %s1441_s26 = smov [#allocation4]   ;;  %s1412_s30 = scalar_lea.hbm %s1768_s2, 16 }
  0x13   :  { %s30_s27 = sshll.u32 %s1441_s26, 4  ;;  %p1413_p8 = scmp.ne.s32.totalorder %s1768_s2, %s1412_s30  ;;  %s31_s27 = int_to_ptr.vmem [resolvable:$true] %s30_s27 }
  0x14   :  { %p1416_p9 = scmp.lt.u32.totalorder %s1412_s30, %s1768_s2 }
  0x16   :  { %p1418_p10 = pnand %p1416_p9, %p1413_p8 }
  0x18   :  { %1421 = shalt.err (!%p1418_p10)
}
  0x19   :  { %s1422_s8 = scalar_lea.vmem %s31_s27, 16  ;;  %s1426_s1 = scalar_lea.vmem %s31_s27, 32 }
  0x1a   :  { %p1423_p11 = scmp.ne.s32.totalorder %s31_s27, %s1422_s8  ;;  %p1427_p12 = scmp.lt.s32.totalorder %s31_s27, %s31_s27 }
  0x1b   :  { %p1428_p13 = scmp.lt.s32.totalorder %s1426_s1, %s1422_s8 }
  0x1d   :  { %p1429_p0 = por %p1428_p13, %p1427_p12 }
  0x1f   :  { %p1430_p1 = pnand %p1429_p0, %p1423_p11 }
  0x21   :  { %1433 = shalt.err (!%p1430_p1)
}
  0x22   :  { %33 = dma.hbm_to_vmem [thread:$0]  %s1768_s2, 16, %s31_s27, [#allocation5]  }
  0x23   :  { %1434 = dma.done.wait [#allocation3], 128  }
  0x24   :  { %1435 = vsyncadd [#allocation3], 4294967168 }
  0x25   :  { %1436 = dma.done.wait [#allocation5], 16  }
  0x26   :  { %1437 = vsyncadd [#allocation5], 4294967280  ;;  %v1442_v0 = vmov 0.0   ;;  %vm1443_vm0 = vmmov 0   ;;  %v1364_v1 = vld [vmem:[#allocation2] sm:$0xff]   ;;  %vm228_vm1 = vcmask 130048  }
  0x27   :  { %1254 = vmatprep.subr.bf16.mxu0 %v1442_v0  ;;  %1256 = vmatprep.mubr.msk.bf16.mxu0 %vm1443_vm0, %v1442_v0  ;;  %v1365_v2 = vld [vmem:[%s1766_s0] sm:$0xff]   ;;  %v1366_v3 = vld [vmem:[%s1766_s0 + $0x68] sm:$0xff]   ;;  %v1368_v5 = vld [vmem:[%s1766_s0 + $0x70] sm:$0xff]  }
  0x28   :  { %1356 = vmatprep.subr.bf16.mxu1 %v1442_v0  ;;  %1308 = vmatprep.mubr.msk.bf16.mxu1 %vm1443_vm0, %v1442_v0  ;;  %v1367_v4 = vld [vmem:[%s1766_s0 + $0x8] sm:$0xff]   ;;  %v1369_v6 = vld [vmem:[%s1766_s0 + $0x10] sm:$0xff]   ;;  %v1370_v7 = vld [vmem:[%s1766_s0 + $0x78] sm:$0xff]  }
  0x29   :  { %1255 = vmatpush3.bf16.msra.mxu0 %v1364_v1  ;;  %1357 = vmatpush3.bf16.msra.mxu1 %v1364_v1  ;;  %v1371_v8 = vld [vmem:[%s1766_s0 + $0x18] sm:$0xff]   ;;  %v1372_v9 = vld [vmem:[%s1766_s0 + $0x80] sm:$0xff]   ;;  %v1374_v11 = vld [vmem:[%s1766_s0 + $0x88] sm:$0xff]  }
  0x2a   :  { %v1373_v10 = vld [vmem:[%s1766_s0 + $0x20] sm:$0xff]   ;;  %v1375_v12 = vld [vmem:[%s1766_s0 + $0x28] sm:$0xff]   ;;  %v1376_v13 = vld [vmem:[%s1766_s0 + $0x90] sm:$0xff]  }
  0x2b   :  { %v1377_v14 = vld [vmem:[%s1766_s0 + $0x30] sm:$0xff]   ;;  %v1378_v15 = vld [vmem:[%s1766_s0 + $0x98] sm:$0xff]   ;;  %v1380_v17 = vld [vmem:[%s1766_s0 + $0xa0] sm:$0xff]  }
  0x2c   :  { %1257 = vmatmul.mubr.msk.bf16.vlgmr.msra.gmra.mrb[0].mxu0 %vm228_vm1, %v1365_v2  ;;  %1309 = vmatmul.mubr.msk.bf16.vlgmr.msra.gmra.mrb[0].mxu1 %vm228_vm1, %v1366_v3  ;;  %v1379_v16 = vld [vmem:[%s1766_s0 + $0x38] sm:$0xff]   ;;  %v1381_v18 = vld [vmem:[%s1766_s0 + $0x40] sm:$0xff]   ;;  %v1382_v19 = vld [vmem:[%s1766_s0 + $0xa8] sm:$0xff]  }
  0x2d   :  { %1260 = vmatprep.mubr.msk.bf16.mxu0 %vm1443_vm0, %v1442_v0  ;;  %1312 = vmatprep.mubr.msk.bf16.mxu1 %vm1443_vm0, %v1442_v0  ;;  %v1383_v20 = vld [vmem:[%s1766_s0 + $0x48] sm:$0xff]   ;;  %v1384_v21 = vld [vmem:[%s1766_s0 + $0xb0] sm:$0xff]   ;;  %v1386_v23 = vld [vmem:[%s1766_s0 + $0xb8] sm:$0xff]  }
  0x2e   :  { %v1385_v22 = vld [vmem:[%s1766_s0 + $0x50] sm:$0xff]   ;;  %v1387_v24 = vld [vmem:[%s1766_s0 + $0x58] sm:$0xff]   ;;  %v1388_v25 = vld [vmem:[%s1766_s0 + $0xc0] ss:$0 sps:$4 sm:$0xff]  }
  0x2f   :  { %v1389_v26 = vld [vmem:[%s1766_s0 + $0x60] sm:$0xff]   ;;  %v1640_v27 = vld [vmem:[#allocation4] ss:$0 sm:$0xff] }
  0x34   :  { %1261 = vmatmul.mubr.msk.bf16.gmra.mrb[4].mxu0 %vm228_vm1, %v1367_v4  ;;  %1313 = vmatmul.mubr.msk.bf16.gmra.mrb[4].mxu1 %vm228_vm1, %v1368_v5 }
  0x35   :  { %1264 = vmatprep.mubr.msk.bf16.mxu0 %vm1443_vm0, %v1442_v0  ;;  %1316 = vmatprep.mubr.msk.bf16.mxu1 %vm1443_vm0, %v1442_v0 }
  0x3c   :  { %1265 = vmatmul.mubr.msk.bf16.gmra.mrb[8].mxu0 %vm228_vm1, %v1369_v6  ;;  %1317 = vmatmul.mubr.msk.bf16.gmra.mrb[8].mxu1 %vm228_vm1, %v1370_v7 }
  0x3d   :  { %1268 = vmatprep.mubr.msk.bf16.mxu0 %vm1443_vm0, %v1442_v0  ;;  %1320 = vmatprep.mubr.msk.bf16.mxu1 %vm1443_vm0, %v1442_v0 }
  0x44   :  { %1269 = vmatmul.mubr.msk.bf16.gmra.mrb[12].mxu0 %vm228_vm1, %v1371_v8  ;;  %1321 = vmatmul.mubr.msk.bf16.gmra.mrb[12].mxu1 %vm228_vm1, %v1372_v9 }
  0x45   :  { %1272 = vmatprep.mubr.msk.bf16.mxu0 %vm1443_vm0, %v1442_v0  ;;  %1324 = vmatprep.mubr.msk.bf16.mxu1 %vm1443_vm0, %v1442_v0 }
  0x4c   :  { %1273 = vmatmul.mubr.msk.bf16.gmra.mrb[16].mxu0 %vm228_vm1, %v1373_v10  ;;  %1325 = vmatmul.mubr.msk.bf16.gmra.mrb[16].mxu1 %vm228_vm1, %v1374_v11 }
  0x4d   :  { %1276 = vmatprep.mubr.msk.bf16.mxu0 %vm1443_vm0, %v1442_v0  ;;  %1328 = vmatprep.mubr.msk.bf16.mxu1 %vm1443_vm0, %v1442_v0 }
  0x54   :  { %1277 = vmatmul.mubr.msk.bf16.gmra.mrb[20].mxu0 %vm228_vm1, %v1375_v12  ;;  %1329 = vmatmul.mubr.msk.bf16.gmra.mrb[20].mxu1 %vm228_vm1, %v1376_v13 }
  0x55   :  { %1280 = vmatprep.mubr.msk.bf16.mxu0 %vm1443_vm0, %v1442_v0  ;;  %1332 = vmatprep.mubr.msk.bf16.mxu1 %vm1443_vm0, %v1442_v0 }
  0x5c   :  { %1281 = vmatmul.mubr.msk.bf16.gmra.mrb[24].mxu0 %vm228_vm1, %v1377_v14  ;;  %1333 = vmatmul.mubr.msk.bf16.gmra.mrb[24].mxu1 %vm228_vm1, %v1378_v15 }
  0x5d   :  { %1284 = vmatprep.mubr.msk.bf16.mxu0 %vm1443_vm0, %v1442_v0  ;;  %1336 = vmatprep.mubr.msk.bf16.mxu1 %vm1443_vm0, %v1442_v0 }
  0x64   :  { %1285 = vmatmul.mubr.msk.bf16.gmra.mrb[28].mxu0 %vm228_vm1, %v1379_v16  ;;  %1337 = vmatmul.mubr.msk.bf16.gmra.mrb[28].mxu1 %vm228_vm1, %v1380_v17 }
  0x65   :  { %1288 = vmatprep.mubr.msk.bf16.mxu0 %vm1443_vm0, %v1442_v0  ;;  %1340 = vmatprep.mubr.msk.bf16.mxu1 %vm1443_vm0, %v1442_v0 }
  0x6c   :  { %1289 = vmatmul.mubr.msk.bf16.gmra.mrb[32].mxu0 %vm228_vm1, %v1381_v18  ;;  %1341 = vmatmul.mubr.msk.bf16.gmra.mrb[32].mxu1 %vm228_vm1, %v1382_v19 }
  0x6d   :  { %1292 = vmatprep.mubr.msk.bf16.mxu0 %vm1443_vm0, %v1442_v0  ;;  %1344 = vmatprep.mubr.msk.bf16.mxu1 %vm1443_vm0, %v1442_v0 }
  0x74   :  { %1293 = vmatmul.mubr.msk.bf16.gmra.mrb[36].mxu0 %vm228_vm1, %v1383_v20  ;;  %1345 = vmatmul.mubr.msk.bf16.gmra.mrb[36].mxu1 %vm228_vm1, %v1384_v21 }
  0x75   :  { %1296 = vmatprep.mubr.msk.bf16.mxu0 %vm1443_vm0, %v1442_v0  ;;  %1348 = vmatprep.mubr.msk.bf16.mxu1 %vm1443_vm0, %v1442_v0 }
  0x7c   :  { %1297 = vmatmul.mubr.msk.bf16.gmra.mrb[40].mxu0 %vm228_vm1, %v1385_v22  ;;  %1349 = vmatmul.mubr.msk.bf16.gmra.mrb[40].mxu1 %vm228_vm1, %v1386_v23 }
  0x7d   :  { %1300 = vmatprep.mubr.msk.bf16.mxu0 %vm1443_vm0, %v1442_v0  ;;  %1352 = vmatprep.mubr.msk.bf16.mxu1 %vm1443_vm0, %v1442_v0 }
  0x84   :  { %1301 = vmatmul.mubr.msk.bf16.gmra.mrb[44].mxu0 %vm228_vm1, %v1387_v24  ;;  %1353 = vmatmul.mubr.msk.bf16.gmra.mrb[44].mxu1 %vm228_vm1, %v1388_v25 }
  0x85   :  { %1304 = vmatprep.mubr.msk.bf16.mxu0 %vm1443_vm0, %v1442_v0 }
  0x8c   :  { %1305 = vmatmul.mubr.msk.bf16.gmra.mrb[48].mxu0 %vm228_vm1, %v1389_v26 }
  0xff   :  { %v338_v28 = vpop.f32.mrb[0].mxu0  ;;  %v442_v29 = vpop.f32.mrb[0].mxu1 }
 0x100   :  { %v339_v30 = vadd.f32 %v1640_v27, %v338_v28  ;;  %v1258_v31 = vpop.f32.mrb[1].mxu0  ;;  %v443_v32 = vadd.f32 %v1640_v27, %v442_v29  ;;  %v1310_v33 = vpop.f32.mrb[1].mxu1 }
 0x101   :  { %v341_v34 = vpop.f32.mrb[2].mxu0  ;;  %v445_v35 = vpop.f32.mrb[2].mxu1 }
 0x102   :  { %v585_v36 = vmul.f32 0.01, %v339_v30  ;;  %v342_v37 = vadd.f32 %v1640_v27, %v341_v34  ;;  %v1259_v38 = vpop.f32.mrb[3].mxu0  ;;  %vm562_vm2 = vcmp.ge.f32.partialorder %v443_v32, 0.0  ;;  %v1311_v39 = vpop.f32.mrb[3].mxu1  ;;  %vm536_vm3 = vcmp.ge.f32.partialorder %v339_v30, 0.0 }
 0x103   :  { %v611_v40 = vmul.f32 0.01, %v443_v32  ;;  %v446_v41 = vadd.f32 %v1640_v27, %v445_v35 }
 0x104   :  { %vm537_vm4 = vcmp.ge.f32.partialorder %v342_v37, 0.0  ;;  %v586_v42 = vmul.f32 0.01, %v342_v37  ;;  %v634_v45 = vsel %vm536_vm3, %v339_v30, %v585_v36 }
 0x105   :  { %v660_v43 = vsel %vm562_vm2, %v443_v32, %v611_v40  ;;  %vm563_vm5 = vcmp.ge.f32.partialorder %v446_v41, 0.0  ;;  %v612_v44 = vmul.f32 0.01, %v446_v41 }
 0x106   :  { %v635_v46 = vsel %vm537_vm4, %v342_v37, %v586_v42 }
 0x107   :  { %v1088_v47 = vpack.c.bf16 %v635_v46, %v634_v45  ;;  %v346_v48 = vpop.f32.mrb[4].mxu0  ;;  %v661_v49 = vsel %vm563_vm5, %v446_v41, %v612_v44  ;;  %v450_v50 = vpop.f32.mrb[4].mxu1 }
 0x108   :  { %v347_v51 = vadd.f32 %v1640_v27, %v346_v48  ;;  %v1153_v52 = vpack.c.bf16 %v661_v49, %v660_v43  ;;  %v1262_v53 = vpop.f32.mrb[5].mxu0  ;;  %v451_v54 = vadd.f32 %v1640_v27, %v450_v50  ;;  %v1314_v55 = vpop.f32.mrb[5].mxu1 }
 0x109   :  { %1089 = vst [vmem:[%s1769_s3] sm:$0xff] %v1088_v47   ;;  %v349_v56 = vpop.f32.mrb[6].mxu0  ;;  %v453_v57 = vpop.f32.mrb[6].mxu1 }
 0x10a   :  { %v587_v58 = vmul.f32 0.01, %v347_v51  ;;  %1217 = vst [vmem:[%s1769_s3 + $0x68] sm:$0xff] %v1153_v52   ;;  %v350_v59 = vadd.f32 %v1640_v27, %v349_v56  ;;  %v1263_v60 = vpop.f32.mrb[7].mxu0  ;;  %vm564_vm6 = vcmp.ge.f32.partialorder %v451_v54, 0.0  ;;  %v1315_v61 = vpop.f32.mrb[7].mxu1  ;;  %v454_v63 = vadd.f32 %v1640_v27, %v453_v57 }
 0x10b   :  { %vm538_vm7 = vcmp.ge.f32.partialorder %v347_v51, 0.0  ;;  %v613_v62 = vmul.f32 0.01, %v451_v54 }
 0x10c   :  { %vm539_vm8 = vcmp.ge.f32.partialorder %v350_v59, 0.0  ;;  %v588_v0 = vmul.f32 0.01, %v350_v59  ;;  %vm565_vm9 = vcmp.ge.f32.partialorder %v454_v63, 0.0  ;;  %v614_v2 = vmul.f32 0.01, %v454_v63 }
 0x10d   :  { %v662_v1 = vsel %vm564_vm6, %v451_v54, %v613_v62  ;;  %v636_v3 = vsel %vm538_vm7, %v347_v51, %v587_v58 }
 0x10e   :  { %v637_v4 = vsel %vm539_vm8, %v350_v59, %v588_v0  ;;  %v663_v7 = vsel %vm565_vm9, %v454_v63, %v614_v2 }
 0x10f   :  { %v1093_v5 = vpack.c.bf16 %v637_v4, %v636_v3  ;;  %v354_v6 = vpop.f32.mrb[8].mxu0  ;;  %v458_v8 = vpop.f32.mrb[8].mxu1  ;;  %v1158_v10 = vpack.c.bf16 %v663_v7, %v662_v1 }
 0x110   :  { %v355_v9 = vadd.f32 %v1640_v27, %v354_v6  ;;  %v1266_v11 = vpop.f32.mrb[9].mxu0  ;;  %v459_v12 = vadd.f32 %v1640_v27, %v458_v8  ;;  %v1318_v13 = vpop.f32.mrb[9].mxu1 }
 0x111   :  { %1205 = vst [vmem:[%s1769_s3 + $0x8] sm:$0xff] %v1093_v5   ;;  %v357_v14 = vpop.f32.mrb[10].mxu0  ;;  %v461_v15 = vpop.f32.mrb[10].mxu1  ;;  %1218 = vst [vmem:[%s1769_s3 + $0x70] sm:$0xff] %v1158_v10  }
 0x112   :  { %v589_v16 = vmul.f32 0.01, %v355_v9  ;;  %v358_v17 = vadd.f32 %v1640_v27, %v357_v14  ;;  %v1267_v18 = vpop.f32.mrb[11].mxu0  ;;  %vm566_vm10 = vcmp.ge.f32.partialorder %v459_v12, 0.0  ;;  %v1319_v19 = vpop.f32.mrb[11].mxu1  ;;  %vm540_vm11 = vcmp.ge.f32.partialorder %v355_v9, 0.0 }
 0x113   :  { %v615_v20 = vmul.f32 0.01, %v459_v12  ;;  %v462_v21 = vadd.f32 %v1640_v27, %v461_v15 }
 0x114   :  { %vm541_vm12 = vcmp.ge.f32.partialorder %v358_v17, 0.0  ;;  %v590_v22 = vmul.f32 0.01, %v358_v17  ;;  %v638_v25 = vsel %vm540_vm11, %v355_v9, %v589_v16 }
 0x115   :  { %v664_v23 = vsel %vm566_vm10, %v459_v12, %v615_v20  ;;  %vm567_vm13 = vcmp.ge.f32.partialorder %v462_v21, 0.0  ;;  %v616_v24 = vmul.f32 0.01, %v462_v21 }
 0x116   :  { %v639_v26 = vsel %vm541_vm12, %v358_v17, %v590_v22 }
 0x117   :  { %v1098_v28 = vpack.c.bf16 %v639_v26, %v638_v25  ;;  %v362_v29 = vpop.f32.mrb[12].mxu0  ;;  %v665_v30 = vsel %vm567_vm13, %v462_v21, %v616_v24  ;;  %v466_v31 = vpop.f32.mrb[12].mxu1 }
 0x118   :  { %v363_v32 = vadd.f32 %v1640_v27, %v362_v29  ;;  %v1163_v33 = vpack.c.bf16 %v665_v30, %v664_v23  ;;  %v1270_v34 = vpop.f32.mrb[13].mxu0  ;;  %v467_v35 = vadd.f32 %v1640_v27, %v466_v31  ;;  %v1322_v36 = vpop.f32.mrb[13].mxu1 }
 0x119   :  { %1206 = vst [vmem:[%s1769_s3 + $0x10] sm:$0xff] %v1098_v28   ;;  %v365_v37 = vpop.f32.mrb[14].mxu0  ;;  %v469_v38 = vpop.f32.mrb[14].mxu1 }
 0x11a   :  { %v591_v39 = vmul.f32 0.01, %v363_v32  ;;  %1219 = vst [vmem:[%s1769_s3 + $0x78] sm:$0xff] %v1163_v33   ;;  %v366_v40 = vadd.f32 %v1640_v27, %v365_v37  ;;  %v1271_v41 = vpop.f32.mrb[15].mxu0  ;;  %vm568_vm14 = vcmp.ge.f32.partialorder %v467_v35, 0.0  ;;  %v1323_v42 = vpop.f32.mrb[15].mxu1  ;;  %v470_v44 = vadd.f32 %v1640_v27, %v469_v38 }
 0x11b   :  { %vm542_vm15 = vcmp.ge.f32.partialorder %v363_v32, 0.0  ;;  %v617_v43 = vmul.f32 0.01, %v467_v35 }
 0x11c   :  { %vm543_vm0 = vcmp.ge.f32.partialorder %v366_v40, 0.0  ;;  %v592_v45 = vmul.f32 0.01, %v366_v40  ;;  %vm569_vm1 = vcmp.ge.f32.partialorder %v470_v44, 0.0  ;;  %v618_v47 = vmul.f32 0.01, %v470_v44 }
 0x11d   :  { %v666_v46 = vsel %vm568_vm14, %v467_v35, %v617_v43  ;;  %v640_v48 = vsel %vm542_vm15, %v363_v32, %v591_v39 }
 0x11e   :  { %v641_v49 = vsel %vm543_vm0, %v366_v40, %v592_v45  ;;  %v667_v52 = vsel %vm569_vm1, %v470_v44, %v618_v47 }
 0x11f   :  { %v1103_v50 = vpack.c.bf16 %v641_v49, %v640_v48  ;;  %v370_v51 = vpop.f32.mrb[16].mxu0  ;;  %v474_v53 = vpop.f32.mrb[16].mxu1  ;;  %v1168_v55 = vpack.c.bf16 %v667_v52, %v666_v46 }
 0x120   :  { %v371_v54 = vadd.f32 %v1640_v27, %v370_v51  ;;  %v1274_v56 = vpop.f32.mrb[17].mxu0  ;;  %v475_v57 = vadd.f32 %v1640_v27, %v474_v53  ;;  %v1326_v58 = vpop.f32.mrb[17].mxu1 }
 0x121   :  { %1207 = vst [vmem:[%s1769_s3 + $0x18] sm:$0xff] %v1103_v50   ;;  %v373_v59 = vpop.f32.mrb[18].mxu0  ;;  %v477_v60 = vpop.f32.mrb[18].mxu1  ;;  %1220 = vst [vmem:[%s1769_s3 + $0x80] sm:$0xff] %v1168_v55  }
 0x122   :  { %v593_v61 = vmul.f32 0.01, %v371_v54  ;;  %v374_v62 = vadd.f32 %v1640_v27, %v373_v59  ;;  %v1275_v63 = vpop.f32.mrb[19].mxu0  ;;  %vm570_vm2 = vcmp.ge.f32.partialorder %v475_v57, 0.0  ;;  %v1327_v0 = vpop.f32.mrb[19].mxu1  ;;  %vm544_vm3 = vcmp.ge.f32.partialorder %v371_v54, 0.0 }
 0x123   :  { %v619_v1 = vmul.f32 0.01, %v475_v57  ;;  %v478_v2 = vadd.f32 %v1640_v27, %v477_v60 }
 0x124   :  { %vm545_vm4 = vcmp.ge.f32.partialorder %v374_v62, 0.0  ;;  %v594_v3 = vmul.f32 0.01, %v374_v62  ;;  %v642_v6 = vsel %vm544_vm3, %v371_v54, %v593_v61 }
 0x125   :  { %v668_v4 = vsel %vm570_vm2, %v475_v57, %v619_v1  ;;  %vm571_vm5 = vcmp.ge.f32.partialorder %v478_v2, 0.0  ;;  %v620_v5 = vmul.f32 0.01, %v478_v2 }
 0x126   :  { %v643_v7 = vsel %vm545_vm4, %v374_v62, %v594_v3 }
 0x127   :  { %v1108_v8 = vpack.c.bf16 %v643_v7, %v642_v6  ;;  %v378_v9 = vpop.f32.mrb[20].mxu0  ;;  %v669_v10 = vsel %vm571_vm5, %v478_v2, %v620_v5  ;;  %v482_v11 = vpop.f32.mrb[20].mxu1 }
 0x128   :  { %v379_v12 = vadd.f32 %v1640_v27, %v378_v9  ;;  %v1173_v13 = vpack.c.bf16 %v669_v10, %v668_v4  ;;  %v1278_v14 = vpop.f32.mrb[21].mxu0  ;;  %v483_v15 = vadd.f32 %v1640_v27, %v482_v11  ;;  %v1330_v16 = vpop.f32.mrb[21].mxu1 }
 0x129   :  { %1208 = vst [vmem:[%s1769_s3 + $0x20] sm:$0xff] %v1108_v8   ;;  %v381_v17 = vpop.f32.mrb[22].mxu0  ;;  %v485_v18 = vpop.f32.mrb[22].mxu1 }
 0x12a   :  { %v595_v19 = vmul.f32 0.01, %v379_v12  ;;  %1221 = vst [vmem:[%s1769_s3 + $0x88] sm:$0xff] %v1173_v13   ;;  %v382_v20 = vadd.f32 %v1640_v27, %v381_v17  ;;  %v1279_v21 = vpop.f32.mrb[23].mxu0  ;;  %vm572_vm6 = vcmp.ge.f32.partialorder %v483_v15, 0.0  ;;  %v1331_v22 = vpop.f32.mrb[23].mxu1  ;;  %v486_v24 = vadd.f32 %v1640_v27, %v485_v18 }
 0x12b   :  { %vm546_vm7 = vcmp.ge.f32.partialorder %v379_v12, 0.0  ;;  %v621_v23 = vmul.f32 0.01, %v483_v15 }
 0x12c   :  { %vm547_vm8 = vcmp.ge.f32.partialorder %v382_v20, 0.0  ;;  %v596_v25 = vmul.f32 0.01, %v382_v20  ;;  %vm573_vm9 = vcmp.ge.f32.partialorder %v486_v24, 0.0  ;;  %v622_v28 = vmul.f32 0.01, %v486_v24 }
 0x12d   :  { %v670_v26 = vsel %vm572_vm6, %v483_v15, %v621_v23  ;;  %v644_v29 = vsel %vm546_vm7, %v379_v12, %v595_v19 }
 0x12e   :  { %v645_v30 = vsel %vm547_vm8, %v382_v20, %v596_v25  ;;  %v671_v33 = vsel %vm573_vm9, %v486_v24, %v622_v28 }
 0x12f   :  { %v1113_v31 = vpack.c.bf16 %v645_v30, %v644_v29  ;;  %v386_v32 = vpop.f32.mrb[24].mxu0  ;;  %v490_v34 = vpop.f32.mrb[24].mxu1  ;;  %v1178_v36 = vpack.c.bf16 %v671_v33, %v670_v26 }
 0x130   :  { %v387_v35 = vadd.f32 %v1640_v27, %v386_v32  ;;  %v1282_v37 = vpop.f32.mrb[25].mxu0  ;;  %v491_v38 = vadd.f32 %v1640_v27, %v490_v34  ;;  %v1334_v39 = vpop.f32.mrb[25].mxu1 }
 0x131   :  { %1209 = vst [vmem:[%s1769_s3 + $0x28] sm:$0xff] %v1113_v31   ;;  %v389_v40 = vpop.f32.mrb[26].mxu0  ;;  %v493_v41 = vpop.f32.mrb[26].mxu1  ;;  %1222 = vst [vmem:[%s1769_s3 + $0x90] sm:$0xff] %v1178_v36  }
 0x132   :  { %v597_v42 = vmul.f32 0.01, %v387_v35  ;;  %v390_v43 = vadd.f32 %v1640_v27, %v389_v40  ;;  %v1283_v44 = vpop.f32.mrb[27].mxu0  ;;  %vm574_vm10 = vcmp.ge.f32.partialorder %v491_v38, 0.0  ;;  %v1335_v45 = vpop.f32.mrb[27].mxu1  ;;  %vm548_vm11 = vcmp.ge.f32.partialorder %v387_v35, 0.0 }
 0x133   :  { %v623_v46 = vmul.f32 0.01, %v491_v38  ;;  %v494_v47 = vadd.f32 %v1640_v27, %v493_v41 }
 0x134   :  { %vm549_vm12 = vcmp.ge.f32.partialorder %v390_v43, 0.0  ;;  %v598_v48 = vmul.f32 0.01, %v390_v43  ;;  %v646_v51 = vsel %vm548_vm11, %v387_v35, %v597_v42 }
 0x135   :  { %v672_v49 = vsel %vm574_vm10, %v491_v38, %v623_v46  ;;  %vm575_vm13 = vcmp.ge.f32.partialorder %v494_v47, 0.0  ;;  %v624_v50 = vmul.f32 0.01, %v494_v47 }
 0x136   :  { %v647_v52 = vsel %vm549_vm12, %v390_v43, %v598_v48 }
 0x137   :  { %v1118_v53 = vpack.c.bf16 %v647_v52, %v646_v51  ;;  %v394_v54 = vpop.f32.mrb[28].mxu0  ;;  %v673_v55 = vsel %vm575_vm13, %v494_v47, %v624_v50  ;;  %v498_v56 = vpop.f32.mrb[28].mxu1 }
 0x138   :  { %v395_v57 = vadd.f32 %v1640_v27, %v394_v54  ;;  %v1183_v58 = vpack.c.bf16 %v673_v55, %v672_v49  ;;  %v1286_v59 = vpop.f32.mrb[29].mxu0  ;;  %v499_v60 = vadd.f32 %v1640_v27, %v498_v56  ;;  %v1338_v61 = vpop.f32.mrb[29].mxu1 }
 0x139   :  { %1210 = vst [vmem:[%s1769_s3 + $0x30] sm:$0xff] %v1118_v53   ;;  %v397_v62 = vpop.f32.mrb[30].mxu0  ;;  %v501_v63 = vpop.f32.mrb[30].mxu1 }
 0x13a   :  { %v599_v0 = vmul.f32 0.01, %v395_v57  ;;  %1223 = vst [vmem:[%s1769_s3 + $0x98] sm:$0xff] %v1183_v58   ;;  %v398_v1 = vadd.f32 %v1640_v27, %v397_v62  ;;  %v1287_v2 = vpop.f32.mrb[31].mxu0  ;;  %vm576_vm14 = vcmp.ge.f32.partialorder %v499_v60, 0.0  ;;  %v1339_v3 = vpop.f32.mrb[31].mxu1  ;;  %v502_v5 = vadd.f32 %v1640_v27, %v501_v63 }
 0x13b   :  { %vm550_vm15 = vcmp.ge.f32.partialorder %v395_v57, 0.0  ;;  %v625_v4 = vmul.f32 0.01, %v499_v60 }
 0x13c   :  { %vm551_vm0 = vcmp.ge.f32.partialorder %v398_v1, 0.0  ;;  %v600_v6 = vmul.f32 0.01, %v398_v1  ;;  %vm577_vm1 = vcmp.ge.f32.partialorder %v502_v5, 0.0  ;;  %v626_v8 = vmul.f32 0.01, %v502_v5 }
 0x13d   :  { %v674_v7 = vsel %vm576_vm14, %v499_v60, %v625_v4  ;;  %v648_v9 = vsel %vm550_vm15, %v395_v57, %v599_v0 }
 0x13e   :  { %v649_v10 = vsel %vm551_vm0, %v398_v1, %v600_v6  ;;  %v675_v13 = vsel %vm577_vm1, %v502_v5, %v626_v8 }
 0x13f   :  { %v1123_v11 = vpack.c.bf16 %v649_v10, %v648_v9  ;;  %v402_v12 = vpop.f32.mrb[32].mxu0  ;;  %v506_v14 = vpop.f32.mrb[32].mxu1  ;;  %v1188_v16 = vpack.c.bf16 %v675_v13, %v674_v7 }
 0x140   :  { %v403_v15 = vadd.f32 %v1640_v27, %v402_v12  ;;  %v1290_v17 = vpop.f32.mrb[33].mxu0  ;;  %v507_v18 = vadd.f32 %v1640_v27, %v506_v14  ;;  %v1342_v19 = vpop.f32.mrb[33].mxu1 }
 0x141   :  { %1211 = vst [vmem:[%s1769_s3 + $0x38] sm:$0xff] %v1123_v11   ;;  %v405_v20 = vpop.f32.mrb[34].mxu0  ;;  %v509_v21 = vpop.f32.mrb[34].mxu1  ;;  %1224 = vst [vmem:[%s1769_s3 + $0xa0] sm:$0xff] %v1188_v16  }
 0x142   :  { %v601_v22 = vmul.f32 0.01, %v403_v15  ;;  %v406_v23 = vadd.f32 %v1640_v27, %v405_v20  ;;  %v1291_v24 = vpop.f32.mrb[35].mxu0  ;;  %vm578_vm2 = vcmp.ge.f32.partialorder %v507_v18, 0.0  ;;  %v1343_v25 = vpop.f32.mrb[35].mxu1  ;;  %vm552_vm3 = vcmp.ge.f32.partialorder %v403_v15, 0.0 }
 0x143   :  { %v627_v26 = vmul.f32 0.01, %v507_v18  ;;  %v510_v28 = vadd.f32 %v1640_v27, %v509_v21 }
 0x144   :  { %vm553_vm4 = vcmp.ge.f32.partialorder %v406_v23, 0.0  ;;  %v602_v29 = vmul.f32 0.01, %v406_v23  ;;  %v650_v32 = vsel %vm552_vm3, %v403_v15, %v601_v22 }
 0x145   :  { %v676_v30 = vsel %vm578_vm2, %v507_v18, %v627_v26  ;;  %vm579_vm5 = vcmp.ge.f32.partialorder %v510_v28, 0.0  ;;  %v628_v31 = vmul.f32 0.01, %v510_v28 }
 0x146   :  { %v651_v33 = vsel %vm553_vm4, %v406_v23, %v602_v29 }
 0x147   :  { %v1128_v34 = vpack.c.bf16 %v651_v33, %v650_v32  ;;  %v410_v35 = vpop.f32.mrb[36].mxu0  ;;  %v677_v36 = vsel %vm579_vm5, %v510_v28, %v628_v31  ;;  %v514_v37 = vpop.f32.mrb[36].mxu1 }
 0x148   :  { %v411_v38 = vadd.f32 %v1640_v27, %v410_v35  ;;  %v1193_v39 = vpack.c.bf16 %v677_v36, %v676_v30  ;;  %v1294_v40 = vpop.f32.mrb[37].mxu0  ;;  %v515_v41 = vadd.f32 %v1640_v27, %v514_v37  ;;  %v1346_v42 = vpop.f32.mrb[37].mxu1 }
 0x149   :  { %1212 = vst [vmem:[%s1769_s3 + $0x40] sm:$0xff] %v1128_v34   ;;  %v413_v43 = vpop.f32.mrb[38].mxu0  ;;  %v517_v44 = vpop.f32.mrb[38].mxu1 }
 0x14a   :  { %v603_v45 = vmul.f32 0.01, %v411_v38  ;;  %1225 = vst [vmem:[%s1769_s3 + $0xa8] sm:$0xff] %v1193_v39   ;;  %v414_v46 = vadd.f32 %v1640_v27, %v413_v43  ;;  %v1295_v47 = vpop.f32.mrb[39].mxu0  ;;  %vm580_vm6 = vcmp.ge.f32.partialorder %v515_v41, 0.0  ;;  %v1347_v48 = vpop.f32.mrb[39].mxu1  ;;  %v518_v50 = vadd.f32 %v1640_v27, %v517_v44 }
 0x14b   :  { %vm554_vm7 = vcmp.ge.f32.partialorder %v411_v38, 0.0  ;;  %v629_v49 = vmul.f32 0.01, %v515_v41 }
 0x14c   :  { %vm555_vm8 = vcmp.ge.f32.partialorder %v414_v46, 0.0  ;;  %v604_v51 = vmul.f32 0.01, %v414_v46  ;;  %vm581_vm9 = vcmp.ge.f32.partialorder %v518_v50, 0.0  ;;  %v630_v53 = vmul.f32 0.01, %v518_v50 }
 0x14d   :  { %v678_v52 = vsel %vm580_vm6, %v515_v41, %v629_v49  ;;  %v652_v54 = vsel %vm554_vm7, %v411_v38, %v603_v45 }
 0x14e   :  { %v653_v55 = vsel %vm555_vm8, %v414_v46, %v604_v51  ;;  %v679_v58 = vsel %vm581_vm9, %v518_v50, %v630_v53 }
 0x14f   :  { %v1133_v56 = vpack.c.bf16 %v653_v55, %v652_v54  ;;  %v418_v57 = vpop.f32.mrb[40].mxu0  ;;  %v522_v59 = vpop.f32.mrb[40].mxu1  ;;  %v1198_v61 = vpack.c.bf16 %v679_v58, %v678_v52 }
 0x150   :  { %v419_v60 = vadd.f32 %v1640_v27, %v418_v57  ;;  %v1298_v62 = vpop.f32.mrb[41].mxu0  ;;  %v523_v63 = vadd.f32 %v1640_v27, %v522_v59  ;;  %v1350_v0 = vpop.f32.mrb[41].mxu1 }
 0x151   :  { %1213 = vst [vmem:[%s1769_s3 + $0x48] sm:$0xff] %v1133_v56   ;;  %v421_v1 = vpop.f32.mrb[42].mxu0  ;;  %v525_v2 = vpop.f32.mrb[42].mxu1  ;;  %1226 = vst [vmem:[%s1769_s3 + $0xb0] sm:$0xff] %v1198_v61  }
 0x152   :  { %v605_v3 = vmul.f32 0.01, %v419_v60  ;;  %v422_v4 = vadd.f32 %v1640_v27, %v421_v1  ;;  %v1299_v5 = vpop.f32.mrb[43].mxu0  ;;  %vm582_vm10 = vcmp.ge.f32.partialorder %v523_v63, 0.0  ;;  %v1351_v6 = vpop.f32.mrb[43].mxu1  ;;  %vm556_vm11 = vcmp.ge.f32.partialorder %v419_v60, 0.0 }
 0x153   :  { %v631_v7 = vmul.f32 0.01, %v523_v63  ;;  %v526_v8 = vadd.f32 %v1640_v27, %v525_v2 }
 0x154   :  { %vm557_vm12 = vcmp.ge.f32.partialorder %v422_v4, 0.0  ;;  %v606_v9 = vmul.f32 0.01, %v422_v4  ;;  %v654_v12 = vsel %vm556_vm11, %v419_v60, %v605_v3 }
 0x155   :  { %v680_v10 = vsel %vm582_vm10, %v523_v63, %v631_v7  ;;  %vm583_vm13 = vcmp.ge.f32.partialorder %v526_v8, 0.0  ;;  %v632_v11 = vmul.f32 0.01, %v526_v8 }
 0x156   :  { %v655_v13 = vsel %vm557_vm12, %v422_v4, %v606_v9 }
 0x157   :  { %v1138_v14 = vpack.c.bf16 %v655_v13, %v654_v12  ;;  %v426_v15 = vpop.f32.mrb[44].mxu0  ;;  %v681_v16 = vsel %vm583_vm13, %v526_v8, %v632_v11  ;;  %v530_v17 = vpop.f32.mrb[44].mxu1 }
 0x158   :  { %v427_v18 = vadd.f32 %v1640_v27, %v426_v15  ;;  %v1203_v19 = vpack.c.bf16 %v681_v16, %v680_v10  ;;  %v1302_v20 = vpop.f32.mrb[45].mxu0  ;;  %v531_v21 = vadd.f32 %v1640_v27, %v530_v17  ;;  %v1354_v22 = vpop.f32.mrb[45].mxu1 }
 0x159   :  { %1214 = vst [vmem:[%s1769_s3 + $0x50] sm:$0xff] %v1138_v14   ;;  %v429_v23 = vpop.f32.mrb[46].mxu0  ;;  %v533_v24 = vpop.f32.mrb[46].mxu1 }
 0x15a   :  { %v607_v25 = vmul.f32 0.01, %v427_v18  ;;  %1227 = vst [vmem:[%s1769_s3 + $0xb8] sm:$0xff] %v1203_v19   ;;  %v430_v26 = vadd.f32 %v1640_v27, %v429_v23  ;;  %v1303_v28 = vpop.f32.mrb[47].mxu0  ;;  %vm584_vm14 = vcmp.ge.f32.partialorder %v531_v21, 0.0  ;;  %v1355_v29 = vpop.f32.mrb[47].mxu1 }
 0x15b   :  { %vm558_vm15 = vcmp.ge.f32.partialorder %v427_v18, 0.0  ;;  %v633_v30 = vmul.f32 0.01, %v531_v21 }
 0x15c   :  { %vm559_vm0 = vcmp.ge.f32.partialorder %v430_v26, 0.0  ;;  %v608_v31 = vmul.f32 0.01, %v430_v26  ;;  %v656_v33 = vsel %vm558_vm15, %v427_v18, %v607_v25 }
 0x15d   :  { %v682_v32 = vsel %vm584_vm14, %v531_v21, %v633_v30 }
 0x15e   :  { %v657_v34 = vsel %vm559_vm0, %v430_v26, %v608_v31  ;;  %v1084_v35 = vpack.c.bf16 %v682_v32, %v682_v32 }
 0x15f   :  { %v1143_v36 = vpack.c.bf16 %v657_v34, %v656_v33  ;;  %v434_v37 = vpop.f32.mrb[48].mxu0 }
 0x160   :  { %928 = vst [vmem:[%s1769_s3 + $0xc0] sm:$0xf] %v1084_v35  ;;  %v435_v38 = vadd.f32 %v1640_v27, %v434_v37  ;;  %v1306_v39 = vpop.f32.mrb[49].mxu0 }
 0x161   :  { %1215 = vst [vmem:[%s1769_s3 + $0x58] sm:$0xff] %v1143_v36   ;;  %v437_v40 = vpop.f32.mrb[50].mxu0 }
 0x162   :  { %v609_v41 = vmul.f32 0.01, %v435_v38  ;;  %v438_v42 = vadd.f32 %v1640_v27, %v437_v40  ;;  %v1307_v43 = vpop.f32.mrb[51].mxu0  ;;  %vm560_vm1 = vcmp.ge.f32.partialorder %v435_v38, 0.0 }
 0x164   :  { %vm561_vm2 = vcmp.ge.f32.partialorder %v438_v42, 0.0  ;;  %v610_v44 = vmul.f32 0.01, %v438_v42  ;;  %v658_v45 = vsel %vm560_vm1, %v435_v38, %v609_v41 }
 0x166   :  { %v659_v46 = vsel %vm561_vm2, %v438_v42, %v610_v44 }
 0x167   :  { %v1148_v47 = vpack.c.bf16 %v659_v46, %v658_v45 }
 0x169   :  { %1216 = vst [vmem:[%s1769_s3 + $0x60] sm:$0xff] %v1148_v47  }
 0x16a   :  { %933 = vsyncpa [#allocation3], 1 }
 0x16b   :  { %934 = vsyncpa [#allocation5], 1 }

// kernel: cnn_lstm_forward.5
= control target key start
LH: loop header
LB: loop body
LE: loop exit
PB: predicated region body
PF: predicated region fallthrough
CT: control target
= control target key end

     0   :  { %v1853_v0 = vmov 0   ;;  %s2313_s1 = inlined_call_operand.vmem [shape: bf16[512,128], index: 1, kind: input, shape index: {}]   ;;  %s2314_s0 = inlined_call_operand.vmem [shape: bf16[288,512], index: 0, kind: input, shape index: {}]   ;;  %s2315_s2 = inlined_call_operand.vmem [shape: f32[1,128], index: 2, kind: input, shape index: {}]   ;;  %s2316_s3 = inlined_call_operand.vmem [shape: bf16[288,128], index: 3, kind: output, shape index: {}]  }
   0x1   :  { %710 = vmatprep.subr.bf16.mxu1 %v1853_v0  ;;  %887 = vmatprep.subr.bf16.mxu0 %v1853_v0  ;;  %v1713_v1 = vld [vmem:[%s2313_s1] sm:$0xff]   ;;  %v1715_v3 = vld [vmem:[%s2313_s1 + $0x8] sm:$0xff]   ;;  %v1717_v5 = vld [vmem:[%s2313_s1 + $0x10] sm:$0xff]  }
   0x2   :  { %v1714_v2 = vld [vmem:[%s2313_s1 + $0x80] sm:$0xff]   ;;  %711 = vmatpush1.bf16.msra.mxu1 %v1713_v1  ;;  %v1716_v4 = vld [vmem:[%s2313_s1 + $0x88] sm:$0xff]   ;;  %v1718_v6 = vld [vmem:[%s2313_s1 + $0x90] sm:$0xff]  }
   0x3   :  { %888 = vmatpush1.bf16.msra.mxu0 %v1714_v2  ;;  %712 = vmatprep.subr.bf16.mxu1 %v1853_v0  ;;  %v1719_v7 = vld [vmem:[%s2313_s1 + $0x18] sm:$0xff]   ;;  %v1721_v9 = vld [vmem:[%s2313_s1 + $0x20] sm:$0xff]   ;;  %v1723_v11 = vld [vmem:[%s2313_s1 + $0x28] sm:$0xff]  }
   0x4   :  { %889 = vmatprep.subr.bf16.mxu0 %v1853_v0  ;;  %v1720_v8 = vld [vmem:[%s2313_s1 + $0x98] sm:$0xff]   ;;  %v1722_v10 = vld [vmem:[%s2313_s1 + $0xa0] sm:$0xff]   ;;  %v1724_v12 = vld [vmem:[%s2313_s1 + $0xa8] sm:$0xff]  }
   0x5   :  { %v1725_v13 = vld [vmem:[%s2313_s1 + $0x30] sm:$0xff]   ;;  %v1727_v15 = vld [vmem:[%s2313_s1 + $0x38] sm:$0xff]   ;;  %v1729_v17 = vld [vmem:[%s2313_s1 + $0x40] sm:$0xff]  }
   0x6   :  { %713 = vmatpush1.bf16.msra.mxu1 %v1715_v3  ;;  %v1726_v14 = vld [vmem:[%s2313_s1 + $0xb0] sm:$0xff]   ;;  %v1728_v16 = vld [vmem:[%s2313_s1 + $0xb8] sm:$0xff]   ;;  %v1730_v18 = vld [vmem:[%s2313_s1 + $0xc0] sm:$0xff]  }
   0x7   :  { %890 = vmatpush1.bf16.msra.mxu0 %v1716_v4  ;;  %714 = vmatprep.subr.bf16.mxu1 %v1853_v0  ;;  %v1747_v19 = vld [vmem:[%s2314_s0 + $0x4] ss:$16 sps:$4 sm:$0xff]   ;;  %v1731_v20 = vld [vmem:[%s2313_s1 + $0x48] sm:$0xff]   ;;  %v1735_v25 = vld [vmem:[%s2313_s1 + $0x58] sm:$0xff]  }
   0x8   :  { %891 = vmatprep.subr.bf16.mxu0 %v1853_v0  ;;  %v1750_v21 = vld [vmem:[%s2314_s0 + $0xc] ss:$16 sps:$4 sm:$0xff]   ;;  %742 = vmatprep.mubr.bf16.mxu1 %v1747_v19  ;;  %v1733_v23 = vld [vmem:[%s2313_s1 + $0x50] sm:$0xff]   ;;  %v1737_v27 = vld [vmem:[%s2313_s1 + $0x60] sm:$0xff]  }
   0x9   :  { %v1732_v22 = vld [vmem:[%s2313_s1 + $0xc8] sm:$0xff]   ;;  %919 = vmatprep.mubr.bf16.mxu0 %v1750_v21  ;;  %v1734_v24 = vld [vmem:[%s2313_s1 + $0xd0] sm:$0xff]   ;;  %v1736_v26 = vld [vmem:[%s2313_s1 + $0xd8] sm:$0xff]  }
   0xa   :  { %715 = vmatpush1.bf16.msra.mxu1 %v1717_v5  ;;  %v1738_v28 = vld [vmem:[%s2313_s1 + $0xe0] sm:$0xff]   ;;  %v1739_v29 = vld [vmem:[%s2313_s1 + $0x68] sm:$0xff]   ;;  %v1741_v31 = vld [vmem:[%s2313_s1 + $0x70] sm:$0xff]  }
   0xb   :  { %892 = vmatpush1.bf16.msra.mxu0 %v1718_v6  ;;  %716 = vmatprep.subr.bf16.mxu1 %v1853_v0  ;;  %v1740_v30 = vld [vmem:[%s2313_s1 + $0xe8] sm:$0xff]   ;;  %v1742_v32 = vld [vmem:[%s2313_s1 + $0xf0] sm:$0xff]   ;;  %v1743_v33 = vld [vmem:[%s2313_s1 + $0x78] sm:$0xff]  }
   0xc   :  { %893 = vmatprep.subr.bf16.mxu0 %v1853_v0  ;;  %v1744_v34 = vld [vmem:[%s2313_s1 + $0xf8] sm:$0xff]   ;;  %v1745_v35 = vld [vmem:[%s2314_s0] ss:$16 sps:$4 sm:$0xff]   ;;  %v1751_v37 = vld [vmem:[%s2314_s0 + $0x24] ss:$16 sps:$4 sm:$0xff]  }
   0xd   :  { %v1748_v36 = vld [vmem:[%s2314_s0 + $0x8] ss:$16 sps:$4 sm:$0xff]   ;;  %v1753_v38 = vld [vmem:[%s2314_s0 + $0x2c] ss:$16 sps:$4 sm:$0xff]   ;;  %v1755_v39 = vld [vmem:[%s2314_s0 + $0x20] ss:$16 sps:$4 sm:$0xff]  }
   0xe   :  { %717 = vmatpush1.bf16.msra.mxu1 %v1719_v7  ;;  %v1756_v40 = vld [vmem:[%s2314_s0 + $0x28] ss:$16 sps:$4 sm:$0xff]   ;;  %v1757_v41 = vld [vmem:[%s2314_s0 + $0x44] ss:$16 sps:$4 sm:$0xff]   ;;  %v1759_v42 = vld [vmem:[%s2314_s0 + $0x4c] ss:$16 sps:$4 sm:$0xff]  }
   0xf   :  { %894 = vmatpush1.bf16.msra.mxu0 %v1720_v8  ;;  %718 = vmatprep.subr.bf16.mxu1 %v1853_v0  ;;  %v1761_v43 = vld [vmem:[%s2314_s0 + $0x40] ss:$16 sps:$4 sm:$0xff]   ;;  %v1762_v44 = vld [vmem:[%s2314_s0 + $0x48] ss:$16 sps:$4 sm:$0xff]   ;;  %v1763_v45 = vld [vmem:[%s2314_s0 + $0x64] ss:$16 sps:$4 sm:$0xff]  }
  0x10   :  { %895 = vmatprep.subr.bf16.mxu0 %v1853_v0  ;;  %v1765_v46 = vld [vmem:[%s2314_s0 + $0x6c] ss:$16 sps:$4 sm:$0xff]   ;;  %v1767_v47 = vld [vmem:[%s2314_s0 + $0x60] ss:$16 sps:$4 sm:$0xff]   ;;  %v1768_v48 = vld [vmem:[%s2314_s0 + $0x68] ss:$16 sps:$4 sm:$0xff]  }
  0x11   :  { %v1769_v49 = vld [vmem:[%s2314_s0 + $0x84] ss:$16 sps:$4 sm:$0xff]   ;;  %v1771_v50 = vld [vmem:[%s2314_s0 + $0x8c] ss:$16 sps:$4 sm:$0xff]   ;;  %v1773_v51 = vld [vmem:[%s2314_s0 + $0x80] ss:$16 sps:$4 sm:$0xff]  }
  0x12   :  { %719 = vmatpush1.bf16.msra.mxu1 %v1721_v9  ;;  %v1774_v52 = vld [vmem:[%s2314_s0 + $0x88] ss:$16 sps:$4 sm:$0xff]   ;;  %v1775_v53 = vld [vmem:[%s2314_s0 + $0xa4] ss:$16 sps:$4 sm:$0xff]   ;;  %v1777_v54 = vld [vmem:[%s2314_s0 + $0xac] ss:$16 sps:$4 sm:$0xff]  }
  0x13   :  { %896 = vmatpush1.bf16.msra.mxu0 %v1722_v10  ;;  %720 = vmatprep.subr.bf16.mxu1 %v1853_v0  ;;  %v1779_v55 = vld [vmem:[%s2314_s0 + $0xa0] ss:$16 sps:$4 sm:$0xff]   ;;  %v1780_v56 = vld [vmem:[%s2314_s0 + $0xa8] ss:$16 sps:$4 sm:$0xff]   ;;  %v1781_v57 = vld [vmem:[%s2314_s0 + $0xc4] ss:$16 sps:$4 sm:$0xff]  }
  0x14   :  { %897 = vmatprep.subr.bf16.mxu0 %v1853_v0  ;;  %v1783_v58 = vld [vmem:[%s2314_s0 + $0xcc] ss:$16 sps:$4 sm:$0xff]   ;;  %v1785_v59 = vld [vmem:[%s2314_s0 + $0xc0] ss:$16 sps:$4 sm:$0xff]   ;;  %v1786_v60 = vld [vmem:[%s2314_s0 + $0xc8] ss:$16 sps:$4 sm:$0xff]  }
  0x15   :  { %v1787_v61 = vld [vmem:[%s2314_s0 + $0xe4] ss:$16 sps:$4 sm:$0xff]   ;;  %v1789_v62 = vld [vmem:[%s2314_s0 + $0xec] ss:$16 sps:$4 sm:$0xff]   ;;  %v1791_v63 = vld [vmem:[%s2314_s0 + $0xe0] ss:$16 sps:$4 sm:$0xff]  }
  0x16   :  { %721 = vmatpush1.bf16.msra.mxu1 %v1723_v11  ;;  %v1793_v1 = vld [vmem:[%s2314_s0 + $0x104] ss:$16 sps:$4 sm:$0xff]   ;;  %v1795_v2 = vld [vmem:[%s2314_s0 + $0x10c] ss:$16 sps:$4 sm:$0xff]   ;;  %v1797_v3 = vld [vmem:[%s2314_s0 + $0x100] ss:$16 sps:$4 sm:$0xff]  }
  0x17   :  { %898 = vmatpush1.bf16.msra.mxu0 %v1724_v12  ;;  %722 = vmatprep.subr.bf16.mxu1 %v1853_v0  ;;  %v1798_v4 = vld [vmem:[%s2314_s0 + $0x108] ss:$16 sps:$4 sm:$0xff]   ;;  %v1799_v5 = vld [vmem:[%s2314_s0 + $0x124] ss:$16 sps:$4 sm:$0xff]   ;;  %v1801_v6 = vld [vmem:[%s2314_s0 + $0x12c] ss:$16 sps:$4 sm:$0xff]  }
  0x18   :  { %899 = vmatprep.subr.bf16.mxu0 %v1853_v0  ;;  %v1803_v7 = vld [vmem:[%s2314_s0 + $0x120] ss:$16 sps:$4 sm:$0xff]   ;;  %v1804_v8 = vld [vmem:[%s2314_s0 + $0x128] ss:$16 sps:$4 sm:$0xff]   ;;  %v1805_v9 = vld [vmem:[%s2314_s0 + $0x144] ss:$16 sps:$4 sm:$0xff]  }
  0x19   :  { %v1807_v10 = vld [vmem:[%s2314_s0 + $0x14c] ss:$16 sps:$4 sm:$0xff]   ;;  %v1809_v11 = vld [vmem:[%s2314_s0 + $0x140] ss:$16 sps:$4 sm:$0xff]   ;;  %v1810_v12 = vld [vmem:[%s2314_s0 + $0x148] ss:$16 sps:$4 sm:$0xff]  }
  0x1a   :  { %723 = vmatpush1.bf16.msra.mxu1 %v1725_v13  ;;  %v1811_v13 = vld [vmem:[%s2314_s0 + $0x164] ss:$16 sps:$4 sm:$0xff]   ;;  %v1821_v19 = vld [vmem:[%s2314_s0 + $0x180] ss:$16 sps:$4 sm:$0xff]  }
  0x1b   :  { %900 = vmatpush1.bf16.msra.mxu0 %v1726_v14  ;;  %724 = vmatprep.subr.bf16.mxu1 %v1853_v0  ;;  %v1813_v14 = vld [vmem:[%s2314_s0 + $0x16c] ss:$16 sps:$4 sm:$0xff]   ;;  %v1823_v21 = vld [vmem:[%s2314_s0 + $0x1a4] ss:$16 sps:$4 sm:$0xff]  }
  0x1c   :  { %901 = vmatprep.subr.bf16.mxu0 %v1853_v0 }
  0x1e   :  { %725 = vmatpush1.bf16.msra.mxu1 %v1727_v15  ;;  %v1815_v15 = vld [vmem:[%s2314_s0 + $0x160] ss:$16 sps:$4 sm:$0xff]  }
  0x1f   :  { %902 = vmatpush1.bf16.msra.mxu0 %v1728_v16  ;;  %726 = vmatprep.subr.bf16.mxu1 %v1853_v0  ;;  %v1816_v16 = vld [vmem:[%s2314_s0 + $0x168] ss:$16 sps:$4 sm:$0xff]  }
  0x20   :  { %903 = vmatprep.subr.bf16.mxu0 %v1853_v0 }
  0x22   :  { %727 = vmatpush1.bf16.msra.mxu1 %v1729_v17  ;;  %v1817_v17 = vld [vmem:[%s2314_s0 + $0x184] ss:$16 sps:$4 sm:$0xff]  }
  0x23   :  { %904 = vmatpush1.bf16.msra.mxu0 %v1730_v18  ;;  %728 = vmatprep.subr.bf16.mxu1 %v1853_v0  ;;  %v1819_v18 = vld [vmem:[%s2314_s0 + $0x18c] ss:$16 sps:$4 sm:$0xff]  }
  0x24   :  { %905 = vmatprep.subr.bf16.mxu0 %v1853_v0 }
  0x26   :  { %729 = vmatpush1.bf16.msra.mxu1 %v1731_v20  ;;  %v1822_v20 = vld [vmem:[%s2314_s0 + $0x188] ss:$16 sps:$4 sm:$0xff]  }
  0x27   :  { %906 = vmatpush1.bf16.msra.mxu0 %v1732_v22  ;;  %730 = vmatprep.subr.bf16.mxu1 %v1853_v0  ;;  %v1825_v22 = vld [vmem:[%s2314_s0 + $0x1ac] ss:$16 sps:$4 sm:$0xff]  }
  0x28   :  { %907 = vmatprep.subr.bf16.mxu0 %v1853_v0 }
  0x2a   :  { %731 = vmatpush1.bf16.msra.mxu1 %v1733_v23  ;;  %v1827_v23 = vld [vmem:[%s2314_s0 + $0x1a0] ss:$16 sps:$4 sm:$0xff]  }
  0x2b   :  { %908 = vmatpush1.bf16.msra.mxu0 %v1734_v24  ;;  %732 = vmatprep.subr.bf16.mxu1 %v1853_v0  ;;  %v1828_v24 = vld [vmem:[%s2314_s0 + $0x1a8] ss:$16 sps:$4 sm:$0xff]  }
  0x2c   :  { %909 = vmatprep.subr.bf16.mxu0 %v1853_v0 }
  0x2e   :  { %733 = vmatpush1.bf16.msra.mxu1 %v1735_v25  ;;  %v1829_v25 = vld [vmem:[%s2314_s0 + $0x1c4] ss:$16 sps:$4 sm:$0xff]  }
  0x2f   :  { %910 = vmatpush1.bf16.msra.mxu0 %v1736_v26  ;;  %734 = vmatprep.subr.bf16.mxu1 %v1853_v0  ;;  %v1831_v26 = vld [vmem:[%s2314_s0 + $0x1cc] ss:$16 sps:$4 sm:$0xff]  }
  0x30   :  { %911 = vmatprep.subr.bf16.mxu0 %v1853_v0 }
  0x32   :  { %735 = vmatpush1.bf16.msra.mxu1 %v1737_v27  ;;  %v1833_v27 = vld [vmem:[%s2314_s0 + $0x1c0] ss:$16 sps:$4 sm:$0xff]  }
  0x33   :  { %912 = vmatpush1.bf16.msra.mxu0 %v1738_v28  ;;  %736 = vmatprep.subr.bf16.mxu1 %v1853_v0  ;;  %v1834_v28 = vld [vmem:[%s2314_s0 + $0x1c8] ss:$16 sps:$4 sm:$0xff]  }
  0x34   :  { %913 = vmatprep.subr.bf16.mxu0 %v1853_v0 }
  0x36   :  { %737 = vmatpush1.bf16.msra.mxu1 %v1739_v29  ;;  %v1835_v29 = vld [vmem:[%s2314_s0 + $0x1e4] ss:$16 sps:$4 sm:$0xff]  }
  0x37   :  { %914 = vmatpush1.bf16.msra.mxu0 %v1740_v30  ;;  %738 = vmatprep.subr.bf16.mxu1 %v1853_v0  ;;  %v1837_v30 = vld [vmem:[%s2314_s0 + $0x1ec] ss:$16 sps:$4 sm:$0xff]  }
  0x38   :  { %915 = vmatprep.subr.bf16.mxu0 %v1853_v0 }
  0x3a   :  { %739 = vmatpush1.bf16.msra.mxu1 %v1741_v31  ;;  %v1839_v31 = vld [vmem:[%s2314_s0 + $0x1e0] ss:$16 sps:$4 sm:$0xff]  }
  0x3b   :  { %916 = vmatpush1.bf16.msra.mxu0 %v1742_v32  ;;  %740 = vmatprep.subr.bf16.mxu1 %v1853_v0  ;;  %v1840_v32 = vld [vmem:[%s2314_s0 + $0x1e8] ss:$16 sps:$4 sm:$0xff]  }
  0x3c   :  { %917 = vmatprep.subr.bf16.mxu0 %v1853_v0  ;;  %v1792_v0 = vld [vmem:[%s2314_s0 + $0xe8] ss:$16 sps:$4 sm:$0xff]  }
  0x3e   :  { %741 = vmatpush1.bf16.msra.mxu1 %v1743_v33  ;;  %v1841_v33 = vld [vmem:[%s2314_s0 + $0x204] ss:$16 sps:$4 sm:$0xff]  }
  0x3f   :  { %918 = vmatpush1.bf16.msra.mxu0 %v1744_v34  ;;  %v1843_v34 = vld [vmem:[%s2314_s0 + $0x20c] ss:$16 sps:$4 sm:$0xff]  }
  0x41   :  { %743 = vmatmul.mubr.bf16.vlgmr.msra.gmra.mrb[0].mxu1 %v1745_v35  ;;  %v1845_v35 = vld [vmem:[%s2314_s0 + $0x200] ss:$16 sps:$4 sm:$0xff]  }
  0x42   :  { %920 = vmatmul.mubr.bf16.vlgmr.msra.gmra.mrb[0].mxu0 %v1748_v36  ;;  %750 = vmatprep.mubr.bf16.mxu1 %v1751_v37  ;;  %v1846_v36 = vld [vmem:[%s2314_s0 + $0x208] ss:$16 sps:$4 sm:$0xff]   ;;  %v1847_v37 = vld [vmem:[%s2314_s0 + $0x224] ss:$16 sps:$4 sm:$0xff]  }
  0x43   :  { %927 = vmatprep.mubr.bf16.mxu0 %v1753_v38  ;;  %v1849_v38 = vld [vmem:[%s2314_s0 + $0x22c] ss:$16 sps:$4 sm:$0xff]  }
  0x49   :  { %751 = vmatmul.mubr.bf16.gmra.mrb[4].mxu1 %v1755_v39  ;;  %v1851_v39 = vld [vmem:[%s2314_s0 + $0x220] ss:$16 sps:$4 sm:$0xff]  }
  0x4a   :  { %928 = vmatmul.mubr.bf16.gmra.mrb[4].mxu0 %v1756_v40  ;;  %758 = vmatprep.mubr.bf16.mxu1 %v1757_v41  ;;  %v1852_v40 = vld [vmem:[%s2314_s0 + $0x228] ss:$16 sps:$4 sm:$0xff]   ;;  %v2221_v41 = vld [vmem:[%s2315_s2] ss:$0 sm:$0xff] }
  0x4b   :  { %935 = vmatprep.mubr.bf16.mxu0 %v1759_v42 }
  0x51   :  { %759 = vmatmul.mubr.bf16.gmra.mrb[8].mxu1 %v1761_v43 }
  0x52   :  { %936 = vmatmul.mubr.bf16.gmra.mrb[8].mxu0 %v1762_v44  ;;  %766 = vmatprep.mubr.bf16.mxu1 %v1763_v45 }
  0x53   :  { %943 = vmatprep.mubr.bf16.mxu0 %v1765_v46 }
  0x59   :  { %767 = vmatmul.mubr.bf16.gmra.mrb[12].mxu1 %v1767_v47 }
  0x5a   :  { %944 = vmatmul.mubr.bf16.gmra.mrb[12].mxu0 %v1768_v48  ;;  %774 = vmatprep.mubr.bf16.mxu1 %v1769_v49 }
  0x5b   :  { %951 = vmatprep.mubr.bf16.mxu0 %v1771_v50 }
  0x61   :  { %775 = vmatmul.mubr.bf16.gmra.mrb[16].mxu1 %v1773_v51 }
  0x62   :  { %952 = vmatmul.mubr.bf16.gmra.mrb[16].mxu0 %v1774_v52  ;;  %782 = vmatprep.mubr.bf16.mxu1 %v1775_v53 }
  0x63   :  { %959 = vmatprep.mubr.bf16.mxu0 %v1777_v54 }
  0x69   :  { %783 = vmatmul.mubr.bf16.gmra.mrb[20].mxu1 %v1779_v55 }
  0x6a   :  { %960 = vmatmul.mubr.bf16.gmra.mrb[20].mxu0 %v1780_v56  ;;  %790 = vmatprep.mubr.bf16.mxu1 %v1781_v57 }
  0x6b   :  { %967 = vmatprep.mubr.bf16.mxu0 %v1783_v58 }
  0x71   :  { %791 = vmatmul.mubr.bf16.gmra.mrb[24].mxu1 %v1785_v59 }
  0x72   :  { %968 = vmatmul.mubr.bf16.gmra.mrb[24].mxu0 %v1786_v60  ;;  %798 = vmatprep.mubr.bf16.mxu1 %v1787_v61 }
  0x73   :  { %975 = vmatprep.mubr.bf16.mxu0 %v1789_v62 }
  0x79   :  { %799 = vmatmul.mubr.bf16.gmra.mrb[28].mxu1 %v1791_v63 }
  0x7a   :  { %976 = vmatmul.mubr.bf16.gmra.mrb[28].mxu0 %v1792_v0  ;;  %806 = vmatprep.mubr.bf16.mxu1 %v1793_v1 }
  0x7b   :  { %983 = vmatprep.mubr.bf16.mxu0 %v1795_v2 }
  0x81   :  { %807 = vmatmul.mubr.bf16.gmra.mrb[32].mxu1 %v1797_v3 }
  0x82   :  { %984 = vmatmul.mubr.bf16.gmra.mrb[32].mxu0 %v1798_v4  ;;  %814 = vmatprep.mubr.bf16.mxu1 %v1799_v5 }
  0x83   :  { %991 = vmatprep.mubr.bf16.mxu0 %v1801_v6 }
  0x89   :  { %815 = vmatmul.mubr.bf16.gmra.mrb[36].mxu1 %v1803_v7 }
  0x8a   :  { %992 = vmatmul.mubr.bf16.gmra.mrb[36].mxu0 %v1804_v8  ;;  %822 = vmatprep.mubr.bf16.mxu1 %v1805_v9 }
  0x8b   :  { %999 = vmatprep.mubr.bf16.mxu0 %v1807_v10 }
  0x91   :  { %823 = vmatmul.mubr.bf16.gmra.mrb[40].mxu1 %v1809_v11 }
  0x92   :  { %1000 = vmatmul.mubr.bf16.gmra.mrb[40].mxu0 %v1810_v12  ;;  %830 = vmatprep.mubr.bf16.mxu1 %v1811_v13 }
  0x93   :  { %1007 = vmatprep.mubr.bf16.mxu0 %v1813_v14 }
  0x99   :  { %831 = vmatmul.mubr.bf16.gmra.mrb[44].mxu1 %v1815_v15 }
  0x9a   :  { %1008 = vmatmul.mubr.bf16.gmra.mrb[44].mxu0 %v1816_v16  ;;  %838 = vmatprep.mubr.bf16.mxu1 %v1817_v17 }
  0x9b   :  { %1015 = vmatprep.mubr.bf16.mxu0 %v1819_v18 }
  0xa1   :  { %839 = vmatmul.mubr.bf16.gmra.mrb[48].mxu1 %v1821_v19 }
  0xa2   :  { %1016 = vmatmul.mubr.bf16.gmra.mrb[48].mxu0 %v1822_v20  ;;  %846 = vmatprep.mubr.bf16.mxu1 %v1823_v21 }
  0xa3   :  { %1023 = vmatprep.mubr.bf16.mxu0 %v1825_v22 }
  0xa9   :  { %847 = vmatmul.mubr.bf16.gmra.mrb[52].mxu1 %v1827_v23 }
  0xaa   :  { %1024 = vmatmul.mubr.bf16.gmra.mrb[52].mxu0 %v1828_v24  ;;  %854 = vmatprep.mubr.bf16.mxu1 %v1829_v25 }
  0xab   :  { %1031 = vmatprep.mubr.bf16.mxu0 %v1831_v26 }
  0xb1   :  { %855 = vmatmul.mubr.bf16.gmra.mrb[56].mxu1 %v1833_v27 }
  0xb2   :  { %1032 = vmatmul.mubr.bf16.gmra.mrb[56].mxu0 %v1834_v28  ;;  %862 = vmatprep.mubr.bf16.mxu1 %v1835_v29 }
  0xb3   :  { %1039 = vmatprep.mubr.bf16.mxu0 %v1837_v30 }
  0xb9   :  { %863 = vmatmul.mubr.bf16.gmra.mrb[60].mxu1 %v1839_v31 }
  0xba   :  { %1040 = vmatmul.mubr.bf16.gmra.mrb[60].mxu0 %v1840_v32  ;;  %870 = vmatprep.mubr.bf16.mxu1 %v1841_v33 }
  0xbb   :  { %1047 = vmatprep.mubr.bf16.mxu0 %v1843_v34 }
  0xc1   :  { %871 = vmatmul.mubr.bf16.gmra.mrb[64].mxu1 %v1845_v35 }
  0xc2   :  { %1048 = vmatmul.mubr.bf16.gmra.mrb[64].mxu0 %v1846_v36  ;;  %878 = vmatprep.mubr.bf16.mxu1 %v1847_v37 }
  0xc3   :  { %1055 = vmatprep.mubr.bf16.mxu0 %v1849_v38 }
  0xc9   :  { %879 = vmatmul.mubr.bf16.gmra.mrb[68].mxu1 %v1851_v39 }
  0xca   :  { %1056 = vmatmul.mubr.bf16.gmra.mrb[68].mxu0 %v1852_v40 }
 0x114   :  { %v744_v42 = vpop.f32.mrb[0].mxu1 }
 0x115   :  { %v745_v43 = vadd.f32 %v2221_v41, %v744_v42  ;;  %v921_v44 = vpop.f32.mrb[0].mxu0  ;;  %v746_v45 = vpop.f32.mrb[1].mxu1 }
 0x116   :  { %v923_v46 = vpop.f32.mrb[1].mxu0  ;;  %v747_v47 = vpop.f32.mrb[2].mxu1 }
 0x117   :  { %v922_v48 = vadd.f32 %v921_v44, %v745_v43  ;;  %v748_v49 = vadd.f32 %v2221_v41, %v747_v47  ;;  %v924_v50 = vpop.f32.mrb[2].mxu0  ;;  %v749_v51 = vpop.f32.mrb[3].mxu1 }
 0x118   :  { %v926_v52 = vpop.f32.mrb[3].mxu0 }
 0x119   :  { %v1100_v53 = vmul.f32 0.01, %v922_v48  ;;  %v925_v54 = vadd.f32 %v924_v50, %v748_v49  ;;  %vm1064_vm0 = vcmp.ge.f32.partialorder %v922_v48, 0.0 }
 0x11b   :  { %vm1065_vm1 = vcmp.ge.f32.partialorder %v925_v54, 0.0  ;;  %v1101_v55 = vmul.f32 0.01, %v925_v54  ;;  %v1136_v57 = vsel %vm1064_vm0, %v922_v48, %v1100_v53 }
 0x11c   :  { %v752_v56 = vpop.f32.mrb[4].mxu1 }
 0x11d   :  { %v1137_v58 = vsel %vm1065_vm1, %v925_v54, %v1101_v55  ;;  %v753_v59 = vadd.f32 %v2221_v41, %v752_v56  ;;  %v929_v60 = vpop.f32.mrb[4].mxu0  ;;  %v754_v61 = vpop.f32.mrb[5].mxu1 }
 0x11e   :  { %v1536_v62 = vpack.c.bf16 %v1137_v58, %v1136_v57  ;;  %v931_v63 = vpop.f32.mrb[5].mxu0  ;;  %v755_v0 = vpop.f32.mrb[6].mxu1 }
 0x11f   :  { %v930_v1 = vadd.f32 %v929_v60, %v753_v59  ;;  %v756_v2 = vadd.f32 %v2221_v41, %v755_v0  ;;  %v932_v3 = vpop.f32.mrb[6].mxu0  ;;  %v757_v4 = vpop.f32.mrb[7].mxu1 }
 0x120   :  { %1537 = vst [vmem:[%s2316_s3] sm:$0xff] %v1536_v62   ;;  %v934_v5 = vpop.f32.mrb[7].mxu0 }
 0x121   :  { %v1102_v6 = vmul.f32 0.01, %v930_v1  ;;  %v933_v7 = vadd.f32 %v932_v3, %v756_v2  ;;  %vm1066_vm2 = vcmp.ge.f32.partialorder %v930_v1, 0.0 }
 0x123   :  { %vm1067_vm3 = vcmp.ge.f32.partialorder %v933_v7, 0.0  ;;  %v1103_v8 = vmul.f32 0.01, %v933_v7  ;;  %v1138_v10 = vsel %vm1066_vm2, %v930_v1, %v1102_v6 }
 0x124   :  { %v760_v9 = vpop.f32.mrb[8].mxu1 }
 0x125   :  { %v1139_v11 = vsel %vm1067_vm3, %v933_v7, %v1103_v8  ;;  %v761_v12 = vadd.f32 %v2221_v41, %v760_v9  ;;  %v937_v13 = vpop.f32.mrb[8].mxu0  ;;  %v762_v14 = vpop.f32.mrb[9].mxu1 }
 0x126   :  { %v1541_v15 = vpack.c.bf16 %v1139_v11, %v1138_v10  ;;  %v939_v16 = vpop.f32.mrb[9].mxu0  ;;  %v763_v17 = vpop.f32.mrb[10].mxu1 }
 0x127   :  { %v938_v18 = vadd.f32 %v937_v13, %v761_v12  ;;  %v764_v19 = vadd.f32 %v2221_v41, %v763_v17  ;;  %v940_v20 = vpop.f32.mrb[10].mxu0  ;;  %v765_v21 = vpop.f32.mrb[11].mxu1 }
 0x128   :  { %1623 = vst [vmem:[%s2316_s3 + $0x8] sm:$0xff] %v1541_v15   ;;  %v942_v22 = vpop.f32.mrb[11].mxu0 }
 0x129   :  { %v1104_v23 = vmul.f32 0.01, %v938_v18  ;;  %v941_v24 = vadd.f32 %v940_v20, %v764_v19  ;;  %vm1068_vm4 = vcmp.ge.f32.partialorder %v938_v18, 0.0 }
 0x12b   :  { %vm1069_vm5 = vcmp.ge.f32.partialorder %v941_v24, 0.0  ;;  %v1105_v25 = vmul.f32 0.01, %v941_v24  ;;  %v1140_v27 = vsel %vm1068_vm4, %v938_v18, %v1104_v23 }
 0x12c   :  { %v768_v26 = vpop.f32.mrb[12].mxu1 }
 0x12d   :  { %v1141_v28 = vsel %vm1069_vm5, %v941_v24, %v1105_v25  ;;  %v769_v29 = vadd.f32 %v2221_v41, %v768_v26  ;;  %v945_v30 = vpop.f32.mrb[12].mxu0  ;;  %v770_v31 = vpop.f32.mrb[13].mxu1 }
 0x12e   :  { %v1546_v32 = vpack.c.bf16 %v1141_v28, %v1140_v27  ;;  %v947_v33 = vpop.f32.mrb[13].mxu0  ;;  %v771_v34 = vpop.f32.mrb[14].mxu1 }
 0x12f   :  { %v946_v35 = vadd.f32 %v945_v30, %v769_v29  ;;  %v772_v36 = vadd.f32 %v2221_v41, %v771_v34  ;;  %v948_v37 = vpop.f32.mrb[14].mxu0  ;;  %v773_v38 = vpop.f32.mrb[15].mxu1 }
 0x130   :  { %1624 = vst [vmem:[%s2316_s3 + $0x10] sm:$0xff] %v1546_v32   ;;  %v950_v39 = vpop.f32.mrb[15].mxu0 }
 0x131   :  { %v1106_v40 = vmul.f32 0.01, %v946_v35  ;;  %v949_v42 = vadd.f32 %v948_v37, %v772_v36  ;;  %vm1070_vm6 = vcmp.ge.f32.partialorder %v946_v35, 0.0 }
 0x133   :  { %vm1071_vm7 = vcmp.ge.f32.partialorder %v949_v42, 0.0  ;;  %v1107_v43 = vmul.f32 0.01, %v949_v42  ;;  %v1142_v45 = vsel %vm1070_vm6, %v946_v35, %v1106_v40 }
 0x134   :  { %v776_v44 = vpop.f32.mrb[16].mxu1 }
 0x135   :  { %v1143_v46 = vsel %vm1071_vm7, %v949_v42, %v1107_v43  ;;  %v777_v47 = vadd.f32 %v2221_v41, %v776_v44  ;;  %v953_v48 = vpop.f32.mrb[16].mxu0  ;;  %v778_v49 = vpop.f32.mrb[17].mxu1 }
 0x136   :  { %v1551_v50 = vpack.c.bf16 %v1143_v46, %v1142_v45  ;;  %v955_v51 = vpop.f32.mrb[17].mxu0  ;;  %v779_v52 = vpop.f32.mrb[18].mxu1 }
 0x137   :  { %v954_v53 = vadd.f32 %v953_v48, %v777_v47  ;;  %v780_v54 = vadd.f32 %v2221_v41, %v779_v52  ;;  %v956_v55 = vpop.f32.mrb[18].mxu0  ;;  %v781_v56 = vpop.f32.mrb[19].mxu1 }
 0x138   :  { %1625 = vst [vmem:[%s2316_s3 + $0x18] sm:$0xff] %v1551_v50   ;;  %v958_v57 = vpop.f32.mrb[19].mxu0 }
 0x139   :  { %v1108_v58 = vmul.f32 0.01, %v954_v53  ;;  %v957_v59 = vadd.f32 %v956_v55, %v780_v54  ;;  %vm1072_vm8 = vcmp.ge.f32.partialorder %v954_v53, 0.0 }
 0x13b   :  { %vm1073_vm9 = vcmp.ge.f32.partialorder %v957_v59, 0.0  ;;  %v1109_v60 = vmul.f32 0.01, %v957_v59  ;;  %v1144_v62 = vsel %vm1072_vm8, %v954_v53, %v1108_v58 }
 0x13c   :  { %v784_v61 = vpop.f32.mrb[20].mxu1 }
 0x13d   :  { %v1145_v63 = vsel %vm1073_vm9, %v957_v59, %v1109_v60  ;;  %v785_v0 = vadd.f32 %v2221_v41, %v784_v61  ;;  %v961_v1 = vpop.f32.mrb[20].mxu0  ;;  %v786_v2 = vpop.f32.mrb[21].mxu1 }
 0x13e   :  { %v1556_v3 = vpack.c.bf16 %v1145_v63, %v1144_v62  ;;  %v963_v4 = vpop.f32.mrb[21].mxu0  ;;  %v787_v5 = vpop.f32.mrb[22].mxu1 }
 0x13f   :  { %v962_v6 = vadd.f32 %v961_v1, %v785_v0  ;;  %v788_v7 = vadd.f32 %v2221_v41, %v787_v5  ;;  %v964_v8 = vpop.f32.mrb[22].mxu0  ;;  %v789_v9 = vpop.f32.mrb[23].mxu1 }
 0x140   :  { %1626 = vst [vmem:[%s2316_s3 + $0x20] sm:$0xff] %v1556_v3   ;;  %v966_v10 = vpop.f32.mrb[23].mxu0 }
 0x141   :  { %v1110_v11 = vmul.f32 0.01, %v962_v6  ;;  %v965_v12 = vadd.f32 %v964_v8, %v788_v7  ;;  %vm1074_vm10 = vcmp.ge.f32.partialorder %v962_v6, 0.0 }
 0x143   :  { %vm1075_vm11 = vcmp.ge.f32.partialorder %v965_v12, 0.0  ;;  %v1111_v13 = vmul.f32 0.01, %v965_v12  ;;  %v1146_v15 = vsel %vm1074_vm10, %v962_v6, %v1110_v11 }
 0x144   :  { %v792_v14 = vpop.f32.mrb[24].mxu1 }
 0x145   :  { %v1147_v16 = vsel %vm1075_vm11, %v965_v12, %v1111_v13  ;;  %v793_v17 = vadd.f32 %v2221_v41, %v792_v14  ;;  %v969_v18 = vpop.f32.mrb[24].mxu0  ;;  %v794_v19 = vpop.f32.mrb[25].mxu1 }
 0x146   :  { %v1561_v20 = vpack.c.bf16 %v1147_v16, %v1146_v15  ;;  %v971_v21 = vpop.f32.mrb[25].mxu0  ;;  %v795_v22 = vpop.f32.mrb[26].mxu1 }
 0x147   :  { %v970_v23 = vadd.f32 %v969_v18, %v793_v17  ;;  %v796_v24 = vadd.f32 %v2221_v41, %v795_v22  ;;  %v972_v25 = vpop.f32.mrb[26].mxu0  ;;  %v797_v26 = vpop.f32.mrb[27].mxu1 }
 0x148   :  { %1627 = vst [vmem:[%s2316_s3 + $0x28] sm:$0xff] %v1561_v20   ;;  %v974_v27 = vpop.f32.mrb[27].mxu0 }
 0x149   :  { %v1112_v28 = vmul.f32 0.01, %v970_v23  ;;  %v973_v29 = vadd.f32 %v972_v25, %v796_v24  ;;  %vm1076_vm12 = vcmp.ge.f32.partialorder %v970_v23, 0.0 }
 0x14b   :  { %vm1077_vm13 = vcmp.ge.f32.partialorder %v973_v29, 0.0  ;;  %v1113_v30 = vmul.f32 0.01, %v973_v29  ;;  %v1148_v32 = vsel %vm1076_vm12, %v970_v23, %v1112_v28 }
 0x14c   :  { %v800_v31 = vpop.f32.mrb[28].mxu1 }
 0x14d   :  { %v1149_v33 = vsel %vm1077_vm13, %v973_v29, %v1113_v30  ;;  %v801_v34 = vadd.f32 %v2221_v41, %v800_v31  ;;  %v977_v35 = vpop.f32.mrb[28].mxu0  ;;  %v802_v36 = vpop.f32.mrb[29].mxu1 }
 0x14e   :  { %v1566_v37 = vpack.c.bf16 %v1149_v33, %v1148_v32  ;;  %v979_v38 = vpop.f32.mrb[29].mxu0  ;;  %v803_v39 = vpop.f32.mrb[30].mxu1 }
 0x14f   :  { %v978_v40 = vadd.f32 %v977_v35, %v801_v34  ;;  %v804_v42 = vadd.f32 %v2221_v41, %v803_v39  ;;  %v980_v43 = vpop.f32.mrb[30].mxu0  ;;  %v805_v44 = vpop.f32.mrb[31].mxu1 }
 0x150   :  { %1628 = vst [vmem:[%s2316_s3 + $0x30] sm:$0xff] %v1566_v37   ;;  %v982_v45 = vpop.f32.mrb[31].mxu0 }
 0x151   :  { %v1114_v46 = vmul.f32 0.01, %v978_v40  ;;  %v981_v47 = vadd.f32 %v980_v43, %v804_v42  ;;  %vm1078_vm14 = vcmp.ge.f32.partialorder %v978_v40, 0.0 }
 0x153   :  { %vm1079_vm15 = vcmp.ge.f32.partialorder %v981_v47, 0.0  ;;  %v1115_v48 = vmul.f32 0.01, %v981_v47  ;;  %v1150_v50 = vsel %vm1078_vm14, %v978_v40, %v1114_v46 }
 0x154   :  { %v808_v49 = vpop.f32.mrb[32].mxu1 }
 0x155   :  { %v1151_v51 = vsel %vm1079_vm15, %v981_v47, %v1115_v48  ;;  %v809_v52 = vadd.f32 %v2221_v41, %v808_v49  ;;  %v985_v53 = vpop.f32.mrb[32].mxu0  ;;  %v810_v54 = vpop.f32.mrb[33].mxu1 }
 0x156   :  { %v1571_v55 = vpack.c.bf16 %v1151_v51, %v1150_v50  ;;  %v987_v56 = vpop.f32.mrb[33].mxu0  ;;  %v811_v57 = vpop.f32.mrb[34].mxu1 }
 0x157   :  { %v986_v58 = vadd.f32 %v985_v53, %v809_v52  ;;  %v812_v59 = vadd.f32 %v2221_v41, %v811_v57  ;;  %v988_v60 = vpop.f32.mrb[34].mxu0  ;;  %v813_v61 = vpop.f32.mrb[35].mxu1 }
 0x158   :  { %1629 = vst [vmem:[%s2316_s3 + $0x38] sm:$0xff] %v1571_v55   ;;  %v990_v62 = vpop.f32.mrb[35].mxu0 }
 0x159   :  { %v1116_v63 = vmul.f32 0.01, %v986_v58  ;;  %v989_v0 = vadd.f32 %v988_v60, %v812_v59  ;;  %vm1080_vm0 = vcmp.ge.f32.partialorder %v986_v58, 0.0 }
 0x15b   :  { %vm1081_vm1 = vcmp.ge.f32.partialorder %v989_v0, 0.0  ;;  %v1117_v1 = vmul.f32 0.01, %v989_v0  ;;  %v1152_v3 = vsel %vm1080_vm0, %v986_v58, %v1116_v63 }
 0x15c   :  { %v816_v2 = vpop.f32.mrb[36].mxu1 }
 0x15d   :  { %v1153_v4 = vsel %vm1081_vm1, %v989_v0, %v1117_v1  ;;  %v817_v5 = vadd.f32 %v2221_v41, %v816_v2  ;;  %v993_v6 = vpop.f32.mrb[36].mxu0  ;;  %v818_v7 = vpop.f32.mrb[37].mxu1 }
 0x15e   :  { %v1576_v8 = vpack.c.bf16 %v1153_v4, %v1152_v3  ;;  %v995_v9 = vpop.f32.mrb[37].mxu0  ;;  %v819_v10 = vpop.f32.mrb[38].mxu1 }
 0x15f   :  { %v994_v11 = vadd.f32 %v993_v6, %v817_v5  ;;  %v820_v12 = vadd.f32 %v2221_v41, %v819_v10  ;;  %v996_v13 = vpop.f32.mrb[38].mxu0  ;;  %v821_v14 = vpop.f32.mrb[39].mxu1 }
 0x160   :  { %1630 = vst [vmem:[%s2316_s3 + $0x40] sm:$0xff] %v1576_v8   ;;  %v998_v15 = vpop.f32.mrb[39].mxu0 }
 0x161   :  { %v1118_v16 = vmul.f32 0.01, %v994_v11  ;;  %v997_v17 = vadd.f32 %v996_v13, %v820_v12  ;;  %vm1082_vm2 = vcmp.ge.f32.partialorder %v994_v11, 0.0 }
 0x163   :  { %vm1083_vm3 = vcmp.ge.f32.partialorder %v997_v17, 0.0  ;;  %v1119_v18 = vmul.f32 0.01, %v997_v17  ;;  %v1154_v20 = vsel %vm1082_vm2, %v994_v11, %v1118_v16 }
 0x164   :  { %v824_v19 = vpop.f32.mrb[40].mxu1 }
 0x165   :  { %v1155_v21 = vsel %vm1083_vm3, %v997_v17, %v1119_v18  ;;  %v825_v22 = vadd.f32 %v2221_v41, %v824_v19  ;;  %v1001_v23 = vpop.f32.mrb[40].mxu0  ;;  %v826_v24 = vpop.f32.mrb[41].mxu1 }
 0x166   :  { %v1581_v25 = vpack.c.bf16 %v1155_v21, %v1154_v20  ;;  %v1003_v26 = vpop.f32.mrb[41].mxu0  ;;  %v827_v27 = vpop.f32.mrb[42].mxu1 }
 0x167   :  { %v1002_v28 = vadd.f32 %v1001_v23, %v825_v22  ;;  %v828_v29 = vadd.f32 %v2221_v41, %v827_v27  ;;  %v1004_v30 = vpop.f32.mrb[42].mxu0  ;;  %v829_v31 = vpop.f32.mrb[43].mxu1 }
 0x168   :  { %1631 = vst [vmem:[%s2316_s3 + $0x48] sm:$0xff] %v1581_v25   ;;  %v1006_v32 = vpop.f32.mrb[43].mxu0 }
 0x169   :  { %v1120_v33 = vmul.f32 0.01, %v1002_v28  ;;  %v1005_v34 = vadd.f32 %v1004_v30, %v828_v29  ;;  %vm1084_vm4 = vcmp.ge.f32.partialorder %v1002_v28, 0.0 }
 0x16b   :  { %vm1085_vm5 = vcmp.ge.f32.partialorder %v1005_v34, 0.0  ;;  %v1121_v35 = vmul.f32 0.01, %v1005_v34  ;;  %v1156_v37 = vsel %vm1084_vm4, %v1002_v28, %v1120_v33 }
 0x16c   :  { %v832_v36 = vpop.f32.mrb[44].mxu1 }
 0x16d   :  { %v1157_v38 = vsel %vm1085_vm5, %v1005_v34, %v1121_v35  ;;  %v833_v39 = vadd.f32 %v2221_v41, %v832_v36  ;;  %v1009_v40 = vpop.f32.mrb[44].mxu0  ;;  %v834_v42 = vpop.f32.mrb[45].mxu1 }
 0x16e   :  { %v1586_v43 = vpack.c.bf16 %v1157_v38, %v1156_v37  ;;  %v1011_v44 = vpop.f32.mrb[45].mxu0  ;;  %v835_v45 = vpop.f32.mrb[46].mxu1 }
 0x16f   :  { %v1010_v46 = vadd.f32 %v1009_v40, %v833_v39  ;;  %v836_v47 = vadd.f32 %v2221_v41, %v835_v45  ;;  %v1012_v48 = vpop.f32.mrb[46].mxu0  ;;  %v837_v49 = vpop.f32.mrb[47].mxu1 }
 0x170   :  { %1632 = vst [vmem:[%s2316_s3 + $0x50] sm:$0xff] %v1586_v43   ;;  %v1014_v50 = vpop.f32.mrb[47].mxu0 }
 0x171   :  { %v1122_v51 = vmul.f32 0.01, %v1010_v46  ;;  %v1013_v52 = vadd.f32 %v1012_v48, %v836_v47  ;;  %vm1086_vm6 = vcmp.ge.f32.partialorder %v1010_v46, 0.0 }
 0x173   :  { %vm1087_vm7 = vcmp.ge.f32.partialorder %v1013_v52, 0.0  ;;  %v1123_v53 = vmul.f32 0.01, %v1013_v52  ;;  %v1158_v55 = vsel %vm1086_vm6, %v1010_v46, %v1122_v51 }
 0x174   :  { %v840_v54 = vpop.f32.mrb[48].mxu1 }
 0x175   :  { %v1159_v56 = vsel %vm1087_vm7, %v1013_v52, %v1123_v53  ;;  %v841_v57 = vadd.f32 %v2221_v41, %v840_v54  ;;  %v1017_v58 = vpop.f32.mrb[48].mxu0  ;;  %v842_v59 = vpop.f32.mrb[49].mxu1 }
 0x176   :  { %v1591_v60 = vpack.c.bf16 %v1159_v56, %v1158_v55  ;;  %v1019_v61 = vpop.f32.mrb[49].mxu0  ;;  %v843_v62 = vpop.f32.mrb[50].mxu1 }
 0x177   :  { %v1018_v63 = vadd.f32 %v1017_v58, %v841_v57  ;;  %v844_v0 = vadd.f32 %v2221_v41, %v843_v62  ;;  %v1020_v1 = vpop.f32.mrb[50].mxu0  ;;  %v845_v2 = vpop.f32.mrb[51].mxu1 }
 0x178   :  { %1633 = vst [vmem:[%s2316_s3 + $0x58] sm:$0xff] %v1591_v60   ;;  %v1022_v3 = vpop.f32.mrb[51].mxu0 }
 0x179   :  { %v1124_v4 = vmul.f32 0.01, %v1018_v63  ;;  %v1021_v5 = vadd.f32 %v1020_v1, %v844_v0  ;;  %vm1088_vm8 = vcmp.ge.f32.partialorder %v1018_v63, 0.0 }
 0x17b   :  { %vm1089_vm9 = vcmp.ge.f32.partialorder %v1021_v5, 0.0  ;;  %v1125_v6 = vmul.f32 0.01, %v1021_v5  ;;  %v1160_v8 = vsel %vm1088_vm8, %v1018_v63, %v1124_v4 }
 0x17c   :  { %v848_v7 = vpop.f32.mrb[52].mxu1 }
 0x17d   :  { %v1161_v9 = vsel %vm1089_vm9, %v1021_v5, %v1125_v6  ;;  %v849_v10 = vadd.f32 %v2221_v41, %v848_v7  ;;  %v1025_v11 = vpop.f32.mrb[52].mxu0  ;;  %v850_v12 = vpop.f32.mrb[53].mxu1 }
 0x17e   :  { %v1596_v13 = vpack.c.bf16 %v1161_v9, %v1160_v8  ;;  %v1027_v14 = vpop.f32.mrb[53].mxu0  ;;  %v851_v15 = vpop.f32.mrb[54].mxu1 }
 0x17f   :  { %v1026_v16 = vadd.f32 %v1025_v11, %v849_v10  ;;  %v852_v17 = vadd.f32 %v2221_v41, %v851_v15  ;;  %v1028_v18 = vpop.f32.mrb[54].mxu0  ;;  %v853_v19 = vpop.f32.mrb[55].mxu1 }
 0x180   :  { %1634 = vst [vmem:[%s2316_s3 + $0x60] sm:$0xff] %v1596_v13   ;;  %v1030_v20 = vpop.f32.mrb[55].mxu0 }
 0x181   :  { %v1126_v21 = vmul.f32 0.01, %v1026_v16  ;;  %v1029_v22 = vadd.f32 %v1028_v18, %v852_v17  ;;  %vm1090_vm10 = vcmp.ge.f32.partialorder %v1026_v16, 0.0 }
 0x183   :  { %vm1091_vm11 = vcmp.ge.f32.partialorder %v1029_v22, 0.0  ;;  %v1127_v23 = vmul.f32 0.01, %v1029_v22  ;;  %v1162_v25 = vsel %vm1090_vm10, %v1026_v16, %v1126_v21 }
 0x184   :  { %v856_v24 = vpop.f32.mrb[56].mxu1 }
 0x185   :  { %v1163_v26 = vsel %vm1091_vm11, %v1029_v22, %v1127_v23  ;;  %v857_v27 = vadd.f32 %v2221_v41, %v856_v24  ;;  %v1033_v28 = vpop.f32.mrb[56].mxu0  ;;  %v858_v29 = vpop.f32.mrb[57].mxu1 }
 0x186   :  { %v1601_v30 = vpack.c.bf16 %v1163_v26, %v1162_v25  ;;  %v1035_v31 = vpop.f32.mrb[57].mxu0  ;;  %v859_v32 = vpop.f32.mrb[58].mxu1 }
 0x187   :  { %v1034_v33 = vadd.f32 %v1033_v28, %v857_v27  ;;  %v860_v34 = vadd.f32 %v2221_v41, %v859_v32  ;;  %v1036_v35 = vpop.f32.mrb[58].mxu0  ;;  %v861_v36 = vpop.f32.mrb[59].mxu1 }
 0x188   :  { %1635 = vst [vmem:[%s2316_s3 + $0x68] sm:$0xff] %v1601_v30   ;;  %v1038_v37 = vpop.f32.mrb[59].mxu0 }
 0x189   :  { %v1128_v38 = vmul.f32 0.01, %v1034_v33  ;;  %v1037_v39 = vadd.f32 %v1036_v35, %v860_v34  ;;  %vm1092_vm12 = vcmp.ge.f32.partialorder %v1034_v33, 0.0 }
 0x18b   :  { %vm1093_vm13 = vcmp.ge.f32.partialorder %v1037_v39, 0.0  ;;  %v1129_v40 = vmul.f32 0.01, %v1037_v39  ;;  %v1164_v43 = vsel %vm1092_vm12, %v1034_v33, %v1128_v38 }
 0x18c   :  { %v864_v42 = vpop.f32.mrb[60].mxu1 }
 0x18d   :  { %v1165_v44 = vsel %vm1093_vm13, %v1037_v39, %v1129_v40  ;;  %v865_v45 = vadd.f32 %v2221_v41, %v864_v42  ;;  %v1041_v46 = vpop.f32.mrb[60].mxu0  ;;  %v866_v47 = vpop.f32.mrb[61].mxu1 }
 0x18e   :  { %v1606_v48 = vpack.c.bf16 %v1165_v44, %v1164_v43  ;;  %v1043_v49 = vpop.f32.mrb[61].mxu0  ;;  %v867_v50 = vpop.f32.mrb[62].mxu1 }
 0x18f   :  { %v1042_v51 = vadd.f32 %v1041_v46, %v865_v45  ;;  %v868_v52 = vadd.f32 %v2221_v41, %v867_v50  ;;  %v1044_v53 = vpop.f32.mrb[62].mxu0  ;;  %v869_v54 = vpop.f32.mrb[63].mxu1 }
 0x190   :  { %1636 = vst [vmem:[%s2316_s3 + $0x70] sm:$0xff] %v1606_v48   ;;  %v1046_v55 = vpop.f32.mrb[63].mxu0 }
 0x191   :  { %v1130_v56 = vmul.f32 0.01, %v1042_v51  ;;  %v1045_v57 = vadd.f32 %v1044_v53, %v868_v52  ;;  %vm1094_vm14 = vcmp.ge.f32.partialorder %v1042_v51, 0.0 }
 0x193   :  { %vm1095_vm15 = vcmp.ge.f32.partialorder %v1045_v57, 0.0  ;;  %v1131_v58 = vmul.f32 0.01, %v1045_v57  ;;  %v1166_v60 = vsel %vm1094_vm14, %v1042_v51, %v1130_v56 }
 0x194   :  { %v872_v59 = vpop.f32.mrb[64].mxu1 }
 0x195   :  { %v1167_v61 = vsel %vm1095_vm15, %v1045_v57, %v1131_v58  ;;  %v873_v62 = vadd.f32 %v2221_v41, %v872_v59  ;;  %v1049_v63 = vpop.f32.mrb[64].mxu0  ;;  %v874_v0 = vpop.f32.mrb[65].mxu1 }
 0x196   :  { %v1611_v1 = vpack.c.bf16 %v1167_v61, %v1166_v60  ;;  %v1051_v2 = vpop.f32.mrb[65].mxu0  ;;  %v875_v3 = vpop.f32.mrb[66].mxu1 }
 0x197   :  { %v1050_v4 = vadd.f32 %v1049_v63, %v873_v62  ;;  %v876_v5 = vadd.f32 %v2221_v41, %v875_v3  ;;  %v1052_v6 = vpop.f32.mrb[66].mxu0  ;;  %v877_v7 = vpop.f32.mrb[67].mxu1 }
 0x198   :  { %1637 = vst [vmem:[%s2316_s3 + $0x78] sm:$0xff] %v1611_v1   ;;  %v1054_v8 = vpop.f32.mrb[67].mxu0 }
 0x199   :  { %v1132_v9 = vmul.f32 0.01, %v1050_v4  ;;  %v1053_v10 = vadd.f32 %v1052_v6, %v876_v5  ;;  %vm1096_vm0 = vcmp.ge.f32.partialorder %v1050_v4, 0.0 }
 0x19b   :  { %vm1097_vm1 = vcmp.ge.f32.partialorder %v1053_v10, 0.0  ;;  %v1133_v11 = vmul.f32 0.01, %v1053_v10  ;;  %v1168_v13 = vsel %vm1096_vm0, %v1050_v4, %v1132_v9 }
 0x19c   :  { %v880_v12 = vpop.f32.mrb[68].mxu1 }
 0x19d   :  { %v1169_v14 = vsel %vm1097_vm1, %v1053_v10, %v1133_v11  ;;  %v881_v15 = vadd.f32 %v2221_v41, %v880_v12  ;;  %v1057_v16 = vpop.f32.mrb[68].mxu0  ;;  %v882_v17 = vpop.f32.mrb[69].mxu1 }
 0x19e   :  { %v1616_v18 = vpack.c.bf16 %v1169_v14, %v1168_v13  ;;  %v1059_v19 = vpop.f32.mrb[69].mxu0  ;;  %v883_v20 = vpop.f32.mrb[70].mxu1 }
 0x19f   :  { %v1058_v21 = vadd.f32 %v1057_v16, %v881_v15  ;;  %v884_v22 = vadd.f32 %v2221_v41, %v883_v20  ;;  %v1060_v23 = vpop.f32.mrb[70].mxu0  ;;  %v885_v24 = vpop.f32.mrb[71].mxu1 }
 0x1a0   :  { %1638 = vst [vmem:[%s2316_s3 + $0x80] sm:$0xff] %v1616_v18   ;;  %v1062_v25 = vpop.f32.mrb[71].mxu0 }
 0x1a1   :  { %v1134_v26 = vmul.f32 0.01, %v1058_v21  ;;  %v1061_v27 = vadd.f32 %v1060_v23, %v884_v22  ;;  %vm1098_vm2 = vcmp.ge.f32.partialorder %v1058_v21, 0.0 }
 0x1a3   :  { %vm1099_vm3 = vcmp.ge.f32.partialorder %v1061_v27, 0.0  ;;  %v1135_v28 = vmul.f32 0.01, %v1061_v27  ;;  %v1170_v29 = vsel %vm1098_vm2, %v1058_v21, %v1134_v26 }
 0x1a5   :  { %v1171_v30 = vsel %vm1099_vm3, %v1061_v27, %v1135_v28 }
 0x1a6   :  { %v1621_v31 = vpack.c.bf16 %v1171_v30, %v1170_v29 }
 0x1a8   :  { %1639 = vst [vmem:[%s2316_s3 + $0x88] sm:$0xff] %v1621_v31  }

// kernel: cnn_lstm_forward.6
= control target key start
LH: loop header
LB: loop body
LE: loop exit
PB: predicated region body
PF: predicated region fallthrough
CT: control target
= control target key end

     0   :  { %s3285_s1 = inlined_call_operand.vmem [shape: bf16[1024,128], index: 1, kind: input, shape index: {}]   ;;  %s3286_s0 = inlined_call_operand.vmem [shape: bf16[200,1024], index: 0, kind: input, shape index: {}]   ;;  %s3287_s2 = inlined_call_operand.vmem [shape: f32[1,128], index: 2, kind: input, shape index: {}]   ;;  %s3288_s3 = inlined_call_operand.vmem [shape: bf16[200,128], index: 3, kind: output, shape index: {}]  }
   0x1   :  { %v2557_v0 = vld [vmem:[%s3285_s1 + $0x40] sm:$0xff]   ;;  %v2561_v4 = vld [vmem:[%s3285_s1 + $0x48] sm:$0xff]   ;;  %v2565_v8 = vld [vmem:[%s3285_s1 + $0x50] sm:$0xff]  }
   0x2   :  { %v2558_v1 = vld [vmem:[%s3285_s1 + $0xc0] sm:$0xff]   ;;  %2181 = vmatprep.subr.bf16.mxu0 %v2557_v0  ;;  %v2562_v5 = vld [vmem:[%s3285_s1 + $0xc8] sm:$0xff]   ;;  %v2566_v9 = vld [vmem:[%s3285_s1 + $0xd0] sm:$0xff]  }
   0x3   :  { %v2559_v2 = vld [vmem:[%s3285_s1] sm:$0xff]   ;;  %2275 = vmatprep.subr.bf16.mxu1 %v2558_v1  ;;  %v2563_v6 = vld [vmem:[%s3285_s1 + $0x8] sm:$0xff]   ;;  %v2567_v10 = vld [vmem:[%s3285_s1 + $0x10] sm:$0xff]  }
   0x4   :  { %v2560_v3 = vld [vmem:[%s3285_s1 + $0x80] sm:$0xff]   ;;  %2182 = vmatpush3.bf16.msra.mxu0 %v2559_v2  ;;  %v2564_v7 = vld [vmem:[%s3285_s1 + $0x88] sm:$0xff]   ;;  %v2568_v11 = vld [vmem:[%s3285_s1 + $0x90] sm:$0xff]  }
   0x5   :  { %2276 = vmatpush3.bf16.msra.mxu1 %v2560_v3  ;;  %2183 = vmatprep.subr.bf16.mxu0 %v2561_v4  ;;  %v2569_v12 = vld [vmem:[%s3285_s1 + $0x58] sm:$0xff]   ;;  %v2573_v16 = vld [vmem:[%s3285_s1 + $0x60] sm:$0xff]   ;;  %v2577_v20 = vld [vmem:[%s3285_s1 + $0x68] sm:$0xff]  }
   0x6   :  { %2277 = vmatprep.subr.bf16.mxu1 %v2562_v5  ;;  %v2570_v13 = vld [vmem:[%s3285_s1 + $0xd8] sm:$0xff]   ;;  %v2574_v17 = vld [vmem:[%s3285_s1 + $0xe0] sm:$0xff]   ;;  %v2578_v21 = vld [vmem:[%s3285_s1 + $0xe8] sm:$0xff]  }
   0x7   :  { %v2571_v14 = vld [vmem:[%s3285_s1 + $0x18] sm:$0xff]   ;;  %v2575_v18 = vld [vmem:[%s3285_s1 + $0x20] sm:$0xff]   ;;  %v2579_v22 = vld [vmem:[%s3285_s1 + $0x28] sm:$0xff]  }
   0x8   :  { %2184 = vmatpush3.bf16.msra.mxu0 %v2563_v6  ;;  %v2572_v15 = vld [vmem:[%s3285_s1 + $0x98] sm:$0xff]   ;;  %v2576_v19 = vld [vmem:[%s3285_s1 + $0xa0] sm:$0xff]   ;;  %v2580_v23 = vld [vmem:[%s3285_s1 + $0xa8] sm:$0xff]  }
   0x9   :  { %2278 = vmatpush3.bf16.msra.mxu1 %v2564_v7  ;;  %2185 = vmatprep.subr.bf16.mxu0 %v2565_v8  ;;  %v2581_v24 = vld [vmem:[%s3285_s1 + $0x70] sm:$0xff]   ;;  %v2585_v28 = vld [vmem:[%s3285_s1 + $0x78] sm:$0xff]   ;;  %v15_v32 = vld [vmem:[%s3286_s0] sm:$0xff] }
   0xa   :  { %2279 = vmatprep.subr.bf16.mxu1 %v2566_v9  ;;  %v2582_v25 = vld [vmem:[%s3285_s1 + $0xf0] sm:$0xff]   ;;  %v2586_v29 = vld [vmem:[%s3285_s1 + $0xf8] sm:$0xff]   ;;  %v19_v33 = vld [vmem:[%s3286_s0 + $0x20] sm:$0xff] }
   0xb   :  { %v2583_v26 = vld [vmem:[%s3285_s1 + $0x30] sm:$0xff]   ;;  %v2587_v30 = vld [vmem:[%s3285_s1 + $0x38] sm:$0xff]   ;;  %v16_v34 = vld [vmem:[%s3286_s0 + $0x8] sm:$0xff]  ;;  %v1892_v35 = vcombine.low %v15_v32, %v19_v33  ;;  %v1893_v36 = vcombine.high %v15_v32, %v19_v33 }
   0xc   :  { %2186 = vmatpush3.bf16.msra.mxu0 %v2567_v10  ;;  %v2584_v27 = vld [vmem:[%s3285_s1 + $0xb0] sm:$0xff]   ;;  %v2588_v31 = vld [vmem:[%s3285_s1 + $0xb8] sm:$0xff]   ;;  %v20_v37 = vld [vmem:[%s3286_s0 + $0x28] sm:$0xff] }
   0xd   :  { %2280 = vmatpush3.bf16.msra.mxu1 %v2568_v11  ;;  %2187 = vmatprep.subr.bf16.mxu0 %v2569_v12  ;;  %v1894_v38 = vcombine.low %v16_v34, %v20_v37  ;;  %v1895_v39 = vcombine.high %v16_v34, %v20_v37  ;;  %v2589_v40 = vld [vmem:[%s3285_s1 + $0x140] sm:$0xff]   ;;  %v24_v47 = vld [vmem:[%s3286_s0 + $0x48] sm:$0xff]  ;;  %v2597_v2 = vld [vmem:[%s3285_s1 + $0x150] sm:$0xff]  }
   0xe   :  { %2281 = vmatprep.subr.bf16.mxu1 %v2570_v13  ;;  %1174 = vmatprep.mubr.bf16.mxu0 %v1893_v36  ;;  %v2590_v41 = vld [vmem:[%s3285_s1 + $0x100] sm:$0xff]   ;;  %v28_v48 = vld [vmem:[%s3286_s0 + $0x68] sm:$0xff]  ;;  %v2598_v3 = vld [vmem:[%s3285_s1 + $0x110] sm:$0xff]  }
   0xf   :  { %1310 = vmatprep.mubr.bf16.mxu1 %v1895_v39  ;;  %v2591_v42 = vld [vmem:[%s3285_s1 + $0x1c0] sm:$0xff]   ;;  %v1903_v49 = vcombine.high %v24_v47, %v28_v48  ;;  %v2593_v50 = vld [vmem:[%s3285_s1 + $0x148] sm:$0xff]   ;;  %v1902_v54 = vcombine.low %v24_v47, %v28_v48  ;;  %v2599_v5 = vld [vmem:[%s3285_s1 + $0x1d0] sm:$0xff]  }
  0x10   :  { %2188 = vmatpush3.bf16.msra.mxu0 %v2571_v14  ;;  %v2592_v43 = vld [vmem:[%s3285_s1 + $0x180] sm:$0xff]   ;;  %v2594_v52 = vld [vmem:[%s3285_s1 + $0x108] sm:$0xff]   ;;  %v2600_v8 = vld [vmem:[%s3285_s1 + $0x190] sm:$0xff]  }
  0x11   :  { %2282 = vmatpush3.bf16.msra.mxu1 %v2572_v15  ;;  %2189 = vmatprep.subr.bf16.mxu0 %v2573_v16  ;;  %v23_v44 = vld [vmem:[%s3286_s0 + $0x40] sm:$0xff]  ;;  %v32_v56 = vld [vmem:[%s3286_s0 + $0x88] sm:$0xff]  ;;  %v2601_v12 = vld [vmem:[%s3285_s1 + $0x158] sm:$0xff]  }
  0x12   :  { %2283 = vmatprep.subr.bf16.mxu1 %v2574_v17  ;;  %v27_v45 = vld [vmem:[%s3286_s0 + $0x60] sm:$0xff]  ;;  %v36_v57 = vld [vmem:[%s3286_s0 + $0xa8] sm:$0xff]  ;;  %v2602_v15 = vld [vmem:[%s3285_s1 + $0x118] sm:$0xff]  }
  0x13   :  { %v1901_v46 = vcombine.high %v23_v44, %v27_v45  ;;  %v1900_v51 = vcombine.low %v23_v44, %v27_v45  ;;  %v31_v53 = vld [vmem:[%s3286_s0 + $0x80] sm:$0xff]  ;;  %v1911_v59 = vcombine.high %v32_v56, %v36_v57  ;;  %v2595_v60 = vld [vmem:[%s3285_s1 + $0x1c8] sm:$0xff]   ;;  %v1910_v6 = vcombine.low %v32_v56, %v36_v57  ;;  %v2603_v16 = vld [vmem:[%s3285_s1 + $0x1d8] sm:$0xff]  }
  0x14   :  { %2190 = vmatpush3.bf16.msra.mxu0 %v2575_v18  ;;  %v35_v55 = vld [vmem:[%s3286_s0 + $0xa0] sm:$0xff]  ;;  %v2596_v61 = vld [vmem:[%s3285_s1 + $0x188] sm:$0xff]   ;;  %v2604_v17 = vld [vmem:[%s3285_s1 + $0x198] sm:$0xff]  }
  0x15   :  { %2284 = vmatpush3.bf16.msra.mxu1 %v2576_v19  ;;  %2191 = vmatprep.subr.bf16.mxu0 %v2577_v20  ;;  %v1909_v58 = vcombine.high %v31_v53, %v35_v55  ;;  %v39_v62 = vld [vmem:[%s3286_s0 + $0xc0] sm:$0xff]  ;;  %v40_v0 = vld [vmem:[%s3286_s0 + $0xc8] sm:$0xff]  ;;  %v1908_v4 = vcombine.low %v31_v53, %v35_v55  ;;  %v2614_v44 = vld [vmem:[%s3285_s1 + $0x130] sm:$0xff]  }
  0x16   :  { %2285 = vmatprep.subr.bf16.mxu1 %v2578_v21  ;;  %v43_v63 = vld [vmem:[%s3286_s0 + $0xe0] sm:$0xff]  ;;  %v44_v1 = vld [vmem:[%s3286_s0 + $0xe8] sm:$0xff]  ;;  %v2615_v47 = vld [vmem:[%s3285_s1 + $0x1f0] sm:$0xff]  }
  0x17   :  { %v1917_v7 = vcombine.high %v39_v62, %v43_v63  ;;  %v1919_v9 = vcombine.high %v40_v0, %v44_v1  ;;  %v47_v10 = vld [vmem:[%s3286_s0 + $0x100] sm:$0xff]  ;;  %v48_v13 = vld [vmem:[%s3286_s0 + $0x108] sm:$0xff]  ;;  %v1916_v18 = vcombine.low %v39_v62, %v43_v63  ;;  %v1918_v19 = vcombine.low %v40_v0, %v44_v1  ;;  %v2618_v55 = vld [vmem:[%s3285_s1 + $0x138] sm:$0xff]  }
  0x18   :  { %2192 = vmatpush3.bf16.msra.mxu0 %v2579_v22  ;;  %v51_v11 = vld [vmem:[%s3286_s0 + $0x120] sm:$0xff]  ;;  %v52_v14 = vld [vmem:[%s3286_s0 + $0x128] sm:$0xff]  ;;  %v2619_v56 = vld [vmem:[%s3285_s1 + $0x1f8] sm:$0xff]  }
  0x19   :  { %2286 = vmatpush3.bf16.msra.mxu1 %v2580_v23  ;;  %2193 = vmatprep.subr.bf16.mxu0 %v2581_v24  ;;  %v1925_v20 = vcombine.high %v47_v10, %v51_v11  ;;  %v1927_v21 = vcombine.high %v48_v13, %v52_v14  ;;  %v2605_v22 = vld [vmem:[%s3285_s1 + $0x160] sm:$0xff]   ;;  %v1926_v32 = vcombine.low %v48_v13, %v52_v14  ;;  %v2610_v34 = vld [vmem:[%s3285_s1 + $0x128] sm:$0xff]   ;;  %v2620_v57 = vld [vmem:[%s3285_s1 + $0x1b8] sm:$0xff]  }
  0x1a   :  { %2287 = vmatprep.subr.bf16.mxu1 %v2582_v25  ;;  %v2606_v23 = vld [vmem:[%s3285_s1 + $0x120] sm:$0xff]   ;;  %v2611_v36 = vld [vmem:[%s3285_s1 + $0x1e8] sm:$0xff]  }
  0x1b   :  { %v2607_v24 = vld [vmem:[%s3285_s1 + $0x1e0] sm:$0xff]   ;;  %v2612_v37 = vld [vmem:[%s3285_s1 + $0x1a8] sm:$0xff]  }
  0x1c   :  { %2194 = vmatpush3.bf16.msra.mxu0 %v2583_v26  ;;  %v55_v25 = vld [vmem:[%s3286_s0 + $0x140] sm:$0xff]  ;;  %v72_v53 = vld [vmem:[%s3286_s0 + $0x1c8] sm:$0xff] }
  0x1d   :  { %2288 = vmatpush3.bf16.msra.mxu1 %v2584_v27  ;;  %2195 = vmatprep.subr.bf16.mxu0 %v2585_v28  ;;  %v59_v26 = vld [vmem:[%s3286_s0 + $0x160] sm:$0xff]  ;;  %v56_v28 = vld [vmem:[%s3286_s0 + $0x148] sm:$0xff] }
  0x1e   :  { %2289 = vmatprep.subr.bf16.mxu1 %v2586_v29  ;;  %v2608_v27 = vld [vmem:[%s3285_s1 + $0x1a0] sm:$0xff]   ;;  %v60_v29 = vld [vmem:[%s3286_s0 + $0x168] sm:$0xff]  ;;  %v1933_v33 = vcombine.high %v55_v25, %v59_v26 }
  0x1f   :  { %v67_v39 = vld [vmem:[%s3286_s0 + $0x1a0] sm:$0xff]  ;;  %v1934_v45 = vcombine.low %v56_v28, %v60_v29  ;;  %v80_v0 = vld [vmem:[%s3286_s0 + $0x208] sm:$0xff] }
  0x20   :  { %2196 = vmatpush3.bf16.msra.mxu0 %v2587_v30  ;;  %v1924_v30 = vcombine.low %v47_v10, %v51_v11  ;;  %v79_v62 = vld [vmem:[%s3286_s0 + $0x200] sm:$0xff]  ;;  %v84_v1 = vld [vmem:[%s3286_s0 + $0x228] sm:$0xff] }
  0x21   :  { %2290 = vmatpush3.bf16.msra.mxu1 %v2588_v31  ;;  %2369 = vmatprep.subr.bf16.mxu0 %v2589_v40  ;;  %v2609_v31 = vld [vmem:[%s3285_s1 + $0x168] sm:$0xff]   ;;  %v2613_v40 = vld [vmem:[%s3285_s1 + $0x170] sm:$0xff]   ;;  %v83_v63 = vld [vmem:[%s3286_s0 + $0x220] sm:$0xff]  ;;  %v1958_v11 = vcombine.low %v80_v0, %v84_v1 }
  0x22   :  { %2463 = vmatprep.subr.bf16.mxu1 %v2591_v42  ;;  %v68_v42 = vld [vmem:[%s3286_s0 + $0x1a8] sm:$0xff]  ;;  %v1956_v10 = vcombine.low %v79_v62, %v83_v63  ;;  %v95_v14 = vld [vmem:[%s3286_s0 + $0x280] sm:$0xff] }
  0x23   :  { %1175 = vmatmul.mubr.bf16.vlgmr.msra.gmra.mrb[0].mxu0 %v1892_v35  ;;  %v1935_v35 = vcombine.high %v56_v28, %v60_v29 }
  0x24   :  { %1311 = vmatmul.mubr.bf16.vlgmr.msra.gmra.mrb[0].mxu1 %v1894_v38  ;;  %2370 = vmatpush3.bf16.msra.mxu0 %v2590_v41  ;;  %v63_v38 = vld [vmem:[%s3286_s0 + $0x180] sm:$0xff]  ;;  %v64_v41 = vld [vmem:[%s3286_s0 + $0x188] sm:$0xff] }
  0x25   :  { %2464 = vmatpush3.bf16.msra.mxu1 %v2592_v43  ;;  %1182 = vmatprep.mubr.bf16.mxu0 %v1901_v46  ;;  %v1932_v43 = vcombine.low %v55_v25, %v59_v26  ;;  %v1941_v46 = vcombine.high %v63_v38, %v67_v39  ;;  %v1943_v48 = vcombine.high %v64_v41, %v68_v42  ;;  %v108_v25 = vld [vmem:[%s3286_s0 + $0x2e8] sm:$0xff] }
  0x26   :  { %1318 = vmatprep.mubr.bf16.mxu1 %v1903_v49  ;;  %2371 = vmatprep.subr.bf16.mxu0 %v2593_v50  ;;  %v2616_v49 = vld [vmem:[%s3285_s1 + $0x1b0] sm:$0xff]   ;;  %v71_v50 = vld [vmem:[%s3286_s0 + $0x1c0] sm:$0xff] }
  0x27   :  { %2465 = vmatprep.subr.bf16.mxu1 %v2595_v60 }
  0x28   :  { %2372 = vmatpush3.bf16.msra.mxu0 %v2594_v52  ;;  %v2617_v52 = vld [vmem:[%s3285_s1 + $0x178] sm:$0xff]  }
  0x29   :  { %2466 = vmatpush3.bf16.msra.mxu1 %v2596_v61  ;;  %2373 = vmatprep.subr.bf16.mxu0 %v2597_v2 }
  0x2a   :  { %2467 = vmatprep.subr.bf16.mxu1 %v2599_v5  ;;  %v1959_v5 = vcombine.high %v80_v0, %v84_v1 }
  0x2b   :  { %1183 = vmatmul.mubr.bf16.gmra.mrb[4].mxu0 %v1900_v51  ;;  %v75_v51 = vld [vmem:[%s3286_s0 + $0x1e0] sm:$0xff] }
  0x2c   :  { %1319 = vmatmul.mubr.bf16.gmra.mrb[4].mxu1 %v1902_v54  ;;  %1190 = vmatprep.mubr.bf16.mxu0 %v1909_v58  ;;  %v76_v54 = vld [vmem:[%s3286_s0 + $0x1e8] sm:$0xff]  ;;  %v1940_v58 = vcombine.low %v63_v38, %v67_v39  ;;  %v1949_v60 = vcombine.high %v71_v50, %v75_v51  ;;  %v1948_v2 = vcombine.low %v71_v50, %v75_v51  ;;  %v18_v38 = vld [vmem:[%s3286_s0 + $0x18] sm:$0xff] }
  0x2d   :  { %1326 = vmatprep.mubr.bf16.mxu1 %v1911_v59  ;;  %2374 = vmatpush3.bf16.msra.mxu0 %v2598_v3  ;;  %v1942_v59 = vcombine.low %v64_v41, %v68_v42  ;;  %v1951_v61 = vcombine.high %v72_v53, %v76_v54  ;;  %v1950_v3 = vcombine.low %v72_v53, %v76_v54  ;;  %v22_v39 = vld [vmem:[%s3286_s0 + $0x38] sm:$0xff]  ;;  %v37_v53 = vld [vmem:[%s3286_s0 + $0xb0] sm:$0xff] }
  0x2e   :  { %2468 = vmatpush3.bf16.msra.mxu1 %v2600_v8  ;;  %2375 = vmatprep.subr.bf16.mxu0 %v2601_v12  ;;  %v88_v8 = vld [vmem:[%s3286_s0 + $0x248] sm:$0xff]  ;;  %v34_v54 = vld [vmem:[%s3286_s0 + $0x98] sm:$0xff] }
  0x2f   :  { %2469 = vmatprep.subr.bf16.mxu1 %v2603_v16  ;;  %v96_v16 = vld [vmem:[%s3286_s0 + $0x288] sm:$0xff] }
  0x31   :  { %2376 = vmatpush3.bf16.msra.mxu0 %v2602_v15  ;;  %v99_v15 = vld [vmem:[%s3286_s0 + $0x2a0] sm:$0xff] }
  0x32   :  { %2470 = vmatpush3.bf16.msra.mxu1 %v2604_v17  ;;  %2377 = vmatprep.subr.bf16.mxu0 %v2605_v22  ;;  %v100_v17 = vld [vmem:[%s3286_s0 + $0x2a8] sm:$0xff]  ;;  %v103_v22 = vld [vmem:[%s3286_s0 + $0x2c0] sm:$0xff]  ;;  %v1972_v26 = vcombine.low %v95_v14, %v99_v15 }
  0x33   :  { %1191 = vmatmul.mubr.bf16.gmra.mrb[8].mxu0 %v1908_v4  ;;  %2471 = vmatprep.subr.bf16.mxu1 %v2607_v24  ;;  %v1957_v4 = vcombine.high %v79_v62, %v83_v63  ;;  %v104_v24 = vld [vmem:[%s3286_s0 + $0x2c8] sm:$0xff]  ;;  %v42_v62 = vld [vmem:[%s3286_s0 + $0xd8] sm:$0xff] }
  0x34   :  { %1327 = vmatmul.mubr.bf16.gmra.mrb[8].mxu1 %v1910_v6  ;;  %1198 = vmatprep.mubr.bf16.mxu0 %v1917_v7  ;;  %v87_v6 = vld [vmem:[%s3286_s0 + $0x240] sm:$0xff]  ;;  %v1983_v29 = vcombine.high %v104_v24, %v108_v25  ;;  %v46_v63 = vld [vmem:[%s3286_s0 + $0xf8] sm:$0xff] }
  0x35   :  { %1334 = vmatprep.mubr.bf16.mxu1 %v1919_v9  ;;  %2378 = vmatpush3.bf16.msra.mxu0 %v2606_v23  ;;  %v91_v7 = vld [vmem:[%s3286_s0 + $0x260] sm:$0xff]  ;;  %v92_v9 = vld [vmem:[%s3286_s0 + $0x268] sm:$0xff] }
  0x36   :  { %2472 = vmatpush3.bf16.msra.mxu1 %v2608_v27  ;;  %2379 = vmatprep.subr.bf16.mxu0 %v2609_v31  ;;  %v1965_v12 = vcombine.high %v87_v6, %v91_v7  ;;  %v1967_v13 = vcombine.high %v88_v8, %v92_v9  ;;  %v107_v23 = vld [vmem:[%s3286_s0 + $0x2e0] sm:$0xff]  ;;  %v1974_v27 = vcombine.low %v96_v16, %v100_v17  ;;  %v112_v31 = vld [vmem:[%s3286_s0 + $0x308] sm:$0xff] }
  0x37   :  { %2473 = vmatprep.subr.bf16.mxu1 %v2611_v36  ;;  %v1981_v28 = vcombine.high %v103_v22, %v107_v23  ;;  %v17_v36 = vld [vmem:[%s3286_s0 + $0x10] sm:$0xff]  ;;  %v1990_v41 = vcombine.low %v112_v31, %v112_v31 }
  0x39   :  { %2380 = vmatpush3.bf16.msra.mxu0 %v2610_v34 }
  0x3a   :  { %2474 = vmatpush3.bf16.msra.mxu1 %v2612_v37  ;;  %2381 = vmatprep.subr.bf16.mxu0 %v2613_v40  ;;  %v21_v37 = vld [vmem:[%s3286_s0 + $0x30] sm:$0xff] }
  0x3b   :  { %1199 = vmatmul.mubr.bf16.gmra.mrb[12].mxu0 %v1916_v18  ;;  %2475 = vmatprep.subr.bf16.mxu1 %v2615_v47  ;;  %v1964_v18 = vcombine.low %v87_v6, %v91_v7  ;;  %v1897_v42 = vcombine.high %v17_v36, %v21_v37  ;;  %v30_v47 = vld [vmem:[%s3286_s0 + $0x78] sm:$0xff] }
  0x3c   :  { %1335 = vmatmul.mubr.bf16.gmra.mrb[12].mxu1 %v1918_v19  ;;  %1206 = vmatprep.mubr.bf16.mxu0 %v1925_v20  ;;  %v1966_v19 = vcombine.low %v88_v8, %v92_v9  ;;  %v1973_v20 = vcombine.high %v95_v14, %v99_v15  ;;  %v50_v6 = vld [vmem:[%s3286_s0 + $0x118] sm:$0xff]  ;;  %v1922_v9 = vcombine.low %v42_v62, %v46_v63 }
  0x3d   :  { %1342 = vmatprep.mubr.bf16.mxu1 %v1927_v21  ;;  %2382 = vmatpush3.bf16.msra.mxu0 %v2614_v44  ;;  %v1975_v21 = vcombine.high %v96_v16, %v100_v17  ;;  %v25_v44 = vld [vmem:[%s3286_s0 + $0x50] sm:$0xff]  ;;  %v54_v7 = vld [vmem:[%s3286_s0 + $0x138] sm:$0xff] }
  0x3e   :  { %2476 = vmatpush3.bf16.msra.mxu1 %v2616_v49  ;;  %2383 = vmatprep.subr.bf16.mxu0 %v2617_v52  ;;  %v1898_v49 = vcombine.low %v18_v38, %v22_v39  ;;  %v33_v52 = vld [vmem:[%s3286_s0 + $0x90] sm:$0xff]  ;;  %v58_v14 = vld [vmem:[%s3286_s0 + $0x158] sm:$0xff]  ;;  %v1930_v17 = vcombine.low %v50_v6, %v54_v7 }
  0x3f   :  { %2477 = vmatprep.subr.bf16.mxu1 %v2619_v56  ;;  %v1912_v0 = vcombine.low %v33_v52, %v37_v53  ;;  %v62_v15 = vld [vmem:[%s3286_s0 + $0x178] sm:$0xff] }
  0x41   :  { %2384 = vmatpush3.bf16.msra.mxu0 %v2618_v55  ;;  %v38_v55 = vld [vmem:[%s3286_s0 + $0xb8] sm:$0xff] }
  0x42   :  { %2478 = vmatpush3.bf16.msra.mxu1 %v2620_v57  ;;  %v1914_v1 = vcombine.low %v34_v54, %v38_v55 }
  0x43   :  { %1207 = vmatmul.mubr.bf16.gmra.mrb[16].mxu0 %v1924_v30  ;;  %v111_v30 = vld [vmem:[%s3286_s0 + $0x300] sm:$0xff] }
  0x44   :  { %1343 = vmatmul.mubr.bf16.gmra.mrb[16].mxu1 %v1926_v32  ;;  %1214 = vmatprep.mubr.bf16.mxu0 %v1933_v33  ;;  %v1980_v32 = vcombine.low %v103_v22, %v107_v23  ;;  %v1982_v33 = vcombine.low %v104_v24, %v108_v25  ;;  %v1989_v34 = vcombine.high %v111_v30, %v111_v30  ;;  %v66_v22 = vld [vmem:[%s3286_s0 + $0x198] sm:$0xff] }
  0x45   :  { %1350 = vmatprep.mubr.bf16.mxu1 %v1935_v35  ;;  %v1991_v35 = vcombine.high %v112_v31, %v112_v31  ;;  %v1988_v40 = vcombine.low %v111_v30, %v111_v30  ;;  %v70_v23 = vld [vmem:[%s3286_s0 + $0x1b8] sm:$0xff]  ;;  %v1938_v25 = vcombine.low %v58_v14, %v62_v15 }
  0x46   :  { %v74_v30 = vld [vmem:[%s3286_s0 + $0x1d8] sm:$0xff] }
  0x47   :  { %v78_v31 = vld [vmem:[%s3286_s0 + $0x1f8] sm:$0xff] }
  0x4b   :  { %1215 = vmatmul.mubr.bf16.gmra.mrb[20].mxu0 %v1932_v43  ;;  %v1899_v43 = vcombine.high %v18_v38, %v22_v39  ;;  %v82_v38 = vld [vmem:[%s3286_s0 + $0x218] sm:$0xff] }
  0x4c   :  { %1351 = vmatmul.mubr.bf16.gmra.mrb[20].mxu1 %v1934_v45  ;;  %1222 = vmatprep.mubr.bf16.mxu0 %v1941_v46  ;;  %v29_v45 = vld [vmem:[%s3286_s0 + $0x70] sm:$0xff]  ;;  %v26_v46 = vld [vmem:[%s3286_s0 + $0x58] sm:$0xff] }
  0x4d   :  { %1358 = vmatprep.mubr.bf16.mxu1 %v1943_v48  ;;  %v1896_v48 = vcombine.low %v17_v36, %v21_v37  ;;  %v1905_v50 = vcombine.high %v25_v44, %v29_v45  ;;  %v1907_v51 = vcombine.high %v26_v46, %v30_v47  ;;  %v1904_v56 = vcombine.low %v25_v44, %v29_v45  ;;  %v81_v36 = vld [vmem:[%s3286_s0 + $0x210] sm:$0xff]  ;;  %v86_v39 = vld [vmem:[%s3286_s0 + $0x238] sm:$0xff] }
  0x4e   :  { %v1906_v57 = vcombine.low %v26_v46, %v30_v47  ;;  %v85_v37 = vld [vmem:[%s3286_s0 + $0x230] sm:$0xff]  ;;  %v90_v46 = vld [vmem:[%s3286_s0 + $0x258] sm:$0xff] }
  0x4f   :  { %v89_v44 = vld [vmem:[%s3286_s0 + $0x250] sm:$0xff]  ;;  %v94_v47 = vld [vmem:[%s3286_s0 + $0x278] sm:$0xff] }
  0x50   :  { %v93_v45 = vld [vmem:[%s3286_s0 + $0x270] sm:$0xff] }
  0x53   :  { %1223 = vmatmul.mubr.bf16.gmra.mrb[24].mxu0 %v1940_v58  ;;  %v1913_v58 = vcombine.high %v33_v52, %v37_v53  ;;  %v97_v52 = vld [vmem:[%s3286_s0 + $0x290] sm:$0xff] }
  0x54   :  { %1359 = vmatmul.mubr.bf16.gmra.mrb[24].mxu1 %v1942_v59  ;;  %1230 = vmatprep.mubr.bf16.mxu0 %v1949_v60  ;;  %v1915_v59 = vcombine.high %v34_v54, %v38_v55  ;;  %v41_v60 = vld [vmem:[%s3286_s0 + $0xd0] sm:$0xff]  ;;  %v98_v54 = vld [vmem:[%s3286_s0 + $0x298] sm:$0xff] }
  0x55   :  { %1366 = vmatprep.mubr.bf16.mxu1 %v1951_v61  ;;  %v45_v61 = vld [vmem:[%s3286_s0 + $0xf0] sm:$0xff]  ;;  %v102_v55 = vld [vmem:[%s3286_s0 + $0x2b8] sm:$0xff] }
  0x56   :  { %v1920_v8 = vcombine.low %v41_v60, %v45_v61  ;;  %v101_v53 = vld [vmem:[%s3286_s0 + $0x2b0] sm:$0xff] }
  0x5b   :  { %1231 = vmatmul.mubr.bf16.gmra.mrb[28].mxu0 %v1948_v2  ;;  %v1921_v2 = vcombine.high %v41_v60, %v45_v61  ;;  %v105_v60 = vld [vmem:[%s3286_s0 + $0x2d0] sm:$0xff] }
  0x5c   :  { %1367 = vmatmul.mubr.bf16.gmra.mrb[28].mxu1 %v1950_v3  ;;  %1238 = vmatprep.mubr.bf16.mxu0 %v1957_v4  ;;  %v1923_v3 = vcombine.high %v42_v62, %v46_v63  ;;  %v49_v4 = vld [vmem:[%s3286_s0 + $0x110] sm:$0xff]  ;;  %v106_v62 = vld [vmem:[%s3286_s0 + $0x2d8] sm:$0xff] }
  0x5d   :  { %1374 = vmatprep.mubr.bf16.mxu1 %v1959_v5  ;;  %v53_v5 = vld [vmem:[%s3286_s0 + $0x130] sm:$0xff]  ;;  %v110_v63 = vld [vmem:[%s3286_s0 + $0x2f8] sm:$0xff] }
  0x5e   :  { %v1928_v16 = vcombine.low %v49_v4, %v53_v5  ;;  %v109_v61 = vld [vmem:[%s3286_s0 + $0x2f0] sm:$0xff] }
  0x63   :  { %1239 = vmatmul.mubr.bf16.gmra.mrb[32].mxu0 %v1956_v10  ;;  %v1929_v10 = vcombine.high %v49_v4, %v53_v5  ;;  %v113_v4 = vld [vmem:[%s3286_s0 + $0x310] sm:$0xff]  ;;  %v114_v5 = vld [vmem:[%s3286_s0 + $0x318] sm:$0xff] }
  0x64   :  { %1375 = vmatmul.mubr.bf16.gmra.mrb[32].mxu1 %v1958_v11  ;;  %1246 = vmatprep.mubr.bf16.mxu0 %v1965_v12  ;;  %v1931_v11 = vcombine.high %v50_v6, %v54_v7  ;;  %v57_v12 = vld [vmem:[%s3286_s0 + $0x150] sm:$0xff]  ;;  %v1984_v6 = vcombine.low %v105_v60, %v109_v61  ;;  %v1986_v7 = vcombine.low %v106_v62, %v110_v63 }
  0x65   :  { %1382 = vmatprep.mubr.bf16.mxu1 %v1967_v13  ;;  %v61_v13 = vld [vmem:[%s3286_s0 + $0x170] sm:$0xff] }
  0x66   :  { %v1936_v24 = vcombine.low %v57_v12, %v61_v13 }
  0x6b   :  { %1247 = vmatmul.mubr.bf16.gmra.mrb[36].mxu0 %v1964_v18  ;;  %v1937_v18 = vcombine.high %v57_v12, %v61_v13 }
  0x6c   :  { %1383 = vmatmul.mubr.bf16.gmra.mrb[36].mxu1 %v1966_v19  ;;  %1254 = vmatprep.mubr.bf16.mxu0 %v1973_v20  ;;  %v1939_v19 = vcombine.high %v58_v14, %v62_v15  ;;  %v65_v20 = vld [vmem:[%s3286_s0 + $0x190] sm:$0xff]  ;;  %v3144_v14 = vld [vmem:[%s3287_s2] ss:$0 sm:$0xff] }
  0x6d   :  { %1390 = vmatprep.mubr.bf16.mxu1 %v1975_v21  ;;  %v69_v21 = vld [vmem:[%s3286_s0 + $0x1b0] sm:$0xff] }
  0x73   :  { %1255 = vmatmul.mubr.bf16.gmra.mrb[40].mxu0 %v1972_v26  ;;  %v1945_v26 = vcombine.high %v65_v20, %v69_v21 }
  0x74   :  { %1391 = vmatmul.mubr.bf16.gmra.mrb[40].mxu1 %v1974_v27  ;;  %1262 = vmatprep.mubr.bf16.mxu0 %v1981_v28  ;;  %v1947_v27 = vcombine.high %v66_v22, %v70_v23  ;;  %v73_v28 = vld [vmem:[%s3286_s0 + $0x1d0] sm:$0xff] }
  0x75   :  { %1398 = vmatprep.mubr.bf16.mxu1 %v1983_v29  ;;  %v77_v29 = vld [vmem:[%s3286_s0 + $0x1f0] sm:$0xff] }
  0x7b   :  { %1263 = vmatmul.mubr.bf16.gmra.mrb[44].mxu0 %v1980_v32  ;;  %v1944_v32 = vcombine.low %v65_v20, %v69_v21 }
  0x7c   :  { %1399 = vmatmul.mubr.bf16.gmra.mrb[44].mxu1 %v1982_v33  ;;  %1270 = vmatprep.mubr.bf16.mxu0 %v1989_v34  ;;  %v1946_v33 = vcombine.low %v66_v22, %v70_v23  ;;  %v1953_v34 = vcombine.high %v73_v28, %v77_v29 }
  0x7d   :  { %1406 = vmatprep.mubr.bf16.mxu1 %v1991_v35  ;;  %v1955_v35 = vcombine.high %v74_v30, %v78_v31 }
  0x83   :  { %1271 = vmatmul.mubr.bf16.gmra.mrb[48].mxu0 %v1988_v40  ;;  %v1952_v40 = vcombine.low %v73_v28, %v77_v29 }
  0x84   :  { %1407 = vmatmul.mubr.bf16.gmra.mrb[48].mxu1 %v1990_v41  ;;  %1446 = vmatprep.mubr.bf16.mxu0 %v1897_v42  ;;  %v1954_v41 = vcombine.low %v74_v30, %v78_v31  ;;  %v1961_v42 = vcombine.high %v81_v36, %v85_v37 }
  0x85   :  { %1582 = vmatprep.mubr.bf16.mxu1 %v1899_v43  ;;  %v1963_v43 = vcombine.high %v82_v38, %v86_v39 }
  0x8b   :  { %1447 = vmatmul.mubr.bf16.vlgmr.msra.gmra.mrb[52].mxu0 %v1896_v48  ;;  %v1960_v48 = vcombine.low %v81_v36, %v85_v37 }
  0x8c   :  { %1583 = vmatmul.mubr.bf16.vlgmr.msra.gmra.mrb[52].mxu1 %v1898_v49  ;;  %1454 = vmatprep.mubr.bf16.mxu0 %v1905_v50  ;;  %v1962_v49 = vcombine.low %v82_v38, %v86_v39  ;;  %v1969_v50 = vcombine.high %v89_v44, %v93_v45 }
  0x8d   :  { %1590 = vmatprep.mubr.bf16.mxu1 %v1907_v51  ;;  %v1971_v51 = vcombine.high %v90_v46, %v94_v47 }
  0x93   :  { %1455 = vmatmul.mubr.bf16.gmra.mrb[56].mxu0 %v1904_v56  ;;  %v1968_v56 = vcombine.low %v89_v44, %v93_v45 }
  0x94   :  { %1591 = vmatmul.mubr.bf16.gmra.mrb[56].mxu1 %v1906_v57  ;;  %1462 = vmatprep.mubr.bf16.mxu0 %v1913_v58  ;;  %v1970_v57 = vcombine.low %v90_v46, %v94_v47  ;;  %v1977_v58 = vcombine.high %v97_v52, %v101_v53 }
  0x95   :  { %1598 = vmatprep.mubr.bf16.mxu1 %v1915_v59  ;;  %v1979_v59 = vcombine.high %v98_v54, %v102_v55 }
  0x9b   :  { %1463 = vmatmul.mubr.bf16.gmra.mrb[60].mxu0 %v1912_v0  ;;  %v1976_v0 = vcombine.low %v97_v52, %v101_v53 }
  0x9c   :  { %1599 = vmatmul.mubr.bf16.gmra.mrb[60].mxu1 %v1914_v1  ;;  %1470 = vmatprep.mubr.bf16.mxu0 %v1921_v2  ;;  %v1978_v1 = vcombine.low %v98_v54, %v102_v55  ;;  %v1985_v2 = vcombine.high %v105_v60, %v109_v61 }
  0x9d   :  { %1606 = vmatprep.mubr.bf16.mxu1 %v1923_v3  ;;  %v1987_v3 = vcombine.high %v106_v62, %v110_v63 }
  0xa3   :  { %1471 = vmatmul.mubr.bf16.gmra.mrb[64].mxu0 %v1920_v8  ;;  %v1993_v8 = vcombine.high %v113_v4, %v113_v4 }
  0xa4   :  { %1607 = vmatmul.mubr.bf16.gmra.mrb[64].mxu1 %v1922_v9  ;;  %1478 = vmatprep.mubr.bf16.mxu0 %v1929_v10  ;;  %v1995_v9 = vcombine.high %v114_v5, %v114_v5  ;;  %v1992_v10 = vcombine.low %v113_v4, %v113_v4 }
  0xa5   :  { %1614 = vmatprep.mubr.bf16.mxu1 %v1931_v11  ;;  %v1994_v11 = vcombine.low %v114_v5, %v114_v5 }
  0xab   :  { %1479 = vmatmul.mubr.bf16.gmra.mrb[68].mxu0 %v1928_v16 }
  0xac   :  { %1615 = vmatmul.mubr.bf16.gmra.mrb[68].mxu1 %v1930_v17  ;;  %1486 = vmatprep.mubr.bf16.mxu0 %v1937_v18 }
  0xad   :  { %1622 = vmatprep.mubr.bf16.mxu1 %v1939_v19 }
  0xb3   :  { %1487 = vmatmul.mubr.bf16.gmra.mrb[72].mxu0 %v1936_v24 }
  0xb4   :  { %1623 = vmatmul.mubr.bf16.gmra.mrb[72].mxu1 %v1938_v25  ;;  %1494 = vmatprep.mubr.bf16.mxu0 %v1945_v26 }
  0xb5   :  { %1630 = vmatprep.mubr.bf16.mxu1 %v1947_v27 }
  0xbb   :  { %1495 = vmatmul.mubr.bf16.gmra.mrb[76].mxu0 %v1944_v32 }
  0xbc   :  { %1631 = vmatmul.mubr.bf16.gmra.mrb[76].mxu1 %v1946_v33  ;;  %1502 = vmatprep.mubr.bf16.mxu0 %v1953_v34 }
  0xbd   :  { %1638 = vmatprep.mubr.bf16.mxu1 %v1955_v35 }
  0xc3   :  { %1503 = vmatmul.mubr.bf16.gmra.mrb[80].mxu0 %v1952_v40 }
  0xc4   :  { %1639 = vmatmul.mubr.bf16.gmra.mrb[80].mxu1 %v1954_v41  ;;  %1510 = vmatprep.mubr.bf16.mxu0 %v1961_v42 }
  0xc5   :  { %1646 = vmatprep.mubr.bf16.mxu1 %v1963_v43 }
  0xcb   :  { %1511 = vmatmul.mubr.bf16.gmra.mrb[84].mxu0 %v1960_v48 }
  0xcc   :  { %1647 = vmatmul.mubr.bf16.gmra.mrb[84].mxu1 %v1962_v49  ;;  %1518 = vmatprep.mubr.bf16.mxu0 %v1969_v50 }
  0xcd   :  { %1654 = vmatprep.mubr.bf16.mxu1 %v1971_v51 }
  0xd3   :  { %1519 = vmatmul.mubr.bf16.gmra.mrb[88].mxu0 %v1968_v56 }
  0xd4   :  { %1655 = vmatmul.mubr.bf16.gmra.mrb[88].mxu1 %v1970_v57  ;;  %1526 = vmatprep.mubr.bf16.mxu0 %v1977_v58 }
  0xd5   :  { %1662 = vmatprep.mubr.bf16.mxu1 %v1979_v59 }
  0xdb   :  { %1527 = vmatmul.mubr.bf16.gmra.mrb[92].mxu0 %v1976_v0 }
  0xdc   :  { %1663 = vmatmul.mubr.bf16.gmra.mrb[92].mxu1 %v1978_v1  ;;  %1534 = vmatprep.mubr.bf16.mxu0 %v1985_v2 }
  0xdd   :  { %1670 = vmatprep.mubr.bf16.mxu1 %v1987_v3 }
  0xe3   :  { %1535 = vmatmul.mubr.bf16.gmra.mrb[96].mxu0 %v1984_v6 }
  0xe4   :  { %1671 = vmatmul.mubr.bf16.gmra.mrb[96].mxu1 %v1986_v7  ;;  %1542 = vmatprep.mubr.bf16.mxu0 %v1993_v8 }
  0xe5   :  { %1678 = vmatprep.mubr.bf16.mxu1 %v1995_v9 }
  0xeb   :  { %1543 = vmatmul.mubr.bf16.gmra.mrb[100].mxu0 %v1992_v10 }
  0xec   :  { %1679 = vmatmul.mubr.bf16.gmra.mrb[100].mxu1 %v1994_v11 }
  0xf6   :  { %v2197_v12 = vpop.f32.mrb[0].mxu0 }
  0xf7   :  { %v2291_v13 = vpop.f32.mrb[0].mxu1  ;;  %v2198_v15 = vpop.f32.mrb[1].mxu0 }
  0xf8   :  { %v2199_v16 = vadd.f32 %v2198_v15, %v2197_v12  ;;  %v2292_v17 = vpop.f32.mrb[1].mxu1  ;;  %v2200_v18 = vpop.f32.mrb[2].mxu0 }
  0xf9   :  { %v2293_v19 = vadd.f32 %v2292_v17, %v2291_v13  ;;  %v2294_v20 = vpop.f32.mrb[2].mxu1  ;;  %v2201_v21 = vpop.f32.mrb[3].mxu0 }
  0xfa   :  { %v1177_v22 = vadd.f32 %v2199_v16, %v3144_v14  ;;  %v2202_v23 = vadd.f32 %v2201_v21, %v2200_v18  ;;  %v2295_v24 = vpop.f32.mrb[3].mxu1 }
  0xfb   :  { %v2296_v25 = vadd.f32 %v2295_v24, %v2294_v20 }
  0xfc   :  { %v3147_v26 = vadd.f32 %v2293_v19, %v1177_v22  ;;  %v1180_v27 = vadd.f32 %v2202_v23, %v3144_v14 }
  0xfe   :  { %v3150_v28 = vadd.f32 %v2296_v25, %v1180_v27  ;;  %v2203_v29 = vpop.f32.mrb[4].mxu0 }
  0xff   :  { %v2297_v30 = vpop.f32.mrb[4].mxu1  ;;  %v2204_v31 = vpop.f32.mrb[5].mxu0 }
 0x100   :  { %v2205_v32 = vadd.f32 %v2204_v31, %v2203_v29  ;;  %v2298_v33 = vpop.f32.mrb[5].mxu1  ;;  %v2206_v34 = vpop.f32.mrb[6].mxu0 }
 0x101   :  { %v2299_v35 = vadd.f32 %v2298_v33, %v2297_v30  ;;  %v2300_v36 = vpop.f32.mrb[6].mxu1  ;;  %v2207_v37 = vpop.f32.mrb[7].mxu0 }
 0x102   :  { %v1185_v38 = vadd.f32 %v2205_v32, %v3144_v14  ;;  %v2208_v39 = vadd.f32 %v2207_v37, %v2206_v34  ;;  %v2301_v40 = vpop.f32.mrb[7].mxu1 }
 0x103   :  { %v2302_v41 = vadd.f32 %v2301_v40, %v2300_v36 }
 0x104   :  { %v3153_v42 = vadd.f32 %v2299_v35, %v1185_v38  ;;  %v1188_v43 = vadd.f32 %v2208_v39, %v3144_v14 }
 0x106   :  { %v3156_v44 = vadd.f32 %v2302_v41, %v1188_v43  ;;  %v2209_v45 = vpop.f32.mrb[8].mxu0 }
 0x107   :  { %v2303_v46 = vpop.f32.mrb[8].mxu1  ;;  %v2210_v47 = vpop.f32.mrb[9].mxu0 }
 0x108   :  { %v2211_v48 = vadd.f32 %v2210_v47, %v2209_v45  ;;  %v2304_v49 = vpop.f32.mrb[9].mxu1  ;;  %v2212_v50 = vpop.f32.mrb[10].mxu0 }
 0x109   :  { %v2305_v51 = vadd.f32 %v2304_v49, %v2303_v46  ;;  %v2306_v52 = vpop.f32.mrb[10].mxu1  ;;  %v2213_v53 = vpop.f32.mrb[11].mxu0 }
 0x10a   :  { %v1193_v54 = vadd.f32 %v2211_v48, %v3144_v14  ;;  %v2214_v55 = vadd.f32 %v2213_v53, %v2212_v50  ;;  %v2307_v56 = vpop.f32.mrb[11].mxu1 }
 0x10b   :  { %v2308_v57 = vadd.f32 %v2307_v56, %v2306_v52 }
 0x10c   :  { %v3159_v58 = vadd.f32 %v2305_v51, %v1193_v54  ;;  %v1196_v59 = vadd.f32 %v2214_v55, %v3144_v14 }
 0x10e   :  { %v3162_v60 = vadd.f32 %v2308_v57, %v1196_v59  ;;  %v2215_v61 = vpop.f32.mrb[12].mxu0 }
 0x10f   :  { %v2309_v62 = vpop.f32.mrb[12].mxu1  ;;  %v2216_v63 = vpop.f32.mrb[13].mxu0 }
 0x110   :  { %v2217_v0 = vadd.f32 %v2216_v63, %v2215_v61  ;;  %v2310_v1 = vpop.f32.mrb[13].mxu1  ;;  %v2218_v2 = vpop.f32.mrb[14].mxu0 }
 0x111   :  { %v2311_v3 = vadd.f32 %v2310_v1, %v2309_v62  ;;  %v2312_v4 = vpop.f32.mrb[14].mxu1  ;;  %v2219_v5 = vpop.f32.mrb[15].mxu0 }
 0x112   :  { %v1201_v6 = vadd.f32 %v2217_v0, %v3144_v14  ;;  %v2220_v7 = vadd.f32 %v2219_v5, %v2218_v2  ;;  %v2313_v8 = vpop.f32.mrb[15].mxu1 }
 0x113   :  { %v2314_v9 = vadd.f32 %v2313_v8, %v2312_v4 }
 0x114   :  { %v3165_v10 = vadd.f32 %v2311_v3, %v1201_v6  ;;  %v1204_v11 = vadd.f32 %v2220_v7, %v3144_v14 }
 0x116   :  { %v3168_v12 = vadd.f32 %v2314_v9, %v1204_v11  ;;  %v2221_v13 = vpop.f32.mrb[16].mxu0 }
 0x117   :  { %v2315_v15 = vpop.f32.mrb[16].mxu1  ;;  %v2222_v16 = vpop.f32.mrb[17].mxu0 }
 0x118   :  { %v2223_v17 = vadd.f32 %v2222_v16, %v2221_v13  ;;  %v2316_v18 = vpop.f32.mrb[17].mxu1  ;;  %v2224_v19 = vpop.f32.mrb[18].mxu0 }
 0x119   :  { %v2317_v20 = vadd.f32 %v2316_v18, %v2315_v15  ;;  %v2318_v21 = vpop.f32.mrb[18].mxu1  ;;  %v2225_v22 = vpop.f32.mrb[19].mxu0 }
 0x11a   :  { %v1209_v23 = vadd.f32 %v2223_v17, %v3144_v14  ;;  %v2226_v24 = vadd.f32 %v2225_v22, %v2224_v19  ;;  %v2319_v25 = vpop.f32.mrb[19].mxu1 }
 0x11b   :  { %v2320_v27 = vadd.f32 %v2319_v25, %v2318_v21 }
 0x11c   :  { %v3171_v29 = vadd.f32 %v2317_v20, %v1209_v23  ;;  %v1212_v30 = vadd.f32 %v2226_v24, %v3144_v14 }
 0x11e   :  { %v3174_v31 = vadd.f32 %v2320_v27, %v1212_v30  ;;  %v2227_v32 = vpop.f32.mrb[20].mxu0 }
 0x11f   :  { %v2321_v33 = vpop.f32.mrb[20].mxu1  ;;  %v2228_v34 = vpop.f32.mrb[21].mxu0 }
 0x120   :  { %v2229_v35 = vadd.f32 %v2228_v34, %v2227_v32  ;;  %v2322_v36 = vpop.f32.mrb[21].mxu1  ;;  %v2230_v37 = vpop.f32.mrb[22].mxu0 }
 0x121   :  { %v2323_v38 = vadd.f32 %v2322_v36, %v2321_v33  ;;  %v2324_v39 = vpop.f32.mrb[22].mxu1  ;;  %v2231_v40 = vpop.f32.mrb[23].mxu0 }
 0x122   :  { %v1217_v41 = vadd.f32 %v2229_v35, %v3144_v14  ;;  %v2232_v43 = vadd.f32 %v2231_v40, %v2230_v37  ;;  %v2325_v45 = vpop.f32.mrb[23].mxu1 }
 0x123   :  { %v2326_v46 = vadd.f32 %v2325_v45, %v2324_v39 }
 0x124   :  { %v3177_v47 = vadd.f32 %v2323_v38, %v1217_v41  ;;  %v1220_v48 = vadd.f32 %v2232_v43, %v3144_v14 }
 0x126   :  { %v3180_v49 = vadd.f32 %v2326_v46, %v1220_v48  ;;  %v2233_v50 = vpop.f32.mrb[24].mxu0 }
 0x127   :  { %v2327_v51 = vpop.f32.mrb[24].mxu1  ;;  %v2234_v52 = vpop.f32.mrb[25].mxu0 }
 0x128   :  { %v2235_v53 = vadd.f32 %v2234_v52, %v2233_v50  ;;  %v2328_v54 = vpop.f32.mrb[25].mxu1  ;;  %v2236_v55 = vpop.f32.mrb[26].mxu0 }
 0x129   :  { %v2329_v56 = vadd.f32 %v2328_v54, %v2327_v51  ;;  %v2330_v57 = vpop.f32.mrb[26].mxu1  ;;  %v2237_v59 = vpop.f32.mrb[27].mxu0 }
 0x12a   :  { %v1225_v61 = vadd.f32 %v2235_v53, %v3144_v14  ;;  %v2238_v62 = vadd.f32 %v2237_v59, %v2236_v55  ;;  %v2331_v63 = vpop.f32.mrb[27].mxu1 }
 0x12b   :  { %v2332_v0 = vadd.f32 %v2331_v63, %v2330_v57 }
 0x12c   :  { %v3183_v1 = vadd.f32 %v2329_v56, %v1225_v61  ;;  %v1228_v2 = vadd.f32 %v2238_v62, %v3144_v14 }
 0x12e   :  { %v3186_v3 = vadd.f32 %v2332_v0, %v1228_v2  ;;  %v2239_v4 = vpop.f32.mrb[28].mxu0 }
 0x12f   :  { %v2333_v5 = vpop.f32.mrb[28].mxu1  ;;  %v2240_v6 = vpop.f32.mrb[29].mxu0 }
 0x130   :  { %v2241_v7 = vadd.f32 %v2240_v6, %v2239_v4  ;;  %v2334_v8 = vpop.f32.mrb[29].mxu1  ;;  %v2242_v9 = vpop.f32.mrb[30].mxu0 }
 0x131   :  { %v2335_v11 = vadd.f32 %v2334_v8, %v2333_v5  ;;  %v2336_v13 = vpop.f32.mrb[30].mxu1  ;;  %v2243_v15 = vpop.f32.mrb[31].mxu0 }
 0x132   :  { %v1233_v16 = vadd.f32 %v2241_v7, %v3144_v14  ;;  %v2244_v17 = vadd.f32 %v2243_v15, %v2242_v9  ;;  %v2337_v18 = vpop.f32.mrb[31].mxu1 }
 0x133   :  { %v2338_v19 = vadd.f32 %v2337_v18, %v2336_v13 }
 0x134   :  { %v3189_v20 = vadd.f32 %v2335_v11, %v1233_v16  ;;  %v1236_v21 = vadd.f32 %v2244_v17, %v3144_v14 }
 0x136   :  { %v3192_v22 = vadd.f32 %v2338_v19, %v1236_v21  ;;  %v2245_v23 = vpop.f32.mrb[32].mxu0 }
 0x137   :  { %v2339_v24 = vpop.f32.mrb[32].mxu1  ;;  %v2246_v25 = vpop.f32.mrb[33].mxu0 }
 0x138   :  { %v2247_v27 = vadd.f32 %v2246_v25, %v2245_v23  ;;  %v2340_v30 = vpop.f32.mrb[33].mxu1  ;;  %v2248_v32 = vpop.f32.mrb[34].mxu0 }
 0x139   :  { %v2341_v33 = vadd.f32 %v2340_v30, %v2339_v24  ;;  %v2342_v34 = vpop.f32.mrb[34].mxu1  ;;  %v2249_v35 = vpop.f32.mrb[35].mxu0 }
 0x13a   :  { %v1241_v36 = vadd.f32 %v2247_v27, %v3144_v14  ;;  %v2250_v37 = vadd.f32 %v2249_v35, %v2248_v32  ;;  %v2343_v38 = vpop.f32.mrb[35].mxu1 }
 0x13b   :  { %v2344_v39 = vadd.f32 %v2343_v38, %v2342_v34 }
 0x13c   :  { %v3195_v40 = vadd.f32 %v2341_v33, %v1241_v36  ;;  %v1244_v41 = vadd.f32 %v2250_v37, %v3144_v14 }
 0x13e   :  { %v3198_v43 = vadd.f32 %v2344_v39, %v1244_v41  ;;  %v2251_v45 = vpop.f32.mrb[36].mxu0 }
 0x13f   :  { %v2345_v46 = vpop.f32.mrb[36].mxu1  ;;  %v2252_v48 = vpop.f32.mrb[37].mxu0 }
 0x140   :  { %v2253_v50 = vadd.f32 %v2252_v48, %v2251_v45  ;;  %v2346_v51 = vpop.f32.mrb[37].mxu1  ;;  %v2254_v52 = vpop.f32.mrb[38].mxu0 }
 0x141   :  { %v2347_v53 = vadd.f32 %v2346_v51, %v2345_v46  ;;  %v2348_v54 = vpop.f32.mrb[38].mxu1  ;;  %v2255_v55 = vpop.f32.mrb[39].mxu0 }
 0x142   :  { %v1249_v56 = vadd.f32 %v2253_v50, %v3144_v14  ;;  %v2256_v57 = vadd.f32 %v2255_v55, %v2254_v52  ;;  %v2349_v59 = vpop.f32.mrb[39].mxu1 }
 0x143   :  { %v2350_v61 = vadd.f32 %v2349_v59, %v2348_v54 }
 0x144   :  { %v3201_v62 = vadd.f32 %v2347_v53, %v1249_v56  ;;  %v1252_v63 = vadd.f32 %v2256_v57, %v3144_v14 }
 0x146   :  { %v3204_v0 = vadd.f32 %v2350_v61, %v1252_v63  ;;  %v2257_v2 = vpop.f32.mrb[40].mxu0 }
 0x147   :  { %v2351_v4 = vpop.f32.mrb[40].mxu1  ;;  %v2258_v5 = vpop.f32.mrb[41].mxu0 }
 0x148   :  { %v2259_v6 = vadd.f32 %v2258_v5, %v2257_v2  ;;  %v2352_v7 = vpop.f32.mrb[41].mxu1  ;;  %v2260_v8 = vpop.f32.mrb[42].mxu0 }
 0x149   :  { %v2353_v9 = vadd.f32 %v2352_v7, %v2351_v4  ;;  %v2354_v11 = vpop.f32.mrb[42].mxu1  ;;  %v2261_v13 = vpop.f32.mrb[43].mxu0 }
 0x14a   :  { %v1257_v15 = vadd.f32 %v2259_v6, %v3144_v14  ;;  %v2262_v16 = vadd.f32 %v2261_v13, %v2260_v8  ;;  %v2355_v17 = vpop.f32.mrb[43].mxu1 }
 0x14b   :  { %v2356_v18 = vadd.f32 %v2355_v17, %v2354_v11 }
 0x14c   :  { %v3207_v19 = vadd.f32 %v2353_v9, %v1257_v15  ;;  %v1260_v21 = vadd.f32 %v2262_v16, %v3144_v14 }
 0x14e   :  { %v3210_v23 = vadd.f32 %v2356_v18, %v1260_v21  ;;  %v2263_v24 = vpop.f32.mrb[44].mxu0 }
 0x14f   :  { %v2357_v25 = vpop.f32.mrb[44].mxu1  ;;  %v2264_v27 = vpop.f32.mrb[45].mxu0 }
 0x150   :  { %v2265_v30 = vadd.f32 %v2264_v27, %v2263_v24  ;;  %v2358_v32 = vpop.f32.mrb[45].mxu1  ;;  %v2266_v33 = vpop.f32.mrb[46].mxu0 }
 0x151   :  { %v2359_v34 = vadd.f32 %v2358_v32, %v2357_v25  ;;  %v2360_v35 = vpop.f32.mrb[46].mxu1  ;;  %v2267_v36 = vpop.f32.mrb[47].mxu0 }
 0x152   :  { %v1265_v37 = vadd.f32 %v2265_v30, %v3144_v14  ;;  %v2268_v38 = vadd.f32 %v2267_v36, %v2266_v33  ;;  %v2361_v39 = vpop.f32.mrb[47].mxu1 }
 0x153   :  { %v2362_v41 = vadd.f32 %v2361_v39, %v2360_v35 }
 0x154   :  { %v3213_v45 = vadd.f32 %v2359_v34, %v1265_v37  ;;  %v1268_v46 = vadd.f32 %v2268_v38, %v3144_v14 }
 0x156   :  { %v3216_v48 = vadd.f32 %v2362_v41, %v1268_v46  ;;  %v2269_v50 = vpop.f32.mrb[48].mxu0 }
 0x157   :  { %v2363_v51 = vpop.f32.mrb[48].mxu1  ;;  %v2270_v52 = vpop.f32.mrb[49].mxu0 }
 0x158   :  { %v2271_v53 = vadd.f32 %v2270_v52, %v2269_v50  ;;  %v2364_v54 = vpop.f32.mrb[49].mxu1  ;;  %v2272_v55 = vpop.f32.mrb[50].mxu0 }
 0x159   :  { %v2365_v56 = vadd.f32 %v2364_v54, %v2363_v51  ;;  %v2366_v57 = vpop.f32.mrb[50].mxu1  ;;  %v2273_v59 = vpop.f32.mrb[51].mxu0 }
 0x15a   :  { %v1273_v61 = vadd.f32 %v2271_v53, %v3144_v14  ;;  %v2367_v63 = vpop.f32.mrb[51].mxu1 }
 0x15c   :  { %v3219_v2 = vadd.f32 %v2365_v56, %v1273_v61 }
 0x15e   :  { %v2385_v4 = vpop.f32.mrb[52].mxu0 }
 0x15f   :  { %v2479_v5 = vpop.f32.mrb[52].mxu1  ;;  %v2386_v6 = vpop.f32.mrb[53].mxu0 }
 0x160   :  { %v2387_v7 = vadd.f32 %v2386_v6, %v2385_v4  ;;  %v2480_v8 = vpop.f32.mrb[53].mxu1  ;;  %v2388_v9 = vpop.f32.mrb[54].mxu0 }
 0x161   :  { %v2481_v11 = vadd.f32 %v2480_v8, %v2479_v5  ;;  %v2482_v13 = vpop.f32.mrb[54].mxu1  ;;  %v2389_v15 = vpop.f32.mrb[55].mxu0 }
 0x162   :  { %v1449_v16 = vadd.f32 %v2387_v7, %v3147_v26  ;;  %v2390_v17 = vadd.f32 %v2389_v15, %v2388_v9  ;;  %v2483_v18 = vpop.f32.mrb[55].mxu1 }
 0x163   :  { %v2484_v21 = vadd.f32 %v2483_v18, %v2482_v13 }
 0x164   :  { %v1585_v24 = vadd.f32 %v2481_v11, %v1449_v16  ;;  %v1452_v14 = vadd.f32 %v2390_v17, %v3150_v28 }
 0x166   :  { %v1711_v25 = vmul.f32 0.01, %v1585_v24  ;;  %v1588_v27 = vadd.f32 %v2484_v21, %v1452_v14  ;;  %v2391_v30 = vpop.f32.mrb[56].mxu0  ;;  %vm1686_vm0 = vcmp.ge.f32.partialorder %v1585_v24, 0.0 }
 0x167   :  { %v2485_v32 = vpop.f32.mrb[56].mxu1  ;;  %v2392_v33 = vpop.f32.mrb[57].mxu0 }
 0x168   :  { %vm1687_vm1 = vcmp.ge.f32.partialorder %v1588_v27, 0.0  ;;  %v1712_v34 = vmul.f32 0.01, %v1588_v27  ;;  %v2393_v35 = vadd.f32 %v2392_v33, %v2391_v30  ;;  %v2486_v36 = vpop.f32.mrb[57].mxu1  ;;  %v2394_v37 = vpop.f32.mrb[58].mxu0  ;;  %v1736_v41 = vsel %vm1686_vm0, %v1585_v24, %v1711_v25 }
 0x169   :  { %v2487_v38 = vadd.f32 %v2486_v36, %v2485_v32  ;;  %v2488_v39 = vpop.f32.mrb[58].mxu1  ;;  %v2395_v26 = vpop.f32.mrb[59].mxu0 }
 0x16a   :  { %v1737_v46 = vsel %vm1687_vm1, %v1588_v27, %v1712_v34  ;;  %v1457_v50 = vadd.f32 %v2393_v35, %v3153_v42  ;;  %v2396_v51 = vadd.f32 %v2395_v26, %v2394_v37  ;;  %v2489_v28 = vpop.f32.mrb[59].mxu1 }
 0x16b   :  { %v2113_v52 = vpack.c.bf16 %v1737_v46, %v1736_v41  ;;  %v2490_v53 = vadd.f32 %v2489_v28, %v2488_v39 }
 0x16c   :  { %v1593_v54 = vadd.f32 %v2487_v38, %v1457_v50  ;;  %v1460_v55 = vadd.f32 %v2396_v51, %v3156_v44 }
 0x16d   :  { %2114 = vst [vmem:[%s3288_s3] sm:$0xff] %v2113_v52  }
 0x16e   :  { %v1713_v56 = vmul.f32 0.01, %v1593_v54  ;;  %v1596_v57 = vadd.f32 %v2490_v53, %v1460_v55  ;;  %v2397_v59 = vpop.f32.mrb[60].mxu0  ;;  %vm1688_vm2 = vcmp.ge.f32.partialorder %v1593_v54, 0.0 }
 0x16f   :  { %v2491_v61 = vpop.f32.mrb[60].mxu1  ;;  %v2398_v63 = vpop.f32.mrb[61].mxu0 }
 0x170   :  { %vm1689_vm3 = vcmp.ge.f32.partialorder %v1596_v57, 0.0  ;;  %v1714_v4 = vmul.f32 0.01, %v1596_v57  ;;  %v2399_v42 = vadd.f32 %v2398_v63, %v2397_v59  ;;  %v2492_v5 = vpop.f32.mrb[61].mxu1  ;;  %v2400_v6 = vpop.f32.mrb[62].mxu0  ;;  %v1738_v11 = vsel %vm1688_vm2, %v1593_v54, %v1713_v56 }
 0x171   :  { %v2493_v7 = vadd.f32 %v2492_v5, %v2491_v61  ;;  %v2494_v8 = vpop.f32.mrb[62].mxu1  ;;  %v2401_v9 = vpop.f32.mrb[63].mxu0 }
 0x172   :  { %v1739_v44 = vsel %vm1689_vm3, %v1596_v57, %v1714_v4  ;;  %v1465_v13 = vadd.f32 %v2399_v42, %v3159_v58  ;;  %v2402_v15 = vadd.f32 %v2401_v9, %v2400_v6  ;;  %v2495_v16 = vpop.f32.mrb[63].mxu1 }
 0x173   :  { %v2118_v17 = vpack.c.bf16 %v1739_v44, %v1738_v11  ;;  %v2496_v18 = vadd.f32 %v2495_v16, %v2494_v8 }
 0x174   :  { %v1601_v21 = vadd.f32 %v2493_v7, %v1465_v13  ;;  %v1468_v24 = vadd.f32 %v2402_v15, %v3162_v60 }
 0x175   :  { %2170 = vst [vmem:[%s3288_s3 + $0x8] sm:$0xff] %v2118_v17  }
 0x176   :  { %v1715_v14 = vmul.f32 0.01, %v1601_v21  ;;  %v1604_v25 = vadd.f32 %v2496_v18, %v1468_v24  ;;  %v2403_v27 = vpop.f32.mrb[64].mxu0  ;;  %vm1690_vm4 = vcmp.ge.f32.partialorder %v1601_v21, 0.0 }
 0x177   :  { %v2497_v30 = vpop.f32.mrb[64].mxu1  ;;  %v2404_v32 = vpop.f32.mrb[65].mxu0 }
 0x178   :  { %vm1691_vm5 = vcmp.ge.f32.partialorder %v1604_v25, 0.0  ;;  %v1716_v33 = vmul.f32 0.01, %v1604_v25  ;;  %v2405_v58 = vadd.f32 %v2404_v32, %v2403_v27  ;;  %v2498_v34 = vpop.f32.mrb[65].mxu1  ;;  %v2406_v35 = vpop.f32.mrb[66].mxu0  ;;  %v1740_v39 = vsel %vm1690_vm4, %v1601_v21, %v1715_v14 }
 0x179   :  { %v2499_v36 = vadd.f32 %v2498_v34, %v2497_v30  ;;  %v2500_v37 = vpop.f32.mrb[66].mxu1  ;;  %v2407_v38 = vpop.f32.mrb[67].mxu0 }
 0x17a   :  { %v1741_v60 = vsel %vm1691_vm5, %v1604_v25, %v1716_v33  ;;  %v1473_v26 = vadd.f32 %v2405_v58, %v3165_v10  ;;  %v2408_v41 = vadd.f32 %v2407_v38, %v2406_v35  ;;  %v2501_v46 = vpop.f32.mrb[67].mxu1 }
 0x17b   :  { %v2123_v50 = vpack.c.bf16 %v1741_v60, %v1740_v39  ;;  %v2502_v51 = vadd.f32 %v2501_v46, %v2500_v37 }
 0x17c   :  { %v1609_v28 = vadd.f32 %v2499_v36, %v1473_v26  ;;  %v1476_v52 = vadd.f32 %v2408_v41, %v3168_v12 }
 0x17d   :  { %2171 = vst [vmem:[%s3288_s3 + $0x10] sm:$0xff] %v2123_v50  }
 0x17e   :  { %v1717_v53 = vmul.f32 0.01, %v1609_v28  ;;  %v1612_v54 = vadd.f32 %v2502_v51, %v1476_v52  ;;  %v2409_v55 = vpop.f32.mrb[68].mxu0  ;;  %vm1692_vm6 = vcmp.ge.f32.partialorder %v1609_v28, 0.0 }
 0x17f   :  { %v2503_v56 = vpop.f32.mrb[68].mxu1  ;;  %v2410_v57 = vpop.f32.mrb[69].mxu0 }
 0x180   :  { %vm1693_vm7 = vcmp.ge.f32.partialorder %v1612_v54, 0.0  ;;  %v1718_v59 = vmul.f32 0.01, %v1612_v54  ;;  %v2411_v10 = vadd.f32 %v2410_v57, %v2409_v55  ;;  %v2504_v61 = vpop.f32.mrb[69].mxu1  ;;  %v2412_v63 = vpop.f32.mrb[70].mxu0  ;;  %v1742_v6 = vsel %vm1692_vm6, %v1609_v28, %v1717_v53 }
 0x181   :  { %v2505_v4 = vadd.f32 %v2504_v61, %v2503_v56  ;;  %v2506_v42 = vpop.f32.mrb[70].mxu1  ;;  %v2413_v5 = vpop.f32.mrb[71].mxu0 }
 0x182   :  { %v1743_v12 = vsel %vm1693_vm7, %v1612_v54, %v1718_v59  ;;  %v1481_v7 = vadd.f32 %v2411_v10, %v3171_v29  ;;  %v2414_v8 = vadd.f32 %v2413_v5, %v2412_v63  ;;  %v2507_v9 = vpop.f32.mrb[71].mxu1 }
 0x183   :  { %v2128_v11 = vpack.c.bf16 %v1743_v12, %v1742_v6  ;;  %v2508_v44 = vadd.f32 %v2507_v9, %v2506_v42 }
 0x184   :  { %v1617_v13 = vadd.f32 %v2505_v4, %v1481_v7  ;;  %v1484_v15 = vadd.f32 %v2414_v8, %v3174_v31 }
 0x185   :  { %2172 = vst [vmem:[%s3288_s3 + $0x18] sm:$0xff] %v2128_v11  }
 0x186   :  { %v1719_v16 = vmul.f32 0.01, %v1617_v13  ;;  %v1620_v17 = vadd.f32 %v2508_v44, %v1484_v15  ;;  %v2415_v18 = vpop.f32.mrb[72].mxu0  ;;  %vm1694_vm8 = vcmp.ge.f32.partialorder %v1617_v13, 0.0 }
 0x187   :  { %v2509_v21 = vpop.f32.mrb[72].mxu1  ;;  %v2416_v24 = vpop.f32.mrb[73].mxu0 }
 0x188   :  { %vm1695_vm9 = vcmp.ge.f32.partialorder %v1620_v17, 0.0  ;;  %v1720_v14 = vmul.f32 0.01, %v1620_v17  ;;  %v2417_v29 = vadd.f32 %v2416_v24, %v2415_v18  ;;  %v2510_v25 = vpop.f32.mrb[73].mxu1  ;;  %v2418_v27 = vpop.f32.mrb[74].mxu0  ;;  %v1744_v58 = vsel %vm1694_vm8, %v1617_v13, %v1719_v16 }
 0x189   :  { %v2511_v30 = vadd.f32 %v2510_v25, %v2509_v21  ;;  %v2512_v32 = vpop.f32.mrb[74].mxu1  ;;  %v2419_v33 = vpop.f32.mrb[75].mxu0 }
 0x18a   :  { %v1745_v31 = vsel %vm1695_vm9, %v1620_v17, %v1720_v14  ;;  %v1489_v34 = vadd.f32 %v2417_v29, %v3177_v47  ;;  %v2420_v35 = vadd.f32 %v2419_v33, %v2418_v27  ;;  %v2513_v36 = vpop.f32.mrb[75].mxu1 }
 0x18b   :  { %v2133_v37 = vpack.c.bf16 %v1745_v31, %v1744_v58  ;;  %v2514_v38 = vadd.f32 %v2513_v36, %v2512_v32 }
 0x18c   :  { %v1625_v39 = vadd.f32 %v2511_v30, %v1489_v34  ;;  %v1492_v60 = vadd.f32 %v2420_v35, %v3180_v49 }
 0x18d   :  { %2173 = vst [vmem:[%s3288_s3 + $0x20] sm:$0xff] %v2133_v37  }
 0x18e   :  { %v1721_v26 = vmul.f32 0.01, %v1625_v39  ;;  %v1628_v41 = vadd.f32 %v2514_v38, %v1492_v60  ;;  %v2421_v46 = vpop.f32.mrb[76].mxu0  ;;  %vm1696_vm10 = vcmp.ge.f32.partialorder %v1625_v39, 0.0 }
 0x18f   :  { %v2515_v50 = vpop.f32.mrb[76].mxu1  ;;  %v2422_v51 = vpop.f32.mrb[77].mxu0 }
 0x190   :  { %vm1697_vm11 = vcmp.ge.f32.partialorder %v1628_v41, 0.0  ;;  %v1722_v28 = vmul.f32 0.01, %v1628_v41  ;;  %v2423_v47 = vadd.f32 %v2422_v51, %v2421_v46  ;;  %v2516_v52 = vpop.f32.mrb[77].mxu1  ;;  %v2424_v53 = vpop.f32.mrb[78].mxu0  ;;  %v1746_v57 = vsel %vm1696_vm10, %v1625_v39, %v1721_v26 }
 0x191   :  { %v2517_v54 = vadd.f32 %v2516_v52, %v2515_v50  ;;  %v2518_v55 = vpop.f32.mrb[78].mxu1  ;;  %v2425_v56 = vpop.f32.mrb[79].mxu0 }
 0x192   :  { %v1747_v49 = vsel %vm1697_vm11, %v1628_v41, %v1722_v28  ;;  %v1497_v59 = vadd.f32 %v2423_v47, %v3183_v1  ;;  %v2426_v10 = vadd.f32 %v2425_v56, %v2424_v53  ;;  %v2519_v61 = vpop.f32.mrb[79].mxu1 }
 0x193   :  { %v2138_v63 = vpack.c.bf16 %v1747_v49, %v1746_v57  ;;  %v2520_v4 = vadd.f32 %v2519_v61, %v2518_v55 }
 0x194   :  { %v1633_v42 = vadd.f32 %v2517_v54, %v1497_v59  ;;  %v1500_v5 = vadd.f32 %v2426_v10, %v3186_v3 }
 0x195   :  { %2174 = vst [vmem:[%s3288_s3 + $0x28] sm:$0xff] %v2138_v63  }
 0x196   :  { %v1723_v6 = vmul.f32 0.01, %v1633_v42  ;;  %v1636_v12 = vadd.f32 %v2520_v4, %v1500_v5  ;;  %v2427_v7 = vpop.f32.mrb[80].mxu0  ;;  %vm1698_vm12 = vcmp.ge.f32.partialorder %v1633_v42, 0.0 }
 0x197   :  { %v2521_v8 = vpop.f32.mrb[80].mxu1  ;;  %v2428_v9 = vpop.f32.mrb[81].mxu0 }
 0x198   :  { %vm1699_vm13 = vcmp.ge.f32.partialorder %v1636_v12, 0.0  ;;  %v1724_v11 = vmul.f32 0.01, %v1636_v12  ;;  %v2429_v1 = vadd.f32 %v2428_v9, %v2427_v7  ;;  %v2522_v44 = vpop.f32.mrb[81].mxu1  ;;  %v2430_v13 = vpop.f32.mrb[82].mxu0  ;;  %v1748_v18 = vsel %vm1698_vm12, %v1633_v42, %v1723_v6 }
 0x199   :  { %v2523_v15 = vadd.f32 %v2522_v44, %v2521_v8  ;;  %v2524_v16 = vpop.f32.mrb[82].mxu1  ;;  %v2431_v17 = vpop.f32.mrb[83].mxu0 }
 0x19a   :  { %v1749_v3 = vsel %vm1699_vm13, %v1636_v12, %v1724_v11  ;;  %v1505_v21 = vadd.f32 %v2429_v1, %v3189_v20  ;;  %v2432_v24 = vadd.f32 %v2431_v17, %v2430_v13  ;;  %v2525_v14 = vpop.f32.mrb[83].mxu1 }
 0x19b   :  { %v2143_v29 = vpack.c.bf16 %v1749_v3, %v1748_v18  ;;  %v2526_v25 = vadd.f32 %v2525_v14, %v2524_v16 }
 0x19c   :  { %v1641_v27 = vadd.f32 %v2523_v15, %v1505_v21  ;;  %v1508_v30 = vadd.f32 %v2432_v24, %v3192_v22 }
 0x19d   :  { %2175 = vst [vmem:[%s3288_s3 + $0x30] sm:$0xff] %v2143_v29  }
 0x19e   :  { %v1725_v32 = vmul.f32 0.01, %v1641_v27  ;;  %v1644_v33 = vadd.f32 %v2526_v25, %v1508_v30  ;;  %v2433_v58 = vpop.f32.mrb[84].mxu0  ;;  %vm1700_vm14 = vcmp.ge.f32.partialorder %v1641_v27, 0.0 }
 0x19f   :  { %v2527_v31 = vpop.f32.mrb[84].mxu1  ;;  %v2434_v34 = vpop.f32.mrb[85].mxu0 }
 0x1a0   :  { %vm1701_vm15 = vcmp.ge.f32.partialorder %v1644_v33, 0.0  ;;  %v1726_v35 = vmul.f32 0.01, %v1644_v33  ;;  %v2435_v20 = vadd.f32 %v2434_v34, %v2433_v58  ;;  %v2528_v36 = vpop.f32.mrb[85].mxu1  ;;  %v2436_v37 = vpop.f32.mrb[86].mxu0  ;;  %v1750_v26 = vsel %vm1700_vm14, %v1641_v27, %v1725_v32 }
 0x1a1   :  { %v2529_v38 = vadd.f32 %v2528_v36, %v2527_v31  ;;  %v2530_v39 = vpop.f32.mrb[86].mxu1  ;;  %v2437_v60 = vpop.f32.mrb[87].mxu0 }
 0x1a2   :  { %v1751_v22 = vsel %vm1701_vm15, %v1644_v33, %v1726_v35  ;;  %v1513_v41 = vadd.f32 %v2435_v20, %v3195_v40  ;;  %v2438_v46 = vadd.f32 %v2437_v60, %v2436_v37  ;;  %v2531_v50 = vpop.f32.mrb[87].mxu1 }
 0x1a3   :  { %v2148_v51 = vpack.c.bf16 %v1751_v22, %v1750_v26  ;;  %v2532_v28 = vadd.f32 %v2531_v50, %v2530_v39 }
 0x1a4   :  { %v1649_v47 = vadd.f32 %v2529_v38, %v1513_v41  ;;  %v1516_v52 = vadd.f32 %v2438_v46, %v3198_v43 }
 0x1a5   :  { %2176 = vst [vmem:[%s3288_s3 + $0x38] sm:$0xff] %v2148_v51  }
 0x1a6   :  { %v1727_v53 = vmul.f32 0.01, %v1649_v47  ;;  %v1652_v54 = vadd.f32 %v2532_v28, %v1516_v52  ;;  %v2439_v55 = vpop.f32.mrb[88].mxu0  ;;  %vm1702_vm0 = vcmp.ge.f32.partialorder %v1649_v47, 0.0 }
 0x1a7   :  { %v2533_v56 = vpop.f32.mrb[88].mxu1  ;;  %v2440_v57 = vpop.f32.mrb[89].mxu0 }
 0x1a8   :  { %vm1703_vm1 = vcmp.ge.f32.partialorder %v1652_v54, 0.0  ;;  %v1728_v49 = vmul.f32 0.01, %v1652_v54  ;;  %v2441_v40 = vadd.f32 %v2440_v57, %v2439_v55  ;;  %v2534_v59 = vpop.f32.mrb[89].mxu1  ;;  %v2442_v10 = vpop.f32.mrb[90].mxu0  ;;  %v1752_v42 = vsel %vm1702_vm0, %v1649_v47, %v1727_v53 }
 0x1a9   :  { %v2535_v61 = vadd.f32 %v2534_v59, %v2533_v56  ;;  %v2536_v63 = vpop.f32.mrb[90].mxu1  ;;  %v2443_v4 = vpop.f32.mrb[91].mxu0 }
 0x1aa   :  { %v1753_v43 = vsel %vm1703_vm1, %v1652_v54, %v1728_v49  ;;  %v1521_v5 = vadd.f32 %v2441_v40, %v3201_v62  ;;  %v2444_v6 = vadd.f32 %v2443_v4, %v2442_v10  ;;  %v2537_v12 = vpop.f32.mrb[91].mxu1 }
 0x1ab   :  { %v2153_v7 = vpack.c.bf16 %v1753_v43, %v1752_v42  ;;  %v2538_v8 = vadd.f32 %v2537_v12, %v2536_v63 }
 0x1ac   :  { %v1657_v9 = vadd.f32 %v2535_v61, %v1521_v5  ;;  %v1524_v11 = vadd.f32 %v2444_v6, %v3204_v0 }
 0x1ad   :  { %2177 = vst [vmem:[%s3288_s3 + $0x40] sm:$0xff] %v2153_v7  }
 0x1ae   :  { %v1729_v1 = vmul.f32 0.01, %v1657_v9  ;;  %v1660_v44 = vadd.f32 %v2538_v8, %v1524_v11  ;;  %v2445_v13 = vpop.f32.mrb[92].mxu0  ;;  %vm1704_vm2 = vcmp.ge.f32.partialorder %v1657_v9, 0.0 }
 0x1af   :  { %v2539_v15 = vpop.f32.mrb[92].mxu1  ;;  %v2446_v16 = vpop.f32.mrb[93].mxu0 }
 0x1b0   :  { %vm1705_vm3 = vcmp.ge.f32.partialorder %v1660_v44, 0.0  ;;  %v1730_v17 = vmul.f32 0.01, %v1660_v44  ;;  %v2447_v62 = vadd.f32 %v2446_v16, %v2445_v13  ;;  %v2540_v18 = vpop.f32.mrb[93].mxu1  ;;  %v2448_v3 = vpop.f32.mrb[94].mxu0  ;;  %v1754_v29 = vsel %vm1704_vm2, %v1657_v9, %v1729_v1 }
 0x1b1   :  { %v2541_v21 = vadd.f32 %v2540_v18, %v2539_v15  ;;  %v2542_v24 = vpop.f32.mrb[94].mxu1  ;;  %v2449_v14 = vpop.f32.mrb[95].mxu0 }
 0x1b2   :  { %v1755_v0 = vsel %vm1705_vm3, %v1660_v44, %v1730_v17  ;;  %v1529_v25 = vadd.f32 %v2447_v62, %v3207_v19  ;;  %v2450_v27 = vadd.f32 %v2449_v14, %v2448_v3  ;;  %v2543_v30 = vpop.f32.mrb[95].mxu1 }
 0x1b3   :  { %v2158_v32 = vpack.c.bf16 %v1755_v0, %v1754_v29  ;;  %v2544_v33 = vadd.f32 %v2543_v30, %v2542_v24 }
 0x1b4   :  { %v1665_v58 = vadd.f32 %v2541_v21, %v1529_v25  ;;  %v1532_v31 = vadd.f32 %v2450_v27, %v3210_v23 }
 0x1b5   :  { %2178 = vst [vmem:[%s3288_s3 + $0x48] sm:$0xff] %v2158_v32  }
 0x1b6   :  { %v1731_v34 = vmul.f32 0.01, %v1665_v58  ;;  %v1668_v35 = vadd.f32 %v2544_v33, %v1532_v31  ;;  %v2451_v20 = vpop.f32.mrb[96].mxu0  ;;  %vm1706_vm4 = vcmp.ge.f32.partialorder %v1665_v58, 0.0 }
 0x1b7   :  { %v2545_v36 = vpop.f32.mrb[96].mxu1  ;;  %v2452_v37 = vpop.f32.mrb[97].mxu0 }
 0x1b8   :  { %vm1707_vm5 = vcmp.ge.f32.partialorder %v1668_v35, 0.0  ;;  %v1732_v38 = vmul.f32 0.01, %v1668_v35  ;;  %v2453_v19 = vadd.f32 %v2452_v37, %v2451_v20  ;;  %v2546_v39 = vpop.f32.mrb[97].mxu1  ;;  %v2454_v60 = vpop.f32.mrb[98].mxu0  ;;  %v1756_v46 = vsel %vm1706_vm4, %v1665_v58, %v1731_v34 }
 0x1b9   :  { %v2547_v26 = vadd.f32 %v2546_v39, %v2545_v36  ;;  %v2548_v22 = vpop.f32.mrb[98].mxu1  ;;  %v2455_v41 = vpop.f32.mrb[99].mxu0 }
 0x1ba   :  { %v1757_v23 = vsel %vm1707_vm5, %v1668_v35, %v1732_v38  ;;  %v1537_v50 = vadd.f32 %v2453_v19, %v3213_v45  ;;  %v2456_v51 = vadd.f32 %v2455_v41, %v2454_v60  ;;  %v2549_v28 = vpop.f32.mrb[99].mxu1 }
 0x1bb   :  { %v2163_v47 = vpack.c.bf16 %v1757_v23, %v1756_v46  ;;  %v2550_v52 = vadd.f32 %v2549_v28, %v2548_v22 }
 0x1bc   :  { %v1673_v53 = vadd.f32 %v2547_v26, %v1537_v50  ;;  %v1540_v54 = vadd.f32 %v2456_v51, %v3216_v48 }
 0x1bd   :  { %2179 = vst [vmem:[%s3288_s3 + $0x50] sm:$0xff] %v2163_v47  }
 0x1be   :  { %v1733_v55 = vmul.f32 0.01, %v1673_v53  ;;  %v1676_v56 = vadd.f32 %v2550_v52, %v1540_v54  ;;  %v2457_v57 = vpop.f32.mrb[100].mxu0  ;;  %vm1708_vm6 = vcmp.ge.f32.partialorder %v1673_v53, 0.0 }
 0x1bf   :  { %v2551_v49 = vpop.f32.mrb[100].mxu1  ;;  %v2458_v40 = vpop.f32.mrb[101].mxu0 }
 0x1c0   :  { %vm1709_vm7 = vcmp.ge.f32.partialorder %v1676_v56, 0.0  ;;  %v1734_v59 = vmul.f32 0.01, %v1676_v56  ;;  %v2459_v45 = vadd.f32 %v2458_v40, %v2457_v57  ;;  %v2552_v10 = vpop.f32.mrb[101].mxu1  ;;  %v2460_v61 = vpop.f32.mrb[102].mxu0  ;;  %v1758_v43 = vsel %vm1708_vm6, %v1673_v53, %v1733_v55 }
 0x1c1   :  { %v2553_v63 = vadd.f32 %v2552_v10, %v2551_v49  ;;  %v2554_v4 = vpop.f32.mrb[102].mxu1  ;;  %v2461_v42 = vpop.f32.mrb[103].mxu0 }
 0x1c2   :  { %v1759_v48 = vsel %vm1709_vm7, %v1676_v56, %v1734_v59  ;;  %v1545_v5 = vadd.f32 %v2459_v45, %v3219_v2  ;;  %v2555_v6 = vpop.f32.mrb[103].mxu1 }
 0x1c3   :  { %v2168_v12 = vpack.c.bf16 %v1759_v48, %v1758_v43 }
 0x1c4   :  { %v1681_v7 = vadd.f32 %v2553_v63, %v1545_v5 }
 0x1c5   :  { %2180 = vst [vmem:[%s3288_s3 + $0x58] sm:$0xff] %v2168_v12  }
 0x1c6   :  { %vm1710_vm8 = vcmp.ge.f32.partialorder %v1681_v7, 0.0  ;;  %v1735_v8 = vmul.f32 0.01, %v1681_v7 }
 0x1c8   :  { %v1760_v9 = vsel %vm1710_vm8, %v1681_v7, %v1735_v8 }
 0x1c9   :  { %v2109_v11 = vpack.c.bf16 %v1760_v9, %v1760_v9 }
 0x1cb   :  { %1886 = vst [vmem:[%s3288_s3 + $0x60] sm:$0xf] %v2109_v11 }

// kernel: cnn_lstm_forward.7
= control target key start
LH: loop header
LB: loop body
LE: loop exit
PB: predicated region body
PF: predicated region fallthrough
CT: control target
= control target key end

     0   :  { %vm1309_vm0 = vcmask 1040384   ;;  %vm1305_vm1 = vcmask 277504   ;;  %s9766_s0 = inlined_call_operand.vmem [shape: bf16[8,802], index: 0, kind: input, shape index: {}]   ;;  %s9767_s1 = inlined_call_operand.vmem [shape: bf16[2,3], index: 1, kind: input, shape index: {}]   ;;  %s9768_s2 = inlined_call_operand.vmem [shape: bf16[802,512], index: 2, kind: input, shape index: {}]   ;;  %s9769_s3 = inlined_call_operand.vmem [shape: f32[1,512], index: 3, kind: input, shape index: {}]   ;;  %s9770_s4 = inlined_call_operand.vmem [shape: bf16[3,128,512], index: 4, kind: input, shape index: {}]   ;;  %s9771_s5 = inlined_call_operand.vmem [shape: bf16[4,128,512], index: 5, kind: input, shape index: {}]   ;;  %s9772_s6 = inlined_call_operand.vmem [shape: f32[3,1,512], index: 6, kind: input, shape index: {}]   ;;  %s9773_s7 = inlined_call_operand.vmem [shape: bf16[128,64], index: 7, kind: input, shape index: {}]   ;;  %s9774_s8 = inlined_call_operand.vmem [shape: bf16[3,64], index: 8, kind: input, shape index: {}]   ;;  %s9775_s9 = inlined_call_operand.vmem [shape: f32[1,64], index: 9, kind: input, shape index: {}]   ;;  %s9776_s10 = inlined_call_operand.vmem [shape: bf16[64,5], index: 10, kind: input, shape index: {}]   ;;  %s9777_s11 = inlined_call_operand.vmem [shape: f32[1,5], index: 11, kind: input, shape index: {}]   ;;  %s9778_s12 = inlined_call_operand.hbm [shape: f32[2,5], index: 12, kind: output, shape index: {}]  }
   0x1   :  { %v6326_v0 = vld [vmem:[%s9768_s2 + $0x4] ss:$16 sps:$4 sm:$0xff]   ;;  %v6328_v1 = vld [vmem:[%s9768_s2 + $0xc] ss:$16 sps:$4 sm:$0xff]   ;;  %v6330_v2 = vld [vmem:[%s9768_s2] ss:$16 sps:$4 sm:$0xff]  }
   0x2   :  { %1322 = vmatprep.subr.bf16.mxu0 %v6326_v0  ;;  %v6331_v3 = vld [vmem:[%s9768_s2 + $0x8] ss:$16 sps:$4 sm:$0xff]   ;;  %1486 = vmatprep.subr.bf16.mxu1 %v6328_v1  ;;  %v6332_v4 = vld [vmem:[%s9768_s2 + $0x24] ss:$16 sps:$4 sm:$0xff]   ;;  %v6334_v5 = vld [vmem:[%s9768_s2 + $0x2c] ss:$16 sps:$4 sm:$0xff]  }
   0x3   :  { %1323 = vmatpush1.bf16.msra.mxu0 %v6330_v2  ;;  %1487 = vmatpush1.bf16.msra.mxu1 %v6331_v3  ;;  %v6336_v6 = vld [vmem:[%s9768_s2 + $0x20] ss:$16 sps:$4 sm:$0xff]   ;;  %v6337_v7 = vld [vmem:[%s9768_s2 + $0x28] ss:$16 sps:$4 sm:$0xff]   ;;  %v6338_v8 = vld [vmem:[%s9768_s2 + $0x44] ss:$16 sps:$4 sm:$0xff]  }
   0x4   :  { %1324 = vmatprep.subr.bf16.mxu0 %v6332_v4  ;;  %1488 = vmatprep.subr.bf16.mxu1 %v6334_v5  ;;  %v6340_v9 = vld [vmem:[%s9768_s2 + $0x4c] ss:$16 sps:$4 sm:$0xff]   ;;  %v6342_v10 = vld [vmem:[%s9768_s2 + $0x40] ss:$16 sps:$4 sm:$0xff]   ;;  %v6343_v11 = vld [vmem:[%s9768_s2 + $0x48] ss:$16 sps:$4 sm:$0xff]  }
   0x5   :  { %v6344_v12 = vld [vmem:[%s9768_s2 + $0x64] ss:$16 sps:$4 sm:$0xff]   ;;  %v6346_v13 = vld [vmem:[%s9768_s2 + $0x6c] ss:$16 sps:$4 sm:$0xff]   ;;  %v6348_v14 = vld [vmem:[%s9768_s2 + $0x60] ss:$16 sps:$4 sm:$0xff]  }
   0x6   :  { %v6349_v15 = vld [vmem:[%s9768_s2 + $0x68] ss:$16 sps:$4 sm:$0xff]   ;;  %v6350_v16 = vld [vmem:[%s9768_s2 + $0x84] ss:$16 sps:$4 sm:$0xff]   ;;  %v6352_v17 = vld [vmem:[%s9768_s2 + $0x8c] ss:$16 sps:$4 sm:$0xff]  }
   0x7   :  { %1325 = vmatpush1.bf16.msra.mxu0 %v6336_v6  ;;  %1489 = vmatpush1.bf16.msra.mxu1 %v6337_v7  ;;  %v6354_v18 = vld [vmem:[%s9768_s2 + $0x80] ss:$16 sps:$4 sm:$0xff]   ;;  %v6355_v19 = vld [vmem:[%s9768_s2 + $0x88] ss:$16 sps:$4 sm:$0xff]   ;;  %v6356_v20 = vld [vmem:[%s9768_s2 + $0xa4] ss:$16 sps:$4 sm:$0xff]  }
   0x8   :  { %1326 = vmatprep.subr.bf16.mxu0 %v6338_v8  ;;  %1490 = vmatprep.subr.bf16.mxu1 %v6340_v9  ;;  %v6358_v21 = vld [vmem:[%s9768_s2 + $0xac] ss:$16 sps:$4 sm:$0xff]   ;;  %v6360_v22 = vld [vmem:[%s9768_s2 + $0xa0] ss:$16 sps:$4 sm:$0xff]   ;;  %v6361_v23 = vld [vmem:[%s9768_s2 + $0xa8] ss:$16 sps:$4 sm:$0xff]  }
   0x9   :  { %v6362_v24 = vld [vmem:[%s9768_s2 + $0xc4] ss:$16 sps:$4 sm:$0xff]   ;;  %v6364_v25 = vld [vmem:[%s9768_s2 + $0xcc] ss:$16 sps:$4 sm:$0xff]   ;;  %v6366_v26 = vld [vmem:[%s9768_s2 + $0xc0] ss:$16 sps:$4 sm:$0xff]  }
   0xa   :  { %v6367_v27 = vld [vmem:[%s9768_s2 + $0xc8] ss:$16 sps:$4 sm:$0xff]   ;;  %v6368_v28 = vld [vmem:[%s9768_s2 + $0xe4] ss:$16 sps:$4 sm:$0xff]   ;;  %v6370_v29 = vld [vmem:[%s9768_s2 + $0xec] ss:$16 sps:$4 sm:$0xff]  }
   0xb   :  { %1327 = vmatpush1.bf16.msra.mxu0 %v6342_v10  ;;  %1491 = vmatpush1.bf16.msra.mxu1 %v6343_v11  ;;  %v6372_v30 = vld [vmem:[%s9768_s2 + $0xe0] ss:$16 sps:$4 sm:$0xff]   ;;  %v6373_v31 = vld [vmem:[%s9768_s2 + $0xe8] ss:$16 sps:$4 sm:$0xff]   ;;  %v6374_v32 = vld [vmem:[%s9768_s2 + $0x104] ss:$16 sps:$4 sm:$0xff]  }
   0xc   :  { %1328 = vmatprep.subr.bf16.mxu0 %v6344_v12  ;;  %1492 = vmatprep.subr.bf16.mxu1 %v6346_v13  ;;  %v6376_v33 = vld [vmem:[%s9768_s2 + $0x10c] ss:$16 sps:$4 sm:$0xff]   ;;  %v6378_v34 = vld [vmem:[%s9768_s2 + $0x100] ss:$16 sps:$4 sm:$0xff]   ;;  %v6379_v35 = vld [vmem:[%s9768_s2 + $0x108] ss:$16 sps:$4 sm:$0xff]  }
   0xd   :  { %v6380_v36 = vld [vmem:[%s9768_s2 + $0x124] ss:$16 sps:$4 sm:$0xff]   ;;  %v6382_v37 = vld [vmem:[%s9768_s2 + $0x12c] ss:$16 sps:$4 sm:$0xff]   ;;  %v6384_v38 = vld [vmem:[%s9768_s2 + $0x120] ss:$16 sps:$4 sm:$0xff]  }
   0xe   :  { %v6385_v39 = vld [vmem:[%s9768_s2 + $0x128] ss:$16 sps:$4 sm:$0xff]   ;;  %v6386_v40 = vld [vmem:[%s9768_s2 + $0x144] ss:$16 sps:$4 sm:$0xff]   ;;  %v6388_v41 = vld [vmem:[%s9768_s2 + $0x14c] ss:$16 sps:$4 sm:$0xff]  }
   0xf   :  { %1329 = vmatpush1.bf16.msra.mxu0 %v6348_v14  ;;  %1493 = vmatpush1.bf16.msra.mxu1 %v6349_v15  ;;  %v6390_v42 = vld [vmem:[%s9768_s2 + $0x140] ss:$16 sps:$4 sm:$0xff]   ;;  %v6391_v43 = vld [vmem:[%s9768_s2 + $0x148] ss:$16 sps:$4 sm:$0xff]   ;;  %v6392_v44 = vld [vmem:[%s9768_s2 + $0x164] ss:$16 sps:$4 sm:$0xff]  }
  0x10   :  { %1330 = vmatprep.subr.bf16.mxu0 %v6350_v16  ;;  %1494 = vmatprep.subr.bf16.mxu1 %v6352_v17  ;;  %v6394_v45 = vld [vmem:[%s9768_s2 + $0x16c] ss:$16 sps:$4 sm:$0xff]   ;;  %v43_v46 = vld [vmem:[%s9766_s0] sm:$0xff]  ;;  %v6397_v49 = vld [vmem:[%s9768_s2 + $0x168] ss:$16 sps:$4 sm:$0xff]  }
  0x11   :  { %v6396_v47 = vld [vmem:[%s9768_s2 + $0x160] ss:$16 sps:$4 sm:$0xff]   ;;  %v5575_v48 = vcombine.high %v43_v46, %v43_v46  ;;  %v6398_v50 = vld [vmem:[%s9768_s2 + $0x184] ss:$16 sps:$4 sm:$0xff]   ;;  %v6400_v51 = vld [vmem:[%s9768_s2 + $0x18c] ss:$16 sps:$4 sm:$0xff]   ;;  %v5574_v4 = vcombine.low %v43_v46, %v43_v46 }
  0x12   :  { %v6402_v52 = vld [vmem:[%s9768_s2 + $0x180] ss:$16 sps:$4 sm:$0xff]   ;;  %v6403_v53 = vld [vmem:[%s9768_s2 + $0x188] ss:$16 sps:$4 sm:$0xff]   ;;  %v6404_v54 = vld [vmem:[%s9768_s2 + $0x1a4] ss:$16 sps:$4 sm:$0xff]  }
  0x13   :  { %1331 = vmatpush1.bf16.msra.mxu0 %v6354_v18  ;;  %1495 = vmatpush1.bf16.msra.mxu1 %v6355_v19  ;;  %v6406_v55 = vld [vmem:[%s9768_s2 + $0x1ac] ss:$16 sps:$4 sm:$0xff]   ;;  %v6408_v56 = vld [vmem:[%s9768_s2 + $0x1a0] ss:$16 sps:$4 sm:$0xff]   ;;  %v6409_v57 = vld [vmem:[%s9768_s2 + $0x1a8] ss:$16 sps:$4 sm:$0xff]  }
  0x14   :  { %1332 = vmatprep.subr.bf16.mxu0 %v6356_v20  ;;  %1496 = vmatprep.subr.bf16.mxu1 %v6358_v21  ;;  %v6410_v58 = vld [vmem:[%s9768_s2 + $0x1c4] ss:$16 sps:$4 sm:$0xff]   ;;  %v6412_v59 = vld [vmem:[%s9768_s2 + $0x1cc] ss:$16 sps:$4 sm:$0xff]   ;;  %v6414_v60 = vld [vmem:[%s9768_s2 + $0x1c0] ss:$16 sps:$4 sm:$0xff]  }
  0x15   :  { %1354 = vmatprep.mubr.bf16.mxu0 %v5575_v48  ;;  %1518 = vmatprep.mubr.bf16.mxu1 %v5575_v48  ;;  %v6415_v61 = vld [vmem:[%s9768_s2 + $0x1c8] ss:$16 sps:$4 sm:$0xff]   ;;  %v6416_v62 = vld [vmem:[%s9768_s2 + $0x1e4] ss:$16 sps:$4 sm:$0xff]   ;;  %v6418_v63 = vld [vmem:[%s9768_s2 + $0x1ec] ss:$16 sps:$4 sm:$0xff]  }
  0x16   :  { %v6420_v0 = vld [vmem:[%s9768_s2 + $0x1e0] ss:$16 sps:$4 sm:$0xff]   ;;  %v6421_v1 = vld [vmem:[%s9768_s2 + $0x1e8] ss:$16 sps:$4 sm:$0xff]   ;;  %v6426_v2 = vld [vmem:[%s9768_s2 + $0x204] ss:$16 sps:$4 sm:$0xff]  }
  0x17   :  { %1333 = vmatpush1.bf16.msra.mxu0 %v6360_v22  ;;  %1497 = vmatpush1.bf16.msra.mxu1 %v6361_v23  ;;  %v6429_v3 = vld [vmem:[%s9768_s2 + $0x20c] ss:$16 sps:$4 sm:$0xff]   ;;  %v6424_v5 = vld [vmem:[%s9768_s2 + $0x200] ss:$16 sps:$4 sm:$0xff]   ;;  %v6427_v6 = vld [vmem:[%s9768_s2 + $0x208] ss:$16 sps:$4 sm:$0xff]  }
  0x18   :  { %1334 = vmatprep.subr.bf16.mxu0 %v6362_v24  ;;  %1498 = vmatprep.subr.bf16.mxu1 %v6364_v25  ;;  %v6432_v7 = vld [vmem:[%s9768_s2 + $0x224] ss:$16 sps:$4 sm:$0xff]   ;;  %v6435_v8 = vld [vmem:[%s9768_s2 + $0x22c] ss:$16 sps:$4 sm:$0xff]   ;;  %v6430_v9 = vld [vmem:[%s9768_s2 + $0x220] ss:$16 sps:$4 sm:$0xff]  }
  0x19   :  { %v6433_v10 = vld [vmem:[%s9768_s2 + $0x228] ss:$16 sps:$4 sm:$0xff]   ;;  %v6438_v11 = vld [vmem:[%s9768_s2 + $0x244] ss:$16 sps:$4 sm:$0xff]   ;;  %v6441_v12 = vld [vmem:[%s9768_s2 + $0x24c] ss:$16 sps:$4 sm:$0xff]  }
  0x1a   :  { %v6436_v13 = vld [vmem:[%s9768_s2 + $0x240] ss:$16 sps:$4 sm:$0xff]   ;;  %v6439_v14 = vld [vmem:[%s9768_s2 + $0x248] ss:$16 sps:$4 sm:$0xff]   ;;  %v6444_v15 = vld [vmem:[%s9768_s2 + $0x264] ss:$16 sps:$4 sm:$0xff]  }
  0x1b   :  { %1335 = vmatpush1.bf16.msra.mxu0 %v6366_v26  ;;  %1499 = vmatpush1.bf16.msra.mxu1 %v6367_v27  ;;  %v6447_v16 = vld [vmem:[%s9768_s2 + $0x26c] ss:$16 sps:$4 sm:$0xff]   ;;  %v6442_v17 = vld [vmem:[%s9768_s2 + $0x260] ss:$16 sps:$4 sm:$0xff]   ;;  %v6445_v18 = vld [vmem:[%s9768_s2 + $0x268] ss:$16 sps:$4 sm:$0xff]  }
  0x1c   :  { %1336 = vmatprep.subr.bf16.mxu0 %v6368_v28  ;;  %1500 = vmatprep.subr.bf16.mxu1 %v6370_v29  ;;  %v6450_v19 = vld [vmem:[%s9768_s2 + $0x284] ss:$16 sps:$4 sm:$0xff]   ;;  %v6453_v20 = vld [vmem:[%s9768_s2 + $0x28c] ss:$16 sps:$4 sm:$0xff]   ;;  %v6448_v21 = vld [vmem:[%s9768_s2 + $0x280] ss:$16 sps:$4 sm:$0xff]  }
  0x1d   :  { %v6451_v22 = vld [vmem:[%s9768_s2 + $0x288] ss:$16 sps:$4 sm:$0xff]   ;;  %v6456_v23 = vld [vmem:[%s9768_s2 + $0x2a4] ss:$16 sps:$4 sm:$0xff]   ;;  %v6459_v24 = vld [vmem:[%s9768_s2 + $0x2ac] ss:$16 sps:$4 sm:$0xff]  }
  0x1e   :  { %v6454_v25 = vld [vmem:[%s9768_s2 + $0x2a0] ss:$16 sps:$4 sm:$0xff]   ;;  %v6457_v26 = vld [vmem:[%s9768_s2 + $0x2a8] ss:$16 sps:$4 sm:$0xff]   ;;  %v6462_v27 = vld [vmem:[%s9768_s2 + $0x2c4] ss:$16 sps:$4 sm:$0xff]  }
  0x1f   :  { %1337 = vmatpush1.bf16.msra.mxu0 %v6372_v30  ;;  %1501 = vmatpush1.bf16.msra.mxu1 %v6373_v31  ;;  %v6465_v28 = vld [vmem:[%s9768_s2 + $0x2cc] ss:$16 sps:$4 sm:$0xff]   ;;  %v6460_v31 = vld [vmem:[%s9768_s2 + $0x2c0] ss:$16 sps:$4 sm:$0xff]   ;;  %v6487_v48 = vld [vmem:[%s9768_s2 + $0x348] ss:$16 sps:$4 sm:$0xff]  }
  0x20   :  { %1338 = vmatprep.subr.bf16.mxu0 %v6374_v32  ;;  %1502 = vmatprep.subr.bf16.mxu1 %v6376_v33  ;;  %v7611_v29 = vld [vmem:[%s9766_s0 + $0x8] sm:$0xff]  ;;  %v6468_v33 = vld [vmem:[%s9768_s2 + $0x2e4] ss:$16 sps:$4 sm:$0xff]  }
  0x21   :  { %v5577_v30 = vcombine.high %v7611_v29, %v7611_v29  ;;  %v6463_v32 = vld [vmem:[%s9768_s2 + $0x2c8] ss:$16 sps:$4 sm:$0xff]   ;;  %v6489_v46 = vld [vmem:[%s9768_s2 + $0x34c] ss:$16 sps:$4 sm:$0xff]  }
  0x23   :  { %1339 = vmatpush1.bf16.msra.mxu0 %v6378_v34  ;;  %1503 = vmatpush1.bf16.msra.mxu1 %v6379_v35  ;;  %v6471_v34 = vld [vmem:[%s9768_s2 + $0x2ec] ss:$16 sps:$4 sm:$0xff]   ;;  %v6466_v35 = vld [vmem:[%s9768_s2 + $0x2e0] ss:$16 sps:$4 sm:$0xff]  }
  0x24   :  { %1340 = vmatprep.subr.bf16.mxu0 %v6380_v36  ;;  %1504 = vmatprep.subr.bf16.mxu1 %v6382_v37  ;;  %v6469_v36 = vld [vmem:[%s9768_s2 + $0x2e8] ss:$16 sps:$4 sm:$0xff]   ;;  %v6474_v37 = vld [vmem:[%s9768_s2 + $0x304] ss:$16 sps:$4 sm:$0xff]  }
  0x27   :  { %1341 = vmatpush1.bf16.msra.mxu0 %v6384_v38  ;;  %1505 = vmatpush1.bf16.msra.mxu1 %v6385_v39  ;;  %v6477_v38 = vld [vmem:[%s9768_s2 + $0x30c] ss:$16 sps:$4 sm:$0xff]   ;;  %v6472_v39 = vld [vmem:[%s9768_s2 + $0x300] ss:$16 sps:$4 sm:$0xff]  }
  0x28   :  { %1342 = vmatprep.subr.bf16.mxu0 %v6386_v40  ;;  %1506 = vmatprep.subr.bf16.mxu1 %v6388_v41  ;;  %v6475_v40 = vld [vmem:[%s9768_s2 + $0x308] ss:$16 sps:$4 sm:$0xff]   ;;  %v6480_v41 = vld [vmem:[%s9768_s2 + $0x324] ss:$16 sps:$4 sm:$0xff]  }
  0x2b   :  { %1343 = vmatpush1.bf16.msra.mxu0 %v6390_v42  ;;  %1507 = vmatpush1.bf16.msra.mxu1 %v6391_v43  ;;  %v6483_v42 = vld [vmem:[%s9768_s2 + $0x32c] ss:$16 sps:$4 sm:$0xff]   ;;  %v6478_v43 = vld [vmem:[%s9768_s2 + $0x320] ss:$16 sps:$4 sm:$0xff]  }
  0x2c   :  { %1344 = vmatprep.subr.bf16.mxu0 %v6392_v44  ;;  %1508 = vmatprep.subr.bf16.mxu1 %v6394_v45  ;;  %v6481_v44 = vld [vmem:[%s9768_s2 + $0x328] ss:$16 sps:$4 sm:$0xff]   ;;  %v6486_v45 = vld [vmem:[%s9768_s2 + $0x344] ss:$16 sps:$4 sm:$0xff]  }
  0x2f   :  { %1345 = vmatpush1.bf16.msra.mxu0 %v6396_v47  ;;  %1509 = vmatpush1.bf16.msra.mxu1 %v6397_v49  ;;  %v6484_v47 = vld [vmem:[%s9768_s2 + $0x340] ss:$16 sps:$4 sm:$0xff]   ;;  %v6492_v49 = vld [vmem:[%s9768_s2 + $0x364] ss:$16 sps:$4 sm:$0xff]  }
  0x30   :  { %1346 = vmatprep.subr.bf16.mxu0 %v6398_v50  ;;  %1510 = vmatprep.subr.bf16.mxu1 %v6400_v51  ;;  %v6495_v50 = vld [vmem:[%s9768_s2 + $0x36c] ss:$16 sps:$4 sm:$0xff]   ;;  %v6490_v51 = vld [vmem:[%s9768_s2 + $0x360] ss:$16 sps:$4 sm:$0xff]  }
  0x33   :  { %1347 = vmatpush1.bf16.msra.mxu0 %v6402_v52  ;;  %1511 = vmatpush1.bf16.msra.mxu1 %v6403_v53  ;;  %v6493_v52 = vld [vmem:[%s9768_s2 + $0x368] ss:$16 sps:$4 sm:$0xff]   ;;  %v6498_v53 = vld [vmem:[%s9768_s2 + $0x384] ss:$16 sps:$4 sm:$0xff]  }
  0x34   :  { %1348 = vmatprep.subr.bf16.mxu0 %v6404_v54  ;;  %1512 = vmatprep.subr.bf16.mxu1 %v6406_v55  ;;  %v6501_v54 = vld [vmem:[%s9768_s2 + $0x38c] ss:$16 sps:$4 sm:$0xff]   ;;  %v6496_v55 = vld [vmem:[%s9768_s2 + $0x380] ss:$16 sps:$4 sm:$0xff]  }
  0x37   :  { %1349 = vmatpush1.bf16.msra.mxu0 %v6408_v56  ;;  %1513 = vmatpush1.bf16.msra.mxu1 %v6409_v57  ;;  %v6499_v56 = vld [vmem:[%s9768_s2 + $0x388] ss:$16 sps:$4 sm:$0xff]   ;;  %v6504_v57 = vld [vmem:[%s9768_s2 + $0x3a4] ss:$16 sps:$4 sm:$0xff]  }
  0x38   :  { %1350 = vmatprep.subr.bf16.mxu0 %v6410_v58  ;;  %1514 = vmatprep.subr.bf16.mxu1 %v6412_v59  ;;  %v6507_v58 = vld [vmem:[%s9768_s2 + $0x3ac] ss:$16 sps:$4 sm:$0xff]   ;;  %v6502_v59 = vld [vmem:[%s9768_s2 + $0x3a0] ss:$16 sps:$4 sm:$0xff]  }
  0x3b   :  { %1351 = vmatpush1.bf16.msra.mxu0 %v6414_v60  ;;  %1515 = vmatpush1.bf16.msra.mxu1 %v6415_v61  ;;  %v6505_v60 = vld [vmem:[%s9768_s2 + $0x3a8] ss:$16 sps:$4 sm:$0xff]   ;;  %v6510_v61 = vld [vmem:[%s9768_s2 + $0x3c4] ss:$16 sps:$4 sm:$0xff]  }
  0x3c   :  { %1352 = vmatprep.subr.bf16.mxu0 %v6416_v62  ;;  %1516 = vmatprep.subr.bf16.mxu1 %v6418_v63  ;;  %v6513_v62 = vld [vmem:[%s9768_s2 + $0x3cc] ss:$16 sps:$4 sm:$0xff]   ;;  %v6508_v63 = vld [vmem:[%s9768_s2 + $0x3c0] ss:$16 sps:$4 sm:$0xff]  }
  0x3f   :  { %1353 = vmatpush1.bf16.msra.mxu0 %v6420_v0  ;;  %1517 = vmatpush1.bf16.msra.mxu1 %v6421_v1  ;;  %v6511_v0 = vld [vmem:[%s9768_s2 + $0x3c8] ss:$16 sps:$4 sm:$0xff]   ;;  %v6516_v1 = vld [vmem:[%s9768_s2 + $0x3e4] ss:$16 sps:$4 sm:$0xff]  }
  0x40   :  { %1363 = vmatprep.subr.bf16.mxu0 %v6426_v2  ;;  %1527 = vmatprep.subr.bf16.mxu1 %v6429_v3  ;;  %v6519_v2 = vld [vmem:[%s9768_s2 + $0x3ec] ss:$16 sps:$4 sm:$0xff]   ;;  %v6514_v3 = vld [vmem:[%s9768_s2 + $0x3e0] ss:$16 sps:$4 sm:$0xff]  }
  0x42   :  { %1355 = vmatmul.mubr.bf16.vlgmr.msra.gmra.mrb[0].mxu0 %v5574_v4  ;;  %1519 = vmatmul.mubr.bf16.vlgmr.msra.gmra.mrb[0].mxu1 %v5574_v4  ;;  %v6517_v4 = vld [vmem:[%s9768_s2 + $0x3e8] ss:$16 sps:$4 sm:$0xff]  }
  0x43   :  { %1364 = vmatpush1.bf16.msra.mxu0 %v6424_v5  ;;  %1528 = vmatpush1.bf16.msra.mxu1 %v6427_v6  ;;  %v6524_v5 = vld [vmem:[%s9768_s2 + $0x404] ss:$16 sps:$4 sm:$0xff]   ;;  %v6527_v6 = vld [vmem:[%s9768_s2 + $0x40c] ss:$16 sps:$4 sm:$0xff]  }
  0x44   :  { %1365 = vmatprep.subr.bf16.mxu0 %v6432_v7  ;;  %1529 = vmatprep.subr.bf16.mxu1 %v6435_v8  ;;  %v5576_v7 = vcombine.low %v7611_v29, %v7611_v29  ;;  %v6522_v8 = vld [vmem:[%s9768_s2 + $0x400] ss:$16 sps:$4 sm:$0xff]   ;;  %v6557_v29 = vld [vmem:[%s9768_s2 + $0x4ac] ss:$16 sps:$4 sm:$0xff]  }
  0x45   :  { %1395 = vmatprep.mubr.bf16.mxu0 %v5577_v30  ;;  %1559 = vmatprep.mubr.bf16.mxu1 %v5577_v30  ;;  %v6552_v30 = vld [vmem:[%s9768_s2 + $0x4a0] ss:$16 sps:$4 sm:$0xff]  }
  0x47   :  { %1366 = vmatpush1.bf16.msra.mxu0 %v6430_v9  ;;  %1530 = vmatpush1.bf16.msra.mxu1 %v6433_v10  ;;  %v6525_v9 = vld [vmem:[%s9768_s2 + $0x408] ss:$16 sps:$4 sm:$0xff]   ;;  %v6530_v10 = vld [vmem:[%s9768_s2 + $0x424] ss:$16 sps:$4 sm:$0xff]  }
  0x48   :  { %1367 = vmatprep.subr.bf16.mxu0 %v6438_v11  ;;  %1531 = vmatprep.subr.bf16.mxu1 %v6441_v12  ;;  %v7749_v11 = vld [vmem:[%s9766_s0 + $0x10] sm:$0xff]  ;;  %v6533_v12 = vld [vmem:[%s9768_s2 + $0x42c] ss:$16 sps:$4 sm:$0xff]  }
  0x4b   :  { %1368 = vmatpush1.bf16.msra.mxu0 %v6436_v13  ;;  %1532 = vmatpush1.bf16.msra.mxu1 %v6439_v14  ;;  %v5579_v13 = vcombine.high %v7749_v11, %v7749_v11  ;;  %v6528_v14 = vld [vmem:[%s9768_s2 + $0x420] ss:$16 sps:$4 sm:$0xff]  }
  0x4c   :  { %1369 = vmatprep.subr.bf16.mxu0 %v6444_v15  ;;  %1533 = vmatprep.subr.bf16.mxu1 %v6447_v16  ;;  %v6531_v15 = vld [vmem:[%s9768_s2 + $0x428] ss:$16 sps:$4 sm:$0xff]   ;;  %v6536_v16 = vld [vmem:[%s9768_s2 + $0x444] ss:$16 sps:$4 sm:$0xff]  }
  0x4f   :  { %1370 = vmatpush1.bf16.msra.mxu0 %v6442_v17  ;;  %1534 = vmatpush1.bf16.msra.mxu1 %v6445_v18  ;;  %v6539_v17 = vld [vmem:[%s9768_s2 + $0x44c] ss:$16 sps:$4 sm:$0xff]   ;;  %v6534_v18 = vld [vmem:[%s9768_s2 + $0x440] ss:$16 sps:$4 sm:$0xff]  }
  0x50   :  { %1371 = vmatprep.subr.bf16.mxu0 %v6450_v19  ;;  %1535 = vmatprep.subr.bf16.mxu1 %v6453_v20  ;;  %v6537_v19 = vld [vmem:[%s9768_s2 + $0x448] ss:$16 sps:$4 sm:$0xff]   ;;  %v6542_v20 = vld [vmem:[%s9768_s2 + $0x464] ss:$16 sps:$4 sm:$0xff]  }
  0x53   :  { %1372 = vmatpush1.bf16.msra.mxu0 %v6448_v21  ;;  %1536 = vmatpush1.bf16.msra.mxu1 %v6451_v22  ;;  %v6545_v21 = vld [vmem:[%s9768_s2 + $0x46c] ss:$16 sps:$4 sm:$0xff]   ;;  %v6540_v22 = vld [vmem:[%s9768_s2 + $0x460] ss:$16 sps:$4 sm:$0xff]  }
  0x54   :  { %1373 = vmatprep.subr.bf16.mxu0 %v6456_v23  ;;  %1537 = vmatprep.subr.bf16.mxu1 %v6459_v24  ;;  %v6543_v23 = vld [vmem:[%s9768_s2 + $0x468] ss:$16 sps:$4 sm:$0xff]   ;;  %v6548_v24 = vld [vmem:[%s9768_s2 + $0x484] ss:$16 sps:$4 sm:$0xff]  }
  0x57   :  { %1374 = vmatpush1.bf16.msra.mxu0 %v6454_v25  ;;  %1538 = vmatpush1.bf16.msra.mxu1 %v6457_v26  ;;  %v6551_v25 = vld [vmem:[%s9768_s2 + $0x48c] ss:$16 sps:$4 sm:$0xff]   ;;  %v6546_v26 = vld [vmem:[%s9768_s2 + $0x480] ss:$16 sps:$4 sm:$0xff]  }
  0x58   :  { %1375 = vmatprep.subr.bf16.mxu0 %v6462_v27  ;;  %1539 = vmatprep.subr.bf16.mxu1 %v6465_v28  ;;  %v6549_v27 = vld [vmem:[%s9768_s2 + $0x488] ss:$16 sps:$4 sm:$0xff]   ;;  %v6554_v28 = vld [vmem:[%s9768_s2 + $0x4a4] ss:$16 sps:$4 sm:$0xff]  }
  0x5b   :  { %1376 = vmatpush1.bf16.msra.mxu0 %v6460_v31  ;;  %1540 = vmatpush1.bf16.msra.mxu1 %v6463_v32  ;;  %v6555_v31 = vld [vmem:[%s9768_s2 + $0x4a8] ss:$16 sps:$4 sm:$0xff]   ;;  %v6560_v32 = vld [vmem:[%s9768_s2 + $0x4c4] ss:$16 sps:$4 sm:$0xff]  }
  0x5c   :  { %1377 = vmatprep.subr.bf16.mxu0 %v6468_v33  ;;  %1541 = vmatprep.subr.bf16.mxu1 %v6471_v34  ;;  %v6563_v33 = vld [vmem:[%s9768_s2 + $0x4cc] ss:$16 sps:$4 sm:$0xff]   ;;  %v6558_v34 = vld [vmem:[%s9768_s2 + $0x4c0] ss:$16 sps:$4 sm:$0xff]  }
  0x5f   :  { %1378 = vmatpush1.bf16.msra.mxu0 %v6466_v35  ;;  %1542 = vmatpush1.bf16.msra.mxu1 %v6469_v36  ;;  %v6561_v35 = vld [vmem:[%s9768_s2 + $0x4c8] ss:$16 sps:$4 sm:$0xff]   ;;  %v6566_v36 = vld [vmem:[%s9768_s2 + $0x4e4] ss:$16 sps:$4 sm:$0xff]  }
  0x60   :  { %1379 = vmatprep.subr.bf16.mxu0 %v6474_v37  ;;  %1543 = vmatprep.subr.bf16.mxu1 %v6477_v38  ;;  %v6569_v37 = vld [vmem:[%s9768_s2 + $0x4ec] ss:$16 sps:$4 sm:$0xff]   ;;  %v6564_v38 = vld [vmem:[%s9768_s2 + $0x4e0] ss:$16 sps:$4 sm:$0xff]  }
  0x63   :  { %1380 = vmatpush1.bf16.msra.mxu0 %v6472_v39  ;;  %1544 = vmatpush1.bf16.msra.mxu1 %v6475_v40  ;;  %v6567_v39 = vld [vmem:[%s9768_s2 + $0x4e8] ss:$16 sps:$4 sm:$0xff]   ;;  %v6572_v40 = vld [vmem:[%s9768_s2 + $0x504] ss:$16 sps:$4 sm:$0xff]  }
  0x64   :  { %1381 = vmatprep.subr.bf16.mxu0 %v6480_v41  ;;  %1545 = vmatprep.subr.bf16.mxu1 %v6483_v42  ;;  %v6575_v41 = vld [vmem:[%s9768_s2 + $0x50c] ss:$16 sps:$4 sm:$0xff]   ;;  %v6570_v42 = vld [vmem:[%s9768_s2 + $0x500] ss:$16 sps:$4 sm:$0xff]  }
  0x67   :  { %1382 = vmatpush1.bf16.msra.mxu0 %v6478_v43  ;;  %1546 = vmatpush1.bf16.msra.mxu1 %v6481_v44  ;;  %v6573_v43 = vld [vmem:[%s9768_s2 + $0x508] ss:$16 sps:$4 sm:$0xff]   ;;  %v6578_v44 = vld [vmem:[%s9768_s2 + $0x524] ss:$16 sps:$4 sm:$0xff]  }
  0x68   :  { %1383 = vmatprep.subr.bf16.mxu0 %v6486_v45  ;;  %1547 = vmatprep.subr.bf16.mxu1 %v6489_v46  ;;  %v6581_v45 = vld [vmem:[%s9768_s2 + $0x52c] ss:$16 sps:$4 sm:$0xff]   ;;  %v6576_v46 = vld [vmem:[%s9768_s2 + $0x520] ss:$16 sps:$4 sm:$0xff]  }
  0x6b   :  { %1384 = vmatpush1.bf16.msra.mxu0 %v6484_v47  ;;  %1548 = vmatpush1.bf16.msra.mxu1 %v6487_v48  ;;  %v6579_v47 = vld [vmem:[%s9768_s2 + $0x528] ss:$16 sps:$4 sm:$0xff]   ;;  %v6584_v48 = vld [vmem:[%s9768_s2 + $0x544] ss:$16 sps:$4 sm:$0xff]  }
  0x6c   :  { %1385 = vmatprep.subr.bf16.mxu0 %v6492_v49  ;;  %1549 = vmatprep.subr.bf16.mxu1 %v6495_v50  ;;  %v6587_v49 = vld [vmem:[%s9768_s2 + $0x54c] ss:$16 sps:$4 sm:$0xff]   ;;  %v6582_v50 = vld [vmem:[%s9768_s2 + $0x540] ss:$16 sps:$4 sm:$0xff]  }
  0x6f   :  { %1386 = vmatpush1.bf16.msra.mxu0 %v6490_v51  ;;  %1550 = vmatpush1.bf16.msra.mxu1 %v6493_v52  ;;  %v6585_v51 = vld [vmem:[%s9768_s2 + $0x548] ss:$16 sps:$4 sm:$0xff]   ;;  %v6590_v52 = vld [vmem:[%s9768_s2 + $0x564] ss:$16 sps:$4 sm:$0xff]  }
  0x70   :  { %1387 = vmatprep.subr.bf16.mxu0 %v6498_v53  ;;  %1551 = vmatprep.subr.bf16.mxu1 %v6501_v54  ;;  %v6593_v53 = vld [vmem:[%s9768_s2 + $0x56c] ss:$16 sps:$4 sm:$0xff]   ;;  %v6588_v54 = vld [vmem:[%s9768_s2 + $0x560] ss:$16 sps:$4 sm:$0xff]  }
  0x73   :  { %1388 = vmatpush1.bf16.msra.mxu0 %v6496_v55  ;;  %1552 = vmatpush1.bf16.msra.mxu1 %v6499_v56  ;;  %v6591_v55 = vld [vmem:[%s9768_s2 + $0x568] ss:$16 sps:$4 sm:$0xff]   ;;  %v6596_v56 = vld [vmem:[%s9768_s2 + $0x584] ss:$16 sps:$4 sm:$0xff]  }
  0x74   :  { %1389 = vmatprep.subr.bf16.mxu0 %v6504_v57  ;;  %1553 = vmatprep.subr.bf16.mxu1 %v6507_v58  ;;  %v6599_v57 = vld [vmem:[%s9768_s2 + $0x58c] ss:$16 sps:$4 sm:$0xff]   ;;  %v6594_v58 = vld [vmem:[%s9768_s2 + $0x580] ss:$16 sps:$4 sm:$0xff]  }
  0x77   :  { %1390 = vmatpush1.bf16.msra.mxu0 %v6502_v59  ;;  %1554 = vmatpush1.bf16.msra.mxu1 %v6505_v60  ;;  %v6597_v59 = vld [vmem:[%s9768_s2 + $0x588] ss:$16 sps:$4 sm:$0xff]   ;;  %v6602_v60 = vld [vmem:[%s9768_s2 + $0x5a4] ss:$16 sps:$4 sm:$0xff]  }
  0x78   :  { %1391 = vmatprep.subr.bf16.mxu0 %v6510_v61  ;;  %1555 = vmatprep.subr.bf16.mxu1 %v6513_v62  ;;  %v6605_v61 = vld [vmem:[%s9768_s2 + $0x5ac] ss:$16 sps:$4 sm:$0xff]   ;;  %v6600_v62 = vld [vmem:[%s9768_s2 + $0x5a0] ss:$16 sps:$4 sm:$0xff]  }
  0x7b   :  { %1392 = vmatpush1.bf16.msra.mxu0 %v6508_v63  ;;  %1556 = vmatpush1.bf16.msra.mxu1 %v6511_v0  ;;  %v6603_v63 = vld [vmem:[%s9768_s2 + $0x5a8] ss:$16 sps:$4 sm:$0xff]   ;;  %v6608_v0 = vld [vmem:[%s9768_s2 + $0x5c4] ss:$16 sps:$4 sm:$0xff]  }
  0x7c   :  { %1393 = vmatprep.subr.bf16.mxu0 %v6516_v1  ;;  %1557 = vmatprep.subr.bf16.mxu1 %v6519_v2  ;;  %v6611_v1 = vld [vmem:[%s9768_s2 + $0x5cc] ss:$16 sps:$4 sm:$0xff]   ;;  %v6606_v2 = vld [vmem:[%s9768_s2 + $0x5c0] ss:$16 sps:$4 sm:$0xff]  }
  0x7f   :  { %1394 = vmatpush1.bf16.msra.mxu0 %v6514_v3  ;;  %1558 = vmatpush1.bf16.msra.mxu1 %v6517_v4  ;;  %v6609_v3 = vld [vmem:[%s9768_s2 + $0x5c8] ss:$16 sps:$4 sm:$0xff]   ;;  %v6614_v4 = vld [vmem:[%s9768_s2 + $0x5e4] ss:$16 sps:$4 sm:$0xff]  }
  0x80   :  { %1404 = vmatprep.subr.bf16.mxu0 %v6524_v5  ;;  %1568 = vmatprep.subr.bf16.mxu1 %v6527_v6  ;;  %v6617_v5 = vld [vmem:[%s9768_s2 + $0x5ec] ss:$16 sps:$4 sm:$0xff]   ;;  %v6612_v6 = vld [vmem:[%s9768_s2 + $0x5e0] ss:$16 sps:$4 sm:$0xff]  }
  0x82   :  { %1396 = vmatmul.mubr.bf16.vlgmr.msra.gmra.mrb[0].mxu0 %v5576_v7  ;;  %1560 = vmatmul.mubr.bf16.vlgmr.msra.gmra.mrb[0].mxu1 %v5576_v7  ;;  %v6615_v7 = vld [vmem:[%s9768_s2 + $0x5e8] ss:$16 sps:$4 sm:$0xff]  }
  0x83   :  { %1405 = vmatpush1.bf16.msra.mxu0 %v6522_v8  ;;  %1569 = vmatpush1.bf16.msra.mxu1 %v6525_v9  ;;  %v6622_v8 = vld [vmem:[%s9768_s2 + $0x604] ss:$16 sps:$4 sm:$0xff]   ;;  %v6625_v9 = vld [vmem:[%s9768_s2 + $0x60c] ss:$16 sps:$4 sm:$0xff]  }
  0x84   :  { %1406 = vmatprep.subr.bf16.mxu0 %v6530_v10  ;;  %1570 = vmatprep.subr.bf16.mxu1 %v6533_v12  ;;  %v6620_v10 = vld [vmem:[%s9768_s2 + $0x600] ss:$16 sps:$4 sm:$0xff]   ;;  %v6623_v12 = vld [vmem:[%s9768_s2 + $0x608] ss:$16 sps:$4 sm:$0xff]  }
  0x85   :  { %1436 = vmatprep.mubr.bf16.mxu0 %v5579_v13  ;;  %1600 = vmatprep.mubr.bf16.mxu1 %v5579_v13  ;;  %v5578_v13 = vcombine.low %v7749_v11, %v7749_v11  ;;  %v6626_v11 = vld [vmem:[%s9768_s2 + $0x620] ss:$16 sps:$4 sm:$0xff]  }
  0x87   :  { %1407 = vmatpush1.bf16.msra.mxu0 %v6528_v14  ;;  %1571 = vmatpush1.bf16.msra.mxu1 %v6531_v15  ;;  %v6628_v14 = vld [vmem:[%s9768_s2 + $0x624] ss:$16 sps:$4 sm:$0xff]   ;;  %v6631_v15 = vld [vmem:[%s9768_s2 + $0x62c] ss:$16 sps:$4 sm:$0xff]  }
  0x88   :  { %1408 = vmatprep.subr.bf16.mxu0 %v6536_v16  ;;  %1572 = vmatprep.subr.bf16.mxu1 %v6539_v17  ;;  %v247_v16 = vld [vmem:[%s9768_s2 + $0x640] sm:$0x11]  ;;  %v248_v17 = vld [vmem:[%s9768_s2 + $0x648] sm:$0x11] }
  0x8b   :  { %1409 = vmatpush1.bf16.msra.mxu0 %v6534_v18  ;;  %1573 = vmatpush1.bf16.msra.mxu1 %v6537_v19  ;;  %v6629_v18 = vld [vmem:[%s9768_s2 + $0x628] ss:$16 sps:$4 sm:$0xff]   ;;  %v5782_v19 = vcombine.high %v247_v16, %v247_v16 }
  0x8c   :  { %1410 = vmatprep.subr.bf16.mxu0 %v6542_v20  ;;  %1574 = vmatprep.subr.bf16.mxu1 %v6545_v21  ;;  %v5784_v20 = vcombine.high %v248_v17, %v248_v17  ;;  %v5781_v21 = vcombine.low %v247_v16, %v247_v16 }
  0x8f   :  { %1411 = vmatpush1.bf16.msra.mxu0 %v6540_v22  ;;  %1575 = vmatpush1.bf16.msra.mxu1 %v6543_v23  ;;  %v5783_v22 = vcombine.low %v248_v17, %v248_v17  ;;  %v7265_v23 = vmov 0  }
  0x90   :  { %1412 = vmatprep.subr.bf16.mxu0 %v6548_v24  ;;  %1576 = vmatprep.subr.bf16.mxu1 %v6551_v25  ;;  %v7967_v24 = vld [vmem:[%s9771_s5 + $0x4] ss:$16 sps:$4 sm:$0xff]   ;;  %v7972_v25 = vld [vmem:[%s9771_s5 + $0xc] ss:$16 sps:$4 sm:$0xff]  }
  0x93   :  { %1413 = vmatpush1.bf16.msra.mxu0 %v6546_v26  ;;  %1577 = vmatpush1.bf16.msra.mxu1 %v6549_v27  ;;  %v1311_v26 = vsel %vm1309_vm0, %v5781_v21, 0  ;;  %v1317_v27 = vsel %vm1309_vm0, %v5783_v22, 0 }
  0x94   :  { %1414 = vmatprep.subr.bf16.mxu0 %v6554_v28  ;;  %1578 = vmatprep.subr.bf16.mxu1 %v6557_v29  ;;  %v6636_v28 = vld [vmem:[%s9766_s0 + $0x18] ss:$0 sps:$4 sm:$0xff]   ;;  %v7984_v29 = vld [vmem:[%s9771_s5] ss:$16 sps:$4 sm:$0xff]  }
  0x97   :  { %1415 = vmatpush1.bf16.msra.mxu0 %v6552_v30  ;;  %1579 = vmatpush1.bf16.msra.mxu1 %v6555_v31  ;;  %v7989_v30 = vld [vmem:[%s9771_s5 + $0x8] ss:$16 sps:$4 sm:$0xff]   ;;  %v7994_v31 = vld [vmem:[%s9771_s5 + $0x24] ss:$16 sps:$4 sm:$0xff]  }
  0x98   :  { %1416 = vmatprep.subr.bf16.mxu0 %v6560_v32  ;;  %1580 = vmatprep.subr.bf16.mxu1 %v6563_v33  ;;  %v7999_v32 = vld [vmem:[%s9771_s5 + $0x2c] ss:$16 sps:$4 sm:$0xff]   ;;  %v8006_v33 = vld [vmem:[%s9771_s5 + $0x20] ss:$16 sps:$4 sm:$0xff]  }
  0x9b   :  { %1417 = vmatpush1.bf16.msra.mxu0 %v6558_v34  ;;  %1581 = vmatpush1.bf16.msra.mxu1 %v6561_v35  ;;  %v8011_v34 = vld [vmem:[%s9771_s5 + $0x28] ss:$16 sps:$4 sm:$0xff]   ;;  %v8016_v35 = vld [vmem:[%s9771_s5 + $0x44] ss:$16 sps:$4 sm:$0xff]  }
  0x9c   :  { %1418 = vmatprep.subr.bf16.mxu0 %v6566_v36  ;;  %1582 = vmatprep.subr.bf16.mxu1 %v6569_v37  ;;  %v8021_v36 = vld [vmem:[%s9771_s5 + $0x4c] ss:$16 sps:$4 sm:$0xff]   ;;  %v8030_v37 = vld [vmem:[%s9771_s5 + $0x40] ss:$16 sps:$4 sm:$0xff]  }
  0x9f   :  { %1419 = vmatpush1.bf16.msra.mxu0 %v6564_v38  ;;  %1583 = vmatpush1.bf16.msra.mxu1 %v6567_v39  ;;  %v8035_v38 = vld [vmem:[%s9771_s5 + $0x48] ss:$16 sps:$4 sm:$0xff]   ;;  %v8042_v39 = vld [vmem:[%s9771_s5 + $0x64] ss:$16 sps:$4 sm:$0xff]  }
  0xa0   :  { %1420 = vmatprep.subr.bf16.mxu0 %v6572_v40  ;;  %1584 = vmatprep.subr.bf16.mxu1 %v6575_v41  ;;  %v8047_v40 = vld [vmem:[%s9771_s5 + $0x6c] ss:$16 sps:$4 sm:$0xff]   ;;  %v8056_v41 = vld [vmem:[%s9771_s5 + $0x60] ss:$16 sps:$4 sm:$0xff]  }
  0xa3   :  { %1421 = vmatpush1.bf16.msra.mxu0 %v6570_v42  ;;  %1585 = vmatpush1.bf16.msra.mxu1 %v6573_v43  ;;  %v8061_v42 = vld [vmem:[%s9771_s5 + $0x68] ss:$16 sps:$4 sm:$0xff]   ;;  %v8066_v43 = vld [vmem:[%s9771_s5 + $0x84] ss:$16 sps:$4 sm:$0xff]  }
  0xa4   :  { %1422 = vmatprep.subr.bf16.mxu0 %v6578_v44  ;;  %1586 = vmatprep.subr.bf16.mxu1 %v6581_v45  ;;  %v8071_v44 = vld [vmem:[%s9771_s5 + $0x8c] ss:$16 sps:$4 sm:$0xff]   ;;  %v8080_v45 = vld [vmem:[%s9771_s5 + $0x80] ss:$16 sps:$4 sm:$0xff]  }
  0xa7   :  { %1423 = vmatpush1.bf16.msra.mxu0 %v6576_v46  ;;  %1587 = vmatpush1.bf16.msra.mxu1 %v6579_v47  ;;  %v8085_v46 = vld [vmem:[%s9771_s5 + $0x88] ss:$16 sps:$4 sm:$0xff]   ;;  %v8090_v47 = vld [vmem:[%s9771_s5 + $0xa4] ss:$16 sps:$4 sm:$0xff]  }
  0xa8   :  { %1424 = vmatprep.subr.bf16.mxu0 %v6584_v48  ;;  %1588 = vmatprep.subr.bf16.mxu1 %v6587_v49  ;;  %v8095_v48 = vld [vmem:[%s9771_s5 + $0xac] ss:$16 sps:$4 sm:$0xff]   ;;  %v8104_v49 = vld [vmem:[%s9771_s5 + $0xa0] ss:$16 sps:$4 sm:$0xff]  }
  0xab   :  { %1425 = vmatpush1.bf16.msra.mxu0 %v6582_v50  ;;  %1589 = vmatpush1.bf16.msra.mxu1 %v6585_v51  ;;  %v8109_v50 = vld [vmem:[%s9771_s5 + $0xa8] ss:$16 sps:$4 sm:$0xff]   ;;  %v8114_v51 = vld [vmem:[%s9771_s5 + $0xc4] ss:$16 sps:$4 sm:$0xff]  }
  0xac   :  { %1426 = vmatprep.subr.bf16.mxu0 %v6590_v52  ;;  %1590 = vmatprep.subr.bf16.mxu1 %v6593_v53  ;;  %v8119_v52 = vld [vmem:[%s9771_s5 + $0xcc] ss:$16 sps:$4 sm:$0xff]   ;;  %v8128_v53 = vld [vmem:[%s9771_s5 + $0xc0] ss:$16 sps:$4 sm:$0xff]  }
  0xaf   :  { %1427 = vmatpush1.bf16.msra.mxu0 %v6588_v54  ;;  %1591 = vmatpush1.bf16.msra.mxu1 %v6591_v55  ;;  %v8133_v54 = vld [vmem:[%s9771_s5 + $0xc8] ss:$16 sps:$4 sm:$0xff]   ;;  %v8138_v55 = vld [vmem:[%s9771_s5 + $0xe4] ss:$16 sps:$4 sm:$0xff]  }
  0xb0   :  { %1428 = vmatprep.subr.bf16.mxu0 %v6596_v56  ;;  %1592 = vmatprep.subr.bf16.mxu1 %v6599_v57  ;;  %v8147_v56 = vld [vmem:[%s9771_s5 + $0xec] ss:$16 sps:$4 sm:$0xff]  }
  0xb3   :  { %1429 = vmatpush1.bf16.msra.mxu0 %v6594_v58  ;;  %1593 = vmatpush1.bf16.msra.mxu1 %v6597_v59 }
  0xb4   :  { %1430 = vmatprep.subr.bf16.mxu0 %v6602_v60  ;;  %1594 = vmatprep.subr.bf16.mxu1 %v6605_v61 }
  0xb7   :  { %1431 = vmatpush1.bf16.msra.mxu0 %v6600_v62  ;;  %1595 = vmatpush1.bf16.msra.mxu1 %v6603_v63 }
  0xb8   :  { %1432 = vmatprep.subr.bf16.mxu0 %v6608_v0  ;;  %1596 = vmatprep.subr.bf16.mxu1 %v6611_v1 }
  0xbb   :  { %1433 = vmatpush1.bf16.msra.mxu0 %v6606_v2  ;;  %1597 = vmatpush1.bf16.msra.mxu1 %v6609_v3 }
  0xbc   :  { %1434 = vmatprep.subr.bf16.mxu0 %v6614_v4  ;;  %1598 = vmatprep.subr.bf16.mxu1 %v6617_v5 }
  0xbf   :  { %1435 = vmatpush1.bf16.msra.mxu0 %v6612_v6  ;;  %1599 = vmatpush1.bf16.msra.mxu1 %v6615_v7 }
  0xc0   :  { %1445 = vmatprep.subr.bf16.mxu0 %v6622_v8  ;;  %1609 = vmatprep.subr.bf16.mxu1 %v6625_v9 }
  0xc2   :  { %1437 = vmatmul.mubr.bf16.vlgmr.msra.gmra.mrb[0].mxu0 %v5578_v13  ;;  %1601 = vmatmul.mubr.bf16.vlgmr.msra.gmra.mrb[0].mxu1 %v5578_v13 }
  0xc3   :  { %1446 = vmatpush1.bf16.msra.mxu0 %v6620_v10  ;;  %1610 = vmatpush1.bf16.msra.mxu1 %v6623_v12 }
  0xc4   :  { %1447 = vmatprep.subr.bf16.mxu0 %v6628_v14  ;;  %1611 = vmatprep.subr.bf16.mxu1 %v6631_v15 }
  0xc5   :  { %1477 = vmatprep.mubr.bf16.mxu0 %v7265_v23  ;;  %1641 = vmatprep.mubr.bf16.mxu1 %v7265_v23 }
  0xc7   :  { %1448 = vmatpush1.bf16.msra.mxu0 %v6626_v11  ;;  %1612 = vmatpush1.bf16.msra.mxu1 %v6629_v18 }
  0xc8   :  { %5785 = vmatprep.subr.msk.bf16.mxu0 %vm1309_vm0, %v5782_v19  ;;  %5787 = vmatprep.subr.msk.bf16.mxu1 %vm1309_vm0, %v5784_v20 }
  0xcb   :  { %1450 = vmatpush1.bf16.msra.mxu0 %v1311_v26  ;;  %1614 = vmatpush1.bf16.msra.mxu1 %v1317_v27 }
  0xcc   :  { %1842 = vmatprep.subr.bf16.mxu0 %v7967_v24  ;;  %1883 = vmatprep.subr.bf16.mxu1 %v7972_v25 }
  0xce   :  { %5786 = vmatmul.mubr.msk.bf16.vlgmr.msra.gmra.mrb[0].mxu0 %vm1305_vm1, %v6636_v28  ;;  %5788 = vmatmul.mubr.msk.bf16.vlgmr.msra.gmra.mrb[0].mxu1 %vm1305_vm1, %v6636_v28 }
  0xcf   :  { %1843 = vmatpush1.bf16.msra.mxu0 %v7984_v29  ;;  %1884 = vmatpush1.bf16.msra.mxu1 %v7989_v30 }
  0xd0   :  { %1844 = vmatprep.subr.bf16.mxu0 %v7994_v31  ;;  %1885 = vmatprep.subr.bf16.mxu1 %v7999_v32 }
  0xd1   :  { %1874 = vmatprep.mubr.bf16.mxu0 %v7265_v23  ;;  %1915 = vmatprep.mubr.bf16.mxu1 %v7265_v23 }
  0xd3   :  { %1845 = vmatpush1.bf16.msra.mxu0 %v8006_v33  ;;  %1886 = vmatpush1.bf16.msra.mxu1 %v8011_v34 }
  0xd4   :  { %1846 = vmatprep.subr.bf16.mxu0 %v8016_v35  ;;  %1887 = vmatprep.subr.bf16.mxu1 %v8021_v36 }
  0xd7   :  { %1847 = vmatpush1.bf16.msra.mxu0 %v8030_v37  ;;  %1888 = vmatpush1.bf16.msra.mxu1 %v8035_v38 }
  0xd8   :  { %1848 = vmatprep.subr.bf16.mxu0 %v8042_v39  ;;  %1889 = vmatprep.subr.bf16.mxu1 %v8047_v40 }
  0xdb   :  { %1849 = vmatpush1.bf16.msra.mxu0 %v8056_v41  ;;  %1890 = vmatpush1.bf16.msra.mxu1 %v8061_v42 }
  0xdc   :  { %1850 = vmatprep.subr.bf16.mxu0 %v8066_v43  ;;  %1891 = vmatprep.subr.bf16.mxu1 %v8071_v44 }
  0xdf   :  { %1851 = vmatpush1.bf16.msra.mxu0 %v8080_v45  ;;  %1892 = vmatpush1.bf16.msra.mxu1 %v8085_v46 }
  0xe0   :  { %1852 = vmatprep.subr.bf16.mxu0 %v8090_v47  ;;  %1893 = vmatprep.subr.bf16.mxu1 %v8095_v48 }
  0xe3   :  { %1853 = vmatpush1.bf16.msra.mxu0 %v8104_v49  ;;  %1894 = vmatpush1.bf16.msra.mxu1 %v8109_v50 }
  0xe4   :  { %1854 = vmatprep.subr.bf16.mxu0 %v8114_v51  ;;  %1895 = vmatprep.subr.bf16.mxu1 %v8119_v52 }
  0xe5   :  { %17 = vsyncpa [#allocation3], 0  ;;  %v8154_v57 = vld [vmem:[%s9771_s5 + $0xe0] ss:$16 sps:$4 sm:$0xff]   ;;  %v8159_v58 = vld [vmem:[%s9771_s5 + $0xe8] ss:$16 sps:$4 sm:$0xff]   ;;  %v251_v3 = vlaneseq }
  0xe6   :  { %v249_v6 = vld [vmem:[%s9769_s3] sm:$0xf]  ;;  %vm2336_vm2 = vcmask 1041408   ;;  %vm2338_vm3 = vcmask 1043456   ;;  %vm2340_vm4 = vcmask 1045504   ;;  %vm7268_vm5 = vmmov 0  }
  0xe7   :  { %1855 = vmatpush1.bf16.msra.mxu0 %v8128_v53  ;;  %1896 = vmatpush1.bf16.msra.mxu1 %v8133_v54  ;;  %v252_v4 = vshrl.u32 %v251_v3, 7  ;;  %vm5323_vm6 = vcmask 23552   ;;  %vm5514_vm8 = vcmask 523264   ;;  %vm5558_vm9 = vcmask 33792  }
  0xe8   :  { %1856 = vmatprep.subr.bf16.mxu0 %v8138_v55  ;;  %1897 = vmatprep.subr.bf16.mxu1 %v8147_v56 }
  0xe9   :  { %v8203_v5 = vsub.s32 0, %v252_v4  ;;  %v8208_v7 = vsub.s32 1, %v252_v4  ;;  %v8212_v10 = vsub.s32 3, %v252_v4  ;;  %v8221_v22 = vsub.s32 2, %v252_v4 }
  0xeb   :  { %1857 = vmatpush1.bf16.msra.mxu0 %v8154_v57  ;;  %1898 = vmatpush1.bf16.msra.mxu1 %v8159_v58  ;;  %v254_v8 = vrot.slane %v249_v6, %v8203_v5  ;;  %v258_v9 = vrot.slane %v249_v6, %v8208_v7  ;;  %v266_v18 = vrot.slane %v249_v6, %v8212_v10 }
  0xec   :  { %1953 = vmatprep.subr.bf16.mxu0 %v7967_v24  ;;  %1994 = vmatprep.subr.bf16.mxu1 %v7972_v25 }
  0xee   :  { %1875 = vmatmul.mubr.bf16.vlgmr.msra.gmra.mrb[4].mxu0 %v7265_v23  ;;  %1916 = vmatmul.mubr.bf16.vlgmr.msra.gmra.mrb[4].mxu1 %v7265_v23 }
  0xef   :  { %1954 = vmatpush1.bf16.msra.mxu0 %v7984_v29  ;;  %1995 = vmatpush1.bf16.msra.mxu1 %v7989_v30 }
  0xf0   :  { %1955 = vmatprep.subr.bf16.mxu0 %v7994_v31  ;;  %1996 = vmatprep.subr.bf16.mxu1 %v7999_v32 }
  0xf1   :  { %1985 = vmatprep.mubr.bf16.mxu0 %v7265_v23  ;;  %2026 = vmatprep.mubr.bf16.mxu1 %v7265_v23 }
  0xf3   :  { %1956 = vmatpush1.bf16.msra.mxu0 %v8006_v33  ;;  %1997 = vmatpush1.bf16.msra.mxu1 %v8011_v34 }
  0xf4   :  { %1957 = vmatprep.subr.bf16.mxu0 %v8016_v35  ;;  %1998 = vmatprep.subr.bf16.mxu1 %v8021_v36 }
  0xf7   :  { %1958 = vmatpush1.bf16.msra.mxu0 %v8030_v37  ;;  %1999 = vmatpush1.bf16.msra.mxu1 %v8035_v38 }
  0xf8   :  { %1959 = vmatprep.subr.bf16.mxu0 %v8042_v39  ;;  %2000 = vmatprep.subr.bf16.mxu1 %v8047_v40 }
  0xfb   :  { %1960 = vmatpush1.bf16.msra.mxu0 %v8056_v41  ;;  %2001 = vmatpush1.bf16.msra.mxu1 %v8061_v42 }
  0xfc   :  { %1961 = vmatprep.subr.bf16.mxu0 %v8066_v43  ;;  %2002 = vmatprep.subr.bf16.mxu1 %v8071_v44 }
  0xff   :  { %1962 = vmatpush1.bf16.msra.mxu0 %v8080_v45  ;;  %2003 = vmatpush1.bf16.msra.mxu1 %v8085_v46 }
 0x100   :  { %1963 = vmatprep.subr.bf16.mxu0 %v8090_v47  ;;  %2004 = vmatprep.subr.bf16.mxu1 %v8095_v48 }
 0x103   :  { %1964 = vmatpush1.bf16.msra.mxu0 %v8104_v49  ;;  %2005 = vmatpush1.bf16.msra.mxu1 %v8109_v50 }
 0x104   :  { %1965 = vmatprep.subr.bf16.mxu0 %v8114_v51  ;;  %2006 = vmatprep.subr.bf16.mxu1 %v8119_v52 }
 0x107   :  { %1966 = vmatpush1.bf16.msra.mxu0 %v8128_v53  ;;  %2007 = vmatpush1.bf16.msra.mxu1 %v8133_v54 }
 0x108   :  { %1967 = vmatprep.subr.bf16.mxu0 %v8138_v55  ;;  %2008 = vmatprep.subr.bf16.mxu1 %v8147_v56 }
 0x10b   :  { %1968 = vmatpush1.bf16.msra.mxu0 %v8154_v57  ;;  %2009 = vmatpush1.bf16.msra.mxu1 %v8159_v58 }
 0x10c   :  { %2082 = vmatprep.subr.bf16.mxu0 %v7967_v24  ;;  %2123 = vmatprep.subr.bf16.mxu1 %v7972_v25 }
 0x1a1   :  { %v1479_v59 = vpop.f32.mrb[0].mxu0  ;;  %v1643_v60 = vpop.f32.mrb[0].mxu1 }
 0x1a2   :  { %v1481_v61 = vpop.f32.mrb[1].mxu0  ;;  %v1645_v62 = vpop.f32.mrb[1].mxu1  ;;  %v8214_v12 = vadd.f32 %v1479_v59, %v254_v8 }
 0x1a3   :  { %v1483_v63 = vpop.f32.mrb[2].mxu0  ;;  %v1647_v0 = vpop.f32.mrb[2].mxu1  ;;  %v8216_v13 = vadd.f32 %v1481_v61, %v258_v9  ;;  %v8223_v61 = vadd.f32 %v1645_v62, %v266_v18 }
 0x1a4   :  { %v1484_v1 = vpop.f32.mrb[3].mxu0  ;;  %v1648_v2 = vpop.f32.mrb[3].mxu1  ;;  %v262_v63 = vrot.slane %v249_v6, %v8221_v22 }
 0x1a6   :  { %v8227_v1 = vadd.f32 %v1643_v60, %v262_v63 }
 0x1c1   :  { %v1876_v14 = vpop.f32.mrb[4].mxu0  ;;  %v1917_v15 = vpop.f32.mrb[4].mxu1 }
 0x1c2   :  { %v1924_v16 = vadd.f32 %v8214_v12, %v1876_v14  ;;  %v1878_v17 = vpop.f32.mrb[5].mxu0  ;;  %v1919_v11 = vpop.f32.mrb[5].mxu1  ;;  %v1926_v3 = vadd.f32 %v8227_v1, %v1917_v15 }
 0x1c3   :  { %v1925_v19 = vadd.f32 %v8216_v13, %v1878_v17  ;;  %v1880_v20 = vpop.f32.mrb[6].mxu0  ;;  %v1921_v21 = vpop.f32.mrb[6].mxu1  ;;  %v1927_v0 = vadd.f32 %v8223_v61, %v1919_v11 }
 0x1c4   :  { %v5821_v26 = vmul.f32 -1.442695, %v1924_v16  ;;  %v1881_v27 = vpop.f32.mrb[7].mxu0  ;;  %v1922_v28 = vpop.f32.mrb[7].mxu1 }
 0x1c5   :  { %v5822_v59 = vmul.f32 -1.442695, %v1925_v19  ;;  %v5823_v2 = vmul.f32 -1.442695, %v1927_v0 }
 0x1c6   :  { %6985 = vpow2.f32 %v5821_v26 }
 0x1c7   :  { %6987 = vpow2.f32 %v5822_v59 }
 0x1c8   :  { %6989 = vpow2.f32 %v5823_v2 }
 0x1c9   :  { %6991 = vtanh.f32 %v1926_v3 }
 0x1d0   :  { %v6986_v8 = vpop.eup %6985 }
 0x1d1   :  { %v6988_v4 = vpop.eup %6987  ;;  %v1931_v9 = vadd.f32 1.0, %v6986_v8 }
 0x1d2   :  { %v1937_v14 = vadd.f32 1.0, %v6988_v4  ;;  %v6990_v62 = vpop.eup %6989 }
 0x1d3   :  { %6993 = vrcp.f32 %v1931_v9  ;;  %v6992_v16 = vpop.eup %6991  ;;  %v1944_v19 = vadd.f32 1.0, %v6990_v62 }
 0x1d4   :  { %6995 = vrcp.f32 %v1937_v14 }
 0x1d5   :  { %6997 = vrcp.f32 %v1944_v19 }
 0x1dd   :  { %v6994_v17 = vpop.eup %6993 }
 0x1de   :  { %v6996_v18 = vpop.eup %6995  ;;  %v1948_v6 = vmul.f32 %v6994_v17, %v6992_v16 }
 0x1df   :  { %v1947_v11 = vmul.f32 0.0, %v6996_v18  ;;  %v6998_v15 = vpop.eup %6997 }
 0x1e1   :  { %v8230_v60 = vadd.f32 %v1948_v6, %v1947_v11 }
 0x1e3   :  { %6999 = vtanh.f32 %v8230_v60 }
 0x1ed   :  { %v7000_v20 = vpop.eup %6999 }
 0x1ee   :  { %v8233_v21 = vmul.f32 %v7000_v20, %v6998_v15 }
 0x1f0   :  { %v1952_v26 = vpack.c.bf16 %v8233_v21, %v8233_v21 }
 0x1f2   :  { %1986 = vmatmul.mubr.bf16.vlgmr.msra.gmra.mrb[8].mxu0 %v1952_v26  ;;  %2027 = vmatmul.mubr.bf16.vlgmr.msra.gmra.mrb[8].mxu1 %v1952_v26 }
 0x1f3   :  { %2083 = vmatpush1.bf16.msra.mxu0 %v7984_v29  ;;  %2124 = vmatpush1.bf16.msra.mxu1 %v7989_v30 }
 0x1f4   :  { %2084 = vmatprep.subr.bf16.mxu0 %v7994_v31  ;;  %2125 = vmatprep.subr.bf16.mxu1 %v7999_v32 }
 0x1f5   :  { %2114 = vmatprep.mubr.bf16.mxu0 %v7265_v23  ;;  %2155 = vmatprep.mubr.bf16.mxu1 %v7265_v23 }
 0x1f7   :  { %2085 = vmatpush1.bf16.msra.mxu0 %v8006_v33  ;;  %2126 = vmatpush1.bf16.msra.mxu1 %v8011_v34 }
 0x1f8   :  { %2086 = vmatprep.subr.bf16.mxu0 %v8016_v35  ;;  %2127 = vmatprep.subr.bf16.mxu1 %v8021_v36 }
 0x1fb   :  { %2087 = vmatpush1.bf16.msra.mxu0 %v8030_v37  ;;  %2128 = vmatpush1.bf16.msra.mxu1 %v8035_v38 }
 0x1fc   :  { %2088 = vmatprep.subr.bf16.mxu0 %v8042_v39  ;;  %2129 = vmatprep.subr.bf16.mxu1 %v8047_v40 }
 0x1ff   :  { %2089 = vmatpush1.bf16.msra.mxu0 %v8056_v41  ;;  %2130 = vmatpush1.bf16.msra.mxu1 %v8061_v42 }
 0x200   :  { %2090 = vmatprep.subr.bf16.mxu0 %v8066_v43  ;;  %2131 = vmatprep.subr.bf16.mxu1 %v8071_v44 }
 0x203   :  { %2091 = vmatpush1.bf16.msra.mxu0 %v8080_v45  ;;  %2132 = vmatpush1.bf16.msra.mxu1 %v8085_v46 }
 0x204   :  { %2092 = vmatprep.subr.bf16.mxu0 %v8090_v47  ;;  %2133 = vmatprep.subr.bf16.mxu1 %v8095_v48 }
 0x207   :  { %2093 = vmatpush1.bf16.msra.mxu0 %v8104_v49  ;;  %2134 = vmatpush1.bf16.msra.mxu1 %v8109_v50 }
 0x208   :  { %2094 = vmatprep.subr.bf16.mxu0 %v8114_v51  ;;  %2135 = vmatprep.subr.bf16.mxu1 %v8119_v52 }
 0x20b   :  { %2095 = vmatpush1.bf16.msra.mxu0 %v8128_v53  ;;  %2136 = vmatpush1.bf16.msra.mxu1 %v8133_v54 }
 0x20c   :  { %2096 = vmatprep.subr.bf16.mxu0 %v8138_v55  ;;  %2137 = vmatprep.subr.bf16.mxu1 %v8147_v56 }
 0x20f   :  { %2097 = vmatpush1.bf16.msra.mxu0 %v8154_v57  ;;  %2138 = vmatpush1.bf16.msra.mxu1 %v8159_v58 }
 0x210   :  { %2211 = vmatprep.subr.bf16.mxu0 %v7967_v24  ;;  %2252 = vmatprep.subr.bf16.mxu1 %v7972_v25 }
 0x2c5   :  { %v1987_v27 = vpop.f32.mrb[8].mxu0  ;;  %v2028_v28 = vpop.f32.mrb[8].mxu1 }
 0x2c6   :  { %v2039_v59 = vrot.slane %v1987_v27, 6  ;;  %v1989_v63 = vpop.f32.mrb[9].mxu0  ;;  %v2030_v0 = vpop.f32.mrb[9].mxu1  ;;  %v2041_v25 = vrot.slane %v2028_v28, 6 }
 0x2c7   :  { %v2040_v2 = vrot.slane %v1989_v63, 6  ;;  %v1991_v3 = vpop.f32.mrb[10].mxu0  ;;  %v2032_v8 = vpop.f32.mrb[10].mxu1  ;;  %v2042_v18 = vrot.slane %v2030_v0, 6  ;;  %v2071_v0 = vrot.slane %v8230_v60, 6 }
 0x2c8   :  { %v2047_v4 = vadd.f32 %v8214_v12, %v2039_v59  ;;  %v1992_v9 = vpop.f32.mrb[11].mxu0  ;;  %v2033_v14 = vpop.f32.mrb[11].mxu1  ;;  %v2049_v19 = vadd.f32 %v8227_v1, %v2041_v25 }
 0x2c9   :  { %v2048_v62 = vadd.f32 %v8216_v13, %v2040_v2  ;;  %v2050_v24 = vadd.f32 %v8223_v61, %v2042_v18 }
 0x2ca   :  { %v5824_v16 = vmul.f32 -1.442695, %v2047_v4 }
 0x2cb   :  { %v5825_v17 = vmul.f32 -1.442695, %v2048_v62  ;;  %v5826_v6 = vmul.f32 -1.442695, %v2050_v24 }
 0x2cc   :  { %7001 = vpow2.f32 %v5824_v16 }
 0x2cd   :  { %7003 = vpow2.f32 %v5825_v17 }
 0x2ce   :  { %7005 = vpow2.f32 %v5826_v6 }
 0x2cf   :  { %7007 = vtanh.f32 %v2049_v19 }
 0x2d6   :  { %v7002_v11 = vpop.eup %7001 }
 0x2d7   :  { %v7004_v15 = vpop.eup %7003  ;;  %v2054_v20 = vadd.f32 1.0, %v7002_v11 }
 0x2d8   :  { %v2060_v26 = vadd.f32 1.0, %v7004_v15  ;;  %v7006_v27 = vpop.eup %7005 }
 0x2d9   :  { %7009 = vrcp.f32 %v2054_v20  ;;  %v7008_v59 = vpop.eup %7007  ;;  %v2067_v8 = vadd.f32 1.0, %v7006_v27  ;;  %v6690_v27 = vld [vmem:[%s9770_s4 + $0xc] ss:$16 sps:$4 sm:$0xff]  }
 0x2da   :  { %7011 = vrcp.f32 %v2060_v26  ;;  %v6687_v26 = vld [vmem:[%s9770_s4 + $0x4] ss:$16 sps:$4 sm:$0xff]  }
 0x2db   :  { %7013 = vrcp.f32 %v2067_v8  ;;  %v6699_v8 = vld [vmem:[%s9770_s4 + $0x44] ss:$16 sps:$4 sm:$0xff]  }
 0x2e3   :  { %v7010_v63 = vpop.eup %7009 }
 0x2e4   :  { %v7012_v2 = vpop.eup %7011  ;;  %v2074_v3 = vmul.f32 %v7010_v63, %v7008_v59  ;;  %v6688_v59 = vld [vmem:[%s9770_s4 + $0x8] ss:$16 sps:$4 sm:$0xff]   ;;  %v6693_v63 = vld [vmem:[%s9770_s4 + $0x24] ss:$16 sps:$4 sm:$0xff]  }
 0x2e5   :  { %v2073_v28 = vmul.f32 %v7012_v2, %v2071_v0  ;;  %v7014_v9 = vpop.eup %7013  ;;  %v6696_v0 = vld [vmem:[%s9770_s4 + $0x2c] ss:$16 sps:$4 sm:$0xff]   ;;  %v6691_v2 = vld [vmem:[%s9770_s4 + $0x20] ss:$16 sps:$4 sm:$0xff]  }
 0x2e7   :  { %v8276_v4 = vadd.f32 %v2074_v3, %v2073_v28  ;;  %v6694_v3 = vld [vmem:[%s9770_s4 + $0x28] ss:$16 sps:$4 sm:$0xff]   ;;  %v6702_v28 = vld [vmem:[%s9770_s4 + $0x4c] ss:$16 sps:$4 sm:$0xff]  }
 0x2e9   :  { %7015 = vtanh.f32 %v8276_v4 }
 0x2f3   :  { %v7016_v14 = vpop.eup %7015 }
 0x2f4   :  { %v8279_v62 = vmul.f32 %v7016_v14, %v7014_v9  ;;  %v6700_v9 = vld [vmem:[%s9770_s4 + $0x48] ss:$16 sps:$4 sm:$0xff]   ;;  %v6705_v14 = vld [vmem:[%s9770_s4 + $0x64] ss:$16 sps:$4 sm:$0xff]  }
 0x2f6   :  { %v2078_v16 = vpack.c.bf16 %v8279_v62, %v8279_v62  ;;  %v2337_v19 = vsel %vm2336_vm2, %v8233_v21, %v8279_v62  ;;  %v6685_v21 = vld [vmem:[%s9770_s4] ss:$16 sps:$4 sm:$0xff]   ;;  %v6708_v62 = vld [vmem:[%s9770_s4 + $0x6c] ss:$16 sps:$4 sm:$0xff]  }
 0x2f8   :  { %v2080_v17 = vrot.slane %v2078_v16, 1  ;;  %v6703_v16 = vld [vmem:[%s9770_s4 + $0x60] ss:$16 sps:$4 sm:$0xff]  }
 0x2fa   :  { %2115 = vmatmul.mubr.bf16.vlgmr.msra.gmra.mrb[12].mxu0 %v2080_v17  ;;  %2156 = vmatmul.mubr.bf16.vlgmr.msra.gmra.mrb[12].mxu1 %v2080_v17  ;;  %v6706_v17 = vld [vmem:[%s9770_s4 + $0x68] ss:$16 sps:$4 sm:$0xff]  }
 0x2fb   :  { %2212 = vmatpush1.bf16.msra.mxu0 %v7984_v29  ;;  %2253 = vmatpush1.bf16.msra.mxu1 %v7989_v30 }
 0x2fc   :  { %2213 = vmatprep.subr.bf16.mxu0 %v7994_v31  ;;  %2254 = vmatprep.subr.bf16.mxu1 %v7999_v32 }
 0x2fd   :  { %2243 = vmatprep.mubr.bf16.mxu0 %v7265_v23  ;;  %2284 = vmatprep.mubr.bf16.mxu1 %v7265_v23 }
 0x2ff   :  { %2214 = vmatpush1.bf16.msra.mxu0 %v8006_v33  ;;  %2255 = vmatpush1.bf16.msra.mxu1 %v8011_v34 }
 0x300   :  { %2215 = vmatprep.subr.bf16.mxu0 %v8016_v35  ;;  %2256 = vmatprep.subr.bf16.mxu1 %v8021_v36 }
 0x303   :  { %2216 = vmatpush1.bf16.msra.mxu0 %v8030_v37  ;;  %2257 = vmatpush1.bf16.msra.mxu1 %v8035_v38 }
 0x304   :  { %2217 = vmatprep.subr.bf16.mxu0 %v8042_v39  ;;  %2258 = vmatprep.subr.bf16.mxu1 %v8047_v40 }
 0x307   :  { %2218 = vmatpush1.bf16.msra.mxu0 %v8056_v41  ;;  %2259 = vmatpush1.bf16.msra.mxu1 %v8061_v42 }
 0x308   :  { %2219 = vmatprep.subr.bf16.mxu0 %v8066_v43  ;;  %2260 = vmatprep.subr.bf16.mxu1 %v8071_v44 }
 0x30b   :  { %2220 = vmatpush1.bf16.msra.mxu0 %v8080_v45  ;;  %2261 = vmatpush1.bf16.msra.mxu1 %v8085_v46 }
 0x30c   :  { %2221 = vmatprep.subr.bf16.mxu0 %v8090_v47  ;;  %2262 = vmatprep.subr.bf16.mxu1 %v8095_v48 }
 0x30f   :  { %2222 = vmatpush1.bf16.msra.mxu0 %v8104_v49  ;;  %2263 = vmatpush1.bf16.msra.mxu1 %v8109_v50 }
 0x310   :  { %2223 = vmatprep.subr.bf16.mxu0 %v8114_v51  ;;  %2264 = vmatprep.subr.bf16.mxu1 %v8119_v52 }
 0x313   :  { %2224 = vmatpush1.bf16.msra.mxu0 %v8128_v53  ;;  %2265 = vmatpush1.bf16.msra.mxu1 %v8133_v54 }
 0x314   :  { %2225 = vmatprep.subr.bf16.mxu0 %v8138_v55  ;;  %2266 = vmatprep.subr.bf16.mxu1 %v8147_v56  ;;  %v2200_v55 = vrot.slane %v8276_v4, 6  ;;  %v6697_v4 = vld [vmem:[%s9770_s4 + $0x40] ss:$16 sps:$4 sm:$0xff]  }
 0x317   :  { %2226 = vmatpush1.bf16.msra.mxu0 %v8154_v57  ;;  %2267 = vmatpush1.bf16.msra.mxu1 %v8159_v58 }
 0x318   :  { %2557 = vmatprep.subr.bf16.mxu0 %v6687_v26  ;;  %2598 = vmatprep.subr.bf16.mxu1 %v6690_v27 }
 0x3cd   :  { %v2116_v29 = vpop.f32.mrb[12].mxu0  ;;  %v2157_v30 = vpop.f32.mrb[12].mxu1 }
 0x3ce   :  { %v2168_v31 = vrot.slane %v2116_v29, 4  ;;  %v2118_v32 = vpop.f32.mrb[13].mxu0  ;;  %v2159_v33 = vpop.f32.mrb[13].mxu1  ;;  %v2170_v45 = vrot.slane %v2157_v30, 4  ;;  %v6711_v29 = vld [vmem:[%s9770_s4 + $0x84] ss:$16 sps:$4 sm:$0xff]  }
 0x3cf   :  { %v2169_v34 = vrot.slane %v2118_v32, 4  ;;  %v2120_v35 = vpop.f32.mrb[14].mxu0  ;;  %v2161_v36 = vpop.f32.mrb[14].mxu1  ;;  %v2171_v43 = vrot.slane %v2159_v33, 4  ;;  %v6714_v30 = vld [vmem:[%s9770_s4 + $0x8c] ss:$16 sps:$4 sm:$0xff]  }
 0x3d0   :  { %v2176_v37 = vadd.f32 %v8214_v12, %v2168_v31  ;;  %v2121_v38 = vpop.f32.mrb[15].mxu0  ;;  %v2162_v39 = vpop.f32.mrb[15].mxu1  ;;  %v2178_v47 = vadd.f32 %v8227_v1, %v2170_v45  ;;  %v6709_v31 = vld [vmem:[%s9770_s4 + $0x80] ss:$16 sps:$4 sm:$0xff]   ;;  %v6712_v32 = vld [vmem:[%s9770_s4 + $0x88] ss:$16 sps:$4 sm:$0xff]  }
 0x3d1   :  { %v2177_v40 = vadd.f32 %v8216_v13, %v2169_v34  ;;  %v2179_v44 = vadd.f32 %v8223_v61, %v2171_v43  ;;  %v6717_v33 = vld [vmem:[%s9770_s4 + $0xa4] ss:$16 sps:$4 sm:$0xff]   ;;  %v6715_v34 = vld [vmem:[%s9770_s4 + $0xa0] ss:$16 sps:$4 sm:$0xff]   ;;  %v6718_v35 = vld [vmem:[%s9770_s4 + $0xa8] ss:$16 sps:$4 sm:$0xff]  }
 0x3d2   :  { %v5827_v41 = vmul.f32 -1.442695, %v2176_v37  ;;  %v6720_v36 = vld [vmem:[%s9770_s4 + $0xac] ss:$16 sps:$4 sm:$0xff]   ;;  %v6723_v37 = vld [vmem:[%s9770_s4 + $0xc4] ss:$16 sps:$4 sm:$0xff]  }
 0x3d3   :  { %v5828_v42 = vmul.f32 -1.442695, %v2177_v40  ;;  %v5829_v46 = vmul.f32 -1.442695, %v2179_v44  ;;  %v6726_v38 = vld [vmem:[%s9770_s4 + $0xcc] ss:$16 sps:$4 sm:$0xff]  }
 0x3d4   :  { %7017 = vpow2.f32 %v5827_v41  ;;  %v6721_v39 = vld [vmem:[%s9770_s4 + $0xc0] ss:$16 sps:$4 sm:$0xff]   ;;  %v6724_v40 = vld [vmem:[%s9770_s4 + $0xc8] ss:$16 sps:$4 sm:$0xff]   ;;  %v6729_v41 = vld [vmem:[%s9770_s4 + $0xe4] ss:$16 sps:$4 sm:$0xff]  }
 0x3d5   :  { %7019 = vpow2.f32 %v5828_v42  ;;  %v6732_v42 = vld [vmem:[%s9770_s4 + $0xec] ss:$16 sps:$4 sm:$0xff]   ;;  %v6727_v43 = vld [vmem:[%s9770_s4 + $0xe0] ss:$16 sps:$4 sm:$0xff]   ;;  %v6730_v44 = vld [vmem:[%s9770_s4 + $0xe8] ss:$16 sps:$4 sm:$0xff]  }
 0x3d6   :  { %7021 = vpow2.f32 %v5829_v46  ;;  %v8430_v45 = vld [vmem:[%s9771_s5 + $0x104] ss:$16 sps:$4 sm:$0xff]   ;;  %v8435_v46 = vld [vmem:[%s9771_s5 + $0x10c] ss:$16 sps:$4 sm:$0xff]  }
 0x3d7   :  { %7023 = vtanh.f32 %v2178_v47 }
 0x3de   :  { %v7018_v48 = vpop.eup %7017 }
 0x3df   :  { %v7020_v49 = vpop.eup %7019  ;;  %v2183_v50 = vadd.f32 1.0, %v7018_v48 }
 0x3e0   :  { %v2189_v51 = vadd.f32 1.0, %v7020_v49  ;;  %v7022_v52 = vpop.eup %7021 }
 0x3e1   :  { %7025 = vrcp.f32 %v2183_v50  ;;  %v7024_v53 = vpop.eup %7023  ;;  %v2196_v58 = vadd.f32 1.0, %v7022_v52 }
 0x3e2   :  { %7027 = vrcp.f32 %v2189_v51 }
 0x3e3   :  { %7029 = vrcp.f32 %v2196_v58 }
 0x3eb   :  { %v7026_v54 = vpop.eup %7025 }
 0x3ec   :  { %v7028_v56 = vpop.eup %7027  ;;  %v2203_v57 = vmul.f32 %v7026_v54, %v7024_v53 }
 0x3ed   :  { %v2202_v60 = vmul.f32 %v7028_v56, %v2200_v55  ;;  %v7030_v24 = vpop.eup %7029 }
 0x3ef   :  { %v8320_v18 = vadd.f32 %v2203_v57, %v2202_v60 }
 0x3f1   :  { %7031 = vtanh.f32 %v8320_v18 }
 0x3fb   :  { %v7032_v25 = vpop.eup %7031 }
 0x3fc   :  { %v2206_v6 = vmul.f32 %v7032_v25, %v7030_v24 }
 0x3fe   :  { %v2207_v11 = vpack.c.bf16 %v2206_v6, %v2206_v6  ;;  %v8327_v15 = vsel %vm2338_vm3, %v2337_v19, %v2206_v6 }
 0x400   :  { %v2209_v20 = vrot.slane %v2207_v11, 2 }
 0x402   :  { %2244 = vmatmul.mubr.bf16.vlgmr.msra.gmra.mrb[16].mxu0 %v2209_v20  ;;  %2285 = vmatmul.mubr.bf16.vlgmr.msra.gmra.mrb[16].mxu1 %v2209_v20 }
 0x403   :  { %2589 = vmatprep.mubr.bf16.mxu0 %v7265_v23  ;;  %2630 = vmatprep.mubr.bf16.mxu1 %v7265_v23 }
 0x404   :  { %2558 = vmatpush1.bf16.msra.mxu0 %v6685_v21  ;;  %2599 = vmatpush1.bf16.msra.mxu1 %v6688_v59 }
 0x405   :  { %2559 = vmatprep.subr.bf16.mxu0 %v6693_v63  ;;  %2600 = vmatprep.subr.bf16.mxu1 %v6696_v0  ;;  %v2329_v0 = vrot.slane %v8320_v18, 6  ;;  %v8454_v18 = vld [vmem:[%s9771_s5 + $0x108] ss:$16 sps:$4 sm:$0xff]  }
 0x408   :  { %2560 = vmatpush1.bf16.msra.mxu0 %v6691_v2  ;;  %2601 = vmatpush1.bf16.msra.mxu1 %v6694_v3 }
 0x409   :  { %2561 = vmatprep.subr.bf16.mxu0 %v6699_v8  ;;  %2602 = vmatprep.subr.bf16.mxu1 %v6702_v28 }
 0x40c   :  { %2562 = vmatpush1.bf16.msra.mxu0 %v6697_v4  ;;  %2603 = vmatpush1.bf16.msra.mxu1 %v6700_v9 }
 0x40d   :  { %2563 = vmatprep.subr.bf16.mxu0 %v6705_v14  ;;  %2604 = vmatprep.subr.bf16.mxu1 %v6708_v62  ;;  %v8449_v62 = vld [vmem:[%s9771_s5 + $0x100] ss:$16 sps:$4 sm:$0xff]  }
 0x410   :  { %2564 = vmatpush1.bf16.msra.mxu0 %v6703_v16  ;;  %2605 = vmatpush1.bf16.msra.mxu1 %v6706_v17  ;;  %v8459_v17 = vld [vmem:[%s9771_s5 + $0x124] ss:$16 sps:$4 sm:$0xff]  }
 0x411   :  { %2565 = vmatprep.subr.bf16.mxu0 %v6711_v29  ;;  %2606 = vmatprep.subr.bf16.mxu1 %v6714_v30  ;;  %v8471_v29 = vld [vmem:[%s9771_s5 + $0x120] ss:$16 sps:$4 sm:$0xff]   ;;  %v8476_v30 = vld [vmem:[%s9771_s5 + $0x128] ss:$16 sps:$4 sm:$0xff]  }
 0x414   :  { %2566 = vmatpush1.bf16.msra.mxu0 %v6709_v31  ;;  %2607 = vmatpush1.bf16.msra.mxu1 %v6712_v32  ;;  %v8483_v31 = vld [vmem:[%s9771_s5 + $0x144] ss:$16 sps:$4 sm:$0xff]   ;;  %v8488_v32 = vld [vmem:[%s9771_s5 + $0x14c] ss:$16 sps:$4 sm:$0xff]  }
 0x415   :  { %2567 = vmatprep.subr.bf16.mxu0 %v6717_v33  ;;  %2608 = vmatprep.subr.bf16.mxu1 %v6720_v36  ;;  %v8497_v33 = vld [vmem:[%s9771_s5 + $0x140] ss:$16 sps:$4 sm:$0xff]   ;;  %v8514_v36 = vld [vmem:[%s9771_s5 + $0x16c] ss:$16 sps:$4 sm:$0xff]  }
 0x418   :  { %2568 = vmatpush1.bf16.msra.mxu0 %v6715_v34  ;;  %2609 = vmatpush1.bf16.msra.mxu1 %v6718_v35  ;;  %v8502_v34 = vld [vmem:[%s9771_s5 + $0x148] ss:$16 sps:$4 sm:$0xff]   ;;  %v8509_v35 = vld [vmem:[%s9771_s5 + $0x164] ss:$16 sps:$4 sm:$0xff]  }
 0x419   :  { %2569 = vmatprep.subr.bf16.mxu0 %v6723_v37  ;;  %2610 = vmatprep.subr.bf16.mxu1 %v6726_v38  ;;  %v8521_v37 = vld [vmem:[%s9771_s5 + $0x160] ss:$16 sps:$4 sm:$0xff]   ;;  %v8526_v38 = vld [vmem:[%s9771_s5 + $0x168] ss:$16 sps:$4 sm:$0xff]  }
 0x41c   :  { %2570 = vmatpush1.bf16.msra.mxu0 %v6721_v39  ;;  %2611 = vmatpush1.bf16.msra.mxu1 %v6724_v40  ;;  %v8533_v39 = vld [vmem:[%s9771_s5 + $0x184] ss:$16 sps:$4 sm:$0xff]   ;;  %v8538_v40 = vld [vmem:[%s9771_s5 + $0x18c] ss:$16 sps:$4 sm:$0xff]  }
 0x41d   :  { %2571 = vmatprep.subr.bf16.mxu0 %v6729_v41  ;;  %2612 = vmatprep.subr.bf16.mxu1 %v6732_v42  ;;  %v8545_v41 = vld [vmem:[%s9771_s5 + $0x180] ss:$16 sps:$4 sm:$0xff]   ;;  %v8550_v42 = vld [vmem:[%s9771_s5 + $0x188] ss:$16 sps:$4 sm:$0xff]  }
 0x420   :  { %2572 = vmatpush1.bf16.msra.mxu0 %v6727_v43  ;;  %2613 = vmatpush1.bf16.msra.mxu1 %v6730_v44  ;;  %v8557_v43 = vld [vmem:[%s9771_s5 + $0x1a4] ss:$16 sps:$4 sm:$0xff]   ;;  %v8562_v44 = vld [vmem:[%s9771_s5 + $0x1ac] ss:$16 sps:$4 sm:$0xff]  }
 0x421   :  { %2832 = vmatprep.subr.bf16.mxu0 %v8430_v45  ;;  %2873 = vmatprep.subr.bf16.mxu1 %v8435_v46 }
 0x4d5   :  { %v2245_v47 = vpop.f32.mrb[16].mxu0  ;;  %v2286_v48 = vpop.f32.mrb[16].mxu1 }
 0x4d6   :  { %v2297_v49 = vrot.slane %v2245_v47, 2  ;;  %v2247_v50 = vpop.f32.mrb[17].mxu0  ;;  %v2288_v51 = vpop.f32.mrb[17].mxu1  ;;  %v2299_v19 = vrot.slane %v2286_v48, 2  ;;  %v8569_v47 = vld [vmem:[%s9771_s5 + $0x1a0] ss:$16 sps:$4 sm:$0xff]  }
 0x4d7   :  { %v2298_v52 = vrot.slane %v2247_v50, 2  ;;  %v2249_v53 = vpop.f32.mrb[18].mxu0  ;;  %v2290_v54 = vpop.f32.mrb[18].mxu1  ;;  %v2300_v25 = vrot.slane %v2288_v51, 2  ;;  %v8574_v48 = vld [vmem:[%s9771_s5 + $0x1a8] ss:$16 sps:$4 sm:$0xff]  }
 0x4d8   :  { %v2305_v55 = vadd.f32 %v8214_v12, %v2297_v49  ;;  %v2250_v56 = vpop.f32.mrb[19].mxu0  ;;  %v2291_v57 = vpop.f32.mrb[19].mxu1  ;;  %v2307_v20 = vadd.f32 %v8227_v1, %v2299_v19  ;;  %v8581_v49 = vld [vmem:[%s9771_s5 + $0x1c4] ss:$16 sps:$4 sm:$0xff]   ;;  %v8586_v50 = vld [vmem:[%s9771_s5 + $0x1cc] ss:$16 sps:$4 sm:$0xff]  }
 0x4d9   :  { %v2306_v58 = vadd.f32 %v8216_v13, %v2298_v52  ;;  %v2308_v6 = vadd.f32 %v8223_v61, %v2300_v25  ;;  %v8593_v51 = vld [vmem:[%s9771_s5 + $0x1c0] ss:$16 sps:$4 sm:$0xff]   ;;  %v8598_v52 = vld [vmem:[%s9771_s5 + $0x1c8] ss:$16 sps:$4 sm:$0xff]   ;;  %v8605_v53 = vld [vmem:[%s9771_s5 + $0x1e4] ss:$16 sps:$4 sm:$0xff]  }
 0x4da   :  { %v5830_v60 = vmul.f32 -1.442695, %v2305_v55  ;;  %v8610_v54 = vld [vmem:[%s9771_s5 + $0x1ec] ss:$16 sps:$4 sm:$0xff]   ;;  %v8617_v55 = vld [vmem:[%s9771_s5 + $0x1e0] ss:$16 sps:$4 sm:$0xff]  }
 0x4db   :  { %v5831_v24 = vmul.f32 -1.442695, %v2306_v58  ;;  %v5832_v11 = vmul.f32 -1.442695, %v2308_v6  ;;  %v8622_v56 = vld [vmem:[%s9771_s5 + $0x1e8] ss:$16 sps:$4 sm:$0xff]  }
 0x4dc   :  { %7033 = vpow2.f32 %v5830_v60 }
 0x4dd   :  { %7035 = vpow2.f32 %v5831_v24 }
 0x4de   :  { %7037 = vpow2.f32 %v5832_v11 }
 0x4df   :  { %7039 = vtanh.f32 %v2307_v20  ;;  %v2375_v20 = vld [vmem:[%s9772_s6] sm:$0xf] }
 0x4e6   :  { %v7034_v26 = vpop.eup %7033 }
 0x4e7   :  { %v7036_v27 = vpop.eup %7035  ;;  %v2312_v21 = vadd.f32 1.0, %v7034_v26  ;;  %v2380_v26 = vrot.slane %v2375_v20, %v8203_v5 }
 0x4e8   :  { %v2318_v12 = vadd.f32 1.0, %v7036_v27  ;;  %v7038_v13 = vpop.eup %7037  ;;  %v2384_v27 = vrot.slane %v2375_v20, %v8208_v7 }
 0x4e9   :  { %7041 = vrcp.f32 %v2312_v21  ;;  %v7040_v59 = vpop.eup %7039  ;;  %v2325_v61 = vadd.f32 1.0, %v7038_v13 }
 0x4ea   :  { %7043 = vrcp.f32 %v2318_v12 }
 0x4eb   :  { %7045 = vrcp.f32 %v2325_v61 }
 0x4f3   :  { %v7042_v63 = vpop.eup %7041 }
 0x4f4   :  { %v7044_v2 = vpop.eup %7043  ;;  %v2332_v3 = vmul.f32 %v7042_v63, %v7040_v59 }
 0x4f5   :  { %v2331_v8 = vmul.f32 %v7044_v2, %v2329_v0  ;;  %v7046_v1 = vpop.eup %7045 }
 0x4f7   :  { %v2333_v28 = vadd.f32 %v2332_v3, %v2331_v8  ;;  %v2392_v3 = vrot.slane %v2375_v20, %v8212_v10 }
 0x4f9   :  { %7047 = vtanh.f32 %v2333_v28 }
 0x503   :  { %v7048_v4 = vpop.eup %7047 }
 0x504   :  { %v2335_v9 = vmul.f32 %v7048_v4, %v7046_v1 }
 0x506   :  { %v2341_v14 = vsel %vm2340_vm4, %v8327_v15, %v2335_v9  ;;  %v8464_v15 = vld [vmem:[%s9771_s5 + $0x12c] ss:$16 sps:$4 sm:$0xff]  }
 0x507   :  { %v2342_v16 = vpack.c.bf16 %v2341_v14, %v2341_v14 }
 0x509   :  { %2590 = vmatmul.mubr.bf16.vlgmr.msra.gmra.mrb[20].mxu0 %v2342_v16  ;;  %2631 = vmatmul.mubr.bf16.vlgmr.msra.gmra.mrb[20].mxu1 %v2342_v16 }
 0x50a   :  { %2833 = vmatpush1.bf16.msra.mxu0 %v8449_v62  ;;  %2874 = vmatpush1.bf16.msra.mxu1 %v8454_v18 }
 0x50b   :  { %2834 = vmatprep.subr.bf16.mxu0 %v8459_v17  ;;  %2875 = vmatprep.subr.bf16.mxu1 %v8464_v15 }
 0x50c   :  { %2864 = vmatprep.mubr.bf16.mxu0 %v7265_v23  ;;  %2905 = vmatprep.mubr.bf16.mxu1 %v7265_v23 }
 0x50e   :  { %2835 = vmatpush1.bf16.msra.mxu0 %v8471_v29  ;;  %2876 = vmatpush1.bf16.msra.mxu1 %v8476_v30 }
 0x50f   :  { %2836 = vmatprep.subr.bf16.mxu0 %v8483_v31  ;;  %2877 = vmatprep.subr.bf16.mxu1 %v8488_v32 }
 0x512   :  { %2837 = vmatpush1.bf16.msra.mxu0 %v8497_v33  ;;  %2878 = vmatpush1.bf16.msra.mxu1 %v8502_v34 }
 0x513   :  { %2838 = vmatprep.subr.bf16.mxu0 %v8509_v35  ;;  %2879 = vmatprep.subr.bf16.mxu1 %v8514_v36 }
 0x516   :  { %2839 = vmatpush1.bf16.msra.mxu0 %v8521_v37  ;;  %2880 = vmatpush1.bf16.msra.mxu1 %v8526_v38 }
 0x517   :  { %2840 = vmatprep.subr.bf16.mxu0 %v8533_v39  ;;  %2881 = vmatprep.subr.bf16.mxu1 %v8538_v40 }
 0x51a   :  { %2841 = vmatpush1.bf16.msra.mxu0 %v8545_v41  ;;  %2882 = vmatpush1.bf16.msra.mxu1 %v8550_v42 }
 0x51b   :  { %2842 = vmatprep.subr.bf16.mxu0 %v8557_v43  ;;  %2883 = vmatprep.subr.bf16.mxu1 %v8562_v44 }
 0x51e   :  { %2843 = vmatpush1.bf16.msra.mxu0 %v8569_v47  ;;  %2884 = vmatpush1.bf16.msra.mxu1 %v8574_v48 }
 0x51f   :  { %2844 = vmatprep.subr.bf16.mxu0 %v8581_v49  ;;  %2885 = vmatprep.subr.bf16.mxu1 %v8586_v50 }
 0x522   :  { %2845 = vmatpush1.bf16.msra.mxu0 %v8593_v51  ;;  %2886 = vmatpush1.bf16.msra.mxu1 %v8598_v52 }
 0x523   :  { %2846 = vmatprep.subr.bf16.mxu0 %v8605_v53  ;;  %2887 = vmatprep.subr.bf16.mxu1 %v8610_v54 }
 0x526   :  { %2847 = vmatpush1.bf16.msra.mxu0 %v8617_v55  ;;  %2888 = vmatpush1.bf16.msra.mxu1 %v8622_v56 }
 0x527   :  { %2943 = vmatprep.subr.bf16.mxu0 %v8430_v45  ;;  %2984 = vmatprep.subr.bf16.mxu1 %v8435_v46 }
 0x529   :  { %2865 = vmatmul.mubr.bf16.vlgmr.msra.gmra.mrb[24].mxu0 %v7265_v23  ;;  %2906 = vmatmul.mubr.bf16.vlgmr.msra.gmra.mrb[24].mxu1 %v7265_v23 }
 0x52a   :  { %2944 = vmatpush1.bf16.msra.mxu0 %v8449_v62  ;;  %2985 = vmatpush1.bf16.msra.mxu1 %v8454_v18 }
 0x52b   :  { %2945 = vmatprep.subr.bf16.mxu0 %v8459_v17  ;;  %2986 = vmatprep.subr.bf16.mxu1 %v8464_v15 }
 0x52c   :  { %2975 = vmatprep.mubr.bf16.mxu0 %v7265_v23  ;;  %3016 = vmatprep.mubr.bf16.mxu1 %v7265_v23 }
 0x52e   :  { %2946 = vmatpush1.bf16.msra.mxu0 %v8471_v29  ;;  %2987 = vmatpush1.bf16.msra.mxu1 %v8476_v30 }
 0x52f   :  { %2947 = vmatprep.subr.bf16.mxu0 %v8483_v31  ;;  %2988 = vmatprep.subr.bf16.mxu1 %v8488_v32 }
 0x532   :  { %2948 = vmatpush1.bf16.msra.mxu0 %v8497_v33  ;;  %2989 = vmatpush1.bf16.msra.mxu1 %v8502_v34 }
 0x533   :  { %2949 = vmatprep.subr.bf16.mxu0 %v8509_v35  ;;  %2990 = vmatprep.subr.bf16.mxu1 %v8514_v36 }
 0x536   :  { %2950 = vmatpush1.bf16.msra.mxu0 %v8521_v37  ;;  %2991 = vmatpush1.bf16.msra.mxu1 %v8526_v38 }
 0x537   :  { %2951 = vmatprep.subr.bf16.mxu0 %v8533_v39  ;;  %2992 = vmatprep.subr.bf16.mxu1 %v8538_v40 }
 0x53a   :  { %2952 = vmatpush1.bf16.msra.mxu0 %v8545_v41  ;;  %2993 = vmatpush1.bf16.msra.mxu1 %v8550_v42 }
 0x53b   :  { %2953 = vmatprep.subr.bf16.mxu0 %v8557_v43  ;;  %2994 = vmatprep.subr.bf16.mxu1 %v8562_v44 }
 0x53e   :  { %2954 = vmatpush1.bf16.msra.mxu0 %v8569_v47  ;;  %2995 = vmatpush1.bf16.msra.mxu1 %v8574_v48 }
 0x53f   :  { %2955 = vmatprep.subr.bf16.mxu0 %v8581_v49  ;;  %2996 = vmatprep.subr.bf16.mxu1 %v8586_v50 }
 0x542   :  { %2956 = vmatpush1.bf16.msra.mxu0 %v8593_v51  ;;  %2997 = vmatpush1.bf16.msra.mxu1 %v8598_v52 }
 0x543   :  { %2957 = vmatprep.subr.bf16.mxu0 %v8605_v53  ;;  %2998 = vmatprep.subr.bf16.mxu1 %v8610_v54 }
 0x546   :  { %2958 = vmatpush1.bf16.msra.mxu0 %v8617_v55  ;;  %2999 = vmatpush1.bf16.msra.mxu1 %v8622_v56 }
 0x547   :  { %3072 = vmatprep.subr.bf16.mxu0 %v8430_v45  ;;  %3113 = vmatprep.subr.bf16.mxu1 %v8435_v46 }
 0x5dc   :  { %v2591_v57 = vpop.f32.mrb[20].mxu0  ;;  %v2632_v58 = vpop.f32.mrb[20].mxu1 }
 0x5dd   :  { %v2593_v60 = vpop.f32.mrb[21].mxu0  ;;  %v2634_v24 = vpop.f32.mrb[21].mxu1  ;;  %v8671_v21 = vadd.f32 %v2591_v57, %v2380_v26  ;;  %v2388_v57 = vrot.slane %v2375_v20, %v8221_v22 }
 0x5de   :  { %v2595_v25 = vpop.f32.mrb[22].mxu0  ;;  %v2636_v6 = vpop.f32.mrb[22].mxu1  ;;  %v8673_v12 = vadd.f32 %v2593_v60, %v2384_v27  ;;  %v8678_v16 = vadd.f32 %v2634_v24, %v2392_v3 }
 0x5df   :  { %v2596_v19 = vpop.f32.mrb[23].mxu0  ;;  %v2637_v11 = vpop.f32.mrb[23].mxu1  ;;  %v8682_v25 = vadd.f32 %v2632_v58, %v2388_v57 }
 0x5fc   :  { %v2866_v13 = vpop.f32.mrb[24].mxu0  ;;  %v2907_v59 = vpop.f32.mrb[24].mxu1 }
 0x5fd   :  { %v2914_v63 = vadd.f32 %v2866_v13, %v8671_v21  ;;  %v2868_v0 = vpop.f32.mrb[25].mxu0  ;;  %v2909_v2 = vpop.f32.mrb[25].mxu1  ;;  %v2916_v19 = vadd.f32 %v2907_v59, %v8682_v25 }
 0x5fe   :  { %v2915_v61 = vadd.f32 %v2868_v0, %v8673_v12  ;;  %v2870_v8 = vpop.f32.mrb[26].mxu0  ;;  %v2911_v28 = vpop.f32.mrb[26].mxu1  ;;  %v2917_v60 = vadd.f32 %v2909_v2, %v8678_v16 }
 0x5ff   :  { %v5929_v1 = vmul.f32 -1.442695, %v2914_v63  ;;  %v2871_v4 = vpop.f32.mrb[27].mxu0  ;;  %v2912_v9 = vpop.f32.mrb[27].mxu1 }
 0x600   :  { %v5930_v14 = vmul.f32 -1.442695, %v2915_v61  ;;  %v5931_v6 = vmul.f32 -1.442695, %v2917_v60 }
 0x601   :  { %7049 = vpow2.f32 %v5929_v1 }
 0x602   :  { %7051 = vpow2.f32 %v5930_v14 }
 0x603   :  { %7053 = vpow2.f32 %v5931_v6 }
 0x604   :  { %7055 = vtanh.f32 %v2916_v19 }
 0x60b   :  { %v7050_v11 = vpop.eup %7049 }
 0x60c   :  { %v7052_v26 = vpop.eup %7051  ;;  %v2921_v27 = vadd.f32 1.0, %v7050_v11 }
 0x60d   :  { %v2927_v13 = vadd.f32 1.0, %v7052_v26  ;;  %v7054_v24 = vpop.eup %7053 }
 0x60e   :  { %7057 = vrcp.f32 %v2921_v27  ;;  %v7056_v63 = vpop.eup %7055  ;;  %v2934_v61 = vadd.f32 1.0, %v7054_v24 }
 0x60f   :  { %7059 = vrcp.f32 %v2927_v13 }
 0x610   :  { %7061 = vrcp.f32 %v2934_v61 }
 0x618   :  { %v7058_v0 = vpop.eup %7057 }
 0x619   :  { %v7060_v3 = vpop.eup %7059  ;;  %v2938_v20 = vmul.f32 %v7058_v0, %v7056_v63 }
 0x61a   :  { %v2937_v2 = vmul.f32 0.0, %v7060_v3  ;;  %v7062_v59 = vpop.eup %7061 }
 0x61c   :  { %v8685_v58 = vadd.f32 %v2938_v20, %v2937_v2 }
 0x61e   :  { %7063 = vtanh.f32 %v8685_v58 }
 0x628   :  { %v7064_v8 = vpop.eup %7063 }
 0x629   :  { %v8688_v28 = vmul.f32 %v7064_v8, %v7062_v59 }
 0x62b   :  { %v2942_v1 = vpack.c.bf16 %v8688_v28, %v8688_v28 }
 0x62d   :  { %2976 = vmatmul.mubr.bf16.vlgmr.msra.gmra.mrb[28].mxu0 %v2942_v1  ;;  %3017 = vmatmul.mubr.bf16.vlgmr.msra.gmra.mrb[28].mxu1 %v2942_v1 }
 0x62e   :  { %3073 = vmatpush1.bf16.msra.mxu0 %v8449_v62  ;;  %3114 = vmatpush1.bf16.msra.mxu1 %v8454_v18 }
 0x62f   :  { %3074 = vmatprep.subr.bf16.mxu0 %v8459_v17  ;;  %3115 = vmatprep.subr.bf16.mxu1 %v8464_v15 }
 0x630   :  { %3104 = vmatprep.mubr.bf16.mxu0 %v7265_v23  ;;  %3145 = vmatprep.mubr.bf16.mxu1 %v7265_v23 }
 0x632   :  { %3075 = vmatpush1.bf16.msra.mxu0 %v8471_v29  ;;  %3116 = vmatpush1.bf16.msra.mxu1 %v8476_v30 }
 0x633   :  { %3076 = vmatprep.subr.bf16.mxu0 %v8483_v31  ;;  %3117 = vmatprep.subr.bf16.mxu1 %v8488_v32 }
 0x636   :  { %3077 = vmatpush1.bf16.msra.mxu0 %v8497_v33  ;;  %3118 = vmatpush1.bf16.msra.mxu1 %v8502_v34 }
 0x637   :  { %3078 = vmatprep.subr.bf16.mxu0 %v8509_v35  ;;  %3119 = vmatprep.subr.bf16.mxu1 %v8514_v36 }
 0x63a   :  { %3079 = vmatpush1.bf16.msra.mxu0 %v8521_v37  ;;  %3120 = vmatpush1.bf16.msra.mxu1 %v8526_v38 }
 0x63b   :  { %3080 = vmatprep.subr.bf16.mxu0 %v8533_v39  ;;  %3121 = vmatprep.subr.bf16.mxu1 %v8538_v40 }
 0x63e   :  { %3081 = vmatpush1.bf16.msra.mxu0 %v8545_v41  ;;  %3122 = vmatpush1.bf16.msra.mxu1 %v8550_v42 }
 0x63f   :  { %3082 = vmatprep.subr.bf16.mxu0 %v8557_v43  ;;  %3123 = vmatprep.subr.bf16.mxu1 %v8562_v44 }
 0x642   :  { %3083 = vmatpush1.bf16.msra.mxu0 %v8569_v47  ;;  %3124 = vmatpush1.bf16.msra.mxu1 %v8574_v48 }
 0x643   :  { %3084 = vmatprep.subr.bf16.mxu0 %v8581_v49  ;;  %3125 = vmatprep.subr.bf16.mxu1 %v8586_v50 }
 0x646   :  { %3085 = vmatpush1.bf16.msra.mxu0 %v8593_v51  ;;  %3126 = vmatpush1.bf16.msra.mxu1 %v8598_v52 }
 0x647   :  { %3086 = vmatprep.subr.bf16.mxu0 %v8605_v53  ;;  %3127 = vmatprep.subr.bf16.mxu1 %v8610_v54 }
 0x64a   :  { %3087 = vmatpush1.bf16.msra.mxu0 %v8617_v55  ;;  %3128 = vmatpush1.bf16.msra.mxu1 %v8622_v56 }
 0x64b   :  { %3201 = vmatprep.subr.bf16.mxu0 %v8430_v45  ;;  %3242 = vmatprep.subr.bf16.mxu1 %v8435_v46 }
 0x700   :  { %v2977_v4 = vpop.f32.mrb[28].mxu0  ;;  %v3018_v9 = vpop.f32.mrb[28].mxu1 }
 0x701   :  { %v3029_v14 = vrot.slane %v2977_v4, 6  ;;  %v2979_v57 = vpop.f32.mrb[29].mxu0  ;;  %v3020_v60 = vpop.f32.mrb[29].mxu1  ;;  %v3031_v46 = vrot.slane %v3018_v9, 6 }
 0x702   :  { %v3030_v6 = vrot.slane %v2979_v57, 6  ;;  %v2981_v19 = vpop.f32.mrb[30].mxu0  ;;  %v3022_v11 = vpop.f32.mrb[30].mxu1  ;;  %v3032_v3 = vrot.slane %v3020_v60, 6  ;;  %v3061_v60 = vrot.slane %v8685_v58, 6 }
 0x703   :  { %v3037_v26 = vadd.f32 %v3029_v14, %v8671_v21  ;;  %v2982_v27 = vpop.f32.mrb[31].mxu0  ;;  %v3023_v13 = vpop.f32.mrb[31].mxu1  ;;  %v3039_v61 = vadd.f32 %v3031_v46, %v8682_v25 }
 0x704   :  { %v3038_v24 = vadd.f32 %v3030_v6, %v8673_v12  ;;  %v3040_v45 = vadd.f32 %v3032_v3, %v8678_v16 }
 0x705   :  { %v5932_v63 = vmul.f32 -1.442695, %v3037_v26 }
 0x706   :  { %v5933_v0 = vmul.f32 -1.442695, %v3038_v24  ;;  %v5934_v20 = vmul.f32 -1.442695, %v3040_v45 }
 0x707   :  { %7065 = vpow2.f32 %v5932_v63 }
 0x708   :  { %7067 = vpow2.f32 %v5933_v0 }
 0x709   :  { %7069 = vpow2.f32 %v5934_v20 }
 0x70a   :  { %7071 = vtanh.f32 %v3039_v61 }
 0x711   :  { %v7066_v2 = vpop.eup %7065 }
 0x712   :  { %v7068_v59 = vpop.eup %7067  ;;  %v3044_v8 = vadd.f32 1.0, %v7066_v2 }
 0x713   :  { %v3050_v1 = vadd.f32 1.0, %v7068_v59  ;;  %v7070_v4 = vpop.eup %7069 }
 0x714   :  { %7073 = vrcp.f32 %v3044_v8  ;;  %v7072_v14 = vpop.eup %7071  ;;  %v3057_v11 = vadd.f32 1.0, %v7070_v4  ;;  %v6786_v4 = vld [vmem:[%s9770_s4 + $0x10c] ss:$16 sps:$4 sm:$0xff]  }
 0x715   :  { %7075 = vrcp.f32 %v3050_v1  ;;  %v6783_v1 = vld [vmem:[%s9770_s4 + $0x104] ss:$16 sps:$4 sm:$0xff]  }
 0x716   :  { %7077 = vrcp.f32 %v3057_v11  ;;  %v6795_v11 = vld [vmem:[%s9770_s4 + $0x144] ss:$16 sps:$4 sm:$0xff]  }
 0x71e   :  { %v7074_v57 = vpop.eup %7073 }
 0x71f   :  { %v7076_v6 = vpop.eup %7075  ;;  %v3064_v19 = vmul.f32 %v7074_v57, %v7072_v14  ;;  %v6784_v14 = vld [vmem:[%s9770_s4 + $0x108] ss:$16 sps:$4 sm:$0xff]   ;;  %v6789_v57 = vld [vmem:[%s9770_s4 + $0x124] ss:$16 sps:$4 sm:$0xff]  }
 0x720   :  { %v3063_v9 = vmul.f32 %v7076_v6, %v3061_v60  ;;  %v7078_v27 = vpop.eup %7077  ;;  %v6792_v60 = vld [vmem:[%s9770_s4 + $0x12c] ss:$16 sps:$4 sm:$0xff]   ;;  %v6787_v6 = vld [vmem:[%s9770_s4 + $0x120] ss:$16 sps:$4 sm:$0xff]  }
 0x722   :  { %v8731_v26 = vadd.f32 %v3064_v19, %v3063_v9  ;;  %v6790_v19 = vld [vmem:[%s9770_s4 + $0x128] ss:$16 sps:$4 sm:$0xff]   ;;  %v6798_v9 = vld [vmem:[%s9770_s4 + $0x14c] ss:$16 sps:$4 sm:$0xff]  }
 0x724   :  { %7079 = vtanh.f32 %v8731_v26 }
 0x72e   :  { %v7080_v13 = vpop.eup %7079 }
 0x72f   :  { %v8734_v24 = vmul.f32 %v7080_v13, %v7078_v27  ;;  %v6796_v27 = vld [vmem:[%s9770_s4 + $0x148] ss:$16 sps:$4 sm:$0xff]   ;;  %v6801_v13 = vld [vmem:[%s9770_s4 + $0x164] ss:$16 sps:$4 sm:$0xff]  }
 0x731   :  { %v3068_v63 = vpack.c.bf16 %v8734_v24, %v8734_v24  ;;  %v3326_v61 = vsel %vm2336_vm2, %v8688_v28, %v8734_v24  ;;  %v6781_v28 = vld [vmem:[%s9770_s4 + $0x100] ss:$16 sps:$4 sm:$0xff]   ;;  %v6804_v24 = vld [vmem:[%s9770_s4 + $0x16c] ss:$16 sps:$4 sm:$0xff]  }
 0x733   :  { %v3070_v0 = vrot.slane %v3068_v63, 1  ;;  %v6799_v63 = vld [vmem:[%s9770_s4 + $0x160] ss:$16 sps:$4 sm:$0xff]  }
 0x735   :  { %3105 = vmatmul.mubr.bf16.vlgmr.msra.gmra.mrb[32].mxu0 %v3070_v0  ;;  %3146 = vmatmul.mubr.bf16.vlgmr.msra.gmra.mrb[32].mxu1 %v3070_v0  ;;  %v6802_v0 = vld [vmem:[%s9770_s4 + $0x168] ss:$16 sps:$4 sm:$0xff]  }
 0x736   :  { %3202 = vmatpush1.bf16.msra.mxu0 %v8449_v62  ;;  %3243 = vmatpush1.bf16.msra.mxu1 %v8454_v18 }
 0x737   :  { %3203 = vmatprep.subr.bf16.mxu0 %v8459_v17  ;;  %3244 = vmatprep.subr.bf16.mxu1 %v8464_v15 }
 0x738   :  { %3233 = vmatprep.mubr.bf16.mxu0 %v7265_v23  ;;  %3274 = vmatprep.mubr.bf16.mxu1 %v7265_v23 }
 0x73a   :  { %3204 = vmatpush1.bf16.msra.mxu0 %v8471_v29  ;;  %3245 = vmatpush1.bf16.msra.mxu1 %v8476_v30 }
 0x73b   :  { %3205 = vmatprep.subr.bf16.mxu0 %v8483_v31  ;;  %3246 = vmatprep.subr.bf16.mxu1 %v8488_v32 }
 0x73e   :  { %3206 = vmatpush1.bf16.msra.mxu0 %v8497_v33  ;;  %3247 = vmatpush1.bf16.msra.mxu1 %v8502_v34 }
 0x73f   :  { %3207 = vmatprep.subr.bf16.mxu0 %v8509_v35  ;;  %3248 = vmatprep.subr.bf16.mxu1 %v8514_v36 }
 0x742   :  { %3208 = vmatpush1.bf16.msra.mxu0 %v8521_v37  ;;  %3249 = vmatpush1.bf16.msra.mxu1 %v8526_v38 }
 0x743   :  { %3209 = vmatprep.subr.bf16.mxu0 %v8533_v39  ;;  %3250 = vmatprep.subr.bf16.mxu1 %v8538_v40 }
 0x746   :  { %3210 = vmatpush1.bf16.msra.mxu0 %v8545_v41  ;;  %3251 = vmatpush1.bf16.msra.mxu1 %v8550_v42 }
 0x747   :  { %3211 = vmatprep.subr.bf16.mxu0 %v8557_v43  ;;  %3252 = vmatprep.subr.bf16.mxu1 %v8562_v44 }
 0x74a   :  { %3212 = vmatpush1.bf16.msra.mxu0 %v8569_v47  ;;  %3253 = vmatpush1.bf16.msra.mxu1 %v8574_v48 }
 0x74b   :  { %3213 = vmatprep.subr.bf16.mxu0 %v8581_v49  ;;  %3254 = vmatprep.subr.bf16.mxu1 %v8586_v50 }
 0x74e   :  { %3214 = vmatpush1.bf16.msra.mxu0 %v8593_v51  ;;  %3255 = vmatpush1.bf16.msra.mxu1 %v8598_v52 }
 0x74f   :  { %3215 = vmatprep.subr.bf16.mxu0 %v8605_v53  ;;  %3256 = vmatprep.subr.bf16.mxu1 %v8610_v54  ;;  %v3190_v53 = vrot.slane %v8731_v26, 6  ;;  %v6793_v26 = vld [vmem:[%s9770_s4 + $0x140] ss:$16 sps:$4 sm:$0xff]  }
 0x752   :  { %3216 = vmatpush1.bf16.msra.mxu0 %v8617_v55  ;;  %3257 = vmatpush1.bf16.msra.mxu1 %v8622_v56 }
 0x753   :  { %3546 = vmatprep.subr.bf16.mxu0 %v6783_v1  ;;  %3587 = vmatprep.subr.bf16.mxu1 %v6786_v4 }
 0x808   :  { %v3106_v62 = vpop.f32.mrb[32].mxu0  ;;  %v3147_v18 = vpop.f32.mrb[32].mxu1 }
 0x809   :  { %v3158_v17 = vrot.slane %v3106_v62, 4  ;;  %v3108_v15 = vpop.f32.mrb[33].mxu0  ;;  %v3149_v29 = vpop.f32.mrb[33].mxu1  ;;  %v3160_v41 = vrot.slane %v3147_v18, 4  ;;  %v6807_v62 = vld [vmem:[%s9770_s4 + $0x184] ss:$16 sps:$4 sm:$0xff]  }
 0x80a   :  { %v3159_v30 = vrot.slane %v3108_v15, 4  ;;  %v3110_v31 = vpop.f32.mrb[34].mxu0  ;;  %v3151_v32 = vpop.f32.mrb[34].mxu1  ;;  %v3161_v39 = vrot.slane %v3149_v29, 4  ;;  %v6810_v18 = vld [vmem:[%s9770_s4 + $0x18c] ss:$16 sps:$4 sm:$0xff]  }
 0x80b   :  { %v3166_v33 = vadd.f32 %v3158_v17, %v8671_v21  ;;  %v3111_v34 = vpop.f32.mrb[35].mxu0  ;;  %v3152_v35 = vpop.f32.mrb[35].mxu1  ;;  %v3168_v43 = vadd.f32 %v3160_v41, %v8682_v25  ;;  %v6805_v17 = vld [vmem:[%s9770_s4 + $0x180] ss:$16 sps:$4 sm:$0xff]   ;;  %v6808_v15 = vld [vmem:[%s9770_s4 + $0x188] ss:$16 sps:$4 sm:$0xff]  }
 0x80c   :  { %v3167_v36 = vadd.f32 %v3159_v30, %v8673_v12  ;;  %v3169_v40 = vadd.f32 %v3161_v39, %v8678_v16  ;;  %v6813_v29 = vld [vmem:[%s9770_s4 + $0x1a4] ss:$16 sps:$4 sm:$0xff]   ;;  %v6811_v30 = vld [vmem:[%s9770_s4 + $0x1a0] ss:$16 sps:$4 sm:$0xff]   ;;  %v6814_v31 = vld [vmem:[%s9770_s4 + $0x1a8] ss:$16 sps:$4 sm:$0xff]  }
 0x80d   :  { %v5935_v37 = vmul.f32 -1.442695, %v3166_v33  ;;  %v6816_v32 = vld [vmem:[%s9770_s4 + $0x1ac] ss:$16 sps:$4 sm:$0xff]   ;;  %v6819_v33 = vld [vmem:[%s9770_s4 + $0x1c4] ss:$16 sps:$4 sm:$0xff]  }
 0x80e   :  { %v5936_v38 = vmul.f32 -1.442695, %v3167_v36  ;;  %v5937_v42 = vmul.f32 -1.442695, %v3169_v40  ;;  %v6822_v34 = vld [vmem:[%s9770_s4 + $0x1cc] ss:$16 sps:$4 sm:$0xff]  }
 0x80f   :  { %7081 = vpow2.f32 %v5935_v37  ;;  %v6817_v35 = vld [vmem:[%s9770_s4 + $0x1c0] ss:$16 sps:$4 sm:$0xff]   ;;  %v6820_v36 = vld [vmem:[%s9770_s4 + $0x1c8] ss:$16 sps:$4 sm:$0xff]   ;;  %v6825_v37 = vld [vmem:[%s9770_s4 + $0x1e4] ss:$16 sps:$4 sm:$0xff]  }
 0x810   :  { %7083 = vpow2.f32 %v5936_v38  ;;  %v6828_v38 = vld [vmem:[%s9770_s4 + $0x1ec] ss:$16 sps:$4 sm:$0xff]   ;;  %v6823_v39 = vld [vmem:[%s9770_s4 + $0x1e0] ss:$16 sps:$4 sm:$0xff]   ;;  %v6826_v40 = vld [vmem:[%s9770_s4 + $0x1e8] ss:$16 sps:$4 sm:$0xff]  }
 0x811   :  { %7085 = vpow2.f32 %v5937_v42  ;;  %v8885_v41 = vld [vmem:[%s9771_s5 + $0x204] ss:$16 sps:$4 sm:$0xff]   ;;  %v8890_v42 = vld [vmem:[%s9771_s5 + $0x20c] ss:$16 sps:$4 sm:$0xff]  }
 0x812   :  { %7087 = vtanh.f32 %v3168_v43 }
 0x819   :  { %v7082_v44 = vpop.eup %7081 }
 0x81a   :  { %v7084_v47 = vpop.eup %7083  ;;  %v3173_v48 = vadd.f32 1.0, %v7082_v44 }
 0x81b   :  { %v3179_v49 = vadd.f32 1.0, %v7084_v47  ;;  %v7086_v50 = vpop.eup %7085 }
 0x81c   :  { %7089 = vrcp.f32 %v3173_v48  ;;  %v7088_v51 = vpop.eup %7087  ;;  %v3186_v56 = vadd.f32 1.0, %v7086_v50 }
 0x81d   :  { %7091 = vrcp.f32 %v3179_v49 }
 0x81e   :  { %7093 = vrcp.f32 %v3186_v56 }
 0x826   :  { %v7090_v52 = vpop.eup %7089 }
 0x827   :  { %v7092_v54 = vpop.eup %7091  ;;  %v3193_v55 = vmul.f32 %v7090_v52, %v7088_v51 }
 0x828   :  { %v3192_v58 = vmul.f32 %v7092_v54, %v3190_v53  ;;  %v7094_v45 = vpop.eup %7093 }
 0x82a   :  { %v8775_v3 = vadd.f32 %v3193_v55, %v3192_v58 }
 0x82c   :  { %7095 = vtanh.f32 %v8775_v3 }
 0x836   :  { %v7096_v46 = vpop.eup %7095 }
 0x837   :  { %v3196_v20 = vmul.f32 %v7096_v46, %v7094_v45 }
 0x839   :  { %v3197_v2 = vpack.c.bf16 %v3196_v20, %v3196_v20  ;;  %v8782_v59 = vsel %vm2338_vm3, %v3326_v61, %v3196_v20 }
 0x83b   :  { %v3199_v8 = vrot.slane %v3197_v2, 2 }
 0x83d   :  { %3234 = vmatmul.mubr.bf16.vlgmr.msra.gmra.mrb[36].mxu0 %v3199_v8  ;;  %3275 = vmatmul.mubr.bf16.vlgmr.msra.gmra.mrb[36].mxu1 %v3199_v8 }
 0x83e   :  { %3578 = vmatprep.mubr.bf16.mxu0 %v7265_v23  ;;  %3619 = vmatprep.mubr.bf16.mxu1 %v7265_v23 }
 0x83f   :  { %3547 = vmatpush1.bf16.msra.mxu0 %v6781_v28  ;;  %3588 = vmatpush1.bf16.msra.mxu1 %v6784_v14 }
 0x840   :  { %3548 = vmatprep.subr.bf16.mxu0 %v6789_v57  ;;  %3589 = vmatprep.subr.bf16.mxu1 %v6792_v60  ;;  %v3319_v60 = vrot.slane %v8775_v3, 6  ;;  %v8909_v3 = vld [vmem:[%s9771_s5 + $0x208] ss:$16 sps:$4 sm:$0xff]  }
 0x843   :  { %3549 = vmatpush1.bf16.msra.mxu0 %v6787_v6  ;;  %3590 = vmatpush1.bf16.msra.mxu1 %v6790_v19 }
 0x844   :  { %3550 = vmatprep.subr.bf16.mxu0 %v6795_v11  ;;  %3591 = vmatprep.subr.bf16.mxu1 %v6798_v9 }
 0x847   :  { %3551 = vmatpush1.bf16.msra.mxu0 %v6793_v26  ;;  %3592 = vmatpush1.bf16.msra.mxu1 %v6796_v27 }
 0x848   :  { %3552 = vmatprep.subr.bf16.mxu0 %v6801_v13  ;;  %3593 = vmatprep.subr.bf16.mxu1 %v6804_v24  ;;  %v8904_v24 = vld [vmem:[%s9771_s5 + $0x200] ss:$16 sps:$4 sm:$0xff]  }
 0x84b   :  { %3553 = vmatpush1.bf16.msra.mxu0 %v6799_v63  ;;  %3594 = vmatpush1.bf16.msra.mxu1 %v6802_v0  ;;  %v8914_v0 = vld [vmem:[%s9771_s5 + $0x224] ss:$16 sps:$4 sm:$0xff]  }
 0x84c   :  { %3554 = vmatprep.subr.bf16.mxu0 %v6807_v62  ;;  %3595 = vmatprep.subr.bf16.mxu1 %v6810_v18  ;;  %v8926_v62 = vld [vmem:[%s9771_s5 + $0x220] ss:$16 sps:$4 sm:$0xff]   ;;  %v8931_v18 = vld [vmem:[%s9771_s5 + $0x228] ss:$16 sps:$4 sm:$0xff]  }
 0x84f   :  { %3555 = vmatpush1.bf16.msra.mxu0 %v6805_v17  ;;  %3596 = vmatpush1.bf16.msra.mxu1 %v6808_v15  ;;  %v8938_v17 = vld [vmem:[%s9771_s5 + $0x244] ss:$16 sps:$4 sm:$0xff]   ;;  %v8943_v15 = vld [vmem:[%s9771_s5 + $0x24c] ss:$16 sps:$4 sm:$0xff]  }
 0x850   :  { %3556 = vmatprep.subr.bf16.mxu0 %v6813_v29  ;;  %3597 = vmatprep.subr.bf16.mxu1 %v6816_v32  ;;  %v8952_v29 = vld [vmem:[%s9771_s5 + $0x240] ss:$16 sps:$4 sm:$0xff]   ;;  %v8969_v32 = vld [vmem:[%s9771_s5 + $0x26c] ss:$16 sps:$4 sm:$0xff]  }
 0x853   :  { %3557 = vmatpush1.bf16.msra.mxu0 %v6811_v30  ;;  %3598 = vmatpush1.bf16.msra.mxu1 %v6814_v31  ;;  %v8957_v30 = vld [vmem:[%s9771_s5 + $0x248] ss:$16 sps:$4 sm:$0xff]   ;;  %v8964_v31 = vld [vmem:[%s9771_s5 + $0x264] ss:$16 sps:$4 sm:$0xff]  }
 0x854   :  { %3558 = vmatprep.subr.bf16.mxu0 %v6819_v33  ;;  %3599 = vmatprep.subr.bf16.mxu1 %v6822_v34  ;;  %v8976_v33 = vld [vmem:[%s9771_s5 + $0x260] ss:$16 sps:$4 sm:$0xff]   ;;  %v8981_v34 = vld [vmem:[%s9771_s5 + $0x268] ss:$16 sps:$4 sm:$0xff]  }
 0x857   :  { %3559 = vmatpush1.bf16.msra.mxu0 %v6817_v35  ;;  %3600 = vmatpush1.bf16.msra.mxu1 %v6820_v36  ;;  %v8988_v35 = vld [vmem:[%s9771_s5 + $0x284] ss:$16 sps:$4 sm:$0xff]   ;;  %v8993_v36 = vld [vmem:[%s9771_s5 + $0x28c] ss:$16 sps:$4 sm:$0xff]  }
 0x858   :  { %3560 = vmatprep.subr.bf16.mxu0 %v6825_v37  ;;  %3601 = vmatprep.subr.bf16.mxu1 %v6828_v38  ;;  %v9000_v37 = vld [vmem:[%s9771_s5 + $0x280] ss:$16 sps:$4 sm:$0xff]   ;;  %v9005_v38 = vld [vmem:[%s9771_s5 + $0x288] ss:$16 sps:$4 sm:$0xff]  }
 0x85b   :  { %3561 = vmatpush1.bf16.msra.mxu0 %v6823_v39  ;;  %3602 = vmatpush1.bf16.msra.mxu1 %v6826_v40  ;;  %v9012_v39 = vld [vmem:[%s9771_s5 + $0x2a4] ss:$16 sps:$4 sm:$0xff]   ;;  %v9017_v40 = vld [vmem:[%s9771_s5 + $0x2ac] ss:$16 sps:$4 sm:$0xff]  }
 0x85c   :  { %3821 = vmatprep.subr.bf16.mxu0 %v8885_v41  ;;  %3862 = vmatprep.subr.bf16.mxu1 %v8890_v42 }
 0x910   :  { %v3235_v43 = vpop.f32.mrb[36].mxu0  ;;  %v3276_v44 = vpop.f32.mrb[36].mxu1 }
 0x911   :  { %v3287_v47 = vrot.slane %v3235_v43, 2  ;;  %v3237_v48 = vpop.f32.mrb[37].mxu0  ;;  %v3278_v49 = vpop.f32.mrb[37].mxu1  ;;  %v3289_v61 = vrot.slane %v3276_v44, 2  ;;  %v9024_v43 = vld [vmem:[%s9771_s5 + $0x2a0] ss:$16 sps:$4 sm:$0xff]  }
 0x912   :  { %v3288_v50 = vrot.slane %v3237_v48, 2  ;;  %v3239_v51 = vpop.f32.mrb[38].mxu0  ;;  %v3280_v52 = vpop.f32.mrb[38].mxu1  ;;  %v3290_v46 = vrot.slane %v3278_v49, 2  ;;  %v9029_v44 = vld [vmem:[%s9771_s5 + $0x2a8] ss:$16 sps:$4 sm:$0xff]  }
 0x913   :  { %v3295_v53 = vadd.f32 %v3287_v47, %v8671_v21  ;;  %v3240_v54 = vpop.f32.mrb[39].mxu0  ;;  %v3281_v55 = vpop.f32.mrb[39].mxu1  ;;  %v3297_v8 = vadd.f32 %v3289_v61, %v8682_v25  ;;  %v9036_v47 = vld [vmem:[%s9771_s5 + $0x2c4] ss:$16 sps:$4 sm:$0xff]   ;;  %v9041_v48 = vld [vmem:[%s9771_s5 + $0x2cc] ss:$16 sps:$4 sm:$0xff]  }
 0x914   :  { %v3296_v56 = vadd.f32 %v3288_v50, %v8673_v12  ;;  %v3298_v20 = vadd.f32 %v3290_v46, %v8678_v16  ;;  %v9048_v49 = vld [vmem:[%s9771_s5 + $0x2c0] ss:$16 sps:$4 sm:$0xff]   ;;  %v9053_v50 = vld [vmem:[%s9771_s5 + $0x2c8] ss:$16 sps:$4 sm:$0xff]   ;;  %v9060_v51 = vld [vmem:[%s9771_s5 + $0x2e4] ss:$16 sps:$4 sm:$0xff]  }
 0x915   :  { %v5938_v58 = vmul.f32 -1.442695, %v3295_v53  ;;  %v9065_v52 = vld [vmem:[%s9771_s5 + $0x2ec] ss:$16 sps:$4 sm:$0xff]   ;;  %v9072_v53 = vld [vmem:[%s9771_s5 + $0x2e0] ss:$16 sps:$4 sm:$0xff]  }
 0x916   :  { %v5939_v45 = vmul.f32 -1.442695, %v3296_v56  ;;  %v5940_v2 = vmul.f32 -1.442695, %v3298_v20  ;;  %v9077_v54 = vld [vmem:[%s9771_s5 + $0x2e8] ss:$16 sps:$4 sm:$0xff]  }
 0x917   :  { %7097 = vpow2.f32 %v5938_v58 }
 0x918   :  { %7099 = vpow2.f32 %v5939_v45 }
 0x919   :  { %7101 = vpow2.f32 %v5940_v2 }
 0x91a   :  { %7103 = vtanh.f32 %v3297_v8  ;;  %v5973_v8 = vld [vmem:[%s9772_s6 + $0x4] sm:$0xf] }
 0x921   :  { %v7098_v1 = vpop.eup %7097 }
 0x922   :  { %v7100_v4 = vpop.eup %7099  ;;  %v3302_v28 = vadd.f32 1.0, %v7098_v1  ;;  %v3369_v1 = vrot.slane %v5973_v8, %v8203_v5 }
 0x923   :  { %v3308_v21 = vadd.f32 1.0, %v7100_v4  ;;  %v7102_v12 = vpop.eup %7101  ;;  %v3373_v4 = vrot.slane %v5973_v8, %v8208_v7 }
 0x924   :  { %7105 = vrcp.f32 %v3302_v28  ;;  %v7104_v14 = vpop.eup %7103  ;;  %v3315_v16 = vadd.f32 1.0, %v7102_v12 }
 0x925   :  { %7107 = vrcp.f32 %v3308_v21 }
 0x926   :  { %7109 = vrcp.f32 %v3315_v16 }
 0x92e   :  { %v7106_v57 = vpop.eup %7105 }
 0x92f   :  { %v7108_v6 = vpop.eup %7107  ;;  %v3322_v19 = vmul.f32 %v7106_v57, %v7104_v14 }
 0x930   :  { %v3321_v11 = vmul.f32 %v7108_v6, %v3319_v60  ;;  %v7110_v25 = vpop.eup %7109 }
 0x932   :  { %v3323_v9 = vadd.f32 %v3322_v19, %v3321_v11  ;;  %v3381_v19 = vrot.slane %v5973_v8, %v8212_v10 }
 0x934   :  { %7111 = vtanh.f32 %v3323_v9 }
 0x93e   :  { %v7112_v26 = vpop.eup %7111 }
 0x93f   :  { %v3325_v27 = vmul.f32 %v7112_v26, %v7110_v25 }
 0x941   :  { %v3328_v13 = vsel %vm2340_vm4, %v8782_v59, %v3325_v27  ;;  %v8919_v59 = vld [vmem:[%s9771_s5 + $0x22c] ss:$16 sps:$4 sm:$0xff]  }
 0x942   :  { %v3329_v63 = vpack.c.bf16 %v3328_v13, %v3328_v13 }
 0x944   :  { %3579 = vmatmul.mubr.bf16.vlgmr.msra.gmra.mrb[40].mxu0 %v3329_v63  ;;  %3620 = vmatmul.mubr.bf16.vlgmr.msra.gmra.mrb[40].mxu1 %v3329_v63 }
 0x945   :  { %3822 = vmatpush1.bf16.msra.mxu0 %v8904_v24  ;;  %3863 = vmatpush1.bf16.msra.mxu1 %v8909_v3 }
 0x946   :  { %3823 = vmatprep.subr.bf16.mxu0 %v8914_v0  ;;  %3864 = vmatprep.subr.bf16.mxu1 %v8919_v59 }
 0x947   :  { %3853 = vmatprep.mubr.bf16.mxu0 %v7265_v23  ;;  %3894 = vmatprep.mubr.bf16.mxu1 %v7265_v23 }
 0x949   :  { %3824 = vmatpush1.bf16.msra.mxu0 %v8926_v62  ;;  %3865 = vmatpush1.bf16.msra.mxu1 %v8931_v18 }
 0x94a   :  { %3825 = vmatprep.subr.bf16.mxu0 %v8938_v17  ;;  %3866 = vmatprep.subr.bf16.mxu1 %v8943_v15 }
 0x94d   :  { %3826 = vmatpush1.bf16.msra.mxu0 %v8952_v29  ;;  %3867 = vmatpush1.bf16.msra.mxu1 %v8957_v30 }
 0x94e   :  { %3827 = vmatprep.subr.bf16.mxu0 %v8964_v31  ;;  %3868 = vmatprep.subr.bf16.mxu1 %v8969_v32 }
 0x951   :  { %3828 = vmatpush1.bf16.msra.mxu0 %v8976_v33  ;;  %3869 = vmatpush1.bf16.msra.mxu1 %v8981_v34 }
 0x952   :  { %3829 = vmatprep.subr.bf16.mxu0 %v8988_v35  ;;  %3870 = vmatprep.subr.bf16.mxu1 %v8993_v36 }
 0x955   :  { %3830 = vmatpush1.bf16.msra.mxu0 %v9000_v37  ;;  %3871 = vmatpush1.bf16.msra.mxu1 %v9005_v38 }
 0x956   :  { %3831 = vmatprep.subr.bf16.mxu0 %v9012_v39  ;;  %3872 = vmatprep.subr.bf16.mxu1 %v9017_v40 }
 0x959   :  { %3832 = vmatpush1.bf16.msra.mxu0 %v9024_v43  ;;  %3873 = vmatpush1.bf16.msra.mxu1 %v9029_v44 }
 0x95a   :  { %3833 = vmatprep.subr.bf16.mxu0 %v9036_v47  ;;  %3874 = vmatprep.subr.bf16.mxu1 %v9041_v48 }
 0x95d   :  { %3834 = vmatpush1.bf16.msra.mxu0 %v9048_v49  ;;  %3875 = vmatpush1.bf16.msra.mxu1 %v9053_v50 }
 0x95e   :  { %3835 = vmatprep.subr.bf16.mxu0 %v9060_v51  ;;  %3876 = vmatprep.subr.bf16.mxu1 %v9065_v52 }
 0x961   :  { %3836 = vmatpush1.bf16.msra.mxu0 %v9072_v53  ;;  %3877 = vmatpush1.bf16.msra.mxu1 %v9077_v54 }
 0x962   :  { %3932 = vmatprep.subr.bf16.mxu0 %v8885_v41  ;;  %3973 = vmatprep.subr.bf16.mxu1 %v8890_v42 }
 0x964   :  { %3854 = vmatmul.mubr.bf16.vlgmr.msra.gmra.mrb[44].mxu0 %v7265_v23  ;;  %3895 = vmatmul.mubr.bf16.vlgmr.msra.gmra.mrb[44].mxu1 %v7265_v23 }
 0x965   :  { %3933 = vmatpush1.bf16.msra.mxu0 %v8904_v24  ;;  %3974 = vmatpush1.bf16.msra.mxu1 %v8909_v3 }
 0x966   :  { %3934 = vmatprep.subr.bf16.mxu0 %v8914_v0  ;;  %3975 = vmatprep.subr.bf16.mxu1 %v8919_v59 }
 0x967   :  { %3964 = vmatprep.mubr.bf16.mxu0 %v7265_v23  ;;  %4005 = vmatprep.mubr.bf16.mxu1 %v7265_v23 }
 0x969   :  { %3935 = vmatpush1.bf16.msra.mxu0 %v8926_v62  ;;  %3976 = vmatpush1.bf16.msra.mxu1 %v8931_v18 }
 0x96a   :  { %3936 = vmatprep.subr.bf16.mxu0 %v8938_v17  ;;  %3977 = vmatprep.subr.bf16.mxu1 %v8943_v15 }
 0x96d   :  { %3937 = vmatpush1.bf16.msra.mxu0 %v8952_v29  ;;  %3978 = vmatpush1.bf16.msra.mxu1 %v8957_v30 }
 0x96e   :  { %3938 = vmatprep.subr.bf16.mxu0 %v8964_v31  ;;  %3979 = vmatprep.subr.bf16.mxu1 %v8969_v32 }
 0x971   :  { %3939 = vmatpush1.bf16.msra.mxu0 %v8976_v33  ;;  %3980 = vmatpush1.bf16.msra.mxu1 %v8981_v34 }
 0x972   :  { %3940 = vmatprep.subr.bf16.mxu0 %v8988_v35  ;;  %3981 = vmatprep.subr.bf16.mxu1 %v8993_v36 }
 0x975   :  { %3941 = vmatpush1.bf16.msra.mxu0 %v9000_v37  ;;  %3982 = vmatpush1.bf16.msra.mxu1 %v9005_v38 }
 0x976   :  { %3942 = vmatprep.subr.bf16.mxu0 %v9012_v39  ;;  %3983 = vmatprep.subr.bf16.mxu1 %v9017_v40 }
 0x979   :  { %3943 = vmatpush1.bf16.msra.mxu0 %v9024_v43  ;;  %3984 = vmatpush1.bf16.msra.mxu1 %v9029_v44 }
 0x97a   :  { %3944 = vmatprep.subr.bf16.mxu0 %v9036_v47  ;;  %3985 = vmatprep.subr.bf16.mxu1 %v9041_v48 }
 0x97d   :  { %3945 = vmatpush1.bf16.msra.mxu0 %v9048_v49  ;;  %3986 = vmatpush1.bf16.msra.mxu1 %v9053_v50 }
 0x97e   :  { %3946 = vmatprep.subr.bf16.mxu0 %v9060_v51  ;;  %3987 = vmatprep.subr.bf16.mxu1 %v9065_v52 }
 0x981   :  { %3947 = vmatpush1.bf16.msra.mxu0 %v9072_v53  ;;  %3988 = vmatpush1.bf16.msra.mxu1 %v9077_v54 }
 0x982   :  { %4061 = vmatprep.subr.bf16.mxu0 %v8885_v41  ;;  %4102 = vmatprep.subr.bf16.mxu1 %v8890_v42 }
 0xa17   :  { %v3580_v55 = vpop.f32.mrb[40].mxu0  ;;  %v3621_v56 = vpop.f32.mrb[40].mxu1 }
 0xa18   :  { %v3582_v58 = vpop.f32.mrb[41].mxu0  ;;  %v3623_v45 = vpop.f32.mrb[41].mxu1  ;;  %v9126_v28 = vadd.f32 %v3580_v55, %v3369_v1  ;;  %v3377_v55 = vrot.slane %v5973_v8, %v8221_v22 }
 0xa19   :  { %v3584_v46 = vpop.f32.mrb[42].mxu0  ;;  %v3625_v20 = vpop.f32.mrb[42].mxu1  ;;  %v9128_v21 = vadd.f32 %v3582_v58, %v3373_v4  ;;  %v9133_v63 = vadd.f32 %v3623_v45, %v3381_v19 }
 0xa1a   :  { %v3585_v61 = vpop.f32.mrb[43].mxu0  ;;  %v3626_v2 = vpop.f32.mrb[43].mxu1  ;;  %v9137_v46 = vadd.f32 %v3621_v56, %v3377_v55 }
 0xa37   :  { %v3855_v12 = vpop.f32.mrb[44].mxu0  ;;  %v3896_v14 = vpop.f32.mrb[44].mxu1 }
 0xa38   :  { %v3903_v57 = vadd.f32 %v3855_v12, %v9126_v28  ;;  %v3857_v60 = vpop.f32.mrb[45].mxu0  ;;  %v3898_v6 = vpop.f32.mrb[45].mxu1  ;;  %v3905_v61 = vadd.f32 %v3896_v14, %v9137_v46 }
 0xa39   :  { %v3904_v16 = vadd.f32 %v3857_v60, %v9128_v21  ;;  %v3859_v11 = vpop.f32.mrb[46].mxu0  ;;  %v3900_v9 = vpop.f32.mrb[46].mxu1  ;;  %v3906_v58 = vadd.f32 %v3898_v6, %v9133_v63 }
 0xa3a   :  { %v6070_v25 = vmul.f32 -1.442695, %v3903_v57  ;;  %v3860_v26 = vpop.f32.mrb[47].mxu0  ;;  %v3901_v27 = vpop.f32.mrb[47].mxu1 }
 0xa3b   :  { %v6071_v13 = vmul.f32 -1.442695, %v3904_v16  ;;  %v6072_v20 = vmul.f32 -1.442695, %v3906_v58 }
 0xa3c   :  { %7113 = vpow2.f32 %v6070_v25 }
 0xa3d   :  { %7115 = vpow2.f32 %v6071_v13 }
 0xa3e   :  { %7117 = vpow2.f32 %v6072_v20 }
 0xa3f   :  { %7119 = vtanh.f32 %v3905_v61 }
 0xa46   :  { %v7114_v2 = vpop.eup %7113 }
 0xa47   :  { %v7116_v1 = vpop.eup %7115  ;;  %v3910_v4 = vadd.f32 1.0, %v7114_v2 }
 0xa48   :  { %v3916_v12 = vadd.f32 1.0, %v7116_v1  ;;  %v7118_v45 = vpop.eup %7117 }
 0xa49   :  { %7121 = vrcp.f32 %v3910_v4  ;;  %v7120_v57 = vpop.eup %7119  ;;  %v3923_v16 = vadd.f32 1.0, %v7118_v45 }
 0xa4a   :  { %7123 = vrcp.f32 %v3916_v12 }
 0xa4b   :  { %7125 = vrcp.f32 %v3923_v16 }
 0xa53   :  { %v7122_v60 = vpop.eup %7121 }
 0xa54   :  { %v7124_v19 = vpop.eup %7123  ;;  %v3927_v8 = vmul.f32 %v7122_v60, %v7120_v57 }
 0xa55   :  { %v3926_v6 = vmul.f32 0.0, %v7124_v19  ;;  %v7126_v14 = vpop.eup %7125 }
 0xa57   :  { %v9140_v56 = vadd.f32 %v3927_v8, %v3926_v6 }
 0xa59   :  { %7127 = vtanh.f32 %v9140_v56 }
 0xa63   :  { %v7128_v11 = vpop.eup %7127 }
 0xa64   :  { %v9143_v9 = vmul.f32 %v7128_v11, %v7126_v14 }
 0xa66   :  { %v3931_v25 = vpack.c.bf16 %v9143_v9, %v9143_v9 }
 0xa68   :  { %3965 = vmatmul.mubr.bf16.vlgmr.msra.gmra.mrb[48].mxu0 %v3931_v25  ;;  %4006 = vmatmul.mubr.bf16.vlgmr.msra.gmra.mrb[48].mxu1 %v3931_v25 }
 0xa69   :  { %4062 = vmatpush1.bf16.msra.mxu0 %v8904_v24  ;;  %4103 = vmatpush1.bf16.msra.mxu1 %v8909_v3 }
 0xa6a   :  { %4063 = vmatprep.subr.bf16.mxu0 %v8914_v0  ;;  %4104 = vmatprep.subr.bf16.mxu1 %v8919_v59 }
 0xa6b   :  { %4093 = vmatprep.mubr.bf16.mxu0 %v7265_v23  ;;  %4134 = vmatprep.mubr.bf16.mxu1 %v7265_v23 }
 0xa6d   :  { %4064 = vmatpush1.bf16.msra.mxu0 %v8926_v62  ;;  %4105 = vmatpush1.bf16.msra.mxu1 %v8931_v18 }
 0xa6e   :  { %4065 = vmatprep.subr.bf16.mxu0 %v8938_v17  ;;  %4106 = vmatprep.subr.bf16.mxu1 %v8943_v15 }
 0xa71   :  { %4066 = vmatpush1.bf16.msra.mxu0 %v8952_v29  ;;  %4107 = vmatpush1.bf16.msra.mxu1 %v8957_v30 }
 0xa72   :  { %4067 = vmatprep.subr.bf16.mxu0 %v8964_v31  ;;  %4108 = vmatprep.subr.bf16.mxu1 %v8969_v32 }
 0xa75   :  { %4068 = vmatpush1.bf16.msra.mxu0 %v8976_v33  ;;  %4109 = vmatpush1.bf16.msra.mxu1 %v8981_v34 }
 0xa76   :  { %4069 = vmatprep.subr.bf16.mxu0 %v8988_v35  ;;  %4110 = vmatprep.subr.bf16.mxu1 %v8993_v36 }
 0xa79   :  { %4070 = vmatpush1.bf16.msra.mxu0 %v9000_v37  ;;  %4111 = vmatpush1.bf16.msra.mxu1 %v9005_v38 }
 0xa7a   :  { %4071 = vmatprep.subr.bf16.mxu0 %v9012_v39  ;;  %4112 = vmatprep.subr.bf16.mxu1 %v9017_v40 }
 0xa7d   :  { %4072 = vmatpush1.bf16.msra.mxu0 %v9024_v43  ;;  %4113 = vmatpush1.bf16.msra.mxu1 %v9029_v44 }
 0xa7e   :  { %4073 = vmatprep.subr.bf16.mxu0 %v9036_v47  ;;  %4114 = vmatprep.subr.bf16.mxu1 %v9041_v48 }
 0xa81   :  { %4074 = vmatpush1.bf16.msra.mxu0 %v9048_v49  ;;  %4115 = vmatpush1.bf16.msra.mxu1 %v9053_v50 }
 0xa82   :  { %4075 = vmatprep.subr.bf16.mxu0 %v9060_v51  ;;  %4116 = vmatprep.subr.bf16.mxu1 %v9065_v52 }
 0xa85   :  { %4076 = vmatpush1.bf16.msra.mxu0 %v9072_v53  ;;  %4117 = vmatpush1.bf16.msra.mxu1 %v9077_v54 }
 0xa86   :  { %4190 = vmatprep.subr.bf16.mxu0 %v8885_v41  ;;  %4231 = vmatprep.subr.bf16.mxu1 %v8890_v42 }
 0xb3b   :  { %v3966_v26 = vpop.f32.mrb[48].mxu0  ;;  %v4007_v27 = vpop.f32.mrb[48].mxu1 }
 0xb3c   :  { %v4018_v13 = vrot.slane %v3966_v26, 6  ;;  %v3968_v55 = vpop.f32.mrb[49].mxu0  ;;  %v4009_v58 = vpop.f32.mrb[49].mxu1  ;;  %v4020_v42 = vrot.slane %v4007_v27, 6 }
 0xb3d   :  { %v4019_v20 = vrot.slane %v3968_v55, 6  ;;  %v3970_v61 = vpop.f32.mrb[50].mxu0  ;;  %v4011_v2 = vpop.f32.mrb[50].mxu1  ;;  %v4021_v19 = vrot.slane %v4009_v58, 6  ;;  %v4050_v58 = vrot.slane %v9140_v56, 6 }
 0xb3e   :  { %v4026_v1 = vadd.f32 %v4018_v13, %v9126_v28  ;;  %v3971_v4 = vpop.f32.mrb[51].mxu0  ;;  %v4012_v12 = vpop.f32.mrb[51].mxu1  ;;  %v4028_v16 = vadd.f32 %v4020_v42, %v9137_v46 }
 0xb3f   :  { %v4027_v45 = vadd.f32 %v4019_v20, %v9128_v21  ;;  %v4029_v41 = vadd.f32 %v4021_v19, %v9133_v63 }
 0xb40   :  { %v6073_v57 = vmul.f32 -1.442695, %v4026_v1 }
 0xb41   :  { %v6074_v60 = vmul.f32 -1.442695, %v4027_v45  ;;  %v6075_v8 = vmul.f32 -1.442695, %v4029_v41 }
 0xb42   :  { %7129 = vpow2.f32 %v6073_v57 }
 0xb43   :  { %7131 = vpow2.f32 %v6074_v60 }
 0xb44   :  { %7133 = vpow2.f32 %v6075_v8 }
 0xb45   :  { %7135 = vtanh.f32 %v4028_v16 }
 0xb4c   :  { %v7130_v6 = vpop.eup %7129 }
 0xb4d   :  { %v7132_v14 = vpop.eup %7131  ;;  %v4033_v11 = vadd.f32 1.0, %v7130_v6 }
 0xb4e   :  { %v4039_v25 = vadd.f32 1.0, %v7132_v14  ;;  %v7134_v26 = vpop.eup %7133 }
 0xb4f   :  { %7137 = vrcp.f32 %v4033_v11  ;;  %v7136_v13 = vpop.eup %7135  ;;  %v4046_v2 = vadd.f32 1.0, %v7134_v26  ;;  %v6882_v26 = vld [vmem:[%s9770_s4 + $0x20c] ss:$16 sps:$4 sm:$0xff]  }
 0xb50   :  { %7139 = vrcp.f32 %v4039_v25  ;;  %v6879_v25 = vld [vmem:[%s9770_s4 + $0x204] ss:$16 sps:$4 sm:$0xff]  }
 0xb51   :  { %7141 = vrcp.f32 %v4046_v2  ;;  %v6891_v2 = vld [vmem:[%s9770_s4 + $0x244] ss:$16 sps:$4 sm:$0xff]  }
 0xb59   :  { %v7138_v55 = vpop.eup %7137 }
 0xb5a   :  { %v7140_v20 = vpop.eup %7139  ;;  %v4053_v61 = vmul.f32 %v7138_v55, %v7136_v13  ;;  %v6880_v13 = vld [vmem:[%s9770_s4 + $0x208] ss:$16 sps:$4 sm:$0xff]   ;;  %v6885_v55 = vld [vmem:[%s9770_s4 + $0x224] ss:$16 sps:$4 sm:$0xff]  }
 0xb5b   :  { %v4052_v27 = vmul.f32 %v7140_v20, %v4050_v58  ;;  %v7142_v4 = vpop.eup %7141  ;;  %v6888_v58 = vld [vmem:[%s9770_s4 + $0x22c] ss:$16 sps:$4 sm:$0xff]   ;;  %v6883_v20 = vld [vmem:[%s9770_s4 + $0x220] ss:$16 sps:$4 sm:$0xff]  }
 0xb5d   :  { %v9186_v1 = vadd.f32 %v4053_v61, %v4052_v27  ;;  %v6886_v61 = vld [vmem:[%s9770_s4 + $0x228] ss:$16 sps:$4 sm:$0xff]   ;;  %v6894_v27 = vld [vmem:[%s9770_s4 + $0x24c] ss:$16 sps:$4 sm:$0xff]  }
 0xb5f   :  { %7143 = vtanh.f32 %v9186_v1 }
 0xb69   :  { %v7144_v12 = vpop.eup %7143 }
 0xb6a   :  { %v9189_v45 = vmul.f32 %v7144_v12, %v7142_v4  ;;  %v6892_v4 = vld [vmem:[%s9770_s4 + $0x248] ss:$16 sps:$4 sm:$0xff]   ;;  %v6897_v12 = vld [vmem:[%s9770_s4 + $0x264] ss:$16 sps:$4 sm:$0xff]  }
 0xb6c   :  { %v4057_v57 = vpack.c.bf16 %v9189_v45, %v9189_v45  ;;  %v4315_v16 = vsel %vm2336_vm2, %v9143_v9, %v9189_v45  ;;  %v6877_v9 = vld [vmem:[%s9770_s4 + $0x200] ss:$16 sps:$4 sm:$0xff]   ;;  %v6900_v45 = vld [vmem:[%s9770_s4 + $0x26c] ss:$16 sps:$4 sm:$0xff]  }
 0xb6e   :  { %v4059_v60 = vrot.slane %v4057_v57, 1  ;;  %v6895_v57 = vld [vmem:[%s9770_s4 + $0x260] ss:$16 sps:$4 sm:$0xff]  }
 0xb70   :  { %4094 = vmatmul.mubr.bf16.vlgmr.msra.gmra.mrb[52].mxu0 %v4059_v60  ;;  %4135 = vmatmul.mubr.bf16.vlgmr.msra.gmra.mrb[52].mxu1 %v4059_v60  ;;  %v6898_v60 = vld [vmem:[%s9770_s4 + $0x268] ss:$16 sps:$4 sm:$0xff]  }
 0xb71   :  { %4191 = vmatpush1.bf16.msra.mxu0 %v8904_v24  ;;  %4232 = vmatpush1.bf16.msra.mxu1 %v8909_v3 }
 0xb72   :  { %4192 = vmatprep.subr.bf16.mxu0 %v8914_v0  ;;  %4233 = vmatprep.subr.bf16.mxu1 %v8919_v59 }
 0xb73   :  { %4222 = vmatprep.mubr.bf16.mxu0 %v7265_v23  ;;  %4263 = vmatprep.mubr.bf16.mxu1 %v7265_v23 }
 0xb75   :  { %4193 = vmatpush1.bf16.msra.mxu0 %v8926_v62  ;;  %4234 = vmatpush1.bf16.msra.mxu1 %v8931_v18 }
 0xb76   :  { %4194 = vmatprep.subr.bf16.mxu0 %v8938_v17  ;;  %4235 = vmatprep.subr.bf16.mxu1 %v8943_v15 }
 0xb79   :  { %4195 = vmatpush1.bf16.msra.mxu0 %v8952_v29  ;;  %4236 = vmatpush1.bf16.msra.mxu1 %v8957_v30 }
 0xb7a   :  { %4196 = vmatprep.subr.bf16.mxu0 %v8964_v31  ;;  %4237 = vmatprep.subr.bf16.mxu1 %v8969_v32 }
 0xb7d   :  { %4197 = vmatpush1.bf16.msra.mxu0 %v8976_v33  ;;  %4238 = vmatpush1.bf16.msra.mxu1 %v8981_v34 }
 0xb7e   :  { %4198 = vmatprep.subr.bf16.mxu0 %v8988_v35  ;;  %4239 = vmatprep.subr.bf16.mxu1 %v8993_v36 }
 0xb81   :  { %4199 = vmatpush1.bf16.msra.mxu0 %v9000_v37  ;;  %4240 = vmatpush1.bf16.msra.mxu1 %v9005_v38 }
 0xb82   :  { %4200 = vmatprep.subr.bf16.mxu0 %v9012_v39  ;;  %4241 = vmatprep.subr.bf16.mxu1 %v9017_v40 }
 0xb85   :  { %4201 = vmatpush1.bf16.msra.mxu0 %v9024_v43  ;;  %4242 = vmatpush1.bf16.msra.mxu1 %v9029_v44 }
 0xb86   :  { %4202 = vmatprep.subr.bf16.mxu0 %v9036_v47  ;;  %4243 = vmatprep.subr.bf16.mxu1 %v9041_v48 }
 0xb89   :  { %4203 = vmatpush1.bf16.msra.mxu0 %v9048_v49  ;;  %4244 = vmatpush1.bf16.msra.mxu1 %v9053_v50 }
 0xb8a   :  { %4204 = vmatprep.subr.bf16.mxu0 %v9060_v51  ;;  %4245 = vmatprep.subr.bf16.mxu1 %v9065_v52  ;;  %v4179_v51 = vrot.slane %v9186_v1, 6  ;;  %v6889_v1 = vld [vmem:[%s9770_s4 + $0x240] ss:$16 sps:$4 sm:$0xff]  }
 0xb8d   :  { %4205 = vmatpush1.bf16.msra.mxu0 %v9072_v53  ;;  %4246 = vmatpush1.bf16.msra.mxu1 %v9077_v54 }
 0xb8e   :  { %4535 = vmatprep.subr.bf16.mxu0 %v6879_v25  ;;  %4576 = vmatprep.subr.bf16.mxu1 %v6882_v26 }
 0xc43   :  { %v4095_v24 = vpop.f32.mrb[52].mxu0  ;;  %v4136_v3 = vpop.f32.mrb[52].mxu1 }
 0xc44   :  { %v4147_v0 = vrot.slane %v4095_v24, 4  ;;  %v4097_v59 = vpop.f32.mrb[53].mxu0  ;;  %v4138_v62 = vpop.f32.mrb[53].mxu1  ;;  %v4149_v37 = vrot.slane %v4136_v3, 4  ;;  %v6903_v24 = vld [vmem:[%s9770_s4 + $0x284] ss:$16 sps:$4 sm:$0xff]  }
 0xc45   :  { %v4148_v18 = vrot.slane %v4097_v59, 4  ;;  %v4099_v17 = vpop.f32.mrb[54].mxu0  ;;  %v4140_v15 = vpop.f32.mrb[54].mxu1  ;;  %v4150_v35 = vrot.slane %v4138_v62, 4  ;;  %v6906_v3 = vld [vmem:[%s9770_s4 + $0x28c] ss:$16 sps:$4 sm:$0xff]  }
 0xc46   :  { %v4155_v29 = vadd.f32 %v4147_v0, %v9126_v28  ;;  %v4100_v30 = vpop.f32.mrb[55].mxu0  ;;  %v4141_v31 = vpop.f32.mrb[55].mxu1  ;;  %v4157_v39 = vadd.f32 %v4149_v37, %v9137_v46  ;;  %v6901_v0 = vld [vmem:[%s9770_s4 + $0x280] ss:$16 sps:$4 sm:$0xff]   ;;  %v6904_v59 = vld [vmem:[%s9770_s4 + $0x288] ss:$16 sps:$4 sm:$0xff]  }
 0xc47   :  { %v4156_v32 = vadd.f32 %v4148_v18, %v9128_v21  ;;  %v4158_v36 = vadd.f32 %v4150_v35, %v9133_v63  ;;  %v6909_v62 = vld [vmem:[%s9770_s4 + $0x2a4] ss:$16 sps:$4 sm:$0xff]   ;;  %v6907_v18 = vld [vmem:[%s9770_s4 + $0x2a0] ss:$16 sps:$4 sm:$0xff]   ;;  %v6910_v17 = vld [vmem:[%s9770_s4 + $0x2a8] ss:$16 sps:$4 sm:$0xff]  }
 0xc48   :  { %v6076_v33 = vmul.f32 -1.442695, %v4155_v29  ;;  %v6912_v15 = vld [vmem:[%s9770_s4 + $0x2ac] ss:$16 sps:$4 sm:$0xff]   ;;  %v6915_v29 = vld [vmem:[%s9770_s4 + $0x2c4] ss:$16 sps:$4 sm:$0xff]  }
 0xc49   :  { %v6077_v34 = vmul.f32 -1.442695, %v4156_v32  ;;  %v6078_v38 = vmul.f32 -1.442695, %v4158_v36  ;;  %v6918_v30 = vld [vmem:[%s9770_s4 + $0x2cc] ss:$16 sps:$4 sm:$0xff]  }
 0xc4a   :  { %7145 = vpow2.f32 %v6076_v33  ;;  %v6913_v31 = vld [vmem:[%s9770_s4 + $0x2c0] ss:$16 sps:$4 sm:$0xff]   ;;  %v6916_v32 = vld [vmem:[%s9770_s4 + $0x2c8] ss:$16 sps:$4 sm:$0xff]   ;;  %v6921_v33 = vld [vmem:[%s9770_s4 + $0x2e4] ss:$16 sps:$4 sm:$0xff]  }
 0xc4b   :  { %7147 = vpow2.f32 %v6077_v34  ;;  %v6924_v34 = vld [vmem:[%s9770_s4 + $0x2ec] ss:$16 sps:$4 sm:$0xff]   ;;  %v6919_v35 = vld [vmem:[%s9770_s4 + $0x2e0] ss:$16 sps:$4 sm:$0xff]   ;;  %v6922_v36 = vld [vmem:[%s9770_s4 + $0x2e8] ss:$16 sps:$4 sm:$0xff]  }
 0xc4c   :  { %7149 = vpow2.f32 %v6078_v38  ;;  %v9340_v37 = vld [vmem:[%s9771_s5 + $0x304] ss:$16 sps:$4 sm:$0xff]   ;;  %v9345_v38 = vld [vmem:[%s9771_s5 + $0x30c] ss:$16 sps:$4 sm:$0xff]  }
 0xc4d   :  { %7151 = vtanh.f32 %v4157_v39 }
 0xc54   :  { %v7146_v40 = vpop.eup %7145 }
 0xc55   :  { %v7148_v43 = vpop.eup %7147  ;;  %v4162_v44 = vadd.f32 1.0, %v7146_v40 }
 0xc56   :  { %v4168_v47 = vadd.f32 1.0, %v7148_v43  ;;  %v7150_v48 = vpop.eup %7149 }
 0xc57   :  { %7153 = vrcp.f32 %v4162_v44  ;;  %v7152_v49 = vpop.eup %7151  ;;  %v4175_v54 = vadd.f32 1.0, %v7150_v48 }
 0xc58   :  { %7155 = vrcp.f32 %v4168_v47 }
 0xc59   :  { %7157 = vrcp.f32 %v4175_v54 }
 0xc61   :  { %v7154_v50 = vpop.eup %7153 }
 0xc62   :  { %v7156_v52 = vpop.eup %7155  ;;  %v4182_v53 = vmul.f32 %v7154_v50, %v7152_v49 }
 0xc63   :  { %v4181_v56 = vmul.f32 %v7156_v52, %v4179_v51  ;;  %v7158_v41 = vpop.eup %7157 }
 0xc65   :  { %v9230_v19 = vadd.f32 %v4182_v53, %v4181_v56 }
 0xc67   :  { %7159 = vtanh.f32 %v9230_v19 }
 0xc71   :  { %v7160_v42 = vpop.eup %7159 }
 0xc72   :  { %v4185_v8 = vmul.f32 %v7160_v42, %v7158_v41 }
 0xc74   :  { %v4186_v6 = vpack.c.bf16 %v4185_v8, %v4185_v8  ;;  %v9237_v14 = vsel %vm2338_vm3, %v4315_v16, %v4185_v8 }
 0xc76   :  { %v4188_v11 = vrot.slane %v4186_v6, 2 }
 0xc78   :  { %4223 = vmatmul.mubr.bf16.vlgmr.msra.gmra.mrb[56].mxu0 %v4188_v11  ;;  %4264 = vmatmul.mubr.bf16.vlgmr.msra.gmra.mrb[56].mxu1 %v4188_v11 }
 0xc79   :  { %4567 = vmatprep.mubr.bf16.mxu0 %v7265_v23  ;;  %4608 = vmatprep.mubr.bf16.mxu1 %v7265_v23 }
 0xc7a   :  { %4536 = vmatpush1.bf16.msra.mxu0 %v6877_v9  ;;  %4577 = vmatpush1.bf16.msra.mxu1 %v6880_v13 }
 0xc7b   :  { %4537 = vmatprep.subr.bf16.mxu0 %v6885_v55  ;;  %4578 = vmatprep.subr.bf16.mxu1 %v6888_v58  ;;  %v4308_v58 = vrot.slane %v9230_v19, 6  ;;  %v9364_v19 = vld [vmem:[%s9771_s5 + $0x308] ss:$16 sps:$4 sm:$0xff]  }
 0xc7e   :  { %4538 = vmatpush1.bf16.msra.mxu0 %v6883_v20  ;;  %4579 = vmatpush1.bf16.msra.mxu1 %v6886_v61 }
 0xc7f   :  { %4539 = vmatprep.subr.bf16.mxu0 %v6891_v2  ;;  %4580 = vmatprep.subr.bf16.mxu1 %v6894_v27 }
 0xc82   :  { %4540 = vmatpush1.bf16.msra.mxu0 %v6889_v1  ;;  %4581 = vmatpush1.bf16.msra.mxu1 %v6892_v4 }
 0xc83   :  { %4541 = vmatprep.subr.bf16.mxu0 %v6897_v12  ;;  %4582 = vmatprep.subr.bf16.mxu1 %v6900_v45  ;;  %v9359_v45 = vld [vmem:[%s9771_s5 + $0x300] ss:$16 sps:$4 sm:$0xff]  }
 0xc86   :  { %4542 = vmatpush1.bf16.msra.mxu0 %v6895_v57  ;;  %4583 = vmatpush1.bf16.msra.mxu1 %v6898_v60  ;;  %v9369_v60 = vld [vmem:[%s9771_s5 + $0x324] ss:$16 sps:$4 sm:$0xff]  }
 0xc87   :  { %4543 = vmatprep.subr.bf16.mxu0 %v6903_v24  ;;  %4584 = vmatprep.subr.bf16.mxu1 %v6906_v3  ;;  %v9381_v24 = vld [vmem:[%s9771_s5 + $0x320] ss:$16 sps:$4 sm:$0xff]   ;;  %v9386_v3 = vld [vmem:[%s9771_s5 + $0x328] ss:$16 sps:$4 sm:$0xff]  }
 0xc8a   :  { %4544 = vmatpush1.bf16.msra.mxu0 %v6901_v0  ;;  %4585 = vmatpush1.bf16.msra.mxu1 %v6904_v59  ;;  %v9393_v0 = vld [vmem:[%s9771_s5 + $0x344] ss:$16 sps:$4 sm:$0xff]   ;;  %v9398_v59 = vld [vmem:[%s9771_s5 + $0x34c] ss:$16 sps:$4 sm:$0xff]  }
 0xc8b   :  { %4545 = vmatprep.subr.bf16.mxu0 %v6909_v62  ;;  %4586 = vmatprep.subr.bf16.mxu1 %v6912_v15  ;;  %v9407_v62 = vld [vmem:[%s9771_s5 + $0x340] ss:$16 sps:$4 sm:$0xff]   ;;  %v9424_v15 = vld [vmem:[%s9771_s5 + $0x36c] ss:$16 sps:$4 sm:$0xff]  }
 0xc8e   :  { %4546 = vmatpush1.bf16.msra.mxu0 %v6907_v18  ;;  %4587 = vmatpush1.bf16.msra.mxu1 %v6910_v17  ;;  %v9412_v18 = vld [vmem:[%s9771_s5 + $0x348] ss:$16 sps:$4 sm:$0xff]   ;;  %v9419_v17 = vld [vmem:[%s9771_s5 + $0x364] ss:$16 sps:$4 sm:$0xff]  }
 0xc8f   :  { %4547 = vmatprep.subr.bf16.mxu0 %v6915_v29  ;;  %4588 = vmatprep.subr.bf16.mxu1 %v6918_v30  ;;  %v9431_v29 = vld [vmem:[%s9771_s5 + $0x360] ss:$16 sps:$4 sm:$0xff]   ;;  %v9436_v30 = vld [vmem:[%s9771_s5 + $0x368] ss:$16 sps:$4 sm:$0xff]  }
 0xc92   :  { %4548 = vmatpush1.bf16.msra.mxu0 %v6913_v31  ;;  %4589 = vmatpush1.bf16.msra.mxu1 %v6916_v32  ;;  %v9443_v31 = vld [vmem:[%s9771_s5 + $0x384] ss:$16 sps:$4 sm:$0xff]   ;;  %v9448_v32 = vld [vmem:[%s9771_s5 + $0x38c] ss:$16 sps:$4 sm:$0xff]  }
 0xc93   :  { %4549 = vmatprep.subr.bf16.mxu0 %v6921_v33  ;;  %4590 = vmatprep.subr.bf16.mxu1 %v6924_v34  ;;  %v9455_v33 = vld [vmem:[%s9771_s5 + $0x380] ss:$16 sps:$4 sm:$0xff]   ;;  %v9460_v34 = vld [vmem:[%s9771_s5 + $0x388] ss:$16 sps:$4 sm:$0xff]  }
 0xc96   :  { %4550 = vmatpush1.bf16.msra.mxu0 %v6919_v35  ;;  %4591 = vmatpush1.bf16.msra.mxu1 %v6922_v36  ;;  %v9467_v35 = vld [vmem:[%s9771_s5 + $0x3a4] ss:$16 sps:$4 sm:$0xff]   ;;  %v9472_v36 = vld [vmem:[%s9771_s5 + $0x3ac] ss:$16 sps:$4 sm:$0xff]  }
 0xc97   :  { %4810 = vmatprep.subr.bf16.mxu0 %v9340_v37  ;;  %4851 = vmatprep.subr.bf16.mxu1 %v9345_v38 }
 0xd4b   :  { %v4224_v39 = vpop.f32.mrb[56].mxu0  ;;  %v4265_v40 = vpop.f32.mrb[56].mxu1 }
 0xd4c   :  { %v4276_v43 = vrot.slane %v4224_v39, 2  ;;  %v4226_v44 = vpop.f32.mrb[57].mxu0  ;;  %v4267_v47 = vpop.f32.mrb[57].mxu1  ;;  %v4278_v16 = vrot.slane %v4265_v40, 2  ;;  %v9479_v39 = vld [vmem:[%s9771_s5 + $0x3a0] ss:$16 sps:$4 sm:$0xff]  }
 0xd4d   :  { %v4277_v48 = vrot.slane %v4226_v44, 2  ;;  %v4228_v49 = vpop.f32.mrb[58].mxu0  ;;  %v4269_v50 = vpop.f32.mrb[58].mxu1  ;;  %v4279_v42 = vrot.slane %v4267_v47, 2  ;;  %v9484_v40 = vld [vmem:[%s9771_s5 + $0x3a8] ss:$16 sps:$4 sm:$0xff]  }
 0xd4e   :  { %v4284_v51 = vadd.f32 %v4276_v43, %v9126_v28  ;;  %v4229_v52 = vpop.f32.mrb[59].mxu0  ;;  %v4270_v53 = vpop.f32.mrb[59].mxu1  ;;  %v4286_v11 = vadd.f32 %v4278_v16, %v9137_v46  ;;  %v9491_v43 = vld [vmem:[%s9771_s5 + $0x3c4] ss:$16 sps:$4 sm:$0xff]   ;;  %v9496_v44 = vld [vmem:[%s9771_s5 + $0x3cc] ss:$16 sps:$4 sm:$0xff]  }
 0xd4f   :  { %v4285_v54 = vadd.f32 %v4277_v48, %v9128_v21  ;;  %v4287_v8 = vadd.f32 %v4279_v42, %v9133_v63  ;;  %v9503_v47 = vld [vmem:[%s9771_s5 + $0x3c0] ss:$16 sps:$4 sm:$0xff]   ;;  %v9508_v48 = vld [vmem:[%s9771_s5 + $0x3c8] ss:$16 sps:$4 sm:$0xff]   ;;  %v9515_v49 = vld [vmem:[%s9771_s5 + $0x3e4] ss:$16 sps:$4 sm:$0xff]  }
 0xd50   :  { %v6079_v56 = vmul.f32 -1.442695, %v4284_v51  ;;  %v9520_v50 = vld [vmem:[%s9771_s5 + $0x3ec] ss:$16 sps:$4 sm:$0xff]   ;;  %v9527_v51 = vld [vmem:[%s9771_s5 + $0x3e0] ss:$16 sps:$4 sm:$0xff]  }
 0xd51   :  { %v6080_v41 = vmul.f32 -1.442695, %v4285_v54  ;;  %v6081_v6 = vmul.f32 -1.442695, %v4287_v8  ;;  %v9532_v52 = vld [vmem:[%s9771_s5 + $0x3e8] ss:$16 sps:$4 sm:$0xff]  }
 0xd52   :  { %7161 = vpow2.f32 %v6079_v56 }
 0xd53   :  { %7163 = vpow2.f32 %v6080_v41 }
 0xd54   :  { %7165 = vpow2.f32 %v6081_v6 }
 0xd55   :  { %7167 = vtanh.f32 %v4286_v11  ;;  %v6114_v11 = vld [vmem:[%s9772_s6 + $0x8] sm:$0xf] }
 0xd5c   :  { %v7162_v25 = vpop.eup %7161 }
 0xd5d   :  { %v7164_v26 = vpop.eup %7163  ;;  %v4291_v9 = vadd.f32 1.0, %v7162_v25  ;;  %v4358_v25 = vrot.slane %v6114_v11, %v8203_v5 }
 0xd5e   :  { %v4297_v28 = vadd.f32 1.0, %v7164_v26  ;;  %v7166_v21 = vpop.eup %7165  ;;  %v4362_v26 = vrot.slane %v6114_v11, %v8208_v7 }
 0xd5f   :  { %7169 = vrcp.f32 %v4291_v9  ;;  %v7168_v13 = vpop.eup %7167  ;;  %v4304_v63 = vadd.f32 1.0, %v7166_v21 }
 0xd60   :  { %7171 = vrcp.f32 %v4297_v28 }
 0xd61   :  { %7173 = vrcp.f32 %v4304_v63 }
 0xd69   :  { %v7170_v55 = vpop.eup %7169 }
 0xd6a   :  { %v7172_v20 = vpop.eup %7171  ;;  %v4311_v61 = vmul.f32 %v7170_v55, %v7168_v13 }
 0xd6b   :  { %v4310_v2 = vmul.f32 %v7172_v20, %v4308_v58  ;;  %v7174_v46 = vpop.eup %7173 }
 0xd6d   :  { %v4312_v27 = vadd.f32 %v4311_v61, %v4310_v2  ;;  %v4370_v61 = vrot.slane %v6114_v11, %v8212_v10 }
 0xd6f   :  { %7175 = vtanh.f32 %v4312_v27 }
 0xd79   :  { %v7176_v1 = vpop.eup %7175 }
 0xd7a   :  { %v4314_v4 = vmul.f32 %v7176_v1, %v7174_v46 }
 0xd7c   :  { %v4317_v12 = vsel %vm2340_vm4, %v9237_v14, %v4314_v4  ;;  %v9374_v14 = vld [vmem:[%s9771_s5 + $0x32c] ss:$16 sps:$4 sm:$0xff]  }
 0xd7d   :  { %v4318_v57 = vpack.c.bf16 %v4317_v12, %v4317_v12  ;;  %v4366_v12 = vrot.slane %v6114_v11, %v8221_v22 }
 0xd7f   :  { %4568 = vmatmul.mubr.bf16.vlgmr.msra.gmra.mrb[60].mxu0 %v4318_v57  ;;  %4609 = vmatmul.mubr.bf16.vlgmr.msra.gmra.mrb[60].mxu1 %v4318_v57 }
 0xd80   :  { %4811 = vmatpush1.bf16.msra.mxu0 %v9359_v45  ;;  %4852 = vmatpush1.bf16.msra.mxu1 %v9364_v19 }
 0xd81   :  { %4812 = vmatprep.subr.bf16.mxu0 %v9369_v60  ;;  %4853 = vmatprep.subr.bf16.mxu1 %v9374_v14 }
 0xd82   :  { %4842 = vmatprep.mubr.bf16.mxu0 %v7265_v23  ;;  %4883 = vmatprep.mubr.bf16.mxu1 %v7265_v23 }
 0xd84   :  { %4813 = vmatpush1.bf16.msra.mxu0 %v9381_v24  ;;  %4854 = vmatpush1.bf16.msra.mxu1 %v9386_v3 }
 0xd85   :  { %4814 = vmatprep.subr.bf16.mxu0 %v9393_v0  ;;  %4855 = vmatprep.subr.bf16.mxu1 %v9398_v59 }
 0xd88   :  { %4815 = vmatpush1.bf16.msra.mxu0 %v9407_v62  ;;  %4856 = vmatpush1.bf16.msra.mxu1 %v9412_v18 }
 0xd89   :  { %4816 = vmatprep.subr.bf16.mxu0 %v9419_v17  ;;  %4857 = vmatprep.subr.bf16.mxu1 %v9424_v15 }
 0xd8c   :  { %4817 = vmatpush1.bf16.msra.mxu0 %v9431_v29  ;;  %4858 = vmatpush1.bf16.msra.mxu1 %v9436_v30 }
 0xd8d   :  { %4818 = vmatprep.subr.bf16.mxu0 %v9443_v31  ;;  %4859 = vmatprep.subr.bf16.mxu1 %v9448_v32 }
 0xd90   :  { %4819 = vmatpush1.bf16.msra.mxu0 %v9455_v33  ;;  %4860 = vmatpush1.bf16.msra.mxu1 %v9460_v34 }
 0xd91   :  { %4820 = vmatprep.subr.bf16.mxu0 %v9467_v35  ;;  %4861 = vmatprep.subr.bf16.mxu1 %v9472_v36 }
 0xd94   :  { %4821 = vmatpush1.bf16.msra.mxu0 %v9479_v39  ;;  %4862 = vmatpush1.bf16.msra.mxu1 %v9484_v40 }
 0xd95   :  { %4822 = vmatprep.subr.bf16.mxu0 %v9491_v43  ;;  %4863 = vmatprep.subr.bf16.mxu1 %v9496_v44 }
 0xd98   :  { %4823 = vmatpush1.bf16.msra.mxu0 %v9503_v47  ;;  %4864 = vmatpush1.bf16.msra.mxu1 %v9508_v48 }
 0xd99   :  { %4824 = vmatprep.subr.bf16.mxu0 %v9515_v49  ;;  %4865 = vmatprep.subr.bf16.mxu1 %v9520_v50 }
 0xd9c   :  { %4825 = vmatpush1.bf16.msra.mxu0 %v9527_v51  ;;  %4866 = vmatpush1.bf16.msra.mxu1 %v9532_v52 }
 0xd9d   :  { %4921 = vmatprep.subr.bf16.mxu0 %v9340_v37  ;;  %4962 = vmatprep.subr.bf16.mxu1 %v9345_v38 }
 0xd9f   :  { %4843 = vmatmul.mubr.bf16.vlgmr.msra.gmra.mrb[64].mxu0 %v7265_v23  ;;  %4884 = vmatmul.mubr.bf16.vlgmr.msra.gmra.mrb[64].mxu1 %v7265_v23 }
 0xda0   :  { %4922 = vmatpush1.bf16.msra.mxu0 %v9359_v45  ;;  %4963 = vmatpush1.bf16.msra.mxu1 %v9364_v19 }
 0xda1   :  { %4923 = vmatprep.subr.bf16.mxu0 %v9369_v60  ;;  %4964 = vmatprep.subr.bf16.mxu1 %v9374_v14 }
 0xda2   :  { %4953 = vmatprep.mubr.bf16.mxu0 %v7265_v23  ;;  %4994 = vmatprep.mubr.bf16.mxu1 %v7265_v23 }
 0xda4   :  { %4924 = vmatpush1.bf16.msra.mxu0 %v9381_v24  ;;  %4965 = vmatpush1.bf16.msra.mxu1 %v9386_v3 }
 0xda5   :  { %4925 = vmatprep.subr.bf16.mxu0 %v9393_v0  ;;  %4966 = vmatprep.subr.bf16.mxu1 %v9398_v59 }
 0xda8   :  { %4926 = vmatpush1.bf16.msra.mxu0 %v9407_v62  ;;  %4967 = vmatpush1.bf16.msra.mxu1 %v9412_v18 }
 0xda9   :  { %4927 = vmatprep.subr.bf16.mxu0 %v9419_v17  ;;  %4968 = vmatprep.subr.bf16.mxu1 %v9424_v15 }
 0xdac   :  { %4928 = vmatpush1.bf16.msra.mxu0 %v9431_v29  ;;  %4969 = vmatpush1.bf16.msra.mxu1 %v9436_v30 }
 0xdad   :  { %4929 = vmatprep.subr.bf16.mxu0 %v9443_v31  ;;  %4970 = vmatprep.subr.bf16.mxu1 %v9448_v32 }
 0xdb0   :  { %4930 = vmatpush1.bf16.msra.mxu0 %v9455_v33  ;;  %4971 = vmatpush1.bf16.msra.mxu1 %v9460_v34 }
 0xdb1   :  { %4931 = vmatprep.subr.bf16.mxu0 %v9467_v35  ;;  %4972 = vmatprep.subr.bf16.mxu1 %v9472_v36 }
 0xdb4   :  { %4932 = vmatpush1.bf16.msra.mxu0 %v9479_v39  ;;  %4973 = vmatpush1.bf16.msra.mxu1 %v9484_v40 }
 0xdb5   :  { %4933 = vmatprep.subr.bf16.mxu0 %v9491_v43  ;;  %4974 = vmatprep.subr.bf16.mxu1 %v9496_v44 }
 0xdb8   :  { %4934 = vmatpush1.bf16.msra.mxu0 %v9503_v47  ;;  %4975 = vmatpush1.bf16.msra.mxu1 %v9508_v48 }
 0xdb9   :  { %4935 = vmatprep.subr.bf16.mxu0 %v9515_v49  ;;  %4976 = vmatprep.subr.bf16.mxu1 %v9520_v50 }
 0xdbc   :  { %4936 = vmatpush1.bf16.msra.mxu0 %v9527_v51  ;;  %4977 = vmatpush1.bf16.msra.mxu1 %v9532_v52 }
 0xdbd   :  { %5050 = vmatprep.subr.bf16.mxu0 %v9340_v37  ;;  %5091 = vmatprep.subr.bf16.mxu1 %v9345_v38 }
 0xe52   :  { %v4569_v53 = vpop.f32.mrb[60].mxu0  ;;  %v4610_v54 = vpop.f32.mrb[60].mxu1 }
 0xe53   :  { %v4571_v56 = vpop.f32.mrb[61].mxu0  ;;  %v4612_v41 = vpop.f32.mrb[61].mxu1  ;;  %v9581_v9 = vadd.f32 %v4569_v53, %v4358_v25  ;;  %v9592_v53 = vadd.f32 %v4610_v54, %v4366_v12 }
 0xe54   :  { %v4573_v42 = vpop.f32.mrb[62].mxu0  ;;  %v4614_v8 = vpop.f32.mrb[62].mxu1  ;;  %v9583_v28 = vadd.f32 %v4571_v56, %v4362_v26  ;;  %v9588_v4 = vadd.f32 %v4612_v41, %v4370_v61 }
 0xe55   :  { %v4574_v16 = vpop.f32.mrb[63].mxu0  ;;  %v4615_v6 = vpop.f32.mrb[63].mxu1 }
 0xe72   :  { %v4844_v21 = vpop.f32.mrb[64].mxu0  ;;  %v4885_v13 = vpop.f32.mrb[64].mxu1 }
 0xe73   :  { %v4892_v55 = vadd.f32 %v4844_v21, %v9581_v9  ;;  %v4846_v58 = vpop.f32.mrb[65].mxu0  ;;  %v4887_v20 = vpop.f32.mrb[65].mxu1  ;;  %v4894_v10 = vadd.f32 %v4885_v13, %v9592_v53 }
 0xe74   :  { %v4893_v63 = vadd.f32 %v4846_v58, %v9583_v28  ;;  %v4848_v2 = vpop.f32.mrb[66].mxu0  ;;  %v4889_v27 = vpop.f32.mrb[66].mxu1  ;;  %v4895_v57 = vadd.f32 %v4887_v20, %v9588_v4 }
 0xe75   :  { %v6211_v46 = vmul.f32 -1.442695, %v4892_v55  ;;  %v4849_v5 = vpop.f32.mrb[67].mxu0  ;;  %v4890_v1 = vpop.f32.mrb[67].mxu1 }
 0xe76   :  { %v6212_v7 = vmul.f32 -1.442695, %v4893_v63  ;;  %v6213_v56 = vmul.f32 -1.442695, %v4895_v57 }
 0xe77   :  { %7177 = vpow2.f32 %v6211_v46 }
 0xe78   :  { %7179 = vpow2.f32 %v6212_v7 }
 0xe79   :  { %7181 = vpow2.f32 %v6213_v56 }
 0xe7a   :  { %7183 = vtanh.f32 %v4894_v10 }
 0xe81   :  { %v7178_v42 = vpop.eup %7177 }
 0xe82   :  { %v7180_v8 = vpop.eup %7179  ;;  %v4899_v16 = vadd.f32 1.0, %v7178_v42 }
 0xe83   :  { %v4905_v6 = vadd.f32 1.0, %v7180_v8  ;;  %v7182_v41 = vpop.eup %7181 }
 0xe84   :  { %7185 = vrcp.f32 %v4899_v16  ;;  %v7184_v25 = vpop.eup %7183  ;;  %v4912_v11 = vadd.f32 1.0, %v7182_v41 }
 0xe85   :  { %7187 = vrcp.f32 %v4905_v6 }
 0xe86   :  { %7189 = vrcp.f32 %v4912_v11 }
 0xe8e   :  { %v7186_v26 = vpop.eup %7185 }
 0xe8f   :  { %v7188_v21 = vpop.eup %7187  ;;  %v4916_v22 = vmul.f32 %v7186_v26, %v7184_v25 }
 0xe90   :  { %v4915_v55 = vmul.f32 0.0, %v7188_v21  ;;  %v7190_v13 = vpop.eup %7189 }
 0xe92   :  { %v9595_v54 = vadd.f32 %v4916_v22, %v4915_v55 }
 0xe94   :  { %7191 = vtanh.f32 %v9595_v54 }
 0xe9e   :  { %v7192_v58 = vpop.eup %7191 }
 0xe9f   :  { %v4919_v20 = vmul.f32 %v7192_v58, %v7190_v13 }
 0xea1   :  { %v4920_v61 = vpack.c.bf16 %v4919_v20, %v4919_v20  ;;  %v5039_v20 = vrot.slane %v9595_v54, 6 }
 0xea3   :  { %4954 = vmatmul.mubr.bf16.vlgmr.msra.gmra.mrb[68].mxu0 %v4920_v61  ;;  %4995 = vmatmul.mubr.bf16.vlgmr.msra.gmra.mrb[68].mxu1 %v4920_v61 }
 0xea4   :  { %5051 = vmatpush1.bf16.msra.mxu0 %v9359_v45  ;;  %5092 = vmatpush1.bf16.msra.mxu1 %v9364_v19 }
 0xea5   :  { %5052 = vmatprep.subr.bf16.mxu0 %v9369_v60  ;;  %5093 = vmatprep.subr.bf16.mxu1 %v9374_v14 }
 0xea6   :  { %5082 = vmatprep.mubr.bf16.mxu0 %v7265_v23  ;;  %5123 = vmatprep.mubr.bf16.mxu1 %v7265_v23 }
 0xea8   :  { %5053 = vmatpush1.bf16.msra.mxu0 %v9381_v24  ;;  %5094 = vmatpush1.bf16.msra.mxu1 %v9386_v3 }
 0xea9   :  { %5054 = vmatprep.subr.bf16.mxu0 %v9393_v0  ;;  %5095 = vmatprep.subr.bf16.mxu1 %v9398_v59 }
 0xeac   :  { %5055 = vmatpush1.bf16.msra.mxu0 %v9407_v62  ;;  %5096 = vmatpush1.bf16.msra.mxu1 %v9412_v18 }
 0xead   :  { %5056 = vmatprep.subr.bf16.mxu0 %v9419_v17  ;;  %5097 = vmatprep.subr.bf16.mxu1 %v9424_v15 }
 0xeb0   :  { %5057 = vmatpush1.bf16.msra.mxu0 %v9431_v29  ;;  %5098 = vmatpush1.bf16.msra.mxu1 %v9436_v30 }
 0xeb1   :  { %5058 = vmatprep.subr.bf16.mxu0 %v9443_v31  ;;  %5099 = vmatprep.subr.bf16.mxu1 %v9448_v32 }
 0xeb4   :  { %5059 = vmatpush1.bf16.msra.mxu0 %v9455_v33  ;;  %5100 = vmatpush1.bf16.msra.mxu1 %v9460_v34 }
 0xeb5   :  { %5060 = vmatprep.subr.bf16.mxu0 %v9467_v35  ;;  %5101 = vmatprep.subr.bf16.mxu1 %v9472_v36 }
 0xeb8   :  { %5061 = vmatpush1.bf16.msra.mxu0 %v9479_v39  ;;  %5102 = vmatpush1.bf16.msra.mxu1 %v9484_v40 }
 0xeb9   :  { %5062 = vmatprep.subr.bf16.mxu0 %v9491_v43  ;;  %5103 = vmatprep.subr.bf16.mxu1 %v9496_v44 }
 0xebc   :  { %5063 = vmatpush1.bf16.msra.mxu0 %v9503_v47  ;;  %5104 = vmatpush1.bf16.msra.mxu1 %v9508_v48 }
 0xebd   :  { %5064 = vmatprep.subr.bf16.mxu0 %v9515_v49  ;;  %5105 = vmatprep.subr.bf16.mxu1 %v9520_v50 }
 0xec0   :  { %5065 = vmatpush1.bf16.msra.mxu0 %v9527_v51  ;;  %5106 = vmatpush1.bf16.msra.mxu1 %v9532_v52 }
 0xec1   :  { %5179 = vmatprep.subr.bf16.mxu0 %v9340_v37  ;;  %5220 = vmatprep.subr.bf16.mxu1 %v9345_v38 }
 0xf76   :  { %v4955_v63 = vpop.f32.mrb[68].mxu0  ;;  %v4996_v2 = vpop.f32.mrb[68].mxu1 }
 0xf77   :  { %v5007_v27 = vrot.slane %v4955_v63, 6  ;;  %v4957_v46 = vpop.f32.mrb[69].mxu0  ;;  %v4998_v5 = vpop.f32.mrb[69].mxu1  ;;  %v5009_v38 = vrot.slane %v4996_v2, 6 }
 0xf78   :  { %v5008_v1 = vrot.slane %v4957_v46, 6  ;;  %v4959_v7 = vpop.f32.mrb[70].mxu0  ;;  %v5000_v12 = vpop.f32.mrb[70].mxu1  ;;  %v5010_v6 = vrot.slane %v4998_v5, 6 }
 0xf79   :  { %v5015_v57 = vadd.f32 %v5007_v27, %v9581_v9  ;;  %v4960_v56 = vpop.f32.mrb[71].mxu0  ;;  %v5001_v10 = vpop.f32.mrb[71].mxu1  ;;  %v5017_v25 = vadd.f32 %v5009_v38, %v9592_v53  ;;  %v6974_v38 = vld [vmem:[%s9773_s7 + $0x8] sm:$0xff]  }
 0xf7a   :  { %v5016_v42 = vadd.f32 %v5008_v1, %v9583_v28  ;;  %v5018_v37 = vadd.f32 %v5010_v6, %v9588_v4  ;;  %v6973_v6 = vld [vmem:[%s9773_s7] sm:$0xff]  }
 0xf7b   :  { %v6214_v8 = vmul.f32 -1.442695, %v5015_v57 }
 0xf7c   :  { %v6215_v16 = vmul.f32 -1.442695, %v5016_v42  ;;  %v6216_v41 = vmul.f32 -1.442695, %v5018_v37  ;;  %v7266_v37 = vmov 0.0  }
 0xf7d   :  { %7193 = vpow2.f32 %v6214_v8 }
 0xf7e   :  { %7195 = vpow2.f32 %v6215_v16 }
 0xf7f   :  { %7197 = vpow2.f32 %v6216_v41  ;;  %v6975_v41 = vld [vmem:[%s9773_s7 + $0x10] sm:$0xff]  }
 0xf80   :  { %7199 = vtanh.f32 %v5017_v25  ;;  %v6976_v25 = vld [vmem:[%s9773_s7 + $0x18] sm:$0xff]  }
 0xf87   :  { %v7194_v26 = vpop.eup %7193 }
 0xf88   :  { %v7196_v21 = vpop.eup %7195  ;;  %v5022_v22 = vadd.f32 1.0, %v7194_v26  ;;  %v5322_v26 = vld [vmem:[%s9774_s8] sm:$0x3] }
 0xf89   :  { %v5028_v11 = vadd.f32 1.0, %v7196_v21  ;;  %v7198_v55 = vpop.eup %7197  ;;  %v6977_v21 = vld [vmem:[%s9773_s7 + $0x20] sm:$0xff]  }
 0xf8a   :  { %7201 = vrcp.f32 %v5022_v22  ;;  %v7200_v13 = vpop.eup %7199  ;;  %v5035_v27 = vadd.f32 1.0, %v7198_v55  ;;  %v7267_v22 = vmov 65535  }
 0xf8b   :  { %7203 = vrcp.f32 %v5028_v11  ;;  %v5327_v11 = vsel %vm1309_vm0, 4294967295, %v7267_v22 }
 0xf8c   :  { %7205 = vrcp.f32 %v5035_v27  ;;  %v5328_v55 = vsel %vm2336_vm2, %v5327_v11, 0  ;;  %v6981_v27 = vld [vmem:[%s9776_s10] sm:$0xff]  }
 0xf94   :  { %v7202_v58 = vpop.eup %7201 }
 0xf95   :  { %v7204_v61 = vpop.eup %7203  ;;  %v5042_v63 = vmul.f32 %v7202_v58, %v7200_v13  ;;  %v5330_v13 = vand.u32 %v5328_v55, %v5322_v26  ;;  %v6978_v58 = vld [vmem:[%s9773_s7 + $0x28] sm:$0xff]  }
 0xf96   :  { %v5041_v2 = vmul.f32 %v7204_v61, %v5039_v20  ;;  %v7206_v5 = vpop.eup %7205  ;;  %v5321_v20 = vld [vmem:[%s9767_s1] sm:$0x1]  ;;  %v6979_v61 = vld [vmem:[%s9773_s7 + $0x30] sm:$0xff]  }
 0xf98   :  { %v9637_v46 = vadd.f32 %v5042_v63, %v5041_v2  ;;  %v6980_v63 = vld [vmem:[%s9773_s7 + $0x38] sm:$0xff]   ;;  %v6982_v2 = vld [vmem:[%s9776_s10 + $0x8] sm:$0xff]  }
 0xf9a   :  { %7207 = vtanh.f32 %v9637_v46 }
 0xfa4   :  { %v7208_v1 = vpop.eup %7207 }
 0xfa5   :  { %v5045_v7 = vmul.f32 %v7208_v1, %v7206_v5 }
 0xfa7   :  { %v5046_v12 = vpack.c.bf16 %v5045_v7, %v5045_v7 }
 0xfa9   :  { %v5048_v57 = vrot.slane %v5046_v12, 1 }
 0xfab   :  { %5083 = vmatmul.mubr.bf16.vlgmr.msra.gmra.mrb[72].mxu0 %v5048_v57  ;;  %5124 = vmatmul.mubr.bf16.vlgmr.msra.gmra.mrb[72].mxu1 %v5048_v57 }
 0xfac   :  { %5180 = vmatpush1.bf16.msra.mxu0 %v9359_v45  ;;  %5221 = vmatpush1.bf16.msra.mxu1 %v9364_v19 }
 0xfad   :  { %5181 = vmatprep.subr.bf16.mxu0 %v9369_v60  ;;  %5222 = vmatprep.subr.bf16.mxu1 %v9374_v14 }
 0xfae   :  { %5211 = vmatprep.mubr.bf16.mxu0 %v7265_v23  ;;  %5252 = vmatprep.mubr.bf16.mxu1 %v7265_v23 }
 0xfb0   :  { %5182 = vmatpush1.bf16.msra.mxu0 %v9381_v24  ;;  %5223 = vmatpush1.bf16.msra.mxu1 %v9386_v3 }
 0xfb1   :  { %5183 = vmatprep.subr.bf16.mxu0 %v9393_v0  ;;  %5224 = vmatprep.subr.bf16.mxu1 %v9398_v59 }
 0xfb4   :  { %5184 = vmatpush1.bf16.msra.mxu0 %v9407_v62  ;;  %5225 = vmatpush1.bf16.msra.mxu1 %v9412_v18 }
 0xfb5   :  { %5185 = vmatprep.subr.bf16.mxu0 %v9419_v17  ;;  %5226 = vmatprep.subr.bf16.mxu1 %v9424_v15 }
 0xfb8   :  { %5186 = vmatpush1.bf16.msra.mxu0 %v9431_v29  ;;  %5227 = vmatpush1.bf16.msra.mxu1 %v9436_v30 }
 0xfb9   :  { %5187 = vmatprep.subr.bf16.mxu0 %v9443_v31  ;;  %5228 = vmatprep.subr.bf16.mxu1 %v9448_v32 }
 0xfbc   :  { %5188 = vmatpush1.bf16.msra.mxu0 %v9455_v33  ;;  %5229 = vmatpush1.bf16.msra.mxu1 %v9460_v34 }
 0xfbd   :  { %5189 = vmatprep.subr.bf16.mxu0 %v9467_v35  ;;  %5230 = vmatprep.subr.bf16.mxu1 %v9472_v36 }
 0xfc0   :  { %5190 = vmatpush1.bf16.msra.mxu0 %v9479_v39  ;;  %5231 = vmatpush1.bf16.msra.mxu1 %v9484_v40 }
 0xfc1   :  { %5191 = vmatprep.subr.bf16.mxu0 %v9491_v43  ;;  %5232 = vmatprep.subr.bf16.mxu1 %v9496_v44 }
 0xfc4   :  { %5192 = vmatpush1.bf16.msra.mxu0 %v9503_v47  ;;  %5233 = vmatpush1.bf16.msra.mxu1 %v9508_v48  ;;  %v5168_v48 = vrot.slane %v9637_v46, 6 }
 0xfc5   :  { %5193 = vmatprep.subr.bf16.mxu0 %v9515_v49  ;;  %5234 = vmatprep.subr.bf16.mxu1 %v9520_v50 }
 0xfc8   :  { %5194 = vmatpush1.bf16.msra.mxu0 %v9527_v51  ;;  %5235 = vmatpush1.bf16.msra.mxu1 %v9532_v52 }
 0xfc9   :  { %6261 = vmatprep.subr.bf16.mxu1 %v7266_v37  ;;  %6255 = vmatprep.subr.bf16.mxu0 %v7266_v37 }
0x107e   :  { %v5084_v23 = vpop.f32.mrb[72].mxu0  ;;  %v5125_v45 = vpop.f32.mrb[72].mxu1 }
0x107f   :  { %v5136_v19 = vrot.slane %v5084_v23, 4  ;;  %v5086_v60 = vpop.f32.mrb[73].mxu0  ;;  %v5127_v14 = vpop.f32.mrb[73].mxu1  ;;  %v5138_v32 = vrot.slane %v5125_v45, 4 }
0x1080   :  { %v5137_v24 = vrot.slane %v5086_v60, 4  ;;  %v5088_v3 = vpop.f32.mrb[74].mxu0  ;;  %v5129_v0 = vpop.f32.mrb[74].mxu1  ;;  %v5139_v30 = vrot.slane %v5127_v14, 4 }
0x1081   :  { %v5144_v59 = vadd.f32 %v5136_v19, %v9581_v9  ;;  %v5089_v62 = vpop.f32.mrb[75].mxu0  ;;  %v5130_v18 = vpop.f32.mrb[75].mxu1  ;;  %v5146_v34 = vadd.f32 %v5138_v32, %v9592_v53 }
0x1082   :  { %v5145_v17 = vadd.f32 %v5137_v24, %v9583_v28  ;;  %v5147_v31 = vadd.f32 %v5139_v30, %v9588_v4 }
0x1083   :  { %v6217_v15 = vmul.f32 -1.442695, %v5144_v59 }
0x1084   :  { %v6218_v29 = vmul.f32 -1.442695, %v5145_v17  ;;  %v6219_v33 = vmul.f32 -1.442695, %v5147_v31 }
0x1085   :  { %7209 = vpow2.f32 %v6217_v15 }
0x1086   :  { %7211 = vpow2.f32 %v6218_v29 }
0x1087   :  { %7213 = vpow2.f32 %v6219_v33 }
0x1088   :  { %7215 = vtanh.f32 %v5146_v34 }
0x108f   :  { %v7210_v35 = vpop.eup %7209 }
0x1090   :  { %v7212_v36 = vpop.eup %7211  ;;  %v5151_v39 = vadd.f32 1.0, %v7210_v35 }
0x1091   :  { %v5157_v40 = vadd.f32 1.0, %v7212_v36  ;;  %v7214_v43 = vpop.eup %7213 }
0x1092   :  { %7217 = vrcp.f32 %v5151_v39  ;;  %v7216_v44 = vpop.eup %7215  ;;  %v5164_v51 = vadd.f32 1.0, %v7214_v43 }
0x1093   :  { %7219 = vrcp.f32 %v5157_v40 }
0x1094   :  { %7221 = vrcp.f32 %v5164_v51 }
0x109c   :  { %v7218_v47 = vpop.eup %7217 }
0x109d   :  { %v7220_v49 = vpop.eup %7219  ;;  %v5171_v50 = vmul.f32 %v7218_v47, %v7216_v44 }
0x109e   :  { %v5170_v52 = vmul.f32 %v7220_v49, %v5168_v48  ;;  %v7222_v56 = vpop.eup %7221 }
0x10a0   :  { %v9677_v54 = vadd.f32 %v5171_v50, %v5170_v52 }
0x10a2   :  { %7223 = vtanh.f32 %v9677_v54  ;;  %v5297_v34 = vrot.slane %v9677_v54, 6  ;;  %v6983_v54 = vld [vmem:[%s9776_s10 + $0x10] sm:$0xff]  }
0x10ac   :  { %v7224_v10 = vpop.eup %7223 }
0x10ad   :  { %v5174_v42 = vmul.f32 %v7224_v10, %v7222_v56  ;;  %v6984_v56 = vld [vmem:[%s9776_s10 + $0x18] sm:$0xff]   ;;  %s7269_s10 = smov [#allocation2]  }
0x10ae   :  { %s5566_s16 = sshll.u32 %s7269_s10, 4  ;;  %s5567_s16 = int_to_ptr.vmem [resolvable:$true] %s5566_s16 }
0x10af   :  { %v5175_v8 = vpack.c.bf16 %v5174_v42, %v5174_v42  ;;  %v6232_v42 = vld [vmem:[%s9775_s9] ss:$0 sm:$0xff]  ;;  %s7241_s9 = scalar_lea.vmem %s5567_s16, 32  ;;  %p7246_p1 = scmp.lt.s32.totalorder %s5567_s16, %s5567_s16 }
0x10b0   :  { %p7242_p0 = scmp.ne.s32.totalorder %s5567_s16, %s7241_s9  ;;  %p7247_p2 = scmp.lt.s32.totalorder %s7241_s9, %s7241_s9 }
0x10b1   :  { %v5177_v16 = vrot.slane %v5175_v8, 2 }
0x10b2   :  { %p7248_p3 = por %p7247_p2, %p7246_p1 }
0x10b3   :  { %5212 = vmatmul.mubr.bf16.vlgmr.msra.gmra.mrb[76].mxu0 %v5177_v16  ;;  %5253 = vmatmul.mubr.bf16.vlgmr.msra.gmra.mrb[76].mxu1 %v5177_v16 }
0x10b4   :  { %6262 = vmatpush3.bf16.msra.mxu1 %v6973_v6  ;;  %6257 = vmatprep.mubr.msk.bf16.mxu0 %vm7268_vm5, %v7266_v37  ;;  %p7249_p4 = pnand %p7248_p3, %p7242_p0 }
0x10b5   :  { %6263 = vmatprep.subr.bf16.mxu1 %v7266_v37  ;;  %6277 = vmatprep.mubr.msk.bf16.mxu1 %vm7268_vm5, %v7266_v37 }
0x10b6   :  { %6256 = vmatpush3.bf16.msra.mxu0 %v5330_v13 }
0x10b7   :  { %6281 = vmatprep.subr.bf16.mxu0 %v7266_v37 }
0x10b8   :  { %6264 = vmatpush3.bf16.msra.mxu1 %v6974_v38 }
0x10b9   :  { %6265 = vmatprep.subr.bf16.mxu1 %v7266_v37 }
0x10bb   :  { %6258 = vmatmul.mubr.msk.bf16.vlgmr.msra.gmra.mrb[80].mxu0 %vm5323_vm6, %v5321_v20 }
0x10bc   :  { %6266 = vmatpush3.bf16.msra.mxu1 %v6975_v41  ;;  %6289 = vmatprep.mubr.msk.bf16.mxu0 %vm7268_vm5, %v7266_v37 }
0x10bd   :  { %6267 = vmatprep.subr.bf16.mxu1 %v7266_v37  ;;  %6282 = vmatpush3.bf16.msra.mxu0 %v6981_v27 }
0x10be   :  { %6283 = vmatprep.subr.bf16.mxu0 %v7266_v37 }
0x10c0   :  { %6268 = vmatpush3.bf16.msra.mxu1 %v6976_v25 }
0x10c1   :  { %6269 = vmatprep.subr.bf16.mxu1 %v7266_v37  ;;  %6284 = vmatpush3.bf16.msra.mxu0 %v6982_v2 }
0x10c2   :  { %6285 = vmatprep.subr.bf16.mxu0 %v7266_v37 }
0x10c4   :  { %6270 = vmatpush3.bf16.msra.mxu1 %v6977_v21  ;;  %v6233_v21 = vld [vmem:[%s9777_s11] ss:$0 sm:$0xff] }
0x10c5   :  { %6271 = vmatprep.subr.bf16.mxu1 %v7266_v37  ;;  %6286 = vmatpush3.bf16.msra.mxu0 %v6983_v54 }
0x10c6   :  { %6287 = vmatprep.subr.bf16.mxu0 %v7266_v37 }
0x10c8   :  { %6272 = vmatpush3.bf16.msra.mxu1 %v6978_v58 }
0x10c9   :  { %6273 = vmatprep.subr.bf16.mxu1 %v7266_v37  ;;  %6288 = vmatpush3.bf16.msra.mxu0 %v6984_v56 }
0x10cc   :  { %6274 = vmatpush3.bf16.msra.mxu1 %v6979_v61 }
0x10cd   :  { %6275 = vmatprep.subr.bf16.mxu1 %v7266_v37 }
0x10d0   :  { %6276 = vmatpush3.bf16.msra.mxu1 %v6980_v63 }
0x1186   :  { %v5213_v46 = vpop.f32.mrb[76].mxu0  ;;  %v5254_v5 = vpop.f32.mrb[76].mxu1 }
0x1187   :  { %v5265_v1 = vrot.slane %v5213_v46, 2  ;;  %v5215_v7 = vpop.f32.mrb[77].mxu0  ;;  %v5256_v12 = vpop.f32.mrb[77].mxu1  ;;  %v5267_v18 = vrot.slane %v5254_v5, 2 }
0x1188   :  { %v5266_v57 = vrot.slane %v5215_v7, 2  ;;  %v5217_v23 = vpop.f32.mrb[78].mxu0  ;;  %v5258_v45 = vpop.f32.mrb[78].mxu1  ;;  %v5268_v59 = vrot.slane %v5256_v12, 2 }
0x1189   :  { %v5273_v19 = vadd.f32 %v5265_v1, %v9581_v9  ;;  %v5218_v60 = vpop.f32.mrb[79].mxu0  ;;  %v5259_v14 = vpop.f32.mrb[79].mxu1  ;;  %v5275_v15 = vadd.f32 %v5267_v18, %v9592_v53 }
0x118a   :  { %v5274_v24 = vadd.f32 %v5266_v57, %v9583_v28  ;;  %v5276_v62 = vadd.f32 %v5268_v59, %v9588_v4 }
0x118b   :  { %v6220_v3 = vmul.f32 -1.442695, %v5273_v19 }
0x118c   :  { %v6221_v0 = vmul.f32 -1.442695, %v5274_v24  ;;  %v6222_v17 = vmul.f32 -1.442695, %v5276_v62 }
0x118d   :  { %7225 = vpow2.f32 %v6220_v3 }
0x118e   :  { %7227 = vpow2.f32 %v6221_v0  ;;  %v5366_v49 = vpop.f32.mrb[80].mxu0 }
0x118f   :  { %7229 = vpow2.f32 %v6222_v17  ;;  %v6259_v50 = vpop.f32.mrb[81].mxu0 }
0x1190   :  { %7231 = vtanh.f32 %v5275_v15  ;;  %v5369_v51 = vpop.f32.mrb[82].mxu0 }
0x1191   :  { %v6260_v52 = vpop.f32.mrb[83].mxu0 }
0x1197   :  { %v7226_v29 = vpop.eup %7225 }
0x1198   :  { %v7228_v30 = vpop.eup %7227  ;;  %v5280_v31 = vadd.f32 1.0, %v7226_v29 }
0x1199   :  { %v5286_v9 = vadd.f32 1.0, %v7228_v30  ;;  %v7230_v28 = vpop.eup %7229 }
0x119a   :  { %7233 = vrcp.f32 %v5280_v31  ;;  %v7232_v32 = vpop.eup %7231  ;;  %v5293_v4 = vadd.f32 1.0, %v7230_v28 }
0x119b   :  { %7235 = vrcp.f32 %v5286_v9 }
0x119c   :  { %7237 = vrcp.f32 %v5293_v4 }
0x11a4   :  { %v7234_v33 = vpop.eup %7233 }
0x11a5   :  { %v7236_v35 = vpop.eup %7235  ;;  %v5300_v36 = vmul.f32 %v7234_v33, %v7232_v32 }
0x11a6   :  { %v5299_v39 = vmul.f32 %v7236_v35, %v5297_v34  ;;  %v7238_v53 = vpop.eup %7237 }
0x11a8   :  { %v5301_v40 = vadd.f32 %v5300_v36, %v5299_v39 }
0x11aa   :  { %7239 = vtanh.f32 %v5301_v40 }
0x11b4   :  { %v7240_v43 = vpop.eup %7239 }
0x11b5   :  { %v5303_v44 = vmul.f32 %v7240_v43, %v7238_v53 }
0x11b7   :  { %v5304_v47 = vpack.c.bf16 %v5303_v44, %v5303_v44 }
0x11b9   :  { %v5373_v48 = vrot.slane %v5304_v47, 3 }
0x11bb   :  { %6278 = vmatmul.mubr.bf16.vlgmr.msra.gmra.mrb[80].mxu1 %v5373_v48 }
0x128e   :  { %v5457_v10 = vpop.f32.mrb[80].mxu1 }
0x128f   :  { %v5458_v8 = vadd.f32 %v5457_v10, %v5366_v49  ;;  %v6279_v16 = vpop.f32.mrb[81].mxu1 }
0x1290   :  { %v5460_v6 = vpop.f32.mrb[82].mxu1 }
0x1291   :  { %v5470_v38 = vadd.f32 %v6232_v42, %v5458_v8  ;;  %v6280_v41 = vpop.f32.mrb[83].mxu1 }
0x1293   :  { %vm5471_vm7 = vcmp.ge.f32.partialorder %v5470_v38, 0.0  ;;  %v5472_v25 = vmul.f32 0.01, %v5470_v38 }
0x1295   :  { %v5473_v26 = vsel %vm5471_vm7, %v5470_v38, %v5472_v25 }
0x1296   :  { %v5474_v37 = vpack.c.bf16 %v5473_v26, %v5473_v26 }
0x1298   :  { %6290 = vmatmul.mubr.msk.bf16.vlgmr.msra.gmra.mrb[84].mxu0 %vm5514_vm8, %v5474_v37 }
0x136b   :  { %v5552_v22 = vpop.f32.mrb[84].mxu0 }
0x136c   :  { %v5553_v11 = vadd.f32 %v6233_v21, %v5552_v22  ;;  %v6291_v55 = vpop.f32.mrb[85].mxu0 }
0x136d   :  { %v5555_v13 = vpop.f32.mrb[86].mxu0 }
0x136e   :  { %v6292_v58 = vpop.f32.mrb[87].mxu0  ;;  %5559 = vst.msk [vmem:[#allocation2] sm:$0x3] %vm5558_vm9, %v5553_v11 }
0x136f   :  { %7252 = shalt.err (!%p7249_p4)
}
0x1370   :  { %s7253_s11 = scalar_lea.hbm %s9778_s12, 32 }
0x1371   :  { %p7254_p5 = scmp.ne.s32.totalorder %s9778_s12, %s7253_s11  ;;  %p7257_p6 = scmp.lt.u32.totalorder %s7253_s11, %s9778_s12 }
0x1373   :  { %p7259_p7 = pnand %p7257_p6, %p7254_p5 }
0x1375   :  { %7262 = shalt.err (!%p7259_p7)
}
0x1376   :  { %5569 = dma.vmem_to_hbm [thread:$0]  %s5567_s16, 32, %s9778_s12, [#allocation3]  }
0x1377   :  { %7263 = dma.done.wait [#allocation3], 32  }
0x1378   :  { %7264 = vsyncadd [#allocation3], 4294967264 }
0x1379   :  { %5573 = vsyncpa [#allocation3], 1 }

</bundles_post_ra>
